<compile_context>
chip_gen: v5e
topology: v5e:2x2
jax: 0.10.0
libtpu: 0.0.40
codegen_flags: <defaults>
</compile_context>

<pallas_src>
import math
import numpy as np
import jax
import jax.numpy as jnp
from jax import lax
from jax.experimental import pallas as pl
from jax.experimental.pallas import tpu as pltpu

# ----------------------------- config -----------------------------
X_DIM, E_DIM, G_DIM = 8, 5, 6
NUM_EMB = 32          # D (hidden size, "num_emb")
NUM_LAYERS = 3
NUM_HEADS = 2         # H
LN_EPS = 1e-5         # torch_geometric gnn.LayerNorm eps (graph mode, affine=False)
GEN_EPS = 1e-7        # GENConv eps
SM_EPS = 1e-16        # torch_geometric softmax eps
NEG_SLOPE = 0.01      # nn.LeakyReLU default

_F32 = jnp.float32
_BF16 = jnp.bfloat16


def _leaky(x):
    return jnp.where(x > 0, x, NEG_SLOPE * x)


def _bdot(a, b):
    """bf16 x bf16 MXU matmul with f32 accumulation."""
    return jnp.dot(a.astype(_BF16), b.astype(_BF16), preferred_element_type=_F32)


def _bdot_t(a, b):
    """a^T @ b via dot_general contraction on axis 0 (no materialized transpose)."""
    return lax.dot_general(a.astype(_BF16), b.astype(_BF16),
                           dimension_numbers=(((0,), (0,)), ((), ())),
                           preferred_element_type=_F32)


def _sel(onehot, vals):
    """Exact one-hot row selection (per-graph values -> per-row broadcast), f32."""
    return jnp.dot(onehot.astype(_F32), vals, preferred_element_type=_F32,
                   precision=lax.Precision.HIGHEST)


def _full_spec(shape):
    nd = len(shape)
    return pl.BlockSpec(shape, lambda i, nd=nd: (0,) * nd)


def _vmem_limit_bytes():
    # generation-aware: ~3/4 of physical VMEM, clamped to [32 MiB, 112 MiB]
    try:
        cap = int(pltpu.get_tpu_info().vmem_capacity_bytes)
    except Exception:
        cap = 64 * 1024 * 1024
    return int(min(max(cap * 3 // 4, 32 * 1024 * 1024), 112 * 1024 * 1024))


# ------------------------ fused forward kernel ------------------------
def _make_fused_kernel(N, E, G, D, H, L):
    N_aug = N + G               # real nodes + one virtual node per graph
    EP = E + 2 * N              # edges before self loops (orig + node<->virtual)
    E_aug = EP + N_aug          # + self loops
    HD = H * D
    inv_sqrt_d = 1.0 / math.sqrt(D)

    def kernel(
        x_ref, ea_ref, cond_ref,
        ssrc_ref, sdst_ref, bg_ref,
        icp_ref, iln_ref, icn_ref, hexp_ref, hsum_ref,
        wx0, bx0, wx1, bx1, wx2, bx2,
        we0, be0, we1, be1, we2, be2,
        wc0, bc0, wc1, bc1, wc2, bc2,
        wgen_ref, bgen_ref,
        wqkvs_ref, bqkvs_ref, wedge_ref,
        wlin_ref, blin_ref,
        wff1_ref, bff1_ref, wff2_ref, bff2_ref,
        wcs_ref, bcs_ref,
        wf1_ref, bf1_ref, wf2_ref, bf2_ref,
        out_ref,
    ):
        # structural one-hot matrices, shipped once as bf16, never transposed in VMEM
        Ssrc = ssrc_ref[...]                                   # (E_aug, N_aug)
        Sdst = sdst_ref[...]                                   # (E_aug, N_aug)
        Bg = bg_ref[...]                                       # (N_aug, G)
        icp = icp_ref[...]                                     # (N_aug, 1) 1/indeg_pre
        iln = iln_ref[...]                                     # (G, 1)   1/(cnt_aug*D)
        icn = icn_ref[...]                                     # (G, 1)   1/cnt_nodes
        hexp = hexp_ref[...]                                   # (H, HD) head-broadcast
        hsum = hsum_ref[...]                                   # (HD, H) head-reduce

        def enc_mlp(x, w0, b0, w1, b1, w2, b2):
            h = _leaky(_bdot(x, w0[...]) + b0[...])
            h = _leaky(_bdot(h, w1[...]) + b1[...])
            return _bdot(h, w2[...]) + b2[...]

        def graph_ln(x):
            # torch_geometric gnn.LayerNorm(mode='graph', affine=False).
            # sum and sum-of-squares in ONE contraction; var = E[x^2] - E[x]^2.
            stats = _bdot_t(Bg, jnp.concatenate([x, x * x], axis=1))   # (G, 2D)
            mean = jnp.sum(stats[:, 0:D], axis=1, keepdims=True) * iln
            mean_sq = jnp.sum(stats[:, D:2 * D], axis=1, keepdims=True) * iln
            var = jnp.maximum(mean_sq - mean * mean, 0.0)
            rstd = lax.rsqrt(var + LN_EPS)
            bc = _sel(Bg, jnp.concatenate([mean, rstd], axis=1))       # (N_aug, 2)
            return (x - bc[:, 0:1]) * bc[:, 1:2]

        # ---- input encoders ----
        o0 = enc_mlp(x_ref[...], wx0, bx0, wx1, bx1, wx2, bx2)         # (N, D)
        e0 = enc_mlp(ea_ref[...], we0, be0, we1, be1, we2, be2)        # (E, D)
        c = enc_mlp(cond_ref[...], wc0, bc0, wc1, bc1, wc2, bc2)       # (G, D)

        # ---- graph augmentation: o = [nodes ; virtual], aug_e with self loops ----
        o = jnp.concatenate([o0, c], axis=0)                           # (N_aug, D)
        e_p = (lax.broadcasted_iota(jnp.int32, (2 * N, D), 1) == 0).astype(_F32)
        e_pre = jnp.concatenate([e0, e_p], axis=0)                     # (EP, D)
        # add_self_loops(fill_value='mean'): mean of incoming edge attrs per node
        loop_attr = _bdot_t(Sdst[0:EP, :], e_pre) * icp                # (N_aug, D)
        aug_e = jnp.concatenate([e_pre, loop_attr], axis=0)            # (E_aug, D)
        aug_e_bf = aug_e.astype(_BF16)

        cg = _sel(Bg, c)                                               # c[aug_batch]
        cg_bf = cg.astype(_BF16)

        # ---- transformer layers (static in-kernel loop over stacked weights) ----
        for li in range(L):
            # conditioning scale/shift from one fused (D -> 2D) matmul
            cs = _bdot(cg_bf, wcs_ref[li]) + bcs_ref[li]               # (N_aug, 2D)
            scale, shift = cs[:, 0:D], cs[:, D:2 * D]

            o_n = graph_ln(o)

            # GENConv(num_emb, num_emb, num_layers=1, aggr='add', norm=None)
            x_src = _bdot(Ssrc, o_n)                                   # gather x_j
            msg = jnp.maximum(x_src + aug_e, 0.0) + GEN_EPS
            agg = _bdot_t(Sdst, msg)                                   # scatter-add
            gen = _bdot(agg + o_n, wgen_ref[li]) + bgen_ref[li]        # (N_aug, D)

            # TransformerConv(2D -> D, heads=H, edge_dim=D): fused q|k|v|skip proj
            og = jnp.concatenate([o_n, gen], axis=1)                   # (N_aug, 2D)
            proj = _bdot(og, wqkvs_ref[li]) + bqkvs_ref[li]            # (N_aug, 4HD)
            q = proj[:, 0:HD]
            k = proj[:, HD:2 * HD]
            v = proj[:, 2 * HD:3 * HD]
            skip = proj[:, 3 * HD:4 * HD]
            ee = _bdot(aug_e_bf, wedge_ref[li])                        # (E_aug, HD)

            k_e = _bdot(Ssrc, k) + ee
            v_e = _bdot(Ssrc, v) + ee
            q_e = _bdot(Sdst, q)

            # per-destination softmax with an EXACT per-segment max shift
            score = _bdot(q_e * k_e, hsum) * inv_sqrt_d                # (E_aug, H)
            gmin = jnp.min(score, axis=0, keepdims=True)
            sc = score - gmin                                          # >= 0
            # every node has a self-loop, so its shifted segment max is >= 0 and a
            # masked column-max (non-members contribute 0) recovers it exactly.
            segs = [jnp.max(Sdst * sc[:, h:h + 1], axis=0, keepdims=True)
                    for h in range(H)]
            seg_max = jnp.concatenate(segs, axis=0)                    # (H, N_aug)
            shift_e = lax.dot_general(                                 # seg_max[dst(e)]
                Sdst, seg_max.astype(_BF16),
                dimension_numbers=(((1,), (1,)), ((), ())),
                preferred_element_type=_F32)                           # (E_aug, H)
            ex = jnp.exp(sc - shift_e)                                 # stable, <= ~1
            seg_sum = _bdot_t(Sdst, ex)                                # (N_aug, H)
            den = _bdot(Sdst, seg_sum) + SM_EPS                        # (E_aug, H)
            alpha = ex * pl.reciprocal(den, approx=True)               # EUP recip
            alpha_bc = _bdot(alpha, hexp)                              # (E_aug, HD)
            att = _bdot_t(Sdst, v_e * alpha_bc)                        # (N_aug, HD)

            l_h = _bdot(att + skip, wlin_ref[li]) + blin_ref[li]       # (N_aug, D)
            o = o + l_h * scale + shift

            # feed-forward mlp(D, 4D, D, 1) on pre-norm
            o2 = graph_ln(o)
            ffh = _leaky(_bdot(o2, wff1_ref[li]) + bff1_ref[li])       # (N_aug, 4D)
            o = o + _bdot(ffh, wff2_ref[li]) + bff2_ref[li]

        # ---- final: mean-pool real nodes, concat virtual-node emb, 2-layer MLP ----
        pooled = _bdot_t(Bg[0:N, :], o[0:N, :]) * icn                  # (G, D)
        glob = jnp.concatenate([pooled, o[N:N_aug, :]], axis=1)        # (G, 2D)
        h1 = _leaky(_bdot(glob, wf1_ref[...]) + bf1_ref[...])
        out_ref[...] = _bdot(h1, wf2_ref[...]) + bf2_ref[...]

    return kernel


# --------------------------- parameters ----------------------------
def _uniform(key, shape, fan_in):
    s = 1.0 / math.sqrt(fan_in)
    return jax.random.uniform(key, shape, _F32, -s, s)


def init_params(key):
    D, H, L = NUM_EMB, NUM_HEADS, NUM_LAYERS
    HD = H * D
    keys = iter(jax.random.split(key, 256))
    nk = lambda: next(keys)

    def init_mlp(dims):
        ws, bs = [], []
        for i in range(len(dims) - 1):
            ws.append(_uniform(nk(), (dims[i], dims[i + 1]), dims[i]))
            bs.append(_uniform(nk(), (1, dims[i + 1]), dims[i]))
        return ws, bs

    def stack(shape, fan_in):
        return jnp.stack([_uniform(nk(), shape, fan_in) for _ in range(L)])

    params = {
        "x2h": init_mlp([X_DIM, D, D, D]),
        "e2h": init_mlp([E_DIM, D, D, D]),
        "c2h": init_mlp([G_DIM, D, D, D]),
        "layers": {
            "wgen": stack((D, D), D), "bgen": stack((1, D), D),        # GENConv MLP
            "wq": stack((2 * D, HD), 2 * D), "bq": stack((1, HD), 2 * D),
            "wk": stack((2 * D, HD), 2 * D), "bk": stack((1, HD), 2 * D),
            "wv": stack((2 * D, HD), 2 * D), "bv": stack((1, HD), 2 * D),
            "wedge": stack((D, HD), D),                                # lin_edge
            "wskip": stack((2 * D, HD), 2 * D), "bskip": stack((1, HD), 2 * D),
            "wlin": stack((HD, D), HD), "blin": stack((1, D), HD),
            "wff1": stack((D, 4 * D), D), "bff1": stack((1, 4 * D), D),
            "wff2": stack((4 * D, D), 4 * D), "bff2": stack((1, D), 4 * D),
            "wcsc": stack((D, D), D), "bcsc": stack((1, D), D),        # cond scale
            "wcsh": stack((D, D), D), "bcsh": stack((1, D), D),        # cond shift
        },
        "final": {
            "w1a": _uniform(nk(), (D, D), 2 * D),
            "w1b": _uniform(nk(), (D, D), 2 * D),
            "b1": _uniform(nk(), (1, D), 2 * D),
            "w2": _uniform(nk(), (D, D), D),
            "b2": _uniform(nk(), (1, D), D),
        },
    }
    return params


# ----------------------------- forward -----------------------------
def graph_transformer_forward(params, x, edge_attr, cond, edge_index, batch):
    D, H, L = NUM_EMB, NUM_HEADS, NUM_LAYERS
    HD = H * D
    N = int(x.shape[0])
    E = int(edge_attr.shape[0])
    G = int(cond.shape[0])
    N_aug = N + G
    EP = E + 2 * N
    E_aug = EP + N_aug

    # --- host-side graph augmentation bookkeeping (numpy glue) ---
    batch = np.asarray(batch, np.int64)
    ei = np.asarray(edge_index, np.int64)
    u = np.arange(N, dtype=np.int64)
    v = batch + N
    aug_src = np.concatenate([ei[0], u, v, np.arange(N_aug, dtype=np.int64)])
    aug_dst = np.concatenate([ei[1], v, u, np.arange(N_aug, dtype=np.int64)])
    aug_batch = np.concatenate([batch, np.arange(G, dtype=np.int64)])

    Ssrc = np.zeros((E_aug, N_aug), np.float32)
    Ssrc[np.arange(E_aug), aug_src] = 1.0
    Sdst = np.zeros((E_aug, N_aug), np.float32)
    Sdst[np.arange(E_aug), aug_dst] = 1.0
    Bg = np.zeros((N_aug, G), np.float32)
    Bg[np.arange(N_aug), aug_batch] = 1.0

    indeg_pre = Sdst[:EP].sum(axis=0)                                  # (N_aug,)
    icp = (1.0 / np.maximum(indeg_pre, 1.0))[:, None].astype(np.float32)
    cnt_aug = Bg.sum(axis=0)[:, None]
    iln = (1.0 / (cnt_aug * D)).astype(np.float32)                     # 1/(cnt*D)
    cnt_n = np.maximum(Bg[:N].sum(axis=0), 1.0)[:, None]
    icn = (1.0 / cnt_n).astype(np.float32)

    hexp = np.zeros((H, HD), np.float32)                               # head-broadcast
    for h in range(H):
        hexp[h, h * D:(h + 1) * D] = 1.0
    hsum = np.ascontiguousarray(hexp.T)                                # head-reduce

    # --- pack weights: matrices -> bf16 (MXU), biases stay f32 ---
    bf = lambda w: jnp.asarray(w, _BF16)
    f32a = lambda w: jnp.asarray(w, _F32)

    enc = []
    for name in ("x2h", "e2h", "c2h"):
        ws, bs = params[name]
        for w, b in zip(ws, bs):
            enc += [bf(w), f32a(b)]

    lp = params["layers"]
    wqkvs = jnp.concatenate([lp["wq"], lp["wk"], lp["wv"], lp["wskip"]], axis=-1)
    bqkvs = jnp.concatenate([lp["bq"], lp["bk"], lp["bv"], lp["bskip"]], axis=-1)
    wcs = jnp.concatenate([lp["wcsc"], lp["wcsh"]], axis=-1)
    bcs = jnp.concatenate([lp["bcsc"], lp["bcsh"]], axis=-1)
    layer_args = [
        bf(lp["wgen"]), f32a(lp["bgen"]),
        bf(wqkvs), f32a(bqkvs), bf(lp["wedge"]),
        bf(lp["wlin"]), f32a(lp["blin"]),
        bf(lp["wff1"]), f32a(lp["bff1"]), bf(lp["wff2"]), f32a(lp["bff2"]),
        bf(wcs), f32a(bcs),
    ]
    fp = params["final"]
    wf1 = jnp.concatenate([fp["w1a"], fp["w1b"]], axis=0)              # (2D, D)
    final_args = [bf(wf1), f32a(fp["b1"]), bf(fp["w2"]), f32a(fp["b2"])]

    args = [jnp.asarray(x, _F32), jnp.asarray(edge_attr, _F32),
            jnp.asarray(cond, _F32),
            bf(Ssrc), bf(Sdst), bf(Bg),
            f32a(icp), f32a(iln), f32a(icn), bf(hexp), bf(hsum),
            *enc, *layer_args, *final_args]

    kernel = _make_fused_kernel(N, E, G, D, H, L)
    out = pl.pallas_call(
        kernel,
        grid=(1,),
        in_specs=[_full_spec(tuple(a.shape)) for a in args],
        out_specs=_full_spec((G, D)),
        out_shape=jax.ShapeDtypeStruct((G, D), _F32),
        compiler_params=pltpu.CompilerParams(
            dimension_semantics=("arbitrary",),
            vmem_limit_bytes=_vmem_limit_bytes()),
    )(*args)
    return out


# ------------------------------ main -------------------------------
if __name__ == "__main__":
    key = jax.random.PRNGKey(0)
    kx, ke, kc, kp = jax.random.split(key, 4)

    # tiny 2-graph batch: graph 0 has 3 nodes, graph 1 has 4 nodes
    batch = np.array([0, 0, 0, 1, 1, 1, 1], dtype=np.int32)
    edge_index = np.array(
        [[0, 1, 1, 2, 3, 4, 4, 5, 5, 6, 3, 6],
         [1, 0, 2, 1, 4, 3, 5, 4, 6, 5, 6, 3]], dtype=np.int32)
    N = batch.shape[0]
    G = int(batch.max()) + 1
    E = edge_index.shape[1]

    x = jax.random.normal(kx, (N, X_DIM), _F32)
    edge_attr = jax.random.normal(ke, (E, E_DIM), _F32)
    cond = jax.random.normal(kc, (G, G_DIM), _F32)

    params = init_params(kp)
    out = graph_transformer_forward(params, x, edge_attr, cond, edge_index, batch)
    out = jax.block_until_ready(out)
    assert out.shape == (G, NUM_EMB)
    assert bool(jnp.all(jnp.isfinite(out)))
    print("KERNEL_OK")
</pallas_src>

<mosaic_0001>
module attributes {stable_mosaic.version = 11 : i64} {
  func.func @kernel(%arg0: i32, %arg1: memref<7x8xf32, #tpu.memory_space<vmem>>, %arg2: memref<12x5xf32, #tpu.memory_space<vmem>>, %arg3: memref<2x6xf32, #tpu.memory_space<vmem>>, %arg4: memref<35x9xbf16, #tpu.memory_space<vmem>>, %arg5: memref<35x9xbf16, #tpu.memory_space<vmem>>, %arg6: memref<9x2xbf16, #tpu.memory_space<vmem>>, %arg7: memref<9x1xf32, #tpu.memory_space<vmem>>, %arg8: memref<2x1xf32, #tpu.memory_space<vmem>>, %arg9: memref<2x1xf32, #tpu.memory_space<vmem>>, %arg10: memref<2x64xbf16, #tpu.memory_space<vmem>>, %arg11: memref<64x2xbf16, #tpu.memory_space<vmem>>, %arg12: memref<8x32xbf16, #tpu.memory_space<vmem>>, %arg13: memref<1x32xf32, #tpu.memory_space<vmem>>, %arg14: memref<32x32xbf16, #tpu.memory_space<vmem>>, %arg15: memref<1x32xf32, #tpu.memory_space<vmem>>, %arg16: memref<32x32xbf16, #tpu.memory_space<vmem>>, %arg17: memref<1x32xf32, #tpu.memory_space<vmem>>, %arg18: memref<5x32xbf16, #tpu.memory_space<vmem>>, %arg19: memref<1x32xf32, #tpu.memory_space<vmem>>, %arg20: memref<32x32xbf16, #tpu.memory_space<vmem>>, %arg21: memref<1x32xf32, #tpu.memory_space<vmem>>, %arg22: memref<32x32xbf16, #tpu.memory_space<vmem>>, %arg23: memref<1x32xf32, #tpu.memory_space<vmem>>, %arg24: memref<6x32xbf16, #tpu.memory_space<vmem>>, %arg25: memref<1x32xf32, #tpu.memory_space<vmem>>, %arg26: memref<32x32xbf16, #tpu.memory_space<vmem>>, %arg27: memref<1x32xf32, #tpu.memory_space<vmem>>, %arg28: memref<32x32xbf16, #tpu.memory_space<vmem>>, %arg29: memref<1x32xf32, #tpu.memory_space<vmem>>, %arg30: memref<3x32x32xbf16, #tpu.memory_space<vmem>>, %arg31: memref<3x1x32xf32, #tpu.memory_space<vmem>>, %arg32: memref<3x64x256xbf16, #tpu.memory_space<vmem>>, %arg33: memref<3x1x256xf32, #tpu.memory_space<vmem>>, %arg34: memref<3x32x64xbf16, #tpu.memory_space<vmem>>, %arg35: memref<3x64x32xbf16, #tpu.memory_space<vmem>>, %arg36: memref<3x1x32xf32, #tpu.memory_space<vmem>>, %arg37: memref<3x32x128xbf16, #tpu.memory_space<vmem>>, %arg38: memref<3x1x128xf32, #tpu.memory_space<vmem>>, %arg39: memref<3x128x32xbf16, #tpu.memory_space<vmem>>, %arg40: memref<3x1x32xf32, #tpu.memory_space<vmem>>, %arg41: memref<3x32x64xbf16, #tpu.memory_space<vmem>>, %arg42: memref<3x1x64xf32, #tpu.memory_space<vmem>>, %arg43: memref<64x32xbf16, #tpu.memory_space<vmem>>, %arg44: memref<1x32xf32, #tpu.memory_space<vmem>>, %arg45: memref<32x32xbf16, #tpu.memory_space<vmem>>, %arg46: memref<1x32xf32, #tpu.memory_space<vmem>>, %arg47: memref<2x32xf32, #tpu.memory_space<vmem>>) attributes {dimension_semantics = [#tpu.dimension_semantics<arbitrary>], iteration_bounds = array<i64: 1>, scalar_prefetch = 0 : i64, scratch_operands = 0 : i64, tpu.core_type = #tpu.core_type<tc>, window_params = [{pipeline_mode = #tpu.pipeline_mode<synchronous>, transform_indices = @transform_0, window_bounds = array<i64: 7, 8>}, {pipeline_mode = #tpu.pipeline_mode<synchronous>, transform_indices = @transform_1, window_bounds = array<i64: 12, 5>}, {pipeline_mode = #tpu.pipeline_mode<synchronous>, transform_indices = @transform_2, window_bounds = array<i64: 2, 6>}, {pipeline_mode = #tpu.pipeline_mode<synchronous>, transform_indices = @transform_3, window_bounds = array<i64: 35, 9>}, {pipeline_mode = #tpu.pipeline_mode<synchronous>, transform_indices = @transform_4, window_bounds = array<i64: 35, 9>}, {pipeline_mode = #tpu.pipeline_mode<synchronous>, transform_indices = @transform_5, window_bounds = array<i64: 9, 2>}, {pipeline_mode = #tpu.pipeline_mode<synchronous>, transform_indices = @transform_6, window_bounds = array<i64: 9, 1>}, {pipeline_mode = #tpu.pipeline_mode<synchronous>, transform_indices = @transform_7, window_bounds = array<i64: 2, 1>}, {pipeline_mode = #tpu.pipeline_mode<synchronous>, transform_indices = @transform_8, window_bounds = array<i64: 2, 1>}, {pipeline_mode = #tpu.pipeline_mode<synchronous>, transform_indices = @transform_9, window_bounds = array<i64: 2, 64>}, {pipeline_mode = #tpu.pipeline_mode<synchronous>, transform_indices = @transform_10, window_bounds = array<i64: 64, 2>}, {pipeline_mode = #tpu.pipeline_mode<synchronous>, transform_indices = @transform_11, window_bounds = array<i64: 8, 32>}, {pipeline_mode = #tpu.pipeline_mode<synchronous>, transform_indices = @transform_12, window_bounds = array<i64: 1, 32>}, {pipeline_mode = #tpu.pipeline_mode<synchronous>, transform_indices = @transform_13, window_bounds = array<i64: 32, 32>}, {pipeline_mode = #tpu.pipeline_mode<synchronous>, transform_indices = @transform_14, window_bounds = array<i64: 1, 32>}, {pipeline_mode = #tpu.pipeline_mode<synchronous>, transform_indices = @transform_15, window_bounds = array<i64: 32, 32>}, {pipeline_mode = #tpu.pipeline_mode<synchronous>, transform_indices = @transform_16, window_bounds = array<i64: 1, 32>}, {pipeline_mode = #tpu.pipeline_mode<synchronous>, transform_indices = @transform_17, window_bounds = array<i64: 5, 32>}, {pipeline_mode = #tpu.pipeline_mode<synchronous>, transform_indices = @transform_18, window_bounds = array<i64: 1, 32>}, {pipeline_mode = #tpu.pipeline_mode<synchronous>, transform_indices = @transform_19, window_bounds = array<i64: 32, 32>}, {pipeline_mode = #tpu.pipeline_mode<synchronous>, transform_indices = @transform_20, window_bounds = array<i64: 1, 32>}, {pipeline_mode = #tpu.pipeline_mode<synchronous>, transform_indices = @transform_21, window_bounds = array<i64: 32, 32>}, {pipeline_mode = #tpu.pipeline_mode<synchronous>, transform_indices = @transform_22, window_bounds = array<i64: 1, 32>}, {pipeline_mode = #tpu.pipeline_mode<synchronous>, transform_indices = @transform_23, window_bounds = array<i64: 6, 32>}, {pipeline_mode = #tpu.pipeline_mode<synchronous>, transform_indices = @transform_24, window_bounds = array<i64: 1, 32>}, {pipeline_mode = #tpu.pipeline_mode<synchronous>, transform_indices = @transform_25, window_bounds = array<i64: 32, 32>}, {pipeline_mode = #tpu.pipeline_mode<synchronous>, transform_indices = @transform_26, window_bounds = array<i64: 1, 32>}, {pipeline_mode = #tpu.pipeline_mode<synchronous>, transform_indices = @transform_27, window_bounds = array<i64: 32, 32>}, {pipeline_mode = #tpu.pipeline_mode<synchronous>, transform_indices = @transform_28, window_bounds = array<i64: 1, 32>}, {pipeline_mode = #tpu.pipeline_mode<synchronous>, transform_indices = @transform_29, window_bounds = array<i64: 3, 32, 32>}, {pipeline_mode = #tpu.pipeline_mode<synchronous>, transform_indices = @transform_30, window_bounds = array<i64: 3, 1, 32>}, {pipeline_mode = #tpu.pipeline_mode<synchronous>, transform_indices = @transform_31, window_bounds = array<i64: 3, 64, 256>}, {pipeline_mode = #tpu.pipeline_mode<synchronous>, transform_indices = @transform_32, window_bounds = array<i64: 3, 1, 256>}, {pipeline_mode = #tpu.pipeline_mode<synchronous>, transform_indices = @transform_33, window_bounds = array<i64: 3, 32, 64>}, {pipeline_mode = #tpu.pipeline_mode<synchronous>, transform_indices = @transform_34, window_bounds = array<i64: 3, 64, 32>}, {pipeline_mode = #tpu.pipeline_mode<synchronous>, transform_indices = @transform_35, window_bounds = array<i64: 3, 1, 32>}, {pipeline_mode = #tpu.pipeline_mode<synchronous>, transform_indices = @transform_36, window_bounds = array<i64: 3, 32, 128>}, {pipeline_mode = #tpu.pipeline_mode<synchronous>, transform_indices = @transform_37, window_bounds = array<i64: 3, 1, 128>}, {pipeline_mode = #tpu.pipeline_mode<synchronous>, transform_indices = @transform_38, window_bounds = array<i64: 3, 128, 32>}, {pipeline_mode = #tpu.pipeline_mode<synchronous>, transform_indices = @transform_39, window_bounds = array<i64: 3, 1, 32>}, {pipeline_mode = #tpu.pipeline_mode<synchronous>, transform_indices = @transform_40, window_bounds = array<i64: 3, 32, 64>}, {pipeline_mode = #tpu.pipeline_mode<synchronous>, transform_indices = @transform_41, window_bounds = array<i64: 3, 1, 64>}, {pipeline_mode = #tpu.pipeline_mode<synchronous>, transform_indices = @transform_42, window_bounds = array<i64: 64, 32>}, {pipeline_mode = #tpu.pipeline_mode<synchronous>, transform_indices = @transform_43, window_bounds = array<i64: 1, 32>}, {pipeline_mode = #tpu.pipeline_mode<synchronous>, transform_indices = @transform_44, window_bounds = array<i64: 32, 32>}, {pipeline_mode = #tpu.pipeline_mode<synchronous>, transform_indices = @transform_45, window_bounds = array<i64: 1, 32>}, {pipeline_mode = #tpu.pipeline_mode<synchronous>, transform_indices = @transform_46, window_bounds = array<i64: 2, 32>}]} {
    %c0 = arith.constant 0 : index
    %c0_0 = arith.constant 0 : index
    %0 = vector.load %arg4[%c0, %c0_0] : memref<35x9xbf16, #tpu.memory_space<vmem>>, vector<35x9xbf16>
    %c0_1 = arith.constant 0 : index
    %c0_2 = arith.constant 0 : index
    %1 = vector.load %arg5[%c0_1, %c0_2] : memref<35x9xbf16, #tpu.memory_space<vmem>>, vector<35x9xbf16>
    %c0_3 = arith.constant 0 : index
    %c0_4 = arith.constant 0 : index
    %2 = vector.load %arg6[%c0_3, %c0_4] : memref<9x2xbf16, #tpu.memory_space<vmem>>, vector<9x2xbf16>
    %c0_5 = arith.constant 0 : index
    %c0_6 = arith.constant 0 : index
    %3 = vector.load %arg7[%c0_5, %c0_6] : memref<9x1xf32, #tpu.memory_space<vmem>>, vector<9x1xf32>
    %c0_7 = arith.constant 0 : index
    %c0_8 = arith.constant 0 : index
    %4 = vector.load %arg8[%c0_7, %c0_8] : memref<2x1xf32, #tpu.memory_space<vmem>>, vector<2x1xf32>
    %c0_9 = arith.constant 0 : index
    %c0_10 = arith.constant 0 : index
    %5 = vector.load %arg9[%c0_9, %c0_10] : memref<2x1xf32, #tpu.memory_space<vmem>>, vector<2x1xf32>
    %c0_11 = arith.constant 0 : index
    %c0_12 = arith.constant 0 : index
    %6 = vector.load %arg10[%c0_11, %c0_12] : memref<2x64xbf16, #tpu.memory_space<vmem>>, vector<2x64xbf16>
    %c0_13 = arith.constant 0 : index
    %c0_14 = arith.constant 0 : index
    %7 = vector.load %arg11[%c0_13, %c0_14] : memref<64x2xbf16, #tpu.memory_space<vmem>>, vector<64x2xbf16>
    %c0_15 = arith.constant 0 : index
    %c0_16 = arith.constant 0 : index
    %8 = vector.load %arg1[%c0_15, %c0_16] : memref<7x8xf32, #tpu.memory_space<vmem>>, vector<7x8xf32>
    %c0_17 = arith.constant 0 : index
    %c0_18 = arith.constant 0 : index
    %9 = vector.load %arg12[%c0_17, %c0_18] : memref<8x32xbf16, #tpu.memory_space<vmem>>, vector<8x32xbf16>
    %10 = arith.truncf %8 : vector<7x8xf32> to vector<7x8xbf16>
    %cst = arith.constant dense<0.000000e+00> : vector<7x32xf32>
    %11 = tpu.matmul %10, %9, %cst {dimension_numbers = #tpu.dot_dimension_numbers<[1], [0], [0], [1], [0, 0, 1, 1], [], []>} : vector<7x8xbf16>, vector<8x32xbf16>, vector<7x32xf32> -> vector<7x32xf32>
    %c0_19 = arith.constant 0 : index
    %c0_20 = arith.constant 0 : index
    %12 = vector.load %arg13[%c0_19, %c0_20] : memref<1x32xf32, #tpu.memory_space<vmem>>, vector<1x32xf32>
    %13 = vector.broadcast %12 : vector<1x32xf32> to vector<7x32xf32>
    %14 = arith.addf %11, %13 : vector<7x32xf32>
    %cst_21 = arith.constant 0.000000e+00 : f32
    %15 = vector.broadcast %cst_21 : f32 to vector<7x32xf32>
    %16 = arith.cmpf ogt, %14, %15 : vector<7x32xf32>
    %cst_22 = arith.constant 0.00999999977 : f32
    %17 = vector.broadcast %cst_22 : f32 to vector<7x32xf32>
    %18 = arith.mulf %17, %14 : vector<7x32xf32>
    %19 = arith.select %16, %14, %18 : vector<7x32xi1>, vector<7x32xf32>
    %c0_23 = arith.constant 0 : index
    %c0_24 = arith.constant 0 : index
    %20 = vector.load %arg14[%c0_23, %c0_24] : memref<32x32xbf16, #tpu.memory_space<vmem>>, vector<32x32xbf16>
    %21 = arith.truncf %19 : vector<7x32xf32> to vector<7x32xbf16>
    %cst_25 = arith.constant dense<0.000000e+00> : vector<7x32xf32>
    %22 = tpu.matmul %21, %20, %cst_25 {dimension_numbers = #tpu.dot_dimension_numbers<[1], [0], [0], [1], [0, 0, 1, 1], [], []>} : vector<7x32xbf16>, vector<32x32xbf16>, vector<7x32xf32> -> vector<7x32xf32>
    %c0_26 = arith.constant 0 : index
    %c0_27 = arith.constant 0 : index
    %23 = vector.load %arg15[%c0_26, %c0_27] : memref<1x32xf32, #tpu.memory_space<vmem>>, vector<1x32xf32>
    %24 = vector.broadcast %23 : vector<1x32xf32> to vector<7x32xf32>
    %25 = arith.addf %22, %24 : vector<7x32xf32>
    %cst_28 = arith.constant 0.000000e+00 : f32
    %26 = vector.broadcast %cst_28 : f32 to vector<7x32xf32>
    %27 = arith.cmpf ogt, %25, %26 : vector<7x32xf32>
    %cst_29 = arith.constant 0.00999999977 : f32
    %28 = vector.broadcast %cst_29 : f32 to vector<7x32xf32>
    %29 = arith.mulf %28, %25 : vector<7x32xf32>
    %30 = arith.select %27, %25, %29 : vector<7x32xi1>, vector<7x32xf32>
    %c0_30 = arith.constant 0 : index
    %c0_31 = arith.constant 0 : index
    %31 = vector.load %arg16[%c0_30, %c0_31] : memref<32x32xbf16, #tpu.memory_space<vmem>>, vector<32x32xbf16>
    %32 = arith.truncf %30 : vector<7x32xf32> to vector<7x32xbf16>
    %cst_32 = arith.constant dense<0.000000e+00> : vector<7x32xf32>
    %33 = tpu.matmul %32, %31, %cst_32 {dimension_numbers = #tpu.dot_dimension_numbers<[1], [0], [0], [1], [0, 0, 1, 1], [], []>} : vector<7x32xbf16>, vector<32x32xbf16>, vector<7x32xf32> -> vector<7x32xf32>
    %c0_33 = arith.constant 0 : index
    %c0_34 = arith.constant 0 : index
    %34 = vector.load %arg17[%c0_33, %c0_34] : memref<1x32xf32, #tpu.memory_space<vmem>>, vector<1x32xf32>
    %35 = vector.broadcast %34 : vector<1x32xf32> to vector<7x32xf32>
    %36 = arith.addf %33, %35 : vector<7x32xf32>
    %c0_35 = arith.constant 0 : index
    %c0_36 = arith.constant 0 : index
    %37 = vector.load %arg2[%c0_35, %c0_36] : memref<12x5xf32, #tpu.memory_space<vmem>>, vector<12x5xf32>
    %c0_37 = arith.constant 0 : index
    %c0_38 = arith.constant 0 : index
    %38 = vector.load %arg18[%c0_37, %c0_38] : memref<5x32xbf16, #tpu.memory_space<vmem>>, vector<5x32xbf16>
    %39 = arith.truncf %37 : vector<12x5xf32> to vector<12x5xbf16>
    %cst_39 = arith.constant dense<0.000000e+00> : vector<12x32xf32>
    %40 = tpu.matmul %39, %38, %cst_39 {dimension_numbers = #tpu.dot_dimension_numbers<[1], [0], [0], [1], [0, 0, 1, 1], [], []>} : vector<12x5xbf16>, vector<5x32xbf16>, vector<12x32xf32> -> vector<12x32xf32>
    %c0_40 = arith.constant 0 : index
    %c0_41 = arith.constant 0 : index
    %41 = vector.load %arg19[%c0_40, %c0_41] : memref<1x32xf32, #tpu.memory_space<vmem>>, vector<1x32xf32>
    %42 = vector.broadcast %41 : vector<1x32xf32> to vector<12x32xf32>
    %43 = arith.addf %40, %42 : vector<12x32xf32>
    %cst_42 = arith.constant 0.000000e+00 : f32
    %44 = vector.broadcast %cst_42 : f32 to vector<12x32xf32>
    %45 = arith.cmpf ogt, %43, %44 : vector<12x32xf32>
    %cst_43 = arith.constant 0.00999999977 : f32
    %46 = vector.broadcast %cst_43 : f32 to vector<12x32xf32>
    %47 = arith.mulf %46, %43 : vector<12x32xf32>
    %48 = arith.select %45, %43, %47 : vector<12x32xi1>, vector<12x32xf32>
    %c0_44 = arith.constant 0 : index
    %c0_45 = arith.constant 0 : index
    %49 = vector.load %arg20[%c0_44, %c0_45] : memref<32x32xbf16, #tpu.memory_space<vmem>>, vector<32x32xbf16>
    %50 = arith.truncf %48 : vector<12x32xf32> to vector<12x32xbf16>
    %cst_46 = arith.constant dense<0.000000e+00> : vector<12x32xf32>
    %51 = tpu.matmul %50, %49, %cst_46 {dimension_numbers = #tpu.dot_dimension_numbers<[1], [0], [0], [1], [0, 0, 1, 1], [], []>} : vector<12x32xbf16>, vector<32x32xbf16>, vector<12x32xf32> -> vector<12x32xf32>
    %c0_47 = arith.constant 0 : index
    %c0_48 = arith.constant 0 : index
    %52 = vector.load %arg21[%c0_47, %c0_48] : memref<1x32xf32, #tpu.memory_space<vmem>>, vector<1x32xf32>
    %53 = vector.broadcast %52 : vector<1x32xf32> to vector<12x32xf32>
    %54 = arith.addf %51, %53 : vector<12x32xf32>
    %cst_49 = arith.constant 0.000000e+00 : f32
    %55 = vector.broadcast %cst_49 : f32 to vector<12x32xf32>
    %56 = arith.cmpf ogt, %54, %55 : vector<12x32xf32>
    %cst_50 = arith.constant 0.00999999977 : f32
    %57 = vector.broadcast %cst_50 : f32 to vector<12x32xf32>
    %58 = arith.mulf %57, %54 : vector<12x32xf32>
    %59 = arith.select %56, %54, %58 : vector<12x32xi1>, vector<12x32xf32>
    %c0_51 = arith.constant 0 : index
    %c0_52 = arith.constant 0 : index
    %60 = vector.load %arg22[%c0_51, %c0_52] : memref<32x32xbf16, #tpu.memory_space<vmem>>, vector<32x32xbf16>
    %61 = arith.truncf %59 : vector<12x32xf32> to vector<12x32xbf16>
    %cst_53 = arith.constant dense<0.000000e+00> : vector<12x32xf32>
    %62 = tpu.matmul %61, %60, %cst_53 {dimension_numbers = #tpu.dot_dimension_numbers<[1], [0], [0], [1], [0, 0, 1, 1], [], []>} : vector<12x32xbf16>, vector<32x32xbf16>, vector<12x32xf32> -> vector<12x32xf32>
    %c0_54 = arith.constant 0 : index
    %c0_55 = arith.constant 0 : index
    %63 = vector.load %arg23[%c0_54, %c0_55] : memref<1x32xf32, #tpu.memory_space<vmem>>, vector<1x32xf32>
    %64 = vector.broadcast %63 : vector<1x32xf32> to vector<12x32xf32>
    %65 = arith.addf %62, %64 : vector<12x32xf32>
    %c0_56 = arith.constant 0 : index
    %c0_57 = arith.constant 0 : index
    %66 = vector.load %arg3[%c0_56, %c0_57] : memref<2x6xf32, #tpu.memory_space<vmem>>, vector<2x6xf32>
    %c0_58 = arith.constant 0 : index
    %c0_59 = arith.constant 0 : index
    %67 = vector.load %arg24[%c0_58, %c0_59] : memref<6x32xbf16, #tpu.memory_space<vmem>>, vector<6x32xbf16>
    %68 = arith.truncf %66 : vector<2x6xf32> to vector<2x6xbf16>
    %cst_60 = arith.constant dense<0.000000e+00> : vector<2x32xf32>
    %69 = tpu.matmul %68, %67, %cst_60 {dimension_numbers = #tpu.dot_dimension_numbers<[1], [0], [0], [1], [0, 0, 1, 1], [], []>} : vector<2x6xbf16>, vector<6x32xbf16>, vector<2x32xf32> -> vector<2x32xf32>
    %c0_61 = arith.constant 0 : index
    %c0_62 = arith.constant 0 : index
    %70 = vector.load %arg25[%c0_61, %c0_62] : memref<1x32xf32, #tpu.memory_space<vmem>>, vector<1x32xf32>
    %71 = vector.broadcast %70 : vector<1x32xf32> to vector<2x32xf32>
    %72 = arith.addf %69, %71 : vector<2x32xf32>
    %cst_63 = arith.constant 0.000000e+00 : f32
    %73 = vector.broadcast %cst_63 : f32 to vector<2x32xf32>
    %74 = arith.cmpf ogt, %72, %73 : vector<2x32xf32>
    %cst_64 = arith.constant 0.00999999977 : f32
    %75 = vector.broadcast %cst_64 : f32 to vector<2x32xf32>
    %76 = arith.mulf %75, %72 : vector<2x32xf32>
    %77 = arith.select %74, %72, %76 : vector<2x32xi1>, vector<2x32xf32>
    %c0_65 = arith.constant 0 : index
    %c0_66 = arith.constant 0 : index
    %78 = vector.load %arg26[%c0_65, %c0_66] : memref<32x32xbf16, #tpu.memory_space<vmem>>, vector<32x32xbf16>
    %79 = arith.truncf %77 : vector<2x32xf32> to vector<2x32xbf16>
    %cst_67 = arith.constant dense<0.000000e+00> : vector<2x32xf32>
    %80 = tpu.matmul %79, %78, %cst_67 {dimension_numbers = #tpu.dot_dimension_numbers<[1], [0], [0], [1], [0, 0, 1, 1], [], []>} : vector<2x32xbf16>, vector<32x32xbf16>, vector<2x32xf32> -> vector<2x32xf32>
    %c0_68 = arith.constant 0 : index
    %c0_69 = arith.constant 0 : index
    %81 = vector.load %arg27[%c0_68, %c0_69] : memref<1x32xf32, #tpu.memory_space<vmem>>, vector<1x32xf32>
    %82 = vector.broadcast %81 : vector<1x32xf32> to vector<2x32xf32>
    %83 = arith.addf %80, %82 : vector<2x32xf32>
    %cst_70 = arith.constant 0.000000e+00 : f32
    %84 = vector.broadcast %cst_70 : f32 to vector<2x32xf32>
    %85 = arith.cmpf ogt, %83, %84 : vector<2x32xf32>
    %cst_71 = arith.constant 0.00999999977 : f32
    %86 = vector.broadcast %cst_71 : f32 to vector<2x32xf32>
    %87 = arith.mulf %86, %83 : vector<2x32xf32>
    %88 = arith.select %85, %83, %87 : vector<2x32xi1>, vector<2x32xf32>
    %c0_72 = arith.constant 0 : index
    %c0_73 = arith.constant 0 : index
    %89 = vector.load %arg28[%c0_72, %c0_73] : memref<32x32xbf16, #tpu.memory_space<vmem>>, vector<32x32xbf16>
    %90 = arith.truncf %88 : vector<2x32xf32> to vector<2x32xbf16>
    %cst_74 = arith.constant dense<0.000000e+00> : vector<2x32xf32>
    %91 = tpu.matmul %90, %89, %cst_74 {dimension_numbers = #tpu.dot_dimension_numbers<[1], [0], [0], [1], [0, 0, 1, 1], [], []>} : vector<2x32xbf16>, vector<32x32xbf16>, vector<2x32xf32> -> vector<2x32xf32>
    %c0_75 = arith.constant 0 : index
    %c0_76 = arith.constant 0 : index
    %92 = vector.load %arg29[%c0_75, %c0_76] : memref<1x32xf32, #tpu.memory_space<vmem>>, vector<1x32xf32>
    %93 = vector.broadcast %92 : vector<1x32xf32> to vector<2x32xf32>
    %94 = arith.addf %91, %93 : vector<2x32xf32>
    %95 = tpu.concatenate %36, %94 in 0 : vector<7x32xf32>, vector<2x32xf32> -> vector<9x32xf32>
    %96 = tpu.iota {dimensions = array<i32: 1>} : vector<14x32xi32>
    %c0_i32 = arith.constant 0 : i32
    %97 = vector.broadcast %c0_i32 : i32 to vector<14x32xi32>
    %98 = arith.cmpi eq, %96, %97 : vector<14x32xi32>
    %99 = arith.extui %98 : vector<14x32xi1> to vector<14x32xi32>
    %100 = arith.sitofp %99 : vector<14x32xi32> to vector<14x32xf32>
    %101 = tpu.concatenate %65, %100 in 0 : vector<12x32xf32>, vector<14x32xf32> -> vector<26x32xf32>
    %102 = vector.extract_strided_slice %1 {offsets = [0, 0], sizes = [26, 9], strides = [1, 1]} : vector<35x9xbf16> to vector<26x9xbf16>
    %103 = arith.truncf %101 : vector<26x32xf32> to vector<26x32xbf16>
    %cst_77 = arith.constant dense<0.000000e+00> : vector<9x32xf32>
    %104 = tpu.matmul %102, %103, %cst_77 {dimension_numbers = #tpu.dot_dimension_numbers<[0], [0], [1], [1], [0, 1, 1, 1], [], []>} : vector<26x9xbf16>, vector<26x32xbf16>, vector<9x32xf32> -> vector<9x32xf32>
    %105 = vector.broadcast %3 : vector<9x1xf32> to vector<9x32xf32>
    %106 = arith.mulf %104, %105 : vector<9x32xf32>
    %107 = tpu.concatenate %101, %106 in 0 : vector<26x32xf32>, vector<9x32xf32> -> vector<35x32xf32>
    %108 = arith.truncf %107 : vector<35x32xf32> to vector<35x32xbf16>
    %109 = arith.extf %2 : vector<9x2xbf16> to vector<9x2xf32>
    %cst_78 = arith.constant dense<0.000000e+00> : vector<9x32xf32>
    %110 = tpu.matmul %109, %94, %cst_78 {dimension_numbers = #tpu.dot_dimension_numbers<[1], [0], [0], [1], [0, 0, 1, 1], [], []>, precision = #tpu.contract_precision<fp32>} : vector<9x2xf32>, vector<2x32xf32>, vector<9x32xf32> -> vector<9x32xf32>
    %111 = arith.truncf %110 : vector<9x32xf32> to vector<9x32xbf16>
    %c0_79 = arith.constant 0 : index
    %c0_80 = arith.constant 0 : index
    %c0_81 = arith.constant 0 : index
    %112 = vector.load %arg41[%c0_79, %c0_80, %c0_81] : memref<3x32x64xbf16, #tpu.memory_space<vmem>>, vector<1x32x64xbf16>
    %113 = vector.shape_cast %112 : vector<1x32x64xbf16> to vector<32x64xbf16>
    %cst_82 = arith.constant dense<0.000000e+00> : vector<9x64xf32>
    %114 = tpu.matmul %111, %113, %cst_82 {dimension_numbers = #tpu.dot_dimension_numbers<[1], [0], [0], [1], [0, 0, 1, 1], [], []>} : vector<9x32xbf16>, vector<32x64xbf16>, vector<9x64xf32> -> vector<9x64xf32>
    %c0_83 = arith.constant 0 : index
    %c0_84 = arith.constant 0 : index
    %c0_85 = arith.constant 0 : index
    %115 = vector.load %arg42[%c0_83, %c0_84, %c0_85] : memref<3x1x64xf32, #tpu.memory_space<vmem>>, vector<1x1x64xf32>
    %116 = vector.shape_cast %115 : vector<1x1x64xf32> to vector<1x64xf32>
    %117 = vector.broadcast %116 : vector<1x64xf32> to vector<9x64xf32>
    %118 = arith.addf %114, %117 : vector<9x64xf32>
    %119 = vector.extract_strided_slice %118 {offsets = [0, 0], sizes = [9, 32], strides = [1, 1]} : vector<9x64xf32> to vector<9x32xf32>
    %120 = vector.extract_strided_slice %118 {offsets = [0, 32], sizes = [9, 32], strides = [1, 1]} : vector<9x64xf32> to vector<9x32xf32>
    %121 = arith.mulf %95, %95 : vector<9x32xf32>
    %122 = tpu.concatenate %95, %121 in 1 : vector<9x32xf32>, vector<9x32xf32> -> vector<9x64xf32>
    %123 = arith.truncf %122 : vector<9x64xf32> to vector<9x64xbf16>
    %cst_86 = arith.constant dense<0.000000e+00> : vector<2x64xf32>
    %124 = tpu.matmul %2, %123, %cst_86 {dimension_numbers = #tpu.dot_dimension_numbers<[0], [0], [1], [1], [0, 1, 1, 1], [], []>} : vector<9x2xbf16>, vector<9x64xbf16>, vector<2x64xf32> -> vector<2x64xf32>
    %125 = vector.extract_strided_slice %124 {offsets = [0, 0], sizes = [2, 32], strides = [1, 1]} : vector<2x64xf32> to vector<2x32xf32>
    %cst_87 = arith.constant dense<0.000000e+00> : vector<2xf32>
    %126 = vector.multi_reduction <add>, %125, %cst_87 [1] : vector<2x32xf32> to vector<2xf32>
    %127 = vector.shape_cast %126 : vector<2xf32> to vector<2x1xf32>
    %128 = arith.mulf %127, %4 : vector<2x1xf32>
    %129 = vector.extract_strided_slice %124 {offsets = [0, 32], sizes = [2, 32], strides = [1, 1]} : vector<2x64xf32> to vector<2x32xf32>
    %cst_88 = arith.constant dense<0.000000e+00> : vector<2xf32>
    %130 = vector.multi_reduction <add>, %129, %cst_88 [1] : vector<2x32xf32> to vector<2xf32>
    %131 = vector.shape_cast %130 : vector<2xf32> to vector<2x1xf32>
    %132 = arith.mulf %131, %4 : vector<2x1xf32>
    %133 = arith.mulf %128, %128 : vector<2x1xf32>
    %134 = arith.subf %132, %133 : vector<2x1xf32>
    %cst_89 = arith.constant 0.000000e+00 : f32
    %135 = vector.broadcast %cst_89 : f32 to vector<2x1xf32>
    %136 = arith.maximumf %134, %135 : vector<2x1xf32>
    %cst_90 = arith.constant 9.99999974E-6 : f32
    %137 = vector.broadcast %cst_90 : f32 to vector<2x1xf32>
    %138 = arith.addf %136, %137 : vector<2x1xf32>
    %139 = math.rsqrt %138 : vector<2x1xf32>
    %140 = tpu.concatenate %128, %139 in 1 : vector<2x1xf32>, vector<2x1xf32> -> vector<2x2xf32>
    %141 = arith.extf %2 : vector<9x2xbf16> to vector<9x2xf32>
    %cst_91 = arith.constant dense<0.000000e+00> : vector<9x2xf32>
    %142 = tpu.matmul %141, %140, %cst_91 {dimension_numbers = #tpu.dot_dimension_numbers<[1], [0], [0], [1], [0, 0, 1, 1], [], []>, precision = #tpu.contract_precision<fp32>} : vector<9x2xf32>, vector<2x2xf32>, vector<9x2xf32> -> vector<9x2xf32>
    %143 = vector.extract_strided_slice %142 {offsets = [0, 0], sizes = [9, 1], strides = [1, 1]} : vector<9x2xf32> to vector<9x1xf32>
    %144 = vector.broadcast %143 : vector<9x1xf32> to vector<9x32xf32>
    %145 = arith.subf %95, %144 : vector<9x32xf32>
    %146 = vector.extract_strided_slice %142 {offsets = [0, 1], sizes = [9, 1], strides = [1, 1]} : vector<9x2xf32> to vector<9x1xf32>
    %147 = vector.broadcast %146 : vector<9x1xf32> to vector<9x32xf32>
    %148 = arith.mulf %145, %147 : vector<9x32xf32>
    %149 = arith.truncf %148 : vector<9x32xf32> to vector<9x32xbf16>
    %cst_92 = arith.constant dense<0.000000e+00> : vector<35x32xf32>
    %150 = tpu.matmul %0, %149, %cst_92 {dimension_numbers = #tpu.dot_dimension_numbers<[1], [0], [0], [1], [0, 0, 1, 1], [], []>} : vector<35x9xbf16>, vector<9x32xbf16>, vector<35x32xf32> -> vector<35x32xf32>
    %151 = arith.addf %150, %107 : vector<35x32xf32>
    %cst_93 = arith.constant 0.000000e+00 : f32
    %152 = vector.broadcast %cst_93 : f32 to vector<35x32xf32>
    %153 = arith.maximumf %151, %152 : vector<35x32xf32>
    %cst_94 = arith.constant 1.000000e-07 : f32
    %154 = vector.broadcast %cst_94 : f32 to vector<35x32xf32>
    %155 = arith.addf %153, %154 : vector<35x32xf32>
    %156 = arith.truncf %155 : vector<35x32xf32> to vector<35x32xbf16>
    %cst_95 = arith.constant dense<0.000000e+00> : vector<9x32xf32>
    %157 = tpu.matmul %1, %156, %cst_95 {dimension_numbers = #tpu.dot_dimension_numbers<[0], [0], [1], [1], [0, 1, 1, 1], [], []>} : vector<35x9xbf16>, vector<35x32xbf16>, vector<9x32xf32> -> vector<9x32xf32>
    %158 = arith.addf %157, %148 : vector<9x32xf32>
    %c0_96 = arith.constant 0 : index
    %c0_97 = arith.constant 0 : index
    %c0_98 = arith.constant 0 : index
    %159 = vector.load %arg30[%c0_96, %c0_97, %c0_98] : memref<3x32x32xbf16, #tpu.memory_space<vmem>>, vector<1x32x32xbf16>
    %160 = vector.shape_cast %159 : vector<1x32x32xbf16> to vector<32x32xbf16>
    %161 = arith.truncf %158 : vector<9x32xf32> to vector<9x32xbf16>
    %cst_99 = arith.constant dense<0.000000e+00> : vector<9x32xf32>
    %162 = tpu.matmul %161, %160, %cst_99 {dimension_numbers = #tpu.dot_dimension_numbers<[1], [0], [0], [1], [0, 0, 1, 1], [], []>} : vector<9x32xbf16>, vector<32x32xbf16>, vector<9x32xf32> -> vector<9x32xf32>
    %c0_100 = arith.constant 0 : index
    %c0_101 = arith.constant 0 : index
    %c0_102 = arith.constant 0 : index
    %163 = vector.load %arg31[%c0_100, %c0_101, %c0_102] : memref<3x1x32xf32, #tpu.memory_space<vmem>>, vector<1x1x32xf32>
    %164 = vector.shape_cast %163 : vector<1x1x32xf32> to vector<1x32xf32>
    %165 = vector.broadcast %164 : vector<1x32xf32> to vector<9x32xf32>
    %166 = arith.addf %162, %165 : vector<9x32xf32>
    %167 = tpu.concatenate %148, %166 in 1 : vector<9x32xf32>, vector<9x32xf32> -> vector<9x64xf32>
    %c0_103 = arith.constant 0 : index
    %c0_104 = arith.constant 0 : index
    %c0_105 = arith.constant 0 : index
    %168 = vector.load %arg32[%c0_103, %c0_104, %c0_105] : memref<3x64x256xbf16, #tpu.memory_space<vmem>>, vector<1x64x256xbf16>
    %169 = vector.shape_cast %168 : vector<1x64x256xbf16> to vector<64x256xbf16>
    %170 = arith.truncf %167 : vector<9x64xf32> to vector<9x64xbf16>
    %cst_106 = arith.constant dense<0.000000e+00> : vector<9x256xf32>
    %171 = tpu.matmul %170, %169, %cst_106 {dimension_numbers = #tpu.dot_dimension_numbers<[1], [0], [0], [1], [0, 0, 1, 1], [], []>} : vector<9x64xbf16>, vector<64x256xbf16>, vector<9x256xf32> -> vector<9x256xf32>
    %c0_107 = arith.constant 0 : index
    %c0_108 = arith.constant 0 : index
    %c0_109 = arith.constant 0 : index
    %172 = vector.load %arg33[%c0_107, %c0_108, %c0_109] : memref<3x1x256xf32, #tpu.memory_space<vmem>>, vector<1x1x256xf32>
    %173 = vector.shape_cast %172 : vector<1x1x256xf32> to vector<1x256xf32>
    %174 = vector.broadcast %173 : vector<1x256xf32> to vector<9x256xf32>
    %175 = arith.addf %171, %174 : vector<9x256xf32>
    %176 = vector.extract_strided_slice %175 {offsets = [0, 0], sizes = [9, 64], strides = [1, 1]} : vector<9x256xf32> to vector<9x64xf32>
    %177 = vector.extract_strided_slice %175 {offsets = [0, 64], sizes = [9, 64], strides = [1, 1]} : vector<9x256xf32> to vector<9x64xf32>
    %178 = vector.extract_strided_slice %175 {offsets = [0, 128], sizes = [9, 64], strides = [1, 1]} : vector<9x256xf32> to vector<9x64xf32>
    %179 = vector.extract_strided_slice %175 {offsets = [0, 192], sizes = [9, 64], strides = [1, 1]} : vector<9x256xf32> to vector<9x64xf32>
    %c0_110 = arith.constant 0 : index
    %c0_111 = arith.constant 0 : index
    %c0_112 = arith.constant 0 : index
    %180 = vector.load %arg34[%c0_110, %c0_111, %c0_112] : memref<3x32x64xbf16, #tpu.memory_space<vmem>>, vector<1x32x64xbf16>
    %181 = vector.shape_cast %180 : vector<1x32x64xbf16> to vector<32x64xbf16>
    %cst_113 = arith.constant dense<0.000000e+00> : vector<35x64xf32>
    %182 = tpu.matmul %108, %181, %cst_113 {dimension_numbers = #tpu.dot_dimension_numbers<[1], [0], [0], [1], [0, 0, 1, 1], [], []>} : vector<35x32xbf16>, vector<32x64xbf16>, vector<35x64xf32> -> vector<35x64xf32>
    %183 = arith.truncf %177 : vector<9x64xf32> to vector<9x64xbf16>
    %cst_114 = arith.constant dense<0.000000e+00> : vector<35x64xf32>
    %184 = tpu.matmul %0, %183, %cst_114 {dimension_numbers = #tpu.dot_dimension_numbers<[1], [0], [0], [1], [0, 0, 1, 1], [], []>} : vector<35x9xbf16>, vector<9x64xbf16>, vector<35x64xf32> -> vector<35x64xf32>
    %185 = arith.addf %184, %182 : vector<35x64xf32>
    %186 = arith.truncf %178 : vector<9x64xf32> to vector<9x64xbf16>
    %cst_115 = arith.constant dense<0.000000e+00> : vector<35x64xf32>
    %187 = tpu.matmul %0, %186, %cst_115 {dimension_numbers = #tpu.dot_dimension_numbers<[1], [0], [0], [1], [0, 0, 1, 1], [], []>} : vector<35x9xbf16>, vector<9x64xbf16>, vector<35x64xf32> -> vector<35x64xf32>
    %188 = arith.addf %187, %182 : vector<35x64xf32>
    %189 = arith.truncf %176 : vector<9x64xf32> to vector<9x64xbf16>
    %cst_116 = arith.constant dense<0.000000e+00> : vector<35x64xf32>
    %190 = tpu.matmul %1, %189, %cst_116 {dimension_numbers = #tpu.dot_dimension_numbers<[1], [0], [0], [1], [0, 0, 1, 1], [], []>} : vector<35x9xbf16>, vector<9x64xbf16>, vector<35x64xf32> -> vector<35x64xf32>
    %191 = arith.mulf %190, %185 : vector<35x64xf32>
    %192 = arith.truncf %191 : vector<35x64xf32> to vector<35x64xbf16>
    %cst_117 = arith.constant dense<0.000000e+00> : vector<35x2xf32>
    %193 = tpu.matmul %192, %7, %cst_117 {dimension_numbers = #tpu.dot_dimension_numbers<[1], [0], [0], [1], [0, 0, 1, 1], [], []>} : vector<35x64xbf16>, vector<64x2xbf16>, vector<35x2xf32> -> vector<35x2xf32>
    %cst_118 = arith.constant 0.176776692 : f32
    %194 = vector.broadcast %cst_118 : f32 to vector<35x2xf32>
    %195 = arith.mulf %193, %194 : vector<35x2xf32>
    %cst_119 = arith.constant dense<0x7F800000> : vector<2xf32>
    %196 = vector.multi_reduction <minimumf>, %195, %cst_119 [0] : vector<35x2xf32> to vector<2xf32>
    %197 = vector.shape_cast %196 : vector<2xf32> to vector<1x2xf32>
    %198 = vector.broadcast %197 : vector<1x2xf32> to vector<35x2xf32>
    %199 = arith.subf %195, %198 : vector<35x2xf32>
    %200 = vector.extract_strided_slice %199 {offsets = [0, 0], sizes = [35, 1], strides = [1, 1]} : vector<35x2xf32> to vector<35x1xf32>
    %201 = arith.extf %1 : vector<35x9xbf16> to vector<35x9xf32>
    %202 = vector.broadcast %200 : vector<35x1xf32> to vector<35x9xf32>
    %203 = arith.mulf %201, %202 : vector<35x9xf32>
    %cst_120 = arith.constant dense<0xFF800000> : vector<9xf32>
    %204 = vector.multi_reduction <maximumf>, %203, %cst_120 [0] : vector<35x9xf32> to vector<9xf32>
    %205 = vector.shape_cast %204 : vector<9xf32> to vector<1x9xf32>
    %206 = vector.extract_strided_slice %199 {offsets = [0, 1], sizes = [35, 1], strides = [1, 1]} : vector<35x2xf32> to vector<35x1xf32>
    %207 = arith.extf %1 : vector<35x9xbf16> to vector<35x9xf32>
    %208 = vector.broadcast %206 : vector<35x1xf32> to vector<35x9xf32>
    %209 = arith.mulf %207, %208 : vector<35x9xf32>
    %cst_121 = arith.constant dense<0xFF800000> : vector<9xf32>
    %210 = vector.multi_reduction <maximumf>, %209, %cst_121 [0] : vector<35x9xf32> to vector<9xf32>
    %211 = vector.shape_cast %210 : vector<9xf32> to vector<1x9xf32>
    %212 = tpu.concatenate %205, %211 in 0 : vector<1x9xf32>, vector<1x9xf32> -> vector<2x9xf32>
    %213 = arith.truncf %212 : vector<2x9xf32> to vector<2x9xbf16>
    %cst_122 = arith.constant dense<0.000000e+00> : vector<35x2xf32>
    %214 = tpu.matmul %1, %213, %cst_122 {dimension_numbers = #tpu.dot_dimension_numbers<[1], [1], [0], [0], [0, 0, 1, 0], [], []>} : vector<35x9xbf16>, vector<2x9xbf16>, vector<35x2xf32> -> vector<35x2xf32>
    %215 = arith.subf %199, %214 : vector<35x2xf32>
    %216 = math.exp %215 : vector<35x2xf32>
    %217 = arith.truncf %216 : vector<35x2xf32> to vector<35x2xbf16>
    %cst_123 = arith.constant dense<0.000000e+00> : vector<9x2xf32>
    %218 = tpu.matmul %1, %217, %cst_123 {dimension_numbers = #tpu.dot_dimension_numbers<[0], [0], [1], [1], [0, 1, 1, 1], [], []>} : vector<35x9xbf16>, vector<35x2xbf16>, vector<9x2xf32> -> vector<9x2xf32>
    %219 = arith.truncf %218 : vector<9x2xf32> to vector<9x2xbf16>
    %cst_124 = arith.constant dense<0.000000e+00> : vector<35x2xf32>
    %220 = tpu.matmul %1, %219, %cst_124 {dimension_numbers = #tpu.dot_dimension_numbers<[1], [0], [0], [1], [0, 0, 1, 1], [], []>} : vector<35x9xbf16>, vector<9x2xbf16>, vector<35x2xf32> -> vector<35x2xf32>
    %cst_125 = arith.constant 1.000000e-16 : f32
    %221 = vector.broadcast %cst_125 : f32 to vector<35x2xf32>
    %222 = arith.addf %220, %221 : vector<35x2xf32>
    %223 = tpu.reciprocal %222 {approx = true} : vector<35x2xf32> -> vector<35x2xf32>
    %224 = arith.mulf %216, %223 : vector<35x2xf32>
    %225 = arith.truncf %224 : vector<35x2xf32> to vector<35x2xbf16>
    %cst_126 = arith.constant dense<0.000000e+00> : vector<35x64xf32>
    %226 = tpu.matmul %225, %6, %cst_126 {dimension_numbers = #tpu.dot_dimension_numbers<[1], [0], [0], [1], [0, 0, 1, 1], [], []>} : vector<35x2xbf16>, vector<2x64xbf16>, vector<35x64xf32> -> vector<35x64xf32>
    %227 = arith.mulf %188, %226 : vector<35x64xf32>
    %228 = arith.truncf %227 : vector<35x64xf32> to vector<35x64xbf16>
    %cst_127 = arith.constant dense<0.000000e+00> : vector<9x64xf32>
    %229 = tpu.matmul %1, %228, %cst_127 {dimension_numbers = #tpu.dot_dimension_numbers<[0], [0], [1], [1], [0, 1, 1, 1], [], []>} : vector<35x9xbf16>, vector<35x64xbf16>, vector<9x64xf32> -> vector<9x64xf32>
    %230 = arith.addf %229, %179 : vector<9x64xf32>
    %c0_128 = arith.constant 0 : index
    %c0_129 = arith.constant 0 : index
    %c0_130 = arith.constant 0 : index
    %231 = vector.load %arg35[%c0_128, %c0_129, %c0_130] : memref<3x64x32xbf16, #tpu.memory_space<vmem>>, vector<1x64x32xbf16>
    %232 = vector.shape_cast %231 : vector<1x64x32xbf16> to vector<64x32xbf16>
    %233 = arith.truncf %230 : vector<9x64xf32> to vector<9x64xbf16>
    %cst_131 = arith.constant dense<0.000000e+00> : vector<9x32xf32>
    %234 = tpu.matmul %233, %232, %cst_131 {dimension_numbers = #tpu.dot_dimension_numbers<[1], [0], [0], [1], [0, 0, 1, 1], [], []>} : vector<9x64xbf16>, vector<64x32xbf16>, vector<9x32xf32> -> vector<9x32xf32>
    %c0_132 = arith.constant 0 : index
    %c0_133 = arith.constant 0 : index
    %c0_134 = arith.constant 0 : index
    %235 = vector.load %arg36[%c0_132, %c0_133, %c0_134] : memref<3x1x32xf32, #tpu.memory_space<vmem>>, vector<1x1x32xf32>
    %236 = vector.shape_cast %235 : vector<1x1x32xf32> to vector<1x32xf32>
    %237 = vector.broadcast %236 : vector<1x32xf32> to vector<9x32xf32>
    %238 = arith.addf %234, %237 : vector<9x32xf32>
    %239 = arith.mulf %238, %119 : vector<9x32xf32>
    %240 = arith.addf %95, %239 : vector<9x32xf32>
    %241 = arith.addf %240, %120 : vector<9x32xf32>
    %242 = arith.mulf %241, %241 : vector<9x32xf32>
    %243 = tpu.concatenate %241, %242 in 1 : vector<9x32xf32>, vector<9x32xf32> -> vector<9x64xf32>
    %244 = arith.truncf %243 : vector<9x64xf32> to vector<9x64xbf16>
    %cst_135 = arith.constant dense<0.000000e+00> : vector<2x64xf32>
    %245 = tpu.matmul %2, %244, %cst_135 {dimension_numbers = #tpu.dot_dimension_numbers<[0], [0], [1], [1], [0, 1, 1, 1], [], []>} : vector<9x2xbf16>, vector<9x64xbf16>, vector<2x64xf32> -> vector<2x64xf32>
    %246 = vector.extract_strided_slice %245 {offsets = [0, 0], sizes = [2, 32], strides = [1, 1]} : vector<2x64xf32> to vector<2x32xf32>
    %cst_136 = arith.constant dense<0.000000e+00> : vector<2xf32>
    %247 = vector.multi_reduction <add>, %246, %cst_136 [1] : vector<2x32xf32> to vector<2xf32>
    %248 = vector.shape_cast %247 : vector<2xf32> to vector<2x1xf32>
    %249 = arith.mulf %248, %4 : vector<2x1xf32>
    %250 = vector.extract_strided_slice %245 {offsets = [0, 32], sizes = [2, 32], strides = [1, 1]} : vector<2x64xf32> to vector<2x32xf32>
    %cst_137 = arith.constant dense<0.000000e+00> : vector<2xf32>
    %251 = vector.multi_reduction <add>, %250, %cst_137 [1] : vector<2x32xf32> to vector<2xf32>
    %252 = vector.shape_cast %251 : vector<2xf32> to vector<2x1xf32>
    %253 = arith.mulf %252, %4 : vector<2x1xf32>
    %254 = arith.mulf %249, %249 : vector<2x1xf32>
    %255 = arith.subf %253, %254 : vector<2x1xf32>
    %cst_138 = arith.constant 0.000000e+00 : f32
    %256 = vector.broadcast %cst_138 : f32 to vector<2x1xf32>
    %257 = arith.maximumf %255, %256 : vector<2x1xf32>
    %cst_139 = arith.constant 9.99999974E-6 : f32
    %258 = vector.broadcast %cst_139 : f32 to vector<2x1xf32>
    %259 = arith.addf %257, %258 : vector<2x1xf32>
    %260 = math.rsqrt %259 : vector<2x1xf32>
    %261 = tpu.concatenate %249, %260 in 1 : vector<2x1xf32>, vector<2x1xf32> -> vector<2x2xf32>
    %262 = arith.extf %2 : vector<9x2xbf16> to vector<9x2xf32>
    %cst_140 = arith.constant dense<0.000000e+00> : vector<9x2xf32>
    %263 = tpu.matmul %262, %261, %cst_140 {dimension_numbers = #tpu.dot_dimension_numbers<[1], [0], [0], [1], [0, 0, 1, 1], [], []>, precision = #tpu.contract_precision<fp32>} : vector<9x2xf32>, vector<2x2xf32>, vector<9x2xf32> -> vector<9x2xf32>
    %264 = vector.extract_strided_slice %263 {offsets = [0, 0], sizes = [9, 1], strides = [1, 1]} : vector<9x2xf32> to vector<9x1xf32>
    %265 = vector.broadcast %264 : vector<9x1xf32> to vector<9x32xf32>
    %266 = arith.subf %241, %265 : vector<9x32xf32>
    %267 = vector.extract_strided_slice %263 {offsets = [0, 1], sizes = [9, 1], strides = [1, 1]} : vector<9x2xf32> to vector<9x1xf32>
    %268 = vector.broadcast %267 : vector<9x1xf32> to vector<9x32xf32>
    %269 = arith.mulf %266, %268 : vector<9x32xf32>
    %c0_141 = arith.constant 0 : index
    %c0_142 = arith.constant 0 : index
    %c0_143 = arith.constant 0 : index
    %270 = vector.load %arg37[%c0_141, %c0_142, %c0_143] : memref<3x32x128xbf16, #tpu.memory_space<vmem>>, vector<1x32x128xbf16>
    %271 = vector.shape_cast %270 : vector<1x32x128xbf16> to vector<32x128xbf16>
    %272 = arith.truncf %269 : vector<9x32xf32> to vector<9x32xbf16>
    %cst_144 = arith.constant dense<0.000000e+00> : vector<9x128xf32>
    %273 = tpu.matmul %272, %271, %cst_144 {dimension_numbers = #tpu.dot_dimension_numbers<[1], [0], [0], [1], [0, 0, 1, 1], [], []>} : vector<9x32xbf16>, vector<32x128xbf16>, vector<9x128xf32> -> vector<9x128xf32>
    %c0_145 = arith.constant 0 : index
    %c0_146 = arith.constant 0 : index
    %c0_147 = arith.constant 0 : index
    %274 = vector.load %arg38[%c0_145, %c0_146, %c0_147] : memref<3x1x128xf32, #tpu.memory_space<vmem>>, vector<1x1x128xf32>
    %275 = vector.shape_cast %274 : vector<1x1x128xf32> to vector<1x128xf32>
    %276 = vector.broadcast %275 : vector<1x128xf32> to vector<9x128xf32>
    %277 = arith.addf %273, %276 : vector<9x128xf32>
    %cst_148 = arith.constant 0.000000e+00 : f32
    %278 = vector.broadcast %cst_148 : f32 to vector<9x128xf32>
    %279 = arith.cmpf ogt, %277, %278 : vector<9x128xf32>
    %cst_149 = arith.constant 0.00999999977 : f32
    %280 = vector.broadcast %cst_149 : f32 to vector<9x128xf32>
    %281 = arith.mulf %280, %277 : vector<9x128xf32>
    %282 = arith.select %279, %277, %281 : vector<9x128xi1>, vector<9x128xf32>
    %c0_150 = arith.constant 0 : index
    %c0_151 = arith.constant 0 : index
    %c0_152 = arith.constant 0 : index
    %283 = vector.load %arg39[%c0_150, %c0_151, %c0_152] : memref<3x128x32xbf16, #tpu.memory_space<vmem>>, vector<1x128x32xbf16>
    %284 = vector.shape_cast %283 : vector<1x128x32xbf16> to vector<128x32xbf16>
    %285 = arith.truncf %282 : vector<9x128xf32> to vector<9x128xbf16>
    %cst_153 = arith.constant dense<0.000000e+00> : vector<9x32xf32>
    %286 = tpu.matmul %285, %284, %cst_153 {dimension_numbers = #tpu.dot_dimension_numbers<[1], [0], [0], [1], [0, 0, 1, 1], [], []>} : vector<9x128xbf16>, vector<128x32xbf16>, vector<9x32xf32> -> vector<9x32xf32>
    %287 = arith.addf %241, %286 : vector<9x32xf32>
    %c0_154 = arith.constant 0 : index
    %c0_155 = arith.constant 0 : index
    %c0_156 = arith.constant 0 : index
    %288 = vector.load %arg40[%c0_154, %c0_155, %c0_156] : memref<3x1x32xf32, #tpu.memory_space<vmem>>, vector<1x1x32xf32>
    %289 = vector.shape_cast %288 : vector<1x1x32xf32> to vector<1x32xf32>
    %290 = vector.broadcast %289 : vector<1x32xf32> to vector<9x32xf32>
    %291 = arith.addf %287, %290 : vector<9x32xf32>
    %c1 = arith.constant 1 : index
    %c0_157 = arith.constant 0 : index
    %c0_158 = arith.constant 0 : index
    %292 = vector.load %arg41[%c1, %c0_157, %c0_158] : memref<3x32x64xbf16, #tpu.memory_space<vmem>>, vector<1x32x64xbf16>
    %293 = vector.shape_cast %292 : vector<1x32x64xbf16> to vector<32x64xbf16>
    %cst_159 = arith.constant dense<0.000000e+00> : vector<9x64xf32>
    %294 = tpu.matmul %111, %293, %cst_159 {dimension_numbers = #tpu.dot_dimension_numbers<[1], [0], [0], [1], [0, 0, 1, 1], [], []>} : vector<9x32xbf16>, vector<32x64xbf16>, vector<9x64xf32> -> vector<9x64xf32>
    %c1_160 = arith.constant 1 : index
    %c0_161 = arith.constant 0 : index
    %c0_162 = arith.constant 0 : index
    %295 = vector.load %arg42[%c1_160, %c0_161, %c0_162] : memref<3x1x64xf32, #tpu.memory_space<vmem>>, vector<1x1x64xf32>
    %296 = vector.shape_cast %295 : vector<1x1x64xf32> to vector<1x64xf32>
    %297 = vector.broadcast %296 : vector<1x64xf32> to vector<9x64xf32>
    %298 = arith.addf %294, %297 : vector<9x64xf32>
    %299 = vector.extract_strided_slice %298 {offsets = [0, 0], sizes = [9, 32], strides = [1, 1]} : vector<9x64xf32> to vector<9x32xf32>
    %300 = vector.extract_strided_slice %298 {offsets = [0, 32], sizes = [9, 32], strides = [1, 1]} : vector<9x64xf32> to vector<9x32xf32>
    %301 = arith.mulf %291, %291 : vector<9x32xf32>
    %302 = tpu.concatenate %291, %301 in 1 : vector<9x32xf32>, vector<9x32xf32> -> vector<9x64xf32>
    %303 = arith.truncf %302 : vector<9x64xf32> to vector<9x64xbf16>
    %cst_163 = arith.constant dense<0.000000e+00> : vector<2x64xf32>
    %304 = tpu.matmul %2, %303, %cst_163 {dimension_numbers = #tpu.dot_dimension_numbers<[0], [0], [1], [1], [0, 1, 1, 1], [], []>} : vector<9x2xbf16>, vector<9x64xbf16>, vector<2x64xf32> -> vector<2x64xf32>
    %305 = vector.extract_strided_slice %304 {offsets = [0, 0], sizes = [2, 32], strides = [1, 1]} : vector<2x64xf32> to vector<2x32xf32>
    %cst_164 = arith.constant dense<0.000000e+00> : vector<2xf32>
    %306 = vector.multi_reduction <add>, %305, %cst_164 [1] : vector<2x32xf32> to vector<2xf32>
    %307 = vector.shape_cast %306 : vector<2xf32> to vector<2x1xf32>
    %308 = arith.mulf %307, %4 : vector<2x1xf32>
    %309 = vector.extract_strided_slice %304 {offsets = [0, 32], sizes = [2, 32], strides = [1, 1]} : vector<2x64xf32> to vector<2x32xf32>
    %cst_165 = arith.constant dense<0.000000e+00> : vector<2xf32>
    %310 = vector.multi_reduction <add>, %309, %cst_165 [1] : vector<2x32xf32> to vector<2xf32>
    %311 = vector.shape_cast %310 : vector<2xf32> to vector<2x1xf32>
    %312 = arith.mulf %311, %4 : vector<2x1xf32>
    %313 = arith.mulf %308, %308 : vector<2x1xf32>
    %314 = arith.subf %312, %313 : vector<2x1xf32>
    %cst_166 = arith.constant 0.000000e+00 : f32
    %315 = vector.broadcast %cst_166 : f32 to vector<2x1xf32>
    %316 = arith.maximumf %314, %315 : vector<2x1xf32>
    %cst_167 = arith.constant 9.99999974E-6 : f32
    %317 = vector.broadcast %cst_167 : f32 to vector<2x1xf32>
    %318 = arith.addf %316, %317 : vector<2x1xf32>
    %319 = math.rsqrt %318 : vector<2x1xf32>
    %320 = tpu.concatenate %308, %319 in 1 : vector<2x1xf32>, vector<2x1xf32> -> vector<2x2xf32>
    %321 = arith.extf %2 : vector<9x2xbf16> to vector<9x2xf32>
    %cst_168 = arith.constant dense<0.000000e+00> : vector<9x2xf32>
    %322 = tpu.matmul %321, %320, %cst_168 {dimension_numbers = #tpu.dot_dimension_numbers<[1], [0], [0], [1], [0, 0, 1, 1], [], []>, precision = #tpu.contract_precision<fp32>} : vector<9x2xf32>, vector<2x2xf32>, vector<9x2xf32> -> vector<9x2xf32>
    %323 = vector.extract_strided_slice %322 {offsets = [0, 0], sizes = [9, 1], strides = [1, 1]} : vector<9x2xf32> to vector<9x1xf32>
    %324 = vector.broadcast %323 : vector<9x1xf32> to vector<9x32xf32>
    %325 = arith.subf %291, %324 : vector<9x32xf32>
    %326 = vector.extract_strided_slice %322 {offsets = [0, 1], sizes = [9, 1], strides = [1, 1]} : vector<9x2xf32> to vector<9x1xf32>
    %327 = vector.broadcast %326 : vector<9x1xf32> to vector<9x32xf32>
    %328 = arith.mulf %325, %327 : vector<9x32xf32>
    %329 = arith.truncf %328 : vector<9x32xf32> to vector<9x32xbf16>
    %cst_169 = arith.constant dense<0.000000e+00> : vector<35x32xf32>
    %330 = tpu.matmul %0, %329, %cst_169 {dimension_numbers = #tpu.dot_dimension_numbers<[1], [0], [0], [1], [0, 0, 1, 1], [], []>} : vector<35x9xbf16>, vector<9x32xbf16>, vector<35x32xf32> -> vector<35x32xf32>
    %331 = arith.addf %330, %107 : vector<35x32xf32>
    %cst_170 = arith.constant 0.000000e+00 : f32
    %332 = vector.broadcast %cst_170 : f32 to vector<35x32xf32>
    %333 = arith.maximumf %331, %332 : vector<35x32xf32>
    %cst_171 = arith.constant 1.000000e-07 : f32
    %334 = vector.broadcast %cst_171 : f32 to vector<35x32xf32>
    %335 = arith.addf %333, %334 : vector<35x32xf32>
    %336 = arith.truncf %335 : vector<35x32xf32> to vector<35x32xbf16>
    %cst_172 = arith.constant dense<0.000000e+00> : vector<9x32xf32>
    %337 = tpu.matmul %1, %336, %cst_172 {dimension_numbers = #tpu.dot_dimension_numbers<[0], [0], [1], [1], [0, 1, 1, 1], [], []>} : vector<35x9xbf16>, vector<35x32xbf16>, vector<9x32xf32> -> vector<9x32xf32>
    %338 = arith.addf %337, %328 : vector<9x32xf32>
    %c1_173 = arith.constant 1 : index
    %c0_174 = arith.constant 0 : index
    %c0_175 = arith.constant 0 : index
    %339 = vector.load %arg30[%c1_173, %c0_174, %c0_175] : memref<3x32x32xbf16, #tpu.memory_space<vmem>>, vector<1x32x32xbf16>
    %340 = vector.shape_cast %339 : vector<1x32x32xbf16> to vector<32x32xbf16>
    %341 = arith.truncf %338 : vector<9x32xf32> to vector<9x32xbf16>
    %cst_176 = arith.constant dense<0.000000e+00> : vector<9x32xf32>
    %342 = tpu.matmul %341, %340, %cst_176 {dimension_numbers = #tpu.dot_dimension_numbers<[1], [0], [0], [1], [0, 0, 1, 1], [], []>} : vector<9x32xbf16>, vector<32x32xbf16>, vector<9x32xf32> -> vector<9x32xf32>
    %c1_177 = arith.constant 1 : index
    %c0_178 = arith.constant 0 : index
    %c0_179 = arith.constant 0 : index
    %343 = vector.load %arg31[%c1_177, %c0_178, %c0_179] : memref<3x1x32xf32, #tpu.memory_space<vmem>>, vector<1x1x32xf32>
    %344 = vector.shape_cast %343 : vector<1x1x32xf32> to vector<1x32xf32>
    %345 = vector.broadcast %344 : vector<1x32xf32> to vector<9x32xf32>
    %346 = arith.addf %342, %345 : vector<9x32xf32>
    %347 = tpu.concatenate %328, %346 in 1 : vector<9x32xf32>, vector<9x32xf32> -> vector<9x64xf32>
    %c1_180 = arith.constant 1 : index
    %c0_181 = arith.constant 0 : index
    %c0_182 = arith.constant 0 : index
    %348 = vector.load %arg32[%c1_180, %c0_181, %c0_182] : memref<3x64x256xbf16, #tpu.memory_space<vmem>>, vector<1x64x256xbf16>
    %349 = vector.shape_cast %348 : vector<1x64x256xbf16> to vector<64x256xbf16>
    %350 = arith.truncf %347 : vector<9x64xf32> to vector<9x64xbf16>
    %cst_183 = arith.constant dense<0.000000e+00> : vector<9x256xf32>
    %351 = tpu.matmul %350, %349, %cst_183 {dimension_numbers = #tpu.dot_dimension_numbers<[1], [0], [0], [1], [0, 0, 1, 1], [], []>} : vector<9x64xbf16>, vector<64x256xbf16>, vector<9x256xf32> -> vector<9x256xf32>
    %c1_184 = arith.constant 1 : index
    %c0_185 = arith.constant 0 : index
    %c0_186 = arith.constant 0 : index
    %352 = vector.load %arg33[%c1_184, %c0_185, %c0_186] : memref<3x1x256xf32, #tpu.memory_space<vmem>>, vector<1x1x256xf32>
    %353 = vector.shape_cast %352 : vector<1x1x256xf32> to vector<1x256xf32>
    %354 = vector.broadcast %353 : vector<1x256xf32> to vector<9x256xf32>
    %355 = arith.addf %351, %354 : vector<9x256xf32>
    %356 = vector.extract_strided_slice %355 {offsets = [0, 0], sizes = [9, 64], strides = [1, 1]} : vector<9x256xf32> to vector<9x64xf32>
    %357 = vector.extract_strided_slice %355 {offsets = [0, 64], sizes = [9, 64], strides = [1, 1]} : vector<9x256xf32> to vector<9x64xf32>
    %358 = vector.extract_strided_slice %355 {offsets = [0, 128], sizes = [9, 64], strides = [1, 1]} : vector<9x256xf32> to vector<9x64xf32>
    %359 = vector.extract_strided_slice %355 {offsets = [0, 192], sizes = [9, 64], strides = [1, 1]} : vector<9x256xf32> to vector<9x64xf32>
    %c1_187 = arith.constant 1 : index
    %c0_188 = arith.constant 0 : index
    %c0_189 = arith.constant 0 : index
    %360 = vector.load %arg34[%c1_187, %c0_188, %c0_189] : memref<3x32x64xbf16, #tpu.memory_space<vmem>>, vector<1x32x64xbf16>
    %361 = vector.shape_cast %360 : vector<1x32x64xbf16> to vector<32x64xbf16>
    %cst_190 = arith.constant dense<0.000000e+00> : vector<35x64xf32>
    %362 = tpu.matmul %108, %361, %cst_190 {dimension_numbers = #tpu.dot_dimension_numbers<[1], [0], [0], [1], [0, 0, 1, 1], [], []>} : vector<35x32xbf16>, vector<32x64xbf16>, vector<35x64xf32> -> vector<35x64xf32>
    %363 = arith.truncf %357 : vector<9x64xf32> to vector<9x64xbf16>
    %cst_191 = arith.constant dense<0.000000e+00> : vector<35x64xf32>
    %364 = tpu.matmul %0, %363, %cst_191 {dimension_numbers = #tpu.dot_dimension_numbers<[1], [0], [0], [1], [0, 0, 1, 1], [], []>} : vector<35x9xbf16>, vector<9x64xbf16>, vector<35x64xf32> -> vector<35x64xf32>
    %365 = arith.addf %364, %362 : vector<35x64xf32>
    %366 = arith.truncf %358 : vector<9x64xf32> to vector<9x64xbf16>
    %cst_192 = arith.constant dense<0.000000e+00> : vector<35x64xf32>
    %367 = tpu.matmul %0, %366, %cst_192 {dimension_numbers = #tpu.dot_dimension_numbers<[1], [0], [0], [1], [0, 0, 1, 1], [], []>} : vector<35x9xbf16>, vector<9x64xbf16>, vector<35x64xf32> -> vector<35x64xf32>
    %368 = arith.addf %367, %362 : vector<35x64xf32>
    %369 = arith.truncf %356 : vector<9x64xf32> to vector<9x64xbf16>
    %cst_193 = arith.constant dense<0.000000e+00> : vector<35x64xf32>
    %370 = tpu.matmul %1, %369, %cst_193 {dimension_numbers = #tpu.dot_dimension_numbers<[1], [0], [0], [1], [0, 0, 1, 1], [], []>} : vector<35x9xbf16>, vector<9x64xbf16>, vector<35x64xf32> -> vector<35x64xf32>
    %371 = arith.mulf %370, %365 : vector<35x64xf32>
    %372 = arith.truncf %371 : vector<35x64xf32> to vector<35x64xbf16>
    %cst_194 = arith.constant dense<0.000000e+00> : vector<35x2xf32>
    %373 = tpu.matmul %372, %7, %cst_194 {dimension_numbers = #tpu.dot_dimension_numbers<[1], [0], [0], [1], [0, 0, 1, 1], [], []>} : vector<35x64xbf16>, vector<64x2xbf16>, vector<35x2xf32> -> vector<35x2xf32>
    %cst_195 = arith.constant 0.176776692 : f32
    %374 = vector.broadcast %cst_195 : f32 to vector<35x2xf32>
    %375 = arith.mulf %373, %374 : vector<35x2xf32>
    %cst_196 = arith.constant dense<0x7F800000> : vector<2xf32>
    %376 = vector.multi_reduction <minimumf>, %375, %cst_196 [0] : vector<35x2xf32> to vector<2xf32>
    %377 = vector.shape_cast %376 : vector<2xf32> to vector<1x2xf32>
    %378 = vector.broadcast %377 : vector<1x2xf32> to vector<35x2xf32>
    %379 = arith.subf %375, %378 : vector<35x2xf32>
    %380 = vector.extract_strided_slice %379 {offsets = [0, 0], sizes = [35, 1], strides = [1, 1]} : vector<35x2xf32> to vector<35x1xf32>
    %381 = arith.extf %1 : vector<35x9xbf16> to vector<35x9xf32>
    %382 = vector.broadcast %380 : vector<35x1xf32> to vector<35x9xf32>
    %383 = arith.mulf %381, %382 : vector<35x9xf32>
    %cst_197 = arith.constant dense<0xFF800000> : vector<9xf32>
    %384 = vector.multi_reduction <maximumf>, %383, %cst_197 [0] : vector<35x9xf32> to vector<9xf32>
    %385 = vector.shape_cast %384 : vector<9xf32> to vector<1x9xf32>
    %386 = vector.extract_strided_slice %379 {offsets = [0, 1], sizes = [35, 1], strides = [1, 1]} : vector<35x2xf32> to vector<35x1xf32>
    %387 = arith.extf %1 : vector<35x9xbf16> to vector<35x9xf32>
    %388 = vector.broadcast %386 : vector<35x1xf32> to vector<35x9xf32>
    %389 = arith.mulf %387, %388 : vector<35x9xf32>
    %cst_198 = arith.constant dense<0xFF800000> : vector<9xf32>
    %390 = vector.multi_reduction <maximumf>, %389, %cst_198 [0] : vector<35x9xf32> to vector<9xf32>
    %391 = vector.shape_cast %390 : vector<9xf32> to vector<1x9xf32>
    %392 = tpu.concatenate %385, %391 in 0 : vector<1x9xf32>, vector<1x9xf32> -> vector<2x9xf32>
    %393 = arith.truncf %392 : vector<2x9xf32> to vector<2x9xbf16>
    %cst_199 = arith.constant dense<0.000000e+00> : vector<35x2xf32>
    %394 = tpu.matmul %1, %393, %cst_199 {dimension_numbers = #tpu.dot_dimension_numbers<[1], [1], [0], [0], [0, 0, 1, 0], [], []>} : vector<35x9xbf16>, vector<2x9xbf16>, vector<35x2xf32> -> vector<35x2xf32>
    %395 = arith.subf %379, %394 : vector<35x2xf32>
    %396 = math.exp %395 : vector<35x2xf32>
    %397 = arith.truncf %396 : vector<35x2xf32> to vector<35x2xbf16>
    %cst_200 = arith.constant dense<0.000000e+00> : vector<9x2xf32>
    %398 = tpu.matmul %1, %397, %cst_200 {dimension_numbers = #tpu.dot_dimension_numbers<[0], [0], [1], [1], [0, 1, 1, 1], [], []>} : vector<35x9xbf16>, vector<35x2xbf16>, vector<9x2xf32> -> vector<9x2xf32>
    %399 = arith.truncf %398 : vector<9x2xf32> to vector<9x2xbf16>
    %cst_201 = arith.constant dense<0.000000e+00> : vector<35x2xf32>
    %400 = tpu.matmul %1, %399, %cst_201 {dimension_numbers = #tpu.dot_dimension_numbers<[1], [0], [0], [1], [0, 0, 1, 1], [], []>} : vector<35x9xbf16>, vector<9x2xbf16>, vector<35x2xf32> -> vector<35x2xf32>
    %cst_202 = arith.constant 1.000000e-16 : f32
    %401 = vector.broadcast %cst_202 : f32 to vector<35x2xf32>
    %402 = arith.addf %400, %401 : vector<35x2xf32>
    %403 = tpu.reciprocal %402 {approx = true} : vector<35x2xf32> -> vector<35x2xf32>
    %404 = arith.mulf %396, %403 : vector<35x2xf32>
    %405 = arith.truncf %404 : vector<35x2xf32> to vector<35x2xbf16>
    %cst_203 = arith.constant dense<0.000000e+00> : vector<35x64xf32>
    %406 = tpu.matmul %405, %6, %cst_203 {dimension_numbers = #tpu.dot_dimension_numbers<[1], [0], [0], [1], [0, 0, 1, 1], [], []>} : vector<35x2xbf16>, vector<2x64xbf16>, vector<35x64xf32> -> vector<35x64xf32>
    %407 = arith.mulf %368, %406 : vector<35x64xf32>
    %408 = arith.truncf %407 : vector<35x64xf32> to vector<35x64xbf16>
    %cst_204 = arith.constant dense<0.000000e+00> : vector<9x64xf32>
    %409 = tpu.matmul %1, %408, %cst_204 {dimension_numbers = #tpu.dot_dimension_numbers<[0], [0], [1], [1], [0, 1, 1, 1], [], []>} : vector<35x9xbf16>, vector<35x64xbf16>, vector<9x64xf32> -> vector<9x64xf32>
    %410 = arith.addf %409, %359 : vector<9x64xf32>
    %c1_205 = arith.constant 1 : index
    %c0_206 = arith.constant 0 : index
    %c0_207 = arith.constant 0 : index
    %411 = vector.load %arg35[%c1_205, %c0_206, %c0_207] : memref<3x64x32xbf16, #tpu.memory_space<vmem>>, vector<1x64x32xbf16>
    %412 = vector.shape_cast %411 : vector<1x64x32xbf16> to vector<64x32xbf16>
    %413 = arith.truncf %410 : vector<9x64xf32> to vector<9x64xbf16>
    %cst_208 = arith.constant dense<0.000000e+00> : vector<9x32xf32>
    %414 = tpu.matmul %413, %412, %cst_208 {dimension_numbers = #tpu.dot_dimension_numbers<[1], [0], [0], [1], [0, 0, 1, 1], [], []>} : vector<9x64xbf16>, vector<64x32xbf16>, vector<9x32xf32> -> vector<9x32xf32>
    %c1_209 = arith.constant 1 : index
    %c0_210 = arith.constant 0 : index
    %c0_211 = arith.constant 0 : index
    %415 = vector.load %arg36[%c1_209, %c0_210, %c0_211] : memref<3x1x32xf32, #tpu.memory_space<vmem>>, vector<1x1x32xf32>
    %416 = vector.shape_cast %415 : vector<1x1x32xf32> to vector<1x32xf32>
    %417 = vector.broadcast %416 : vector<1x32xf32> to vector<9x32xf32>
    %418 = arith.addf %414, %417 : vector<9x32xf32>
    %419 = arith.mulf %418, %299 : vector<9x32xf32>
    %420 = arith.addf %291, %419 : vector<9x32xf32>
    %421 = arith.addf %420, %300 : vector<9x32xf32>
    %422 = arith.mulf %421, %421 : vector<9x32xf32>
    %423 = tpu.concatenate %421, %422 in 1 : vector<9x32xf32>, vector<9x32xf32> -> vector<9x64xf32>
    %424 = arith.truncf %423 : vector<9x64xf32> to vector<9x64xbf16>
    %cst_212 = arith.constant dense<0.000000e+00> : vector<2x64xf32>
    %425 = tpu.matmul %2, %424, %cst_212 {dimension_numbers = #tpu.dot_dimension_numbers<[0], [0], [1], [1], [0, 1, 1, 1], [], []>} : vector<9x2xbf16>, vector<9x64xbf16>, vector<2x64xf32> -> vector<2x64xf32>
    %426 = vector.extract_strided_slice %425 {offsets = [0, 0], sizes = [2, 32], strides = [1, 1]} : vector<2x64xf32> to vector<2x32xf32>
    %cst_213 = arith.constant dense<0.000000e+00> : vector<2xf32>
    %427 = vector.multi_reduction <add>, %426, %cst_213 [1] : vector<2x32xf32> to vector<2xf32>
    %428 = vector.shape_cast %427 : vector<2xf32> to vector<2x1xf32>
    %429 = arith.mulf %428, %4 : vector<2x1xf32>
    %430 = vector.extract_strided_slice %425 {offsets = [0, 32], sizes = [2, 32], strides = [1, 1]} : vector<2x64xf32> to vector<2x32xf32>
    %cst_214 = arith.constant dense<0.000000e+00> : vector<2xf32>
    %431 = vector.multi_reduction <add>, %430, %cst_214 [1] : vector<2x32xf32> to vector<2xf32>
    %432 = vector.shape_cast %431 : vector<2xf32> to vector<2x1xf32>
    %433 = arith.mulf %432, %4 : vector<2x1xf32>
    %434 = arith.mulf %429, %429 : vector<2x1xf32>
    %435 = arith.subf %433, %434 : vector<2x1xf32>
    %cst_215 = arith.constant 0.000000e+00 : f32
    %436 = vector.broadcast %cst_215 : f32 to vector<2x1xf32>
    %437 = arith.maximumf %435, %436 : vector<2x1xf32>
    %cst_216 = arith.constant 9.99999974E-6 : f32
    %438 = vector.broadcast %cst_216 : f32 to vector<2x1xf32>
    %439 = arith.addf %437, %438 : vector<2x1xf32>
    %440 = math.rsqrt %439 : vector<2x1xf32>
    %441 = tpu.concatenate %429, %440 in 1 : vector<2x1xf32>, vector<2x1xf32> -> vector<2x2xf32>
    %442 = arith.extf %2 : vector<9x2xbf16> to vector<9x2xf32>
    %cst_217 = arith.constant dense<0.000000e+00> : vector<9x2xf32>
    %443 = tpu.matmul %442, %441, %cst_217 {dimension_numbers = #tpu.dot_dimension_numbers<[1], [0], [0], [1], [0, 0, 1, 1], [], []>, precision = #tpu.contract_precision<fp32>} : vector<9x2xf32>, vector<2x2xf32>, vector<9x2xf32> -> vector<9x2xf32>
    %444 = vector.extract_strided_slice %443 {offsets = [0, 0], sizes = [9, 1], strides = [1, 1]} : vector<9x2xf32> to vector<9x1xf32>
    %445 = vector.broadcast %444 : vector<9x1xf32> to vector<9x32xf32>
    %446 = arith.subf %421, %445 : vector<9x32xf32>
    %447 = vector.extract_strided_slice %443 {offsets = [0, 1], sizes = [9, 1], strides = [1, 1]} : vector<9x2xf32> to vector<9x1xf32>
    %448 = vector.broadcast %447 : vector<9x1xf32> to vector<9x32xf32>
    %449 = arith.mulf %446, %448 : vector<9x32xf32>
    %c1_218 = arith.constant 1 : index
    %c0_219 = arith.constant 0 : index
    %c0_220 = arith.constant 0 : index
    %450 = vector.load %arg37[%c1_218, %c0_219, %c0_220] : memref<3x32x128xbf16, #tpu.memory_space<vmem>>, vector<1x32x128xbf16>
    %451 = vector.shape_cast %450 : vector<1x32x128xbf16> to vector<32x128xbf16>
    %452 = arith.truncf %449 : vector<9x32xf32> to vector<9x32xbf16>
    %cst_221 = arith.constant dense<0.000000e+00> : vector<9x128xf32>
    %453 = tpu.matmul %452, %451, %cst_221 {dimension_numbers = #tpu.dot_dimension_numbers<[1], [0], [0], [1], [0, 0, 1, 1], [], []>} : vector<9x32xbf16>, vector<32x128xbf16>, vector<9x128xf32> -> vector<9x128xf32>
    %c1_222 = arith.constant 1 : index
    %c0_223 = arith.constant 0 : index
    %c0_224 = arith.constant 0 : index
    %454 = vector.load %arg38[%c1_222, %c0_223, %c0_224] : memref<3x1x128xf32, #tpu.memory_space<vmem>>, vector<1x1x128xf32>
    %455 = vector.shape_cast %454 : vector<1x1x128xf32> to vector<1x128xf32>
    %456 = vector.broadcast %455 : vector<1x128xf32> to vector<9x128xf32>
    %457 = arith.addf %453, %456 : vector<9x128xf32>
    %cst_225 = arith.constant 0.000000e+00 : f32
    %458 = vector.broadcast %cst_225 : f32 to vector<9x128xf32>
    %459 = arith.cmpf ogt, %457, %458 : vector<9x128xf32>
    %cst_226 = arith.constant 0.00999999977 : f32
    %460 = vector.broadcast %cst_226 : f32 to vector<9x128xf32>
    %461 = arith.mulf %460, %457 : vector<9x128xf32>
    %462 = arith.select %459, %457, %461 : vector<9x128xi1>, vector<9x128xf32>
    %c1_227 = arith.constant 1 : index
    %c0_228 = arith.constant 0 : index
    %c0_229 = arith.constant 0 : index
    %463 = vector.load %arg39[%c1_227, %c0_228, %c0_229] : memref<3x128x32xbf16, #tpu.memory_space<vmem>>, vector<1x128x32xbf16>
    %464 = vector.shape_cast %463 : vector<1x128x32xbf16> to vector<128x32xbf16>
    %465 = arith.truncf %462 : vector<9x128xf32> to vector<9x128xbf16>
    %cst_230 = arith.constant dense<0.000000e+00> : vector<9x32xf32>
    %466 = tpu.matmul %465, %464, %cst_230 {dimension_numbers = #tpu.dot_dimension_numbers<[1], [0], [0], [1], [0, 0, 1, 1], [], []>} : vector<9x128xbf16>, vector<128x32xbf16>, vector<9x32xf32> -> vector<9x32xf32>
    %467 = arith.addf %421, %466 : vector<9x32xf32>
    %c1_231 = arith.constant 1 : index
    %c0_232 = arith.constant 0 : index
    %c0_233 = arith.constant 0 : index
    %468 = vector.load %arg40[%c1_231, %c0_232, %c0_233] : memref<3x1x32xf32, #tpu.memory_space<vmem>>, vector<1x1x32xf32>
    %469 = vector.shape_cast %468 : vector<1x1x32xf32> to vector<1x32xf32>
    %470 = vector.broadcast %469 : vector<1x32xf32> to vector<9x32xf32>
    %471 = arith.addf %467, %470 : vector<9x32xf32>
    %c2 = arith.constant 2 : index
    %c0_234 = arith.constant 0 : index
    %c0_235 = arith.constant 0 : index
    %472 = vector.load %arg41[%c2, %c0_234, %c0_235] : memref<3x32x64xbf16, #tpu.memory_space<vmem>>, vector<1x32x64xbf16>
    %473 = vector.shape_cast %472 : vector<1x32x64xbf16> to vector<32x64xbf16>
    %cst_236 = arith.constant dense<0.000000e+00> : vector<9x64xf32>
    %474 = tpu.matmul %111, %473, %cst_236 {dimension_numbers = #tpu.dot_dimension_numbers<[1], [0], [0], [1], [0, 0, 1, 1], [], []>} : vector<9x32xbf16>, vector<32x64xbf16>, vector<9x64xf32> -> vector<9x64xf32>
    %c2_237 = arith.constant 2 : index
    %c0_238 = arith.constant 0 : index
    %c0_239 = arith.constant 0 : index
    %475 = vector.load %arg42[%c2_237, %c0_238, %c0_239] : memref<3x1x64xf32, #tpu.memory_space<vmem>>, vector<1x1x64xf32>
    %476 = vector.shape_cast %475 : vector<1x1x64xf32> to vector<1x64xf32>
    %477 = vector.broadcast %476 : vector<1x64xf32> to vector<9x64xf32>
    %478 = arith.addf %474, %477 : vector<9x64xf32>
    %479 = vector.extract_strided_slice %478 {offsets = [0, 0], sizes = [9, 32], strides = [1, 1]} : vector<9x64xf32> to vector<9x32xf32>
    %480 = vector.extract_strided_slice %478 {offsets = [0, 32], sizes = [9, 32], strides = [1, 1]} : vector<9x64xf32> to vector<9x32xf32>
    %481 = arith.mulf %471, %471 : vector<9x32xf32>
    %482 = tpu.concatenate %471, %481 in 1 : vector<9x32xf32>, vector<9x32xf32> -> vector<9x64xf32>
    %483 = arith.truncf %482 : vector<9x64xf32> to vector<9x64xbf16>
    %cst_240 = arith.constant dense<0.000000e+00> : vector<2x64xf32>
    %484 = tpu.matmul %2, %483, %cst_240 {dimension_numbers = #tpu.dot_dimension_numbers<[0], [0], [1], [1], [0, 1, 1, 1], [], []>} : vector<9x2xbf16>, vector<9x64xbf16>, vector<2x64xf32> -> vector<2x64xf32>
    %485 = vector.extract_strided_slice %484 {offsets = [0, 0], sizes = [2, 32], strides = [1, 1]} : vector<2x64xf32> to vector<2x32xf32>
    %cst_241 = arith.constant dense<0.000000e+00> : vector<2xf32>
    %486 = vector.multi_reduction <add>, %485, %cst_241 [1] : vector<2x32xf32> to vector<2xf32>
    %487 = vector.shape_cast %486 : vector<2xf32> to vector<2x1xf32>
    %488 = arith.mulf %487, %4 : vector<2x1xf32>
    %489 = vector.extract_strided_slice %484 {offsets = [0, 32], sizes = [2, 32], strides = [1, 1]} : vector<2x64xf32> to vector<2x32xf32>
    %cst_242 = arith.constant dense<0.000000e+00> : vector<2xf32>
    %490 = vector.multi_reduction <add>, %489, %cst_242 [1] : vector<2x32xf32> to vector<2xf32>
    %491 = vector.shape_cast %490 : vector<2xf32> to vector<2x1xf32>
    %492 = arith.mulf %491, %4 : vector<2x1xf32>
    %493 = arith.mulf %488, %488 : vector<2x1xf32>
    %494 = arith.subf %492, %493 : vector<2x1xf32>
    %cst_243 = arith.constant 0.000000e+00 : f32
    %495 = vector.broadcast %cst_243 : f32 to vector<2x1xf32>
    %496 = arith.maximumf %494, %495 : vector<2x1xf32>
    %cst_244 = arith.constant 9.99999974E-6 : f32
    %497 = vector.broadcast %cst_244 : f32 to vector<2x1xf32>
    %498 = arith.addf %496, %497 : vector<2x1xf32>
    %499 = math.rsqrt %498 : vector<2x1xf32>
    %500 = tpu.concatenate %488, %499 in 1 : vector<2x1xf32>, vector<2x1xf32> -> vector<2x2xf32>
    %501 = arith.extf %2 : vector<9x2xbf16> to vector<9x2xf32>
    %cst_245 = arith.constant dense<0.000000e+00> : vector<9x2xf32>
    %502 = tpu.matmul %501, %500, %cst_245 {dimension_numbers = #tpu.dot_dimension_numbers<[1], [0], [0], [1], [0, 0, 1, 1], [], []>, precision = #tpu.contract_precision<fp32>} : vector<9x2xf32>, vector<2x2xf32>, vector<9x2xf32> -> vector<9x2xf32>
    %503 = vector.extract_strided_slice %502 {offsets = [0, 0], sizes = [9, 1], strides = [1, 1]} : vector<9x2xf32> to vector<9x1xf32>
    %504 = vector.broadcast %503 : vector<9x1xf32> to vector<9x32xf32>
    %505 = arith.subf %471, %504 : vector<9x32xf32>
    %506 = vector.extract_strided_slice %502 {offsets = [0, 1], sizes = [9, 1], strides = [1, 1]} : vector<9x2xf32> to vector<9x1xf32>
    %507 = vector.broadcast %506 : vector<9x1xf32> to vector<9x32xf32>
    %508 = arith.mulf %505, %507 : vector<9x32xf32>
    %509 = arith.truncf %508 : vector<9x32xf32> to vector<9x32xbf16>
    %cst_246 = arith.constant dense<0.000000e+00> : vector<35x32xf32>
    %510 = tpu.matmul %0, %509, %cst_246 {dimension_numbers = #tpu.dot_dimension_numbers<[1], [0], [0], [1], [0, 0, 1, 1], [], []>} : vector<35x9xbf16>, vector<9x32xbf16>, vector<35x32xf32> -> vector<35x32xf32>
    %511 = arith.addf %510, %107 : vector<35x32xf32>
    %cst_247 = arith.constant 0.000000e+00 : f32
    %512 = vector.broadcast %cst_247 : f32 to vector<35x32xf32>
    %513 = arith.maximumf %511, %512 : vector<35x32xf32>
    %cst_248 = arith.constant 1.000000e-07 : f32
    %514 = vector.broadcast %cst_248 : f32 to vector<35x32xf32>
    %515 = arith.addf %513, %514 : vector<35x32xf32>
    %516 = arith.truncf %515 : vector<35x32xf32> to vector<35x32xbf16>
    %cst_249 = arith.constant dense<0.000000e+00> : vector<9x32xf32>
    %517 = tpu.matmul %1, %516, %cst_249 {dimension_numbers = #tpu.dot_dimension_numbers<[0], [0], [1], [1], [0, 1, 1, 1], [], []>} : vector<35x9xbf16>, vector<35x32xbf16>, vector<9x32xf32> -> vector<9x32xf32>
    %518 = arith.addf %517, %508 : vector<9x32xf32>
    %c2_250 = arith.constant 2 : index
    %c0_251 = arith.constant 0 : index
    %c0_252 = arith.constant 0 : index
    %519 = vector.load %arg30[%c2_250, %c0_251, %c0_252] : memref<3x32x32xbf16, #tpu.memory_space<vmem>>, vector<1x32x32xbf16>
    %520 = vector.shape_cast %519 : vector<1x32x32xbf16> to vector<32x32xbf16>
    %521 = arith.truncf %518 : vector<9x32xf32> to vector<9x32xbf16>
    %cst_253 = arith.constant dense<0.000000e+00> : vector<9x32xf32>
    %522 = tpu.matmul %521, %520, %cst_253 {dimension_numbers = #tpu.dot_dimension_numbers<[1], [0], [0], [1], [0, 0, 1, 1], [], []>} : vector<9x32xbf16>, vector<32x32xbf16>, vector<9x32xf32> -> vector<9x32xf32>
    %c2_254 = arith.constant 2 : index
    %c0_255 = arith.constant 0 : index
    %c0_256 = arith.constant 0 : index
    %523 = vector.load %arg31[%c2_254, %c0_255, %c0_256] : memref<3x1x32xf32, #tpu.memory_space<vmem>>, vector<1x1x32xf32>
    %524 = vector.shape_cast %523 : vector<1x1x32xf32> to vector<1x32xf32>
    %525 = vector.broadcast %524 : vector<1x32xf32> to vector<9x32xf32>
    %526 = arith.addf %522, %525 : vector<9x32xf32>
    %527 = tpu.concatenate %508, %526 in 1 : vector<9x32xf32>, vector<9x32xf32> -> vector<9x64xf32>
    %c2_257 = arith.constant 2 : index
    %c0_258 = arith.constant 0 : index
    %c0_259 = arith.constant 0 : index
    %528 = vector.load %arg32[%c2_257, %c0_258, %c0_259] : memref<3x64x256xbf16, #tpu.memory_space<vmem>>, vector<1x64x256xbf16>
    %529 = vector.shape_cast %528 : vector<1x64x256xbf16> to vector<64x256xbf16>
    %530 = arith.truncf %527 : vector<9x64xf32> to vector<9x64xbf16>
    %cst_260 = arith.constant dense<0.000000e+00> : vector<9x256xf32>
    %531 = tpu.matmul %530, %529, %cst_260 {dimension_numbers = #tpu.dot_dimension_numbers<[1], [0], [0], [1], [0, 0, 1, 1], [], []>} : vector<9x64xbf16>, vector<64x256xbf16>, vector<9x256xf32> -> vector<9x256xf32>
    %c2_261 = arith.constant 2 : index
    %c0_262 = arith.constant 0 : index
    %c0_263 = arith.constant 0 : index
    %532 = vector.load %arg33[%c2_261, %c0_262, %c0_263] : memref<3x1x256xf32, #tpu.memory_space<vmem>>, vector<1x1x256xf32>
    %533 = vector.shape_cast %532 : vector<1x1x256xf32> to vector<1x256xf32>
    %534 = vector.broadcast %533 : vector<1x256xf32> to vector<9x256xf32>
    %535 = arith.addf %531, %534 : vector<9x256xf32>
    %536 = vector.extract_strided_slice %535 {offsets = [0, 0], sizes = [9, 64], strides = [1, 1]} : vector<9x256xf32> to vector<9x64xf32>
    %537 = vector.extract_strided_slice %535 {offsets = [0, 64], sizes = [9, 64], strides = [1, 1]} : vector<9x256xf32> to vector<9x64xf32>
    %538 = vector.extract_strided_slice %535 {offsets = [0, 128], sizes = [9, 64], strides = [1, 1]} : vector<9x256xf32> to vector<9x64xf32>
    %539 = vector.extract_strided_slice %535 {offsets = [0, 192], sizes = [9, 64], strides = [1, 1]} : vector<9x256xf32> to vector<9x64xf32>
    %c2_264 = arith.constant 2 : index
    %c0_265 = arith.constant 0 : index
    %c0_266 = arith.constant 0 : index
    %540 = vector.load %arg34[%c2_264, %c0_265, %c0_266] : memref<3x32x64xbf16, #tpu.memory_space<vmem>>, vector<1x32x64xbf16>
    %541 = vector.shape_cast %540 : vector<1x32x64xbf16> to vector<32x64xbf16>
    %cst_267 = arith.constant dense<0.000000e+00> : vector<35x64xf32>
    %542 = tpu.matmul %108, %541, %cst_267 {dimension_numbers = #tpu.dot_dimension_numbers<[1], [0], [0], [1], [0, 0, 1, 1], [], []>} : vector<35x32xbf16>, vector<32x64xbf16>, vector<35x64xf32> -> vector<35x64xf32>
    %543 = arith.truncf %537 : vector<9x64xf32> to vector<9x64xbf16>
    %cst_268 = arith.constant dense<0.000000e+00> : vector<35x64xf32>
    %544 = tpu.matmul %0, %543, %cst_268 {dimension_numbers = #tpu.dot_dimension_numbers<[1], [0], [0], [1], [0, 0, 1, 1], [], []>} : vector<35x9xbf16>, vector<9x64xbf16>, vector<35x64xf32> -> vector<35x64xf32>
    %545 = arith.addf %544, %542 : vector<35x64xf32>
    %546 = arith.truncf %538 : vector<9x64xf32> to vector<9x64xbf16>
    %cst_269 = arith.constant dense<0.000000e+00> : vector<35x64xf32>
    %547 = tpu.matmul %0, %546, %cst_269 {dimension_numbers = #tpu.dot_dimension_numbers<[1], [0], [0], [1], [0, 0, 1, 1], [], []>} : vector<35x9xbf16>, vector<9x64xbf16>, vector<35x64xf32> -> vector<35x64xf32>
    %548 = arith.addf %547, %542 : vector<35x64xf32>
    %549 = arith.truncf %536 : vector<9x64xf32> to vector<9x64xbf16>
    %cst_270 = arith.constant dense<0.000000e+00> : vector<35x64xf32>
    %550 = tpu.matmul %1, %549, %cst_270 {dimension_numbers = #tpu.dot_dimension_numbers<[1], [0], [0], [1], [0, 0, 1, 1], [], []>} : vector<35x9xbf16>, vector<9x64xbf16>, vector<35x64xf32> -> vector<35x64xf32>
    %551 = arith.mulf %550, %545 : vector<35x64xf32>
    %552 = arith.truncf %551 : vector<35x64xf32> to vector<35x64xbf16>
    %cst_271 = arith.constant dense<0.000000e+00> : vector<35x2xf32>
    %553 = tpu.matmul %552, %7, %cst_271 {dimension_numbers = #tpu.dot_dimension_numbers<[1], [0], [0], [1], [0, 0, 1, 1], [], []>} : vector<35x64xbf16>, vector<64x2xbf16>, vector<35x2xf32> -> vector<35x2xf32>
    %cst_272 = arith.constant 0.176776692 : f32
    %554 = vector.broadcast %cst_272 : f32 to vector<35x2xf32>
    %555 = arith.mulf %553, %554 : vector<35x2xf32>
    %cst_273 = arith.constant dense<0x7F800000> : vector<2xf32>
    %556 = vector.multi_reduction <minimumf>, %555, %cst_273 [0] : vector<35x2xf32> to vector<2xf32>
    %557 = vector.shape_cast %556 : vector<2xf32> to vector<1x2xf32>
    %558 = vector.broadcast %557 : vector<1x2xf32> to vector<35x2xf32>
    %559 = arith.subf %555, %558 : vector<35x2xf32>
    %560 = vector.extract_strided_slice %559 {offsets = [0, 0], sizes = [35, 1], strides = [1, 1]} : vector<35x2xf32> to vector<35x1xf32>
    %561 = arith.extf %1 : vector<35x9xbf16> to vector<35x9xf32>
    %562 = vector.broadcast %560 : vector<35x1xf32> to vector<35x9xf32>
    %563 = arith.mulf %561, %562 : vector<35x9xf32>
    %cst_274 = arith.constant dense<0xFF800000> : vector<9xf32>
    %564 = vector.multi_reduction <maximumf>, %563, %cst_274 [0] : vector<35x9xf32> to vector<9xf32>
    %565 = vector.shape_cast %564 : vector<9xf32> to vector<1x9xf32>
    %566 = vector.extract_strided_slice %559 {offsets = [0, 1], sizes = [35, 1], strides = [1, 1]} : vector<35x2xf32> to vector<35x1xf32>
    %567 = arith.extf %1 : vector<35x9xbf16> to vector<35x9xf32>
    %568 = vector.broadcast %566 : vector<35x1xf32> to vector<35x9xf32>
    %569 = arith.mulf %567, %568 : vector<35x9xf32>
    %cst_275 = arith.constant dense<0xFF800000> : vector<9xf32>
    %570 = vector.multi_reduction <maximumf>, %569, %cst_275 [0] : vector<35x9xf32> to vector<9xf32>
    %571 = vector.shape_cast %570 : vector<9xf32> to vector<1x9xf32>
    %572 = tpu.concatenate %565, %571 in 0 : vector<1x9xf32>, vector<1x9xf32> -> vector<2x9xf32>
    %573 = arith.truncf %572 : vector<2x9xf32> to vector<2x9xbf16>
    %cst_276 = arith.constant dense<0.000000e+00> : vector<35x2xf32>
    %574 = tpu.matmul %1, %573, %cst_276 {dimension_numbers = #tpu.dot_dimension_numbers<[1], [1], [0], [0], [0, 0, 1, 0], [], []>} : vector<35x9xbf16>, vector<2x9xbf16>, vector<35x2xf32> -> vector<35x2xf32>
    %575 = arith.subf %559, %574 : vector<35x2xf32>
    %576 = math.exp %575 : vector<35x2xf32>
    %577 = arith.truncf %576 : vector<35x2xf32> to vector<35x2xbf16>
    %cst_277 = arith.constant dense<0.000000e+00> : vector<9x2xf32>
    %578 = tpu.matmul %1, %577, %cst_277 {dimension_numbers = #tpu.dot_dimension_numbers<[0], [0], [1], [1], [0, 1, 1, 1], [], []>} : vector<35x9xbf16>, vector<35x2xbf16>, vector<9x2xf32> -> vector<9x2xf32>
    %579 = arith.truncf %578 : vector<9x2xf32> to vector<9x2xbf16>
    %cst_278 = arith.constant dense<0.000000e+00> : vector<35x2xf32>
    %580 = tpu.matmul %1, %579, %cst_278 {dimension_numbers = #tpu.dot_dimension_numbers<[1], [0], [0], [1], [0, 0, 1, 1], [], []>} : vector<35x9xbf16>, vector<9x2xbf16>, vector<35x2xf32> -> vector<35x2xf32>
    %cst_279 = arith.constant 1.000000e-16 : f32
    %581 = vector.broadcast %cst_279 : f32 to vector<35x2xf32>
    %582 = arith.addf %580, %581 : vector<35x2xf32>
    %583 = tpu.reciprocal %582 {approx = true} : vector<35x2xf32> -> vector<35x2xf32>
    %584 = arith.mulf %576, %583 : vector<35x2xf32>
    %585 = arith.truncf %584 : vector<35x2xf32> to vector<35x2xbf16>
    %cst_280 = arith.constant dense<0.000000e+00> : vector<35x64xf32>
    %586 = tpu.matmul %585, %6, %cst_280 {dimension_numbers = #tpu.dot_dimension_numbers<[1], [0], [0], [1], [0, 0, 1, 1], [], []>} : vector<35x2xbf16>, vector<2x64xbf16>, vector<35x64xf32> -> vector<35x64xf32>
    %587 = arith.mulf %548, %586 : vector<35x64xf32>
    %588 = arith.truncf %587 : vector<35x64xf32> to vector<35x64xbf16>
    %cst_281 = arith.constant dense<0.000000e+00> : vector<9x64xf32>
    %589 = tpu.matmul %1, %588, %cst_281 {dimension_numbers = #tpu.dot_dimension_numbers<[0], [0], [1], [1], [0, 1, 1, 1], [], []>} : vector<35x9xbf16>, vector<35x64xbf16>, vector<9x64xf32> -> vector<9x64xf32>
    %590 = arith.addf %589, %539 : vector<9x64xf32>
    %c2_282 = arith.constant 2 : index
    %c0_283 = arith.constant 0 : index
    %c0_284 = arith.constant 0 : index
    %591 = vector.load %arg35[%c2_282, %c0_283, %c0_284] : memref<3x64x32xbf16, #tpu.memory_space<vmem>>, vector<1x64x32xbf16>
    %592 = vector.shape_cast %591 : vector<1x64x32xbf16> to vector<64x32xbf16>
    %593 = arith.truncf %590 : vector<9x64xf32> to vector<9x64xbf16>
    %cst_285 = arith.constant dense<0.000000e+00> : vector<9x32xf32>
    %594 = tpu.matmul %593, %592, %cst_285 {dimension_numbers = #tpu.dot_dimension_numbers<[1], [0], [0], [1], [0, 0, 1, 1], [], []>} : vector<9x64xbf16>, vector<64x32xbf16>, vector<9x32xf32> -> vector<9x32xf32>
    %c2_286 = arith.constant 2 : index
    %c0_287 = arith.constant 0 : index
    %c0_288 = arith.constant 0 : index
    %595 = vector.load %arg36[%c2_286, %c0_287, %c0_288] : memref<3x1x32xf32, #tpu.memory_space<vmem>>, vector<1x1x32xf32>
    %596 = vector.shape_cast %595 : vector<1x1x32xf32> to vector<1x32xf32>
    %597 = vector.broadcast %596 : vector<1x32xf32> to vector<9x32xf32>
    %598 = arith.addf %594, %597 : vector<9x32xf32>
    %599 = arith.mulf %598, %479 : vector<9x32xf32>
    %600 = arith.addf %471, %599 : vector<9x32xf32>
    %601 = arith.addf %600, %480 : vector<9x32xf32>
    %602 = arith.mulf %601, %601 : vector<9x32xf32>
    %603 = tpu.concatenate %601, %602 in 1 : vector<9x32xf32>, vector<9x32xf32> -> vector<9x64xf32>
    %604 = arith.truncf %603 : vector<9x64xf32> to vector<9x64xbf16>
    %cst_289 = arith.constant dense<0.000000e+00> : vector<2x64xf32>
    %605 = tpu.matmul %2, %604, %cst_289 {dimension_numbers = #tpu.dot_dimension_numbers<[0], [0], [1], [1], [0, 1, 1, 1], [], []>} : vector<9x2xbf16>, vector<9x64xbf16>, vector<2x64xf32> -> vector<2x64xf32>
    %606 = vector.extract_strided_slice %605 {offsets = [0, 0], sizes = [2, 32], strides = [1, 1]} : vector<2x64xf32> to vector<2x32xf32>
    %cst_290 = arith.constant dense<0.000000e+00> : vector<2xf32>
    %607 = vector.multi_reduction <add>, %606, %cst_290 [1] : vector<2x32xf32> to vector<2xf32>
    %608 = vector.shape_cast %607 : vector<2xf32> to vector<2x1xf32>
    %609 = arith.mulf %608, %4 : vector<2x1xf32>
    %610 = vector.extract_strided_slice %605 {offsets = [0, 32], sizes = [2, 32], strides = [1, 1]} : vector<2x64xf32> to vector<2x32xf32>
    %cst_291 = arith.constant dense<0.000000e+00> : vector<2xf32>
    %611 = vector.multi_reduction <add>, %610, %cst_291 [1] : vector<2x32xf32> to vector<2xf32>
    %612 = vector.shape_cast %611 : vector<2xf32> to vector<2x1xf32>
    %613 = arith.mulf %612, %4 : vector<2x1xf32>
    %614 = arith.mulf %609, %609 : vector<2x1xf32>
    %615 = arith.subf %613, %614 : vector<2x1xf32>
    %cst_292 = arith.constant 0.000000e+00 : f32
    %616 = vector.broadcast %cst_292 : f32 to vector<2x1xf32>
    %617 = arith.maximumf %615, %616 : vector<2x1xf32>
    %cst_293 = arith.constant 9.99999974E-6 : f32
    %618 = vector.broadcast %cst_293 : f32 to vector<2x1xf32>
    %619 = arith.addf %617, %618 : vector<2x1xf32>
    %620 = math.rsqrt %619 : vector<2x1xf32>
    %621 = tpu.concatenate %609, %620 in 1 : vector<2x1xf32>, vector<2x1xf32> -> vector<2x2xf32>
    %622 = arith.extf %2 : vector<9x2xbf16> to vector<9x2xf32>
    %cst_294 = arith.constant dense<0.000000e+00> : vector<9x2xf32>
    %623 = tpu.matmul %622, %621, %cst_294 {dimension_numbers = #tpu.dot_dimension_numbers<[1], [0], [0], [1], [0, 0, 1, 1], [], []>, precision = #tpu.contract_precision<fp32>} : vector<9x2xf32>, vector<2x2xf32>, vector<9x2xf32> -> vector<9x2xf32>
    %624 = vector.extract_strided_slice %623 {offsets = [0, 0], sizes = [9, 1], strides = [1, 1]} : vector<9x2xf32> to vector<9x1xf32>
    %625 = vector.broadcast %624 : vector<9x1xf32> to vector<9x32xf32>
    %626 = arith.subf %601, %625 : vector<9x32xf32>
    %627 = vector.extract_strided_slice %623 {offsets = [0, 1], sizes = [9, 1], strides = [1, 1]} : vector<9x2xf32> to vector<9x1xf32>
    %628 = vector.broadcast %627 : vector<9x1xf32> to vector<9x32xf32>
    %629 = arith.mulf %626, %628 : vector<9x32xf32>
    %c2_295 = arith.constant 2 : index
    %c0_296 = arith.constant 0 : index
    %c0_297 = arith.constant 0 : index
    %630 = vector.load %arg37[%c2_295, %c0_296, %c0_297] : memref<3x32x128xbf16, #tpu.memory_space<vmem>>, vector<1x32x128xbf16>
    %631 = vector.shape_cast %630 : vector<1x32x128xbf16> to vector<32x128xbf16>
    %632 = arith.truncf %629 : vector<9x32xf32> to vector<9x32xbf16>
    %cst_298 = arith.constant dense<0.000000e+00> : vector<9x128xf32>
    %633 = tpu.matmul %632, %631, %cst_298 {dimension_numbers = #tpu.dot_dimension_numbers<[1], [0], [0], [1], [0, 0, 1, 1], [], []>} : vector<9x32xbf16>, vector<32x128xbf16>, vector<9x128xf32> -> vector<9x128xf32>
    %c2_299 = arith.constant 2 : index
    %c0_300 = arith.constant 0 : index
    %c0_301 = arith.constant 0 : index
    %634 = vector.load %arg38[%c2_299, %c0_300, %c0_301] : memref<3x1x128xf32, #tpu.memory_space<vmem>>, vector<1x1x128xf32>
    %635 = vector.shape_cast %634 : vector<1x1x128xf32> to vector<1x128xf32>
    %636 = vector.broadcast %635 : vector<1x128xf32> to vector<9x128xf32>
    %637 = arith.addf %633, %636 : vector<9x128xf32>
    %cst_302 = arith.constant 0.000000e+00 : f32
    %638 = vector.broadcast %cst_302 : f32 to vector<9x128xf32>
    %639 = arith.cmpf ogt, %637, %638 : vector<9x128xf32>
    %cst_303 = arith.constant 0.00999999977 : f32
    %640 = vector.broadcast %cst_303 : f32 to vector<9x128xf32>
    %641 = arith.mulf %640, %637 : vector<9x128xf32>
    %642 = arith.select %639, %637, %641 : vector<9x128xi1>, vector<9x128xf32>
    %c2_304 = arith.constant 2 : index
    %c0_305 = arith.constant 0 : index
    %c0_306 = arith.constant 0 : index
    %643 = vector.load %arg39[%c2_304, %c0_305, %c0_306] : memref<3x128x32xbf16, #tpu.memory_space<vmem>>, vector<1x128x32xbf16>
    %644 = vector.shape_cast %643 : vector<1x128x32xbf16> to vector<128x32xbf16>
    %645 = arith.truncf %642 : vector<9x128xf32> to vector<9x128xbf16>
    %cst_307 = arith.constant dense<0.000000e+00> : vector<9x32xf32>
    %646 = tpu.matmul %645, %644, %cst_307 {dimension_numbers = #tpu.dot_dimension_numbers<[1], [0], [0], [1], [0, 0, 1, 1], [], []>} : vector<9x128xbf16>, vector<128x32xbf16>, vector<9x32xf32> -> vector<9x32xf32>
    %647 = arith.addf %601, %646 : vector<9x32xf32>
    %c2_308 = arith.constant 2 : index
    %c0_309 = arith.constant 0 : index
    %c0_310 = arith.constant 0 : index
    %648 = vector.load %arg40[%c2_308, %c0_309, %c0_310] : memref<3x1x32xf32, #tpu.memory_space<vmem>>, vector<1x1x32xf32>
    %649 = vector.shape_cast %648 : vector<1x1x32xf32> to vector<1x32xf32>
    %650 = vector.broadcast %649 : vector<1x32xf32> to vector<9x32xf32>
    %651 = arith.addf %647, %650 : vector<9x32xf32>
    %652 = vector.extract_strided_slice %2 {offsets = [0, 0], sizes = [7, 2], strides = [1, 1]} : vector<9x2xbf16> to vector<7x2xbf16>
    %653 = vector.extract_strided_slice %651 {offsets = [0, 0], sizes = [7, 32], strides = [1, 1]} : vector<9x32xf32> to vector<7x32xf32>
    %654 = arith.truncf %653 : vector<7x32xf32> to vector<7x32xbf16>
    %cst_311 = arith.constant dense<0.000000e+00> : vector<2x32xf32>
    %655 = tpu.matmul %652, %654, %cst_311 {dimension_numbers = #tpu.dot_dimension_numbers<[0], [0], [1], [1], [0, 1, 1, 1], [], []>} : vector<7x2xbf16>, vector<7x32xbf16>, vector<2x32xf32> -> vector<2x32xf32>
    %656 = vector.broadcast %5 : vector<2x1xf32> to vector<2x32xf32>
    %657 = arith.mulf %655, %656 : vector<2x32xf32>
    %658 = vector.extract_strided_slice %651 {offsets = [7, 0], sizes = [2, 32], strides = [1, 1]} : vector<9x32xf32> to vector<2x32xf32>
    %659 = tpu.concatenate %657, %658 in 1 : vector<2x32xf32>, vector<2x32xf32> -> vector<2x64xf32>
    %c0_312 = arith.constant 0 : index
    %c0_313 = arith.constant 0 : index
    %660 = vector.load %arg43[%c0_312, %c0_313] : memref<64x32xbf16, #tpu.memory_space<vmem>>, vector<64x32xbf16>
    %661 = arith.truncf %659 : vector<2x64xf32> to vector<2x64xbf16>
    %cst_314 = arith.constant dense<0.000000e+00> : vector<2x32xf32>
    %662 = tpu.matmul %661, %660, %cst_314 {dimension_numbers = #tpu.dot_dimension_numbers<[1], [0], [0], [1], [0, 0, 1, 1], [], []>} : vector<2x64xbf16>, vector<64x32xbf16>, vector<2x32xf32> -> vector<2x32xf32>
    %c0_315 = arith.constant 0 : index
    %c0_316 = arith.constant 0 : index
    %663 = vector.load %arg44[%c0_315, %c0_316] : memref<1x32xf32, #tpu.memory_space<vmem>>, vector<1x32xf32>
    %664 = vector.broadcast %663 : vector<1x32xf32> to vector<2x32xf32>
    %665 = arith.addf %662, %664 : vector<2x32xf32>
    %cst_317 = arith.constant 0.000000e+00 : f32
    %666 = vector.broadcast %cst_317 : f32 to vector<2x32xf32>
    %667 = arith.cmpf ogt, %665, %666 : vector<2x32xf32>
    %cst_318 = arith.constant 0.00999999977 : f32
    %668 = vector.broadcast %cst_318 : f32 to vector<2x32xf32>
    %669 = arith.mulf %668, %665 : vector<2x32xf32>
    %670 = arith.select %667, %665, %669 : vector<2x32xi1>, vector<2x32xf32>
    %c0_319 = arith.constant 0 : index
    %c0_320 = arith.constant 0 : index
    %671 = vector.load %arg45[%c0_319, %c0_320] : memref<32x32xbf16, #tpu.memory_space<vmem>>, vector<32x32xbf16>
    %672 = arith.truncf %670 : vector<2x32xf32> to vector<2x32xbf16>
    %cst_321 = arith.constant dense<0.000000e+00> : vector<2x32xf32>
    %673 = tpu.matmul %672, %671, %cst_321 {dimension_numbers = #tpu.dot_dimension_numbers<[1], [0], [0], [1], [0, 0, 1, 1], [], []>} : vector<2x32xbf16>, vector<32x32xbf16>, vector<2x32xf32> -> vector<2x32xf32>
    %c0_322 = arith.constant 0 : index
    %c0_323 = arith.constant 0 : index
    %674 = vector.load %arg46[%c0_322, %c0_323] : memref<1x32xf32, #tpu.memory_space<vmem>>, vector<1x32xf32>
    %675 = vector.broadcast %674 : vector<1x32xf32> to vector<2x32xf32>
    %676 = arith.addf %673, %675 : vector<2x32xf32>
    %c0_324 = arith.constant 0 : index
    %c0_325 = arith.constant 0 : index
    %677 = vector.load %arg47[%c0_324, %c0_325] : memref<2x32xf32, #tpu.memory_space<vmem>>, vector<2x32xf32>
    tpu.vector_store %arg47[%c0_324, %c0_325], %676 {strides = array<i32>} : memref<2x32xf32, #tpu.memory_space<vmem>>, vector<2x32xf32>,
    return
  }
  func.func @transform_0(%arg0: i32) -> (i32, i32) {
    %c0_i32 = arith.constant 0 : i32
    %c0_i32_0 = arith.constant 0 : i32
    %c0_i32_1 = arith.constant 0 : i32
    return %c0_i32, %c0_i32_0 : i32, i32
  }
  func.func @transform_1(%arg0: i32) -> (i32, i32) {
    %c0_i32 = arith.constant 0 : i32
    %c0_i32_0 = arith.constant 0 : i32
    %c0_i32_1 = arith.constant 0 : i32
    return %c0_i32, %c0_i32_0 : i32, i32
  }
  func.func @transform_2(%arg0: i32) -> (i32, i32) {
    %c0_i32 = arith.constant 0 : i32
    %c0_i32_0 = arith.constant 0 : i32
    %c0_i32_1 = arith.constant 0 : i32
    return %c0_i32, %c0_i32_0 : i32, i32
  }
  func.func @transform_3(%arg0: i32) -> (i32, i32) {
    %c0_i32 = arith.constant 0 : i32
    %c0_i32_0 = arith.constant 0 : i32
    %c0_i32_1 = arith.constant 0 : i32
    return %c0_i32, %c0_i32_0 : i32, i32
  }
  func.func @transform_4(%arg0: i32) -> (i32, i32) {
    %c0_i32 = arith.constant 0 : i32
    %c0_i32_0 = arith.constant 0 : i32
    %c0_i32_1 = arith.constant 0 : i32
    return %c0_i32, %c0_i32_0 : i32, i32
  }
  func.func @transform_5(%arg0: i32) -> (i32, i32) {
    %c0_i32 = arith.constant 0 : i32
    %c0_i32_0 = arith.constant 0 : i32
    %c0_i32_1 = arith.constant 0 : i32
    return %c0_i32, %c0_i32_0 : i32, i32
  }
  func.func @transform_6(%arg0: i32) -> (i32, i32) {
    %c0_i32 = arith.constant 0 : i32
    %c0_i32_0 = arith.constant 0 : i32
    %c0_i32_1 = arith.constant 0 : i32
    return %c0_i32, %c0_i32_0 : i32, i32
  }
  func.func @transform_7(%arg0: i32) -> (i32, i32) {
    %c0_i32 = arith.constant 0 : i32
    %c0_i32_0 = arith.constant 0 : i32
    %c0_i32_1 = arith.constant 0 : i32
    return %c0_i32, %c0_i32_0 : i32, i32
  }
  func.func @transform_8(%arg0: i32) -> (i32, i32) {
    %c0_i32 = arith.constant 0 : i32
    %c0_i32_0 = arith.constant 0 : i32
    %c0_i32_1 = arith.constant 0 : i32
    return %c0_i32, %c0_i32_0 : i32, i32
  }
  func.func @transform_9(%arg0: i32) -> (i32, i32) {
    %c0_i32 = arith.constant 0 : i32
    %c0_i32_0 = arith.constant 0 : i32
    %c0_i32_1 = arith.constant 0 : i32
    return %c0_i32, %c0_i32_0 : i32, i32
  }
  func.func @transform_10(%arg0: i32) -> (i32, i32) {
    %c0_i32 = arith.constant 0 : i32
    %c0_i32_0 = arith.constant 0 : i32
    %c0_i32_1 = arith.constant 0 : i32
    return %c0_i32, %c0_i32_0 : i32, i32
  }
  func.func @transform_11(%arg0: i32) -> (i32, i32) {
    %c0_i32 = arith.constant 0 : i32
    %c0_i32_0 = arith.constant 0 : i32
    %c0_i32_1 = arith.constant 0 : i32
    return %c0_i32, %c0_i32_0 : i32, i32
  }
  func.func @transform_12(%arg0: i32) -> (i32, i32) {
    %c0_i32 = arith.constant 0 : i32
    %c0_i32_0 = arith.constant 0 : i32
    %c0_i32_1 = arith.constant 0 : i32
    return %c0_i32, %c0_i32_0 : i32, i32
  }
  func.func @transform_13(%arg0: i32) -> (i32, i32) {
    %c0_i32 = arith.constant 0 : i32
    %c0_i32_0 = arith.constant 0 : i32
    %c0_i32_1 = arith.constant 0 : i32
    return %c0_i32, %c0_i32_0 : i32, i32
  }
  func.func @transform_14(%arg0: i32) -> (i32, i32) {
    %c0_i32 = arith.constant 0 : i32
    %c0_i32_0 = arith.constant 0 : i32
    %c0_i32_1 = arith.constant 0 : i32
    return %c0_i32, %c0_i32_0 : i32, i32
  }
  func.func @transform_15(%arg0: i32) -> (i32, i32) {
    %c0_i32 = arith.constant 0 : i32
    %c0_i32_0 = arith.constant 0 : i32
    %c0_i32_1 = arith.constant 0 : i32
    return %c0_i32, %c0_i32_0 : i32, i32
  }
  func.func @transform_16(%arg0: i32) -> (i32, i32) {
    %c0_i32 = arith.constant 0 : i32
    %c0_i32_0 = arith.constant 0 : i32
    %c0_i32_1 = arith.constant 0 : i32
    return %c0_i32, %c0_i32_0 : i32, i32
  }
  func.func @transform_17(%arg0: i32) -> (i32, i32) {
    %c0_i32 = arith.constant 0 : i32
    %c0_i32_0 = arith.constant 0 : i32
    %c0_i32_1 = arith.constant 0 : i32
    return %c0_i32, %c0_i32_0 : i32, i32
  }
  func.func @transform_18(%arg0: i32) -> (i32, i32) {
    %c0_i32 = arith.constant 0 : i32
    %c0_i32_0 = arith.constant 0 : i32
    %c0_i32_1 = arith.constant 0 : i32
    return %c0_i32, %c0_i32_0 : i32, i32
  }
  func.func @transform_19(%arg0: i32) -> (i32, i32) {
    %c0_i32 = arith.constant 0 : i32
    %c0_i32_0 = arith.constant 0 : i32
    %c0_i32_1 = arith.constant 0 : i32
    return %c0_i32, %c0_i32_0 : i32, i32
  }
  func.func @transform_20(%arg0: i32) -> (i32, i32) {
    %c0_i32 = arith.constant 0 : i32
    %c0_i32_0 = arith.constant 0 : i32
    %c0_i32_1 = arith.constant 0 : i32
    return %c0_i32, %c0_i32_0 : i32, i32
  }
  func.func @transform_21(%arg0: i32) -> (i32, i32) {
    %c0_i32 = arith.constant 0 : i32
    %c0_i32_0 = arith.constant 0 : i32
    %c0_i32_1 = arith.constant 0 : i32
    return %c0_i32, %c0_i32_0 : i32, i32
  }
  func.func @transform_22(%arg0: i32) -> (i32, i32) {
    %c0_i32 = arith.constant 0 : i32
    %c0_i32_0 = arith.constant 0 : i32
    %c0_i32_1 = arith.constant 0 : i32
    return %c0_i32, %c0_i32_0 : i32, i32
  }
  func.func @transform_23(%arg0: i32) -> (i32, i32) {
    %c0_i32 = arith.constant 0 : i32
    %c0_i32_0 = arith.constant 0 : i32
    %c0_i32_1 = arith.constant 0 : i32
    return %c0_i32, %c0_i32_0 : i32, i32
  }
  func.func @transform_24(%arg0: i32) -> (i32, i32) {
    %c0_i32 = arith.constant 0 : i32
    %c0_i32_0 = arith.constant 0 : i32
    %c0_i32_1 = arith.constant 0 : i32
    return %c0_i32, %c0_i32_0 : i32, i32
  }
  func.func @transform_25(%arg0: i32) -> (i32, i32) {
    %c0_i32 = arith.constant 0 : i32
    %c0_i32_0 = arith.constant 0 : i32
    %c0_i32_1 = arith.constant 0 : i32
    return %c0_i32, %c0_i32_0 : i32, i32
  }
  func.func @transform_26(%arg0: i32) -> (i32, i32) {
    %c0_i32 = arith.constant 0 : i32
    %c0_i32_0 = arith.constant 0 : i32
    %c0_i32_1 = arith.constant 0 : i32
    return %c0_i32, %c0_i32_0 : i32, i32
  }
  func.func @transform_27(%arg0: i32) -> (i32, i32) {
    %c0_i32 = arith.constant 0 : i32
    %c0_i32_0 = arith.constant 0 : i32
    %c0_i32_1 = arith.constant 0 : i32
    return %c0_i32, %c0_i32_0 : i32, i32
  }
  func.func @transform_28(%arg0: i32) -> (i32, i32) {
    %c0_i32 = arith.constant 0 : i32
    %c0_i32_0 = arith.constant 0 : i32
    %c0_i32_1 = arith.constant 0 : i32
    return %c0_i32, %c0_i32_0 : i32, i32
  }
  func.func @transform_29(%arg0: i32) -> (i32, i32, i32) {
    %c0_i32 = arith.constant 0 : i32
    %c0_i32_0 = arith.constant 0 : i32
    %c0_i32_1 = arith.constant 0 : i32
    %c0_i32_2 = arith.constant 0 : i32
    return %c0_i32, %c0_i32_0, %c0_i32_1 : i32, i32, i32
  }
  func.func @transform_30(%arg0: i32) -> (i32, i32, i32) {
    %c0_i32 = arith.constant 0 : i32
    %c0_i32_0 = arith.constant 0 : i32
    %c0_i32_1 = arith.constant 0 : i32
    %c0_i32_2 = arith.constant 0 : i32
    return %c0_i32, %c0_i32_0, %c0_i32_1 : i32, i32, i32
  }
  func.func @transform_31(%arg0: i32) -> (i32, i32, i32) {
    %c0_i32 = arith.constant 0 : i32
    %c0_i32_0 = arith.constant 0 : i32
    %c0_i32_1 = arith.constant 0 : i32
    %c0_i32_2 = arith.constant 0 : i32
    return %c0_i32, %c0_i32_0, %c0_i32_1 : i32, i32, i32
  }
  func.func @transform_32(%arg0: i32) -> (i32, i32, i32) {
    %c0_i32 = arith.constant 0 : i32
    %c0_i32_0 = arith.constant 0 : i32
    %c0_i32_1 = arith.constant 0 : i32
    %c0_i32_2 = arith.constant 0 : i32
    return %c0_i32, %c0_i32_0, %c0_i32_1 : i32, i32, i32
  }
  func.func @transform_33(%arg0: i32) -> (i32, i32, i32) {
    %c0_i32 = arith.constant 0 : i32
    %c0_i32_0 = arith.constant 0 : i32
    %c0_i32_1 = arith.constant 0 : i32
    %c0_i32_2 = arith.constant 0 : i32
    return %c0_i32, %c0_i32_0, %c0_i32_1 : i32, i32, i32
  }
  func.func @transform_34(%arg0: i32) -> (i32, i32, i32) {
    %c0_i32 = arith.constant 0 : i32
    %c0_i32_0 = arith.constant 0 : i32
    %c0_i32_1 = arith.constant 0 : i32
    %c0_i32_2 = arith.constant 0 : i32
    return %c0_i32, %c0_i32_0, %c0_i32_1 : i32, i32, i32
  }
  func.func @transform_35(%arg0: i32) -> (i32, i32, i32) {
    %c0_i32 = arith.constant 0 : i32
    %c0_i32_0 = arith.constant 0 : i32
    %c0_i32_1 = arith.constant 0 : i32
    %c0_i32_2 = arith.constant 0 : i32
    return %c0_i32, %c0_i32_0, %c0_i32_1 : i32, i32, i32
  }
  func.func @transform_36(%arg0: i32) -> (i32, i32, i32) {
    %c0_i32 = arith.constant 0 : i32
    %c0_i32_0 = arith.constant 0 : i32
    %c0_i32_1 = arith.constant 0 : i32
    %c0_i32_2 = arith.constant 0 : i32
    return %c0_i32, %c0_i32_0, %c0_i32_1 : i32, i32, i32
  }
  func.func @transform_37(%arg0: i32) -> (i32, i32, i32) {
    %c0_i32 = arith.constant 0 : i32
    %c0_i32_0 = arith.constant 0 : i32
    %c0_i32_1 = arith.constant 0 : i32
    %c0_i32_2 = arith.constant 0 : i32
    return %c0_i32, %c0_i32_0, %c0_i32_1 : i32, i32, i32
  }
  func.func @transform_38(%arg0: i32) -> (i32, i32, i32) {
    %c0_i32 = arith.constant 0 : i32
    %c0_i32_0 = arith.constant 0 : i32
    %c0_i32_1 = arith.constant 0 : i32
    %c0_i32_2 = arith.constant 0 : i32
    return %c0_i32, %c0_i32_0, %c0_i32_1 : i32, i32, i32
  }
  func.func @transform_39(%arg0: i32) -> (i32, i32, i32) {
    %c0_i32 = arith.constant 0 : i32
    %c0_i32_0 = arith.constant 0 : i32
    %c0_i32_1 = arith.constant 0 : i32
    %c0_i32_2 = arith.constant 0 : i32
    return %c0_i32, %c0_i32_0, %c0_i32_1 : i32, i32, i32
  }
  func.func @transform_40(%arg0: i32) -> (i32, i32, i32) {
    %c0_i32 = arith.constant 0 : i32
    %c0_i32_0 = arith.constant 0 : i32
    %c0_i32_1 = arith.constant 0 : i32
    %c0_i32_2 = arith.constant 0 : i32
    return %c0_i32, %c0_i32_0, %c0_i32_1 : i32, i32, i32
  }
  func.func @transform_41(%arg0: i32) -> (i32, i32, i32) {
    %c0_i32 = arith.constant 0 : i32
    %c0_i32_0 = arith.constant 0 : i32
    %c0_i32_1 = arith.constant 0 : i32
    %c0_i32_2 = arith.constant 0 : i32
    return %c0_i32, %c0_i32_0, %c0_i32_1 : i32, i32, i32
  }
  func.func @transform_42(%arg0: i32) -> (i32, i32) {
    %c0_i32 = arith.constant 0 : i32
    %c0_i32_0 = arith.constant 0 : i32
    %c0_i32_1 = arith.constant 0 : i32
    return %c0_i32, %c0_i32_0 : i32, i32
  }
  func.func @transform_43(%arg0: i32) -> (i32, i32) {
    %c0_i32 = arith.constant 0 : i32
    %c0_i32_0 = arith.constant 0 : i32
    %c0_i32_1 = arith.constant 0 : i32
    return %c0_i32, %c0_i32_0 : i32, i32
  }
  func.func @transform_44(%arg0: i32) -> (i32, i32) {
    %c0_i32 = arith.constant 0 : i32
    %c0_i32_0 = arith.constant 0 : i32
    %c0_i32_1 = arith.constant 0 : i32
    return %c0_i32, %c0_i32_0 : i32, i32
  }
  func.func @transform_45(%arg0: i32) -> (i32, i32) {
    %c0_i32 = arith.constant 0 : i32
    %c0_i32_0 = arith.constant 0 : i32
    %c0_i32_1 = arith.constant 0 : i32
    return %c0_i32, %c0_i32_0 : i32, i32
  }
  func.func @transform_46(%arg0: i32) -> (i32, i32) {
    %c0_i32 = arith.constant 0 : i32
    %c0_i32_0 = arith.constant 0 : i32
    %c0_i32_1 = arith.constant 0 : i32
    return %c0_i32, %c0_i32_0 : i32, i32
  }
}

</mosaic_0001>

<bundles_post_ra>
// kernel: tpu_custom_call.1
= control target key start
LH: loop header
LB: loop body
LE: loop exit
PB: predicated region body
PF: predicated region fallthrough
CT: control target
= control target key end

     0   :  { %s7373_s6 = smov 1   ;;  %s7374_s10 = smov 2   ;;  %s9056_s0 = inlined_call_operand.smem [shape: u32[47], index: -1, kind: input, shape index: {}] }
   0x1   :  { %s7460_s5 = sld [smem:[%s9056_s0]]   ;;  %s7375_s14 = smov 3  }
   0x2   :  { %s7465_s9 = sld [smem:[%s9056_s0 + %s7373_s6]]   ;;  %s7376_s18 = smov 4  }
   0x3   :  { %s7470_s13 = sld [smem:[%s9056_s0 + %s7374_s10]]   ;;  %s7377_s22 = smov 5  }
   0x4   :  { %s7475_s17 = sld [smem:[%s9056_s0 + %s7375_s14]]   ;;  %s7378_s26 = smov 6  }
   0x5   :  { %s7480_s21 = sld [smem:[%s9056_s0 + %s7376_s18]]   ;;  %s7379_s30 = smov 7  }
   0x6   :  { %s7485_s25 = sld [smem:[%s9056_s0 + %s7377_s22]]   ;;  %s7380_s4 = smov 8  }
   0x7   :  { %s7490_s29 = sld [smem:[%s9056_s0 + %s7378_s26]]   ;;  %s7381_s10 = smov 9  }
   0x8   :  { %9112 = sst [smem:[#allocation51_spill]] %s7465_s9  ;;  %s7382_s15 = smov 10  }
   0x9   :  { %s7495_s3 = sld [smem:[%s9056_s0 + %s7379_s30]]   ;;  %s7383_s20 = smov 11  }
   0xa   :  { %9113 = sst [smem:[#allocation52_spill]] %s7475_s17  ;;  %s7384_s26 = smov 12  }
   0xb   :  { %9114 = sst [smem:[#allocation53_spill]] %s7480_s21  ;;  %s7385_s1 = smov 13  }
   0xc   :  { %9115 = sst [smem:[#allocation54_spill]] %s7485_s25  ;;  %s7386_s7 = smov 14  }
   0xd   :  { %9116 = sst [smem:[#allocation55_spill]] %s7490_s29  ;;  %s7388_s22 = smov 16  }
   0xe   :  { %s7500_s8 = sld [smem:[%s9056_s0 + %s7380_s4]]   ;;  %s7389_s28 = smov 17  }
   0xf   :  { %9117 = sst [smem:[#allocation56_spill]] %s7495_s3 }
  0x10   :  { %s7505_s14 = sld [smem:[%s9056_s0 + %s7381_s10]]  }
  0x11   :  { %s7510_s19 = sld [smem:[%s9056_s0 + %s7382_s15]]   ;;  %s7387_s15 = smov 15  }
  0x12   :  { %s7515_s24 = sld [smem:[%s9056_s0 + %s7383_s20]]  }
  0x13   :  { %s7520_s30 = sld [smem:[%s9056_s0 + %s7384_s26]]  }
  0x14   :  { %9118 = sst [smem:[#allocation57_spill]] %s7500_s8 }
  0x15   :  { %s7525_s6 = sld [smem:[%s9056_s0 + %s7385_s1]]  }
  0x16   :  { %s7530_s12 = sld [smem:[%s9056_s0 + %s7386_s7]]   ;;  %s7390_s7 = smov 18  }
  0x17   :  { %9119 = sst [smem:[#allocation58_spill]] %s7510_s19 }
  0x18   :  { %s7535_s20 = sld [smem:[%s9056_s0 + %s7387_s15]]   ;;  %s7391_s15 = smov 19  }
  0x19   :  { %s7540_s27 = sld [smem:[%s9056_s0 + %s7388_s22]]   ;;  %s7392_s22 = smov 20  }
  0x1a   :  { %s7545_s4 = sld [smem:[%s9056_s0 + %s7389_s28]]   ;;  %s7393_s28 = smov 21  }
  0x1b   :  { %9120 = sst [smem:[#allocation59_spill]] %s7525_s6 }
  0x1c   :  { %s7550_s8 = sld [smem:[%s9056_s0 + %s7390_s7]]   ;;  %s7394_s7 = smov 22  }
  0x1d   :  { %s7555_s19 = sld [smem:[%s9056_s0 + %s7391_s15]]   ;;  %s7395_s15 = smov 23  }
  0x1e   :  { %9121 = sst [smem:[#allocation60_spill]] %s7535_s20 }
  0x1f   :  { %s7560_s17 = sld [smem:[%s9056_s0 + %s7392_s22]]   ;;  %s7396_s22 = smov 24  }
  0x20   :  { %s7565_s29 = sld [smem:[%s9056_s0 + %s7393_s28]]   ;;  %s7397_s28 = smov 25  }
  0x21   :  { %s7570_s3 = sld [smem:[%s9056_s0 + %s7394_s7]]   ;;  %s7398_s7 = smov 26  }
  0x22   :  { %9122 = sst [smem:[#allocation61_spill]] %s7550_s8 }
  0x23   :  { %9123 = sst [smem:[#allocation62_spill]] %s7555_s19 }
  0x24   :  { %s7575_s25 = sld [smem:[%s9056_s0 + %s7395_s15]]   ;;  %s7399_s15 = smov 27  }
  0x25   :  { %s7580_s21 = sld [smem:[%s9056_s0 + %s7396_s22]]   ;;  %s7400_s22 = smov 28  }
  0x26   :  { %9124 = sst [smem:[#allocation63_spill]] %s7565_s29 }
  0x27   :  { %9125 = sst [smem:[#allocation64_spill]] %s7570_s3 }
  0x28   :  { %s7585_s29 = sld [smem:[%s9056_s0 + %s7397_s28]]   ;;  %s7401_s28 = smov 29  }
  0x29   :  { %s7590_s20 = sld [smem:[%s9056_s0 + %s7398_s7]]   ;;  %s7402_s7 = smov 30  }
  0x2a   :  { %s7595_s19 = sld [smem:[%s9056_s0 + %s7399_s15]]   ;;  %s7403_s15 = smov 31  }
  0x2b   :  { %9126 = sst [smem:[#allocation65_spill]] %s7580_s21 }
  0x2c   :  { %s7600_s6 = sld [smem:[%s9056_s0 + %s7400_s22]]   ;;  %s7404_s22 = smov 32  }
  0x2d   :  { %s7605_s9 = sld [smem:[%s9056_s0 + %s7401_s28]]   ;;  %s7405_s28 = smov 33  }
  0x2e   :  { %s7615_s21 = sld [smem:[%s9056_s0 + %s7403_s15]]   ;;  %s7407_s15 = smov 35  }
  0x2f   :  { %9127 = sst [smem:[#allocation66_spill]] %s7590_s20 }
  0x30   :  { %s7610_s20 = sld [smem:[%s9056_s0 + %s7402_s7]]   ;;  %s7406_s7 = smov 34  }
  0x31   :  { %s7630_s3 = sld [smem:[%s9056_s0 + %s7406_s7]]   ;;  %s7410_s7 = smov 38  }
  0x32   :  { %9128 = sst [smem:[#allocation67_spill]] %s7600_s6 }
  0x33   :  { %9129 = sst [smem:[#allocation68_spill]] %s7605_s9 }
  0x34   :  { %9130 = sst [smem:[#allocation69_spill]] %s7615_s21 }
  0x35   :  { %s7620_s6 = sld [smem:[%s9056_s0 + %s7404_s22]]   ;;  %s7408_s22 = smov 36  }
  0x36   :  { %s7625_s9 = sld [smem:[%s9056_s0 + %s7405_s28]]   ;;  %s7409_s28 = smov 37  }
  0x37   :  { %9133 = sst [smem:[#allocation72_spill]] %s7630_s3 }
  0x38   :  { %s7635_s21 = sld [smem:[%s9056_s0 + %s7407_s15]]   ;;  %s7411_s15 = smov 39  }
  0x39   :  { %s7650_s3 = sld [smem:[%s9056_s0 + %s7410_s7]]   ;;  %s7414_s7 = smov 42  }
  0x3b   :  { %9131 = sst [smem:[#allocation70_spill]] %s7620_s6 }
  0x3c   :  { %9132 = sst [smem:[#allocation71_spill]] %s7625_s9 }
  0x3d   :  { %s7640_s6 = sld [smem:[%s9056_s0 + %s7408_s22]]   ;;  %s7412_s22 = smov 40  }
  0x3e   :  { %9134 = sst [smem:[#allocation73_spill]] %s7635_s21 }
  0x3f   :  { %s7645_s9 = sld [smem:[%s9056_s0 + %s7409_s28]]   ;;  %s7413_s28 = smov 41  }
  0x40   :  { %9136 = sst [smem:[#allocation75_spill]] %s7650_s3 }
  0x41   :  { %s7655_s21 = sld [smem:[%s9056_s0 + %s7411_s15]]   ;;  %s7415_s15 = smov 43  }
  0x42   :  { %s7665_s8 = sld [smem:[%s9056_s0 + %s7413_s28]]   ;;  %s7417_s28 = smov 45  }
  0x43   :  { %9135 = sst [smem:[#allocation74_spill]] %s7640_s6 }
  0x44   :  { %s7660_s6 = sld [smem:[%s9056_s0 + %s7412_s22]]   ;;  %s7416_s22 = smov 44  }
  0x45   :  { %s7670_s3 = sld [smem:[%s9056_s0 + %s7414_s7]]   ;;  %s7418_s7 = smov 46  }
  0x47   :  { %9137 = sst [smem:[#allocation76_spill]] %s7655_s21 }
  0x48   :  { %9139 = sst [smem:[#allocation78_spill]] %s7665_s8 }
  0x49   :  { %s7675_s21 = sld [smem:[%s9056_s0 + %s7415_s15]]  }
  0x4a   :  { %9138 = sst [smem:[#allocation77_spill]] %s7660_s6 }
  0x4b   :  { %9140 = sst [smem:[#allocation79_spill]] %s7670_s3 }
  0x4c   :  { %s7680_s6 = sld [smem:[%s9056_s0 + %s7416_s22]]  }
  0x4d   :  { %s7685_s8 = sld [smem:[%s9056_s0 + %s7417_s28]]  }
  0x4e   :  { %s7690_s3 = sld [smem:[%s9056_s0 + %s7418_s7]]  }
  0x4f   :  { %98 = vsyncpa [#allocation3], 0 }
  0x50   :  { %99 = vsyncpa [#allocation6], 0 }
  0x51   :  { %100 = vsyncpa [#allocation9], 0 }
  0x52   :  { %101 = vsyncpa [#allocation12], 0 }
  0x53   :  { %102 = vsyncpa [#allocation15], 0 }
  0x54   :  { %103 = vsyncpa [#allocation18], 0 }
  0x55   :  { %104 = vsyncpa [#allocation21], 0 }
  0x56   :  { %105 = vsyncpa [#allocation24], 0 }
  0x57   :  { %106 = vsyncpa [#allocation27], 0 }
  0x58   :  { %107 = vsyncpa [#allocation30], 0 }
  0x59   :  { %108 = vsyncpa [#allocation33], 0 }
  0x5a   :  { %109 = vsyncpa [#allocation36], 0  ;;  %s129_s15 = sshll.u32 %s7470_s13, 4  ;;  %s130_s15 = int_to_ptr.hbm [resolvable:$true] %s129_s15 }
  0x5b   :  { %110 = vsyncpa [#allocation4], 0  ;;  %s7419_s0 = smov [#allocation5]   ;;  %s165_s18 = sshll.u32 %s7515_s24, 4  ;;  %s166_s18 = int_to_ptr.hbm [resolvable:$true] %s165_s18 }
  0x5c   :  { %s131_s16 = sshll.u32 %s7419_s0, 4  ;;  %s6795_s22 = sshra.s32 %s130_s15, 4  ;;  %s132_s16 = int_to_ptr.vmem [resolvable:$true] %s131_s16  ;;  %s6796_s22 = int_to_ptr.hbm [resolvable:$true] %s6795_s22 }
  0x5d   :  { %s6797_s23 = scalar_lea.hbm %s6796_s22, 2  ;;  %s6799_s26 = scalar_lea.hbm %s7470_s13, 2 }
  0x5e   :  { %p6798_p0 = scmp.ne.s32.totalorder %s6796_s22, %s6797_s23  ;;  %p6800_p1 = scmp.lt.s32.totalorder %s6796_s22, %s7470_s13 }
  0x5f   :  { %p6801_p2 = scmp.lt.s32.totalorder %s6799_s26, %s6797_s23 }
  0x61   :  { %p6802_p3 = por %p6801_p2, %p6800_p1 }
  0x63   :  { %p6803_p4 = pnand %p6802_p3, %p6798_p0 }
  0x65   :  { %6806 = shalt.err (!%p6803_p4)
}
  0x66   :  { %134 = dma.hbm_to_vmem [thread:$0]  %s130_s15, 32, %s132_s16, [#allocation6]  }
  0x67   :  { %s7420_s28 = smov [#allocation8]   ;;  %s189_s2 = sshll.u32 %s7530_s12, 4  ;;  %s190_s2 = int_to_ptr.hbm [resolvable:$true] %s189_s2 }
  0x68   :  { %s167_s1 = sshll.u32 %s7420_s28, 4  ;;  %s6819_s7 = sshra.s32 %s166_s18, 4  ;;  %s168_s1 = int_to_ptr.vmem [resolvable:$true] %s167_s1  ;;  %s6820_s7 = int_to_ptr.hbm [resolvable:$true] %s6819_s7 }
  0x69   :  { %s6821_s10 = scalar_lea.hbm %s6820_s7, 4  ;;  %s6823_s11 = scalar_lea.hbm %s7515_s24, 4 }
  0x6a   :  { %p6822_p5 = scmp.ne.s32.totalorder %s6820_s7, %s6821_s10  ;;  %p6824_p6 = scmp.lt.s32.totalorder %s6820_s7, %s7515_s24 }
  0x6b   :  { %p6825_p7 = scmp.lt.s32.totalorder %s6823_s11, %s6821_s10 }
  0x6d   :  { %p6826_p8 = por %p6825_p7, %p6824_p6 }
  0x6f   :  { %p6827_p9 = pnand %p6826_p8, %p6822_p5 }
  0x71   :  { %6830 = shalt.err (!%p6827_p9)
}
  0x72   :  { %170 = dma.hbm_to_vmem [thread:$0]  %s166_s18, 64, %s168_s1, [#allocation9]  }
  0x73   :  { %s213_s13 = sshll.u32 %s7545_s4, 4  ;;  %s7421_s15 = smov [#allocation11]   ;;  %s214_s13 = int_to_ptr.hbm [resolvable:$true] %s213_s13 }
  0x74   :  { %s191_s0 = sshll.u32 %s7421_s15, 4  ;;  %s6843_s16 = sshra.s32 %s190_s2, 4  ;;  %s192_s0 = int_to_ptr.vmem [resolvable:$true] %s191_s0  ;;  %s6844_s16 = int_to_ptr.hbm [resolvable:$true] %s6843_s16 }
  0x75   :  { %s6845_s22 = scalar_lea.hbm %s6844_s16, 1  ;;  %s6847_s23 = scalar_lea.hbm %s7530_s12, 1 }
  0x76   :  { %p6846_p10 = scmp.ne.s32.totalorder %s6844_s16, %s6845_s22  ;;  %p6848_p11 = scmp.lt.s32.totalorder %s6844_s16, %s7530_s12 }
  0x77   :  { %p6849_p12 = scmp.lt.s32.totalorder %s6847_s23, %s6845_s22 }
  0x79   :  { %p6850_p13 = por %p6849_p12, %p6848_p11 }
  0x7b   :  { %p6851_p0 = pnand %p6850_p13, %p6846_p10 }
  0x7d   :  { %6854 = shalt.err (!%p6851_p0)
}
  0x7e   :  { %194 = dma.hbm_to_vmem [thread:$0]  %s190_s2, 16, %s192_s0, [#allocation12]  }
  0x7f   :  { %s7422_s24 = smov [#allocation14]   ;;  %s237_s26 = sshll.u32 %s7560_s17, 4  ;;  %s238_s26 = int_to_ptr.hbm [resolvable:$true] %s237_s26 }
  0x80   :  { %s215_s18 = sshll.u32 %s7422_s24, 4  ;;  %s6867_s28 = sshra.s32 %s214_s13, 4  ;;  %s216_s18 = int_to_ptr.vmem [resolvable:$true] %s215_s18  ;;  %s6868_s28 = int_to_ptr.hbm [resolvable:$true] %s6867_s28 }
  0x81   :  { %s6869_s1 = scalar_lea.hbm %s6868_s28, 4  ;;  %s6871_s7 = scalar_lea.hbm %s7545_s4, 4 }
  0x82   :  { %p6870_p1 = scmp.ne.s32.totalorder %s6868_s28, %s6869_s1  ;;  %p6872_p2 = scmp.lt.s32.totalorder %s6868_s28, %s7545_s4 }
  0x83   :  { %p6873_p3 = scmp.lt.s32.totalorder %s6871_s7, %s6869_s1 }
  0x85   :  { %p6874_p4 = por %p6873_p3, %p6872_p2 }
  0x87   :  { %p6875_p5 = pnand %p6874_p4, %p6870_p1 }
  0x89   :  { %6878 = shalt.err (!%p6875_p5)
}
  0x8a   :  { %218 = dma.hbm_to_vmem [thread:$0]  %s214_s13, 64, %s216_s18, [#allocation15]  }
  0x8b   :  { %s261_s12 = sshll.u32 %s7575_s25, 4  ;;  %s7423_s2 = smov [#allocation17]   ;;  %s262_s12 = int_to_ptr.hbm [resolvable:$true] %s261_s12 }
  0x8c   :  { %s239_s10 = sshll.u32 %s7423_s2, 4  ;;  %s6891_s11 = sshra.s32 %s238_s26, 4  ;;  %s240_s10 = int_to_ptr.vmem [resolvable:$true] %s239_s10  ;;  %s6892_s11 = int_to_ptr.hbm [resolvable:$true] %s6891_s11 }
  0x8d   :  { %s6893_s15 = scalar_lea.hbm %s6892_s11, 1  ;;  %s6895_s0 = scalar_lea.hbm %s7560_s17, 1 }
  0x8e   :  { %p6894_p6 = scmp.ne.s32.totalorder %s6892_s11, %s6893_s15  ;;  %p6896_p7 = scmp.lt.s32.totalorder %s6892_s11, %s7560_s17 }
  0x8f   :  { %p6897_p8 = scmp.lt.s32.totalorder %s6895_s0, %s6893_s15 }
  0x91   :  { %p6898_p9 = por %p6897_p8, %p6896_p7 }
  0x93   :  { %p6899_p10 = pnand %p6898_p9, %p6894_p6 }
  0x95   :  { %6902 = shalt.err (!%p6899_p10)
}
  0x96   :  { %242 = dma.hbm_to_vmem [thread:$0]  %s238_s26, 16, %s240_s10, [#allocation18]  }
  0x97   :  { %s7424_s4 = smov [#allocation20]   ;;  %s282_s16 = sshll.u32 %s7585_s29, 4  ;;  %s7709_s16 = int_to_ptr.hbm [resolvable:$true] %s282_s16 }
  0x98   :  { %s263_s13 = sshll.u32 %s7424_s4, 4  ;;  %s6915_s22 = sshra.s32 %s262_s12, 4  ;;  %s264_s13 = int_to_ptr.vmem [resolvable:$true] %s263_s13  ;;  %s6916_s22 = int_to_ptr.hbm [resolvable:$true] %s6915_s22 }
  0x99   :  { %s6917_s23 = scalar_lea.hbm %s6916_s22, 4  ;;  %s6919_s24 = scalar_lea.hbm %s7575_s25, 4 }
  0x9a   :  { %p6918_p11 = scmp.ne.s32.totalorder %s6916_s22, %s6917_s23  ;;  %p6920_p12 = scmp.lt.s32.totalorder %s6916_s22, %s7575_s25 }
  0x9b   :  { %p6921_p13 = scmp.lt.s32.totalorder %s6919_s24, %s6917_s23 }
  0x9d   :  { %p6922_p0 = por %p6921_p13, %p6920_p12 }
  0x9f   :  { %p6923_p1 = pnand %p6922_p0, %p6918_p11 }
  0xa1   :  { %6926 = shalt.err (!%p6923_p1)
}
  0xa2   :  { %266 = dma.hbm_to_vmem [thread:$0]  %s262_s12, 64, %s264_s13, [#allocation21]  }
  0xa3   :  { %s7425_s17 = smov [#allocation23]   ;;  %s306_s26 = sshll.u32 %s7595_s19, 4  ;;  %s307_s26 = int_to_ptr.hbm [resolvable:$true] %s306_s26 }
  0xa4   :  { %s284_s18 = sshll.u32 %s7425_s17, 4  ;;  %s6939_s28 = sshra.s32 %s7709_s16, 4  ;;  %s285_s18 = int_to_ptr.vmem [resolvable:$true] %s284_s18  ;;  %s6940_s28 = int_to_ptr.hbm [resolvable:$true] %s6939_s28 }
  0xa5   :  { %s6941_s1 = scalar_lea.hbm %s6940_s28, 16  ;;  %s6943_s7 = scalar_lea.hbm %s7585_s29, 16 }
  0xa6   :  { %p6942_p2 = scmp.ne.s32.totalorder %s6940_s28, %s6941_s1  ;;  %p6944_p3 = scmp.lt.s32.totalorder %s6940_s28, %s7585_s29 }
  0xa7   :  { %p6945_p4 = scmp.lt.s32.totalorder %s6943_s7, %s6941_s1 }
  0xa9   :  { %p6946_p5 = por %p6945_p4, %p6944_p3 }
  0xab   :  { %p6947_p6 = pnand %p6946_p5, %p6942_p2 }
  0xad   :  { %6950 = shalt.err (!%p6947_p6)
}
  0xae   :  { %s7426_s25 = smov 64   ;;  %s7427_s12 = smov 4  }
  0xaf   :  { %290 = dma.hbm_to_vmem [thread:$0]  %s7709_s16, 256, %s285_s18, [#allocation24], %s7426_s25, %s7426_s25, %s7427_s12  }
  0xb0   :  { %s7428_s2 = smov [#allocation26]   ;;  %s332_s11 = sshll.u32 %s7610_s20, 4  ;;  %s7721_s11 = int_to_ptr.hbm [resolvable:$true] %s332_s11 }
  0xb1   :  { %s308_s10 = sshll.u32 %s7428_s2, 4  ;;  %s6963_s29 = sshra.s32 %s307_s26, 4  ;;  %s309_s10 = int_to_ptr.vmem [resolvable:$true] %s308_s10  ;;  %s6964_s29 = int_to_ptr.hbm [resolvable:$true] %s6963_s29 }
  0xb2   :  { %s6965_s15 = scalar_lea.hbm %s6964_s29, 16  ;;  %s6967_s0 = scalar_lea.hbm %s7595_s19, 16 }
  0xb3   :  { %p6966_p7 = scmp.ne.s32.totalorder %s6964_s29, %s6965_s15  ;;  %p6968_p8 = scmp.lt.s32.totalorder %s6964_s29, %s7595_s19 }
  0xb4   :  { %p6969_p9 = scmp.lt.s32.totalorder %s6967_s0, %s6965_s15 }
  0xb6   :  { %p6970_p10 = por %p6969_p9, %p6968_p8 }
  0xb8   :  { %p6971_p11 = pnand %p6970_p10, %p6966_p7 }
  0xba   :  { %6974 = shalt.err (!%p6971_p11)
}
  0xbb   :  { %314 = dma.hbm_to_vmem [thread:$0]  %s307_s26, 256, %s309_s10, [#allocation27], %s7426_s25, %s7426_s25, %s7427_s12  }
  0xbc   :  { %s7429_s4 = smov [#allocation29]   ;;  %s368_s16 = sshll.u32 %s7645_s9, 4  ;;  %s369_s16 = int_to_ptr.hbm [resolvable:$true] %s368_s16 }
  0xbd   :  { %s334_s13 = sshll.u32 %s7429_s4, 4  ;;  %s6987_s22 = sshra.s32 %s7721_s11, 4  ;;  %s335_s13 = int_to_ptr.vmem [resolvable:$true] %s334_s13  ;;  %s6988_s22 = int_to_ptr.hbm [resolvable:$true] %s6987_s22 }
  0xbe   :  { %s6989_s23 = scalar_lea.hbm %s6988_s22, 3  ;;  %s6991_s19 = scalar_lea.hbm %s7610_s20, 3 }
  0xbf   :  { %p6990_p12 = scmp.ne.s32.totalorder %s6988_s22, %s6989_s23  ;;  %p6992_p13 = scmp.lt.s32.totalorder %s6988_s22, %s7610_s20 }
  0xc0   :  { %p6993_p0 = scmp.lt.s32.totalorder %s6991_s19, %s6989_s23 }
  0xc2   :  { %p6994_p1 = por %p6993_p0, %p6992_p13 }
  0xc4   :  { %p6995_p2 = pnand %p6994_p1, %p6990_p12 }
  0xc6   :  { %6998 = shalt.err (!%p6995_p2)
}
  0xc7   :  { %s7430_s24 = smov 16   ;;  %s7431_s17 = smov 1  }
  0xc8   :  { %340 = dma.hbm_to_vmem [thread:$0]  %s7721_s11, 48, %s335_s13, [#allocation30], %s7430_s24, %s7430_s24, %s7431_s17  }
  0xc9   :  { %s7432_s18 = smov [#allocation32]   ;;  %s116_s28 = sshll.u32 %s7460_s5, 4  ;;  %s117_s28 = int_to_ptr.hbm [resolvable:$true] %s116_s28 }
  0xca   :  { %s370_s26 = sshll.u32 %s7432_s18, 4  ;;  %s7011_s20 = sshra.s32 %s369_s16, 4  ;;  %s371_s26 = int_to_ptr.vmem [resolvable:$true] %s370_s26  ;;  %s7012_s20 = int_to_ptr.hbm [resolvable:$true] %s7011_s20 }
  0xcb   :  { %s7013_s1 = scalar_lea.hbm %s7012_s20, 3  ;;  %s7015_s7 = scalar_lea.hbm %s7645_s9, 3 }
  0xcc   :  { %p7014_p3 = scmp.ne.s32.totalorder %s7012_s20, %s7013_s1  ;;  %p7016_p4 = scmp.lt.s32.totalorder %s7012_s20, %s7645_s9 }
  0xcd   :  { %p7017_p5 = scmp.lt.s32.totalorder %s7015_s7, %s7013_s1 }
  0xcf   :  { %p7018_p6 = por %p7017_p5, %p7016_p4 }
  0xd1   :  { %p7019_p7 = pnand %p7018_p6, %p7014_p3 }
  0xd3   :  { %7022 = shalt.err (!%p7019_p7)
}
  0xd4   :  { %376 = dma.hbm_to_vmem [thread:$0]  %s369_s16, 48, %s371_s26, [#allocation33], %s7430_s24, %s7430_s24, %s7431_s17  }
  0xd5   :  { %s152_s12 = sshll.u32 %s7505_s14, 4  ;;  %s7433_s2 = smov [#allocation2]   ;;  %s153_s12 = int_to_ptr.hbm [resolvable:$true] %s152_s12 }
  0xd6   :  { %s118_s10 = sshll.u32 %s7433_s2, 4  ;;  %s7035_s11 = sshra.s32 %s117_s28, 4  ;;  %s119_s10 = int_to_ptr.vmem [resolvable:$true] %s118_s10  ;;  %s7036_s11 = int_to_ptr.hbm [resolvable:$true] %s7035_s11 }
  0xd7   :  { %s7037_s29 = scalar_lea.hbm %s7036_s11, 8  ;;  %s7039_s9 = scalar_lea.hbm %s7460_s5, 8 }
  0xd8   :  { %p7038_p8 = scmp.ne.s32.totalorder %s7036_s11, %s7037_s29  ;;  %p7040_p9 = scmp.lt.s32.totalorder %s7036_s11, %s7460_s5 }
  0xd9   :  { %p7041_p10 = scmp.lt.s32.totalorder %s7039_s9, %s7037_s29 }
  0xdb   :  { %p7042_p11 = por %p7041_p10, %p7040_p9 }
  0xdd   :  { %p7043_p12 = pnand %p7042_p11, %p7038_p8 }
  0xdf   :  { %7046 = shalt.err (!%p7043_p12)
}
  0xe0   :  { %121 = dma.hbm_to_vmem [thread:$0]  %s117_s28, 128, %s119_s10, [#allocation3]  }
  0xe1   :  { %s7434_s15 = smov [#allocation7]   ;;  %s176_s4 = sshll.u32 %s7520_s30, 4  ;;  %s177_s4 = int_to_ptr.hbm [resolvable:$true] %s176_s4 }
  0xe2   :  { %s154_s0 = sshll.u32 %s7434_s15, 4  ;;  %s7059_s13 = sshra.s32 %s153_s12, 4  ;;  %s155_s0 = int_to_ptr.vmem [resolvable:$true] %s154_s0  ;;  %s7060_s13 = int_to_ptr.hbm [resolvable:$true] %s7059_s13 }
  0xe3   :  { %s7061_s16 = scalar_lea.hbm %s7060_s13, 1  ;;  %s7063_s22 = scalar_lea.hbm %s7505_s14, 1 }
  0xe4   :  { %p7062_p13 = scmp.ne.s32.totalorder %s7060_s13, %s7061_s16  ;;  %p7064_p0 = scmp.lt.s32.totalorder %s7060_s13, %s7505_s14 }
  0xe5   :  { %p7065_p1 = scmp.lt.s32.totalorder %s7063_s22, %s7061_s16 }
  0xe7   :  { %p7066_p2 = por %p7065_p1, %p7064_p0 }
  0xe9   :  { %p7067_p3 = pnand %p7066_p2, %p7062_p13 }
  0xeb   :  { %7070 = shalt.err (!%p7067_p3)
}
  0xec   :  { %157 = dma.hbm_to_vmem [thread:$0]  %s153_s12, 16, %s155_s0, [#allocation6]  }
  0xed   :  { %s202_s5 = sshll.u32 %s7540_s27, 4  ;;  %s7435_s23 = smov [#allocation10]   ;;  %s203_s5 = int_to_ptr.hbm [resolvable:$true] %s202_s5 }
  0xee   :  { %s178_s19 = sshll.u32 %s7435_s23, 4  ;;  %s7083_s18 = sshra.s32 %s177_s4, 4  ;;  %s179_s19 = int_to_ptr.vmem [resolvable:$true] %s178_s19  ;;  %s7084_s18 = int_to_ptr.hbm [resolvable:$true] %s7083_s18 }
  0xef   :  { %s7085_s26 = scalar_lea.hbm %s7084_s18, 1  ;;  %s7087_s28 = scalar_lea.hbm %s7520_s30, 1 }
  0xf0   :  { %p7086_p4 = scmp.ne.s32.totalorder %s7084_s18, %s7085_s26  ;;  %p7088_p5 = scmp.lt.s32.totalorder %s7084_s18, %s7520_s30 }
  0xf1   :  { %p7089_p6 = scmp.lt.s32.totalorder %s7087_s28, %s7085_s26 }
  0xf3   :  { %p7090_p7 = por %p7089_p6, %p7088_p5 }
  0xf5   :  { %p7091_p8 = pnand %p7090_p7, %p7086_p4 }
  0xf7   :  { %7094 = shalt.err (!%p7091_p8)
}
  0xf8   :  { %181 = dma.hbm_to_vmem [thread:$0]  %s177_s4, 16, %s179_s19, [#allocation9]  }
  0xf9   :  { %s9141_s14 = sld [smem:[#allocation61_spill]]  ;;  %s7436_s20 = smov [#allocation13]  }
  0xfa   :  { %s204_s1 = sshll.u32 %s7436_s20, 4  ;;  %s7107_s12 = sshra.s32 %s203_s5, 4  ;;  %s205_s1 = int_to_ptr.vmem [resolvable:$true] %s204_s1  ;;  %s7108_s12 = int_to_ptr.hbm [resolvable:$true] %s7107_s12 }
  0xfb   :  { %s7109_s2 = scalar_lea.hbm %s7108_s12, 1  ;;  %s7111_s10 = scalar_lea.hbm %s7540_s27, 1 }
  0xfc   :  { %p7110_p9 = scmp.ne.s32.totalorder %s7108_s12, %s7109_s2  ;;  %p7112_p10 = scmp.lt.s32.totalorder %s7108_s12, %s7540_s27 }
  0xfd   :  { %p7113_p11 = scmp.lt.s32.totalorder %s7111_s10, %s7109_s2 }
  0xff   :  { %s224_s7 = sshll.u32 %s9141_s14, 4  ;;  %p7114_p12 = por %p7113_p11, %p7112_p10  ;;  %s225_s7 = int_to_ptr.hbm [resolvable:$true] %s224_s7 }
 0x101   :  { %p7115_p13 = pnand %p7114_p12, %p7110_p9 }
 0x103   :  { %7118 = shalt.err (!%p7115_p13)
}
 0x104   :  { %207 = dma.hbm_to_vmem [thread:$0]  %s203_s5, 16, %s205_s1, [#allocation12]  }
 0x105   :  { %s9142_s30 = sld [smem:[#allocation64_spill]]  ;;  %s7437_s29 = smov [#allocation16]  }
 0x106   :  { %s226_s9 = sshll.u32 %s7437_s29, 4  ;;  %s7131_s15 = sshra.s32 %s225_s7, 4  ;;  %s227_s9 = int_to_ptr.vmem [resolvable:$true] %s226_s9  ;;  %s7132_s15 = int_to_ptr.hbm [resolvable:$true] %s7131_s15 }
 0x107   :  { %s7133_s0 = scalar_lea.hbm %s7132_s15, 1  ;;  %s7135_s4 = scalar_lea.hbm %s9141_s14, 1 }
 0x108   :  { %p7134_p0 = scmp.ne.s32.totalorder %s7132_s15, %s7133_s0  ;;  %p7136_p1 = scmp.lt.s32.totalorder %s7132_s15, %s9141_s14 }
 0x109   :  { %p7137_p2 = scmp.lt.s32.totalorder %s7135_s4, %s7133_s0 }
 0x10b   :  { %s250_s11 = sshll.u32 %s9142_s30, 4  ;;  %p7138_p3 = por %p7137_p2, %p7136_p1  ;;  %s251_s11 = int_to_ptr.hbm [resolvable:$true] %s250_s11 }
 0x10d   :  { %p7139_p4 = pnand %p7138_p3, %p7134_p0 }
 0x10f   :  { %7142 = shalt.err (!%p7139_p4)
}
 0x110   :  { %229 = dma.hbm_to_vmem [thread:$0]  %s225_s7, 16, %s227_s9, [#allocation15]  }
 0x111   :  { %s9143_s27 = sld [smem:[#allocation65_spill]]  ;;  %s7438_s13 = smov [#allocation19]  }
 0x112   :  { %s252_s16 = sshll.u32 %s7438_s13, 4  ;;  %s7155_s5 = sshra.s32 %s251_s11, 4  ;;  %s253_s16 = int_to_ptr.vmem [resolvable:$true] %s252_s16  ;;  %s7156_s5 = int_to_ptr.hbm [resolvable:$true] %s7155_s5 }
 0x113   :  { %s7157_s23 = scalar_lea.hbm %s7156_s5, 1  ;;  %s7159_s19 = scalar_lea.hbm %s9142_s30, 1 }
 0x114   :  { %p7158_p5 = scmp.ne.s32.totalorder %s7156_s5, %s7157_s23  ;;  %p7160_p6 = scmp.lt.s32.totalorder %s7156_s5, %s9142_s30 }
 0x115   :  { %p7161_p7 = scmp.lt.s32.totalorder %s7159_s19, %s7157_s23 }
 0x117   :  { %s272_s22 = sshll.u32 %s9143_s27, 4  ;;  %p7162_p8 = por %p7161_p7, %p7160_p6  ;;  %s273_s22 = int_to_ptr.hbm [resolvable:$true] %s272_s22 }
 0x119   :  { %p7163_p9 = pnand %p7162_p8, %p7158_p5 }
 0x11b   :  { %7166 = shalt.err (!%p7163_p9)
}
 0x11c   :  { %255 = dma.hbm_to_vmem [thread:$0]  %s251_s11, 16, %s253_s16, [#allocation18]  }
 0x11d   :  { %s9144_s18 = sld [smem:[#allocation66_spill]]  ;;  %s7439_s28 = smov [#allocation22]  }
 0x11e   :  { %s274_s14 = sshll.u32 %s7439_s28, 4  ;;  %s7179_s20 = sshra.s32 %s273_s22, 4  ;;  %s275_s14 = int_to_ptr.vmem [resolvable:$true] %s274_s14  ;;  %s7180_s20 = int_to_ptr.hbm [resolvable:$true] %s7179_s20 }
 0x11f   :  { %s7181_s1 = scalar_lea.hbm %s7180_s20, 1  ;;  %s7183_s7 = scalar_lea.hbm %s9143_s27, 1 }
 0x120   :  { %p7182_p10 = scmp.ne.s32.totalorder %s7180_s20, %s7181_s1  ;;  %p7184_p11 = scmp.lt.s32.totalorder %s7180_s20, %s9143_s27 }
 0x121   :  { %p7185_p12 = scmp.lt.s32.totalorder %s7183_s7, %s7181_s1 }
 0x123   :  { %s296_s26 = sshll.u32 %s9144_s18, 4  ;;  %p7186_p13 = por %p7185_p12, %p7184_p11  ;;  %s297_s26 = int_to_ptr.hbm [resolvable:$true] %s296_s26 }
 0x125   :  { %p7187_p0 = pnand %p7186_p13, %p7182_p10 }
 0x127   :  { %7190 = shalt.err (!%p7187_p0)
}
 0x128   :  { %277 = dma.hbm_to_vmem [thread:$0]  %s273_s22, 16, %s275_s14, [#allocation21]  }
 0x129   :  { %s9145_s12 = sld [smem:[#allocation67_spill]]  ;;  %s7440_s2 = smov [#allocation25]  }
 0x12a   :  { %s298_s10 = sshll.u32 %s7440_s2, 4  ;;  %s7203_s11 = sshra.s32 %s297_s26, 4  ;;  %s299_s10 = int_to_ptr.vmem [resolvable:$true] %s298_s10  ;;  %s7204_s11 = int_to_ptr.hbm [resolvable:$true] %s7203_s11 }
 0x12b   :  { %s7205_s29 = scalar_lea.hbm %s7204_s11, 1  ;;  %s7207_s9 = scalar_lea.hbm %s9144_s18, 1 }
 0x12c   :  { %p7206_p1 = scmp.ne.s32.totalorder %s7204_s11, %s7205_s29  ;;  %p7208_p2 = scmp.lt.s32.totalorder %s7204_s11, %s9144_s18 }
 0x12d   :  { %p7209_p3 = scmp.lt.s32.totalorder %s7207_s9, %s7205_s29 }
 0x12f   :  { %s320_s30 = sshll.u32 %s9145_s12, 4  ;;  %p7210_p4 = por %p7209_p3, %p7208_p2  ;;  %s321_s30 = int_to_ptr.hbm [resolvable:$true] %s320_s30 }
 0x131   :  { %p7211_p5 = pnand %p7210_p4, %p7206_p1 }
 0x133   :  { %7214 = shalt.err (!%p7211_p5)
}
 0x134   :  { %301 = dma.hbm_to_vmem [thread:$0]  %s297_s26, 16, %s299_s10, [#allocation24]  }
 0x135   :  { %s9146_s15 = sld [smem:[#allocation73_spill]]  ;;  %s7441_s4 = smov [#allocation28]  }
 0x136   :  { %s322_s27 = sshll.u32 %s7441_s4, 4  ;;  %s7227_s13 = sshra.s32 %s321_s30, 4  ;;  %s323_s27 = int_to_ptr.vmem [resolvable:$true] %s322_s27  ;;  %s7228_s13 = int_to_ptr.hbm [resolvable:$true] %s7227_s13 }
 0x137   :  { %s7229_s16 = scalar_lea.hbm %s7228_s13, 1  ;;  %s7231_s22 = scalar_lea.hbm %s9145_s12, 1 }
 0x138   :  { %p7230_p6 = scmp.ne.s32.totalorder %s7228_s13, %s7229_s16  ;;  %p7232_p7 = scmp.lt.s32.totalorder %s7228_s13, %s9145_s12 }
 0x139   :  { %p7233_p8 = scmp.lt.s32.totalorder %s7231_s22, %s7229_s16 }
 0x13b   :  { %s353_s0 = sshll.u32 %s9146_s15, 4  ;;  %p7234_p9 = por %p7233_p8, %p7232_p7  ;;  %s7766_s0 = int_to_ptr.hbm [resolvable:$true] %s353_s0 }
 0x13d   :  { %p7235_p10 = pnand %p7234_p9, %p7230_p6 }
 0x13f   :  { %7238 = shalt.err (!%p7235_p10)
}
 0x140   :  { %325 = dma.hbm_to_vmem [thread:$0]  %s321_s30, 16, %s323_s27, [#allocation27]  }
 0x141   :  { %s9147_s5 = sld [smem:[#allocation76_spill]]  ;;  %s7442_s23 = smov [#allocation31]  }
 0x142   :  { %s355_s19 = sshll.u32 %s7442_s23, 4  ;;  %s7251_s26 = sshra.s32 %s7766_s0, 4  ;;  %s356_s19 = int_to_ptr.vmem [resolvable:$true] %s355_s19  ;;  %s7252_s26 = int_to_ptr.hbm [resolvable:$true] %s7251_s26 }
 0x143   :  { %s7253_s28 = scalar_lea.hbm %s7252_s26, 3  ;;  %s7255_s14 = scalar_lea.hbm %s9146_s15, 3 }
 0x144   :  { %p7254_p11 = scmp.ne.s32.totalorder %s7252_s26, %s7253_s28  ;;  %p7256_p12 = scmp.lt.s32.totalorder %s7252_s26, %s9146_s15 }
 0x145   :  { %p7257_p13 = scmp.lt.s32.totalorder %s7255_s14, %s7253_s28 }
 0x147   :  { %s383_s18 = sshll.u32 %s9147_s5, 4  ;;  %p7258_p0 = por %p7257_p13, %p7256_p12  ;;  %s7771_s18 = int_to_ptr.hbm [resolvable:$true] %s383_s18 }
 0x149   :  { %p7259_p1 = pnand %p7258_p0, %p7254_p11 }
 0x14b   :  { %7262 = shalt.err (!%p7259_p1)
}
 0x14c   :  { %s9148_s20 = sld [smem:[#allocation78_spill]]  ;;  %s7443_s7 = smov [#allocation34]  }
 0x14d   :  { %361 = dma.hbm_to_vmem [thread:$0]  %s7766_s0, 48, %s356_s19, [#allocation30], %s7430_s24, %s7430_s24, %s7431_s17  }
 0x14e   :  { %s385_s12 = sshll.u32 %s7443_s7, 4  ;;  %s7275_s2 = sshra.s32 %s7771_s18, 4  ;;  %s386_s12 = int_to_ptr.vmem [resolvable:$true] %s385_s12  ;;  %s7276_s2 = int_to_ptr.hbm [resolvable:$true] %s7275_s2 }
 0x14f   :  { %s7277_s10 = scalar_lea.hbm %s7276_s2, 3  ;;  %s7279_s30 = scalar_lea.hbm %s9147_s5, 3 }
 0x150   :  { %p7278_p2 = scmp.ne.s32.totalorder %s7276_s2, %s7277_s10  ;;  %p7280_p3 = scmp.lt.s32.totalorder %s7276_s2, %s9147_s5 }
 0x151   :  { %p7281_p4 = scmp.lt.s32.totalorder %s7279_s30, %s7277_s10 }
 0x152   :  { %s398_s1 = sshll.u32 %s9148_s20, 4  ;;  %s7781_s1 = int_to_ptr.hbm [resolvable:$true] %s398_s1 }
 0x153   :  { %p7282_p5 = por %p7281_p4, %p7280_p3 }
 0x155   :  { %p7283_p6 = pnand %p7282_p5, %p7278_p2 }
 0x157   :  { %7286 = shalt.err (!%p7283_p6)
}
 0x158   :  { %391 = dma.hbm_to_vmem [thread:$0]  %s7771_s18, 48, %s386_s12, [#allocation33], %s7430_s24, %s7430_s24, %s7431_s17  }
 0x159   :  { %s7444_s11 = smov [#allocation35]   ;;  %s7299_s9 = sshra.s32 %s7781_s1, 4  ;;  %s7300_s9 = int_to_ptr.hbm [resolvable:$true] %s7299_s9 }
 0x15a   :  { %s400_s29 = sshll.u32 %s7444_s11, 4  ;;  %s7301_s15 = scalar_lea.hbm %s7300_s9, 3  ;;  %s401_s29 = int_to_ptr.vmem [resolvable:$true] %s400_s29 }
 0x15b   :  { %p7302_p7 = scmp.ne.s32.totalorder %s7300_s9, %s7301_s15  ;;  %s7303_s0 = scalar_lea.hbm %s9148_s20, 3 }
 0x15c   :  { %p7304_p8 = scmp.lt.s32.totalorder %s7300_s9, %s9148_s20  ;;  %p7305_p9 = scmp.lt.s32.totalorder %s7303_s0, %s7301_s15 }
 0x15e   :  { %p7306_p10 = por %p7305_p9, %p7304_p8 }
 0x160   :  { %p7307_p11 = pnand %p7306_p10, %p7302_p7 }
 0x162   :  { %7310 = shalt.err (!%p7307_p11)
}
 0x163   :  { %406 = dma.hbm_to_vmem [thread:$0]  %s7781_s1, 48, %s401_s29, [#allocation36], %s7430_s24, %s7430_s24, %s7431_s17  }
 0x164   :  { %7347 = dma.done.wait [#allocation3], 128  }
 0x165   :  { %7348 = vsyncadd [#allocation3], 4294967168 }
 0x166   :  { %7349 = dma.done.wait [#allocation6], 48  }
 0x167   :  { %7350 = vsyncadd [#allocation6], 4294967248 }
 0x168   :  { %7351 = dma.done.wait [#allocation9], 80  }
 0x169   :  { %7352 = vsyncadd [#allocation9], 4294967216 }
 0x16a   :  { %7353 = dma.done.wait [#allocation12], 32  }
 0x16b   :  { %7354 = vsyncadd [#allocation12], 4294967264 }
 0x16c   :  { %7355 = dma.done.wait [#allocation15], 80  }
 0x16d   :  { %7356 = vsyncadd [#allocation15], 4294967216 }
 0x16e   :  { %7357 = dma.done.wait [#allocation18], 32  }
 0x16f   :  { %7358 = vsyncadd [#allocation18], 4294967264 }
 0x170   :  { %7359 = dma.done.wait [#allocation21], 80  }
 0x171   :  { %7360 = vsyncadd [#allocation21], 4294967216 }
 0x172   :  { %7361 = dma.done.wait [#allocation24], 272  }
 0x173   :  { %7362 = vsyncadd [#allocation24], 4294967024 }
 0x174   :  { %7363 = dma.done.wait [#allocation27], 272  }
 0x175   :  { %7364 = vsyncadd [#allocation27], 4294967024 }
 0x176   :  { %7365 = dma.done.wait [#allocation30], 96  }
 0x177   :  { %7366 = vsyncadd [#allocation30], 4294967200 }
 0x178   :  { %7367 = dma.done.wait [#allocation33], 96  }
 0x179   :  { %7368 = vsyncadd [#allocation33], 4294967200 }
 0x17a   :  { %7369 = dma.done.wait [#allocation36], 48  }
 0x17b   :  { %7370 = vsyncadd [#allocation36], 4294967248  ;;  %s9149_s24 = sld [smem:[#allocation51_spill]]  ;;  %vm650_vm0 = vcmask 1041408   ;;  %vm651_vm1 = vcmask 1042432   ;;  %v9085_v0 = vmov 65535  }
 0x17c   :  { %v652_v1 = vsel %vm650_vm0, 4294967295, %v9085_v0  ;;  %vm540_vm2 = vcmask 1043456   ;;  %s9150_s4 = sld [smem:[#allocation59_spill]]  ;;  %v530_v3 = vld [vmem:[#allocation8] sm:$0xf]  ;;  %vm536_vm3 = vcmask 64512  }
 0x17d   :  { %v653_v2 = vsel %vm651_vm1, %v652_v1, 0  ;;  %v529_v4 = vld [vmem:[#allocation2] sm:$0x7f]  ;;  %v640_v5 = vld [vmem:[#allocation14] sm:$0x7]  ;;  %v542_v6 = vsel %vm540_vm2, %v530_v3, 0 }
 0x17e   :  { %v531_v7 = vpack.c.bf16 %v529_v4, %v529_v4  ;;  %v655_v8 = vand.u32 %v653_v2, %v640_v5  ;;  %551 = vmatpush.bf16.msra.mxu0 %v542_v6  ;;  %vm646_vm4 = vcmask 39936   ;;  %v760_v14 = vld [vmem:[#allocation20] sm:$0x7]  ;;  %v6675_v16 = vld [vmem:[#allocation10] ss:$0 sm:$0xff]  ;;  %vm581_vm6 = vcmask 261120  }
 0x17f   :  { %v771_v15 = vsel %vm651_vm1, %v760_v14, 0  ;;  %s9151_s27 = sld [smem:[#allocation62_spill]]  ;;  %v759_v23 = vld [vmem:[#allocation5] sm:$0x3]  ;;  %vm766_vm7 = vcmask 48128   ;;  %v6417_v39 = vld [vmem:[#allocation23 + $0x8] sm:$0xff] }
 0x180   :  { %664 = vmatpush.bf16.msra.mxu3 %v655_v8  ;;  %s9152_s13 = sld [smem:[#allocation60_spill]]  ;;  %v761_v24 = vpack.c.bf16 %v759_v23, %v759_v23  ;;  %v6676_v26 = vld [vmem:[#allocation16] ss:$0 sm:$0xff]  ;;  %v6416_v40 = vld [vmem:[#allocation23] sm:$0xff]  ;;  %v6677_v41 = vld [vmem:[#allocation11] ss:$0 sm:$0xff] }
 0x181   :  { %v638_v9 = vld [vmem:[%s9149_s24] sm:$0xff]  ;;  %v639_v10 = vld [vmem:[%s9149_s24 + $0x8] sm:$0xf]  ;;  %5687 = vmatmul.msk.bf16.vlgmr.msra.gmra.mxu0 %vm536_vm3, %v531_v7  ;;  %s9153_s16 = sld [smem:[#allocation63_spill]]  ;;  %v6679_v55 = vld [vmem:[#allocation17] ss:$0 sm:$0xff] }
 0x182   :  { %v641_v11 = vpack.c.bf16 %v639_v10, %v638_v9  ;;  %v6409_v12 = vld [vmem:[%s9150_s4 + $0x8] sm:$0xff]  ;;  %v6408_v13 = vld [vmem:[%s9150_s4] sm:$0xff]  ;;  %s9154_s22 = sld [smem:[#allocation53_spill]]  ;;  %v6418_v5 = vld [vmem:[#allocation26] sm:$0xff]  ;;  %vm911_vm3 = vcmask 1044480   ;;  %s7447_s23 = smov 32  }
 0x183   :  { %591 = vmatpush.bf16.msra.mxu1 %v6409_v12  ;;  %v6678_v48 = vld [vmem:[#allocation22] ss:$0 sm:$0xff]  ;;  %v6681_v10 = vld [vmem:[#allocation25] ss:$0 sm:$0xff]  ;;  %s9155_s5 = sld [smem:[#allocation54_spill]]  ;;  %s7448_s26 = smov 96  }
 0x184   :  { %5706 = vmatmul.msk.bf16.vlgmr.msra.gmra.mxu3 %vm646_vm4, %v641_v11  ;;  %v6419_v4 = vld [vmem:[#allocation26 + $0x8] sm:$0xff]  ;;  %vm953_vm4 = vcmask 15360   ;;  %s9160_s19 = sld [smem:[#allocation77_spill]]  ;;  %s7451_s29 = smov [#allocation37]  }
 0x185   :  { %v6413_v32 = vld [vmem:[%s9151_s27 + $0x8] sm:$0xff]  ;;  %v6412_v36 = vld [vmem:[%s9151_s27] sm:$0xff]  ;;  %s9161_s18 = sld [smem:[#allocation56_spill]]  ;;  %s5618_s9 = sshll.u32 %s7451_s29, 4  ;;  %s5619_s9 = int_to_ptr.vmem [resolvable:$true] %s5618_s9 }
 0x186   :  { %v6411_v33 = vld [vmem:[%s9152_s13 + $0x8] sm:$0xff]  ;;  %707 = vmatpush.bf16.msrb.mxu0 %v6413_v32  ;;  %v6410_v38 = vld [vmem:[%s9152_s13] sm:$0xff]  ;;  %s9162_s28 = sld [smem:[#allocation55_spill]]  ;;  %s5620_s15 = sshll.u32 %s7690_s3, 4  ;;  %s5621_s15 = int_to_ptr.hbm [resolvable:$true] %s5620_s15 }
 0x187   :  { %592 = vmatpush.bf16.msra.mxu1 %v6408_v13  ;;  %631 = vmatpush.bf16.msra.mxu2 %v6411_v33  ;;  %v6415_v59 = vld [vmem:[%s9153_s16 + $0x8] sm:$0xff]  ;;  %v6414_v62 = vld [vmem:[%s9153_s16] sm:$0xff]  ;;  %s9163_s14 = sld [smem:[#allocation52_spill]]  ;;  %s7339_s0 = scalar_lea.hbm %s7690_s3, 2 }
 0x188   :  { %751 = vmatpush.bf16.msrb.mxu3 %v6415_v59  ;;  %v7818_v6 = vld [vmem:[%s9154_s22] sm:$0xff]  ;;  %v7822_v8 = vld [vmem:[%s9154_s22 + $0x8] sm:$0xff]  ;;  %s9166_s20 = sld [smem:[#allocation68_spill]] }
 0x189   :  { %891 = vxpose.xlu0.c.b16.start [1/2] (short) (narrow) %v7818_v6, 16  ;;  %v515_v32 = vld [vmem:[%s9155_s5 + $0x4] sm:$0x1]  ;;  %s9167_s1 = sld [smem:[#allocation71_spill]] }
 0x18a   :  { %708 = vmatpush.bf16.msrb.mxu0 %v6412_v36  ;;  %v7846_v33 = vunpack.c.l.bf16 %v515_v32  ;;  %s9168_s7 = sld [smem:[#allocation69_spill]] }
 0x18b   :  { %780 = vmatpush.bf16.msrb.mxu1 %v771_v15  ;;  %632 = vmatpush.bf16.msra.mxu2 %v6410_v38  ;;  %v6680_v38 = vld [vmem:[#allocation13] ss:$0 sm:$0xff]  ;;  %s9171_s12 = sld [smem:[#allocation70_spill]] }
 0x18c   :  { %752 = vmatpush.bf16.msrb.mxu3 %v6414_v62  ;;  %s9172_s2 = sld [smem:[#allocation58_spill]] }
 0x18d   :  { %s9178_s10 = sld [smem:[#allocation72_spill]] }
 0x18e   :  { %859 = vmatpush.bf16.msra.mxu0 %v6419_v4  ;;  %s9179_s30 = sld [smem:[#allocation74_spill]] }
 0x18f   :  { %819 = vmatpush.bf16.msrb.mxu2 %v6417_v39  ;;  %s9180_s11 = sld [smem:[#allocation75_spill]] }
 0x192   :  { %860 = vmatpush.bf16.msra.mxu0 %v6418_v5 }
 0x193   :  { %820 = vmatpush.bf16.msrb.mxu2 %v6416_v40 }
 0x199   :  { %892 = vxpose.xlu0.c.b16.end [2/2] (short) (narrow) %v7822_v8, 16 }
 0x1fe   :  { %v553_v17 = vpop.f32.mrf.mxu0 }
 0x1ff   :  { %v554_v18 = vadd.f32 %v6675_v16, %v553_v17  ;;  %v871_v17 = vlaneseq }
 0x201   :  { %vm557_vm5 = vcmp.gt.f32.partialorder %v554_v18, 0.0  ;;  %v558_v19 = vmul.f32 0.01, %v554_v18 }
 0x203   :  { %v559_v20 = vsel %vm557_vm5, %v554_v18, %v558_v19  ;;  %v872_v18 = vand.u32 127, %v871_v17  ;;  %vm869_vm5 = vcmask 1046528  }
 0x204   :  { %v564_v21 = vpack.c.bf16 %v559_v20, %v559_v20  ;;  %v6682_v20 = vld [vmem:[#allocation19] ss:$0 sm:$0xff] }
 0x205   :  { %vm873_vm15 = vcmp.eq.s32.totalorder %v872_v18, 0 }
 0x206   :  { %v555_v22 = vpop.f32.mrf.mxu0  ;;  %5696 = vmatmul.msk.bf16.vlgmr.msra.gmra.mxu1 %vm581_vm6, %v564_v21  ;;  %v7446_v21 = vmov 0.0  }
 0x207   :  { %v666_v25 = vpop.f32.mrf.mxu3  ;;  %v7826_v22 = vsel %vm873_vm15, 1.0, %v7446_v21  ;;  %vm1551_vm15 = vcmask 285696  }
 0x208   :  { %v667_v28 = vadd.f32 %v6676_v26, %v666_v25  ;;  %9156 = vst [vmem:[#allocation80_spill] sm:$0xff] %v7826_v22  ;;  %v878_v23 = vpack.c.bf16 %v7826_v22, %v7826_v22 }
 0x20a   :  { %v673_v30 = vmul.f32 0.01, %v667_v28  ;;  %vm671_vm8 = vcmp.gt.f32.partialorder %v667_v28, 0.0 }
 0x20c   :  { %v675_v34 = vsel %vm671_vm8, %v667_v28, %v673_v30  ;;  %vm1212_vm8 = vcmask 72704  }
 0x20f   :  { %v668_v27 = vpop.f32.mrf.mxu3 }
 0x210   :  { %v669_v29 = vadd.f32 %v6676_v26, %v668_v27  ;;  %v913_v27 = vsel %vm911_vm3, %v878_v23, 0 }
 0x211   :  { %921 = vmatpush.bf16.msra.mxu3 %v913_v27 }
 0x212   :  { %v674_v31 = vmul.f32 0.01, %v669_v29  ;;  %vm672_vm9 = vcmp.gt.f32.partialorder %v669_v29, 0.0 }
 0x214   :  { %v676_v35 = vsel %vm672_vm9, %v669_v29, %v674_v31  ;;  %v1216_v29 = vsel %vm540_vm2, 4294967295, %v9085_v0  ;;  %vm1234_vm9 = vcmask 254976  }
 0x215   :  { %v681_v37 = vpack.c.bf16 %v676_v35, %v675_v34  ;;  %v7843_v31 = vsel %vm911_vm3, %v1216_v29, 0  ;;  %v958_v34 = vsel %vm953_vm4, %v7846_v33, 0  ;;  %vm1678_vm3 = vcmask 523264  }
 0x216   :  { %5725 = vmatmul.msk.bf16.vlgmr.msrb.gmra.mxu1 %vm766_vm7, %v761_v24  ;;  %v7850_v35 = vsub.f32 %v958_v34, %v958_v34  ;;  %vm907_vm7 = vcmask 211968  }
 0x217   :  { %5715 = vmatmul.msk.bf16.vlgmr.msrb.gmra.mxu0 %vm581_vm6, %v681_v37  ;;  %v6683_v37 = vld [vmem:[#allocation28] ss:$0 sm:$0xff] }
 0x218   :  { %v7853_v36 = vand.u32 4294901760, %v7850_v35 }
 0x21a   :  { %v990_v39 = vsub.f32 %v7850_v35, %v7853_v36 }
 0x235   :  { %v899_v59 = vpop.trf.xlu0 }
 0x283   :  { %v594_v42 = vpop.f32.mrf.mxu1 }
 0x284   :  { %v595_v43 = vadd.f32 %v6677_v41, %v594_v42 }
 0x286   :  { %vm598_vm10 = vcmp.gt.f32.partialorder %v595_v43, 0.0  ;;  %v599_v44 = vmul.f32 0.01, %v595_v43 }
 0x288   :  { %v600_v45 = vsel %vm598_vm10, %v595_v43, %v599_v44 }
 0x289   :  { %v605_v46 = vpack.c.bf16 %v600_v45, %v600_v45  ;;  %v7860_v45 = vand.u32 4294901760, %v990_v39 }
 0x28b   :  { %v596_v47 = vpop.f32.mrf.mxu1  ;;  %5705 = vmatmul.msk.bf16.vlgmr.msra.gmra.mxu2 %vm581_vm6, %v605_v46 }
 0x293   :  { %v782_v49 = vpop.f32.mrf.mxu1 }
 0x294   :  { %v783_v50 = vadd.f32 %v6678_v48, %v782_v49  ;;  %v710_v56 = vpop.f32.mrf.mxu0 }
 0x295   :  { %v711_v57 = vadd.f32 %v6679_v55, %v710_v56  ;;  %v5771_v56 = vld [vmem:[%s9155_s5] sm:$0xf] }
 0x296   :  { %vm786_vm11 = vcmp.gt.f32.partialorder %v783_v50, 0.0  ;;  %v787_v51 = vmul.f32 0.01, %v783_v50 }
 0x297   :  { %v717_v58 = vmul.f32 0.01, %v711_v57  ;;  %vm715_vm12 = vcmp.gt.f32.partialorder %v711_v57, 0.0 }
 0x298   :  { %v788_v52 = vsel %vm786_vm11, %v783_v50, %v787_v51 }
 0x299   :  { %v793_v53 = vpack.c.bf16 %v788_v52, %v788_v52  ;;  %v719_v63 = vsel %vm715_vm12, %v711_v57, %v717_v58  ;;  %v6403_v57 = vld [vmem:[%s9155_s5] sm:$0x10] }
 0x29a   :  { %v5772_v58 = vor.u32 %v6403_v57, %v5771_v56  ;;  %v518_v57 = vld [vmem:[%s9161_s18] sm:$0x3] }
 0x29b   :  { %v784_v54 = vpop.f32.mrf.mxu1  ;;  %5734 = vmatmul.msk.bf16.vlgmr.msrb.gmra.mxu2 %vm581_vm6, %v793_v53 }
 0x29c   :  { %v712_v60 = vpop.f32.mrf.mxu0 }
 0x29d   :  { %v713_v61 = vadd.f32 %v6679_v55, %v712_v60  ;;  %v514_v60 = vld [vmem:[%s9155_s5] sm:$0xf] }
 0x29f   :  { %vm716_vm13 = vcmp.gt.f32.partialorder %v713_v61, 0.0  ;;  %v718_v1 = vmul.f32 0.01, %v713_v61 }
 0x2a1   :  { %v720_v2 = vsel %vm716_vm13, %v713_v61, %v718_v1  ;;  %v7874_v61 = vunpack.c.l.bf16 %v514_v60  ;;  %vm1265_vm13 = vcmask 7168  }
 0x2a2   :  { %v725_v3 = vpack.c.bf16 %v720_v2, %v719_v63 }
 0x2a3   :  { %v955_v62 = vsel %vm953_vm4, %v7874_v61, 0 }
 0x2a4   :  { %5724 = vmatmul.msk.bf16.vlgmr.msrb.gmra.mxu3 %vm581_vm6, %v725_v3  ;;  %v7880_v63 = vsub.f32 %v955_v62, %v955_v62 }
 0x2a6   :  { %v7883_v1 = vand.u32 4294901760, %v7880_v63 }
 0x2a8   :  { %v982_v2 = vsub.f32 %v7880_v63, %v7883_v1 }
 0x2aa   :  { %v7888_v3 = vand.u32 4294901760, %v982_v2 }
 0x30e   :  { %v634_v7 = vpop.f32.mrf.mxu2 }
 0x30f   :  { %v635_v42 = vadd.f32 %v6680_v38, %v634_v7 }
 0x316   :  { %v636_v9 = vpop.f32.mrf.mxu2 }
 0x31e   :  { %v822_v11 = vpop.f32.mrf.mxu2 }
 0x31f   :  { %v823_v12 = vadd.f32 %v6681_v10, %v822_v11 }
 0x321   :  { %vm826_vm14 = vcmp.gt.f32.partialorder %v823_v12, 0.0  ;;  %v827_v13 = vmul.f32 0.01, %v823_v12 }
 0x323   :  { %v828_v14 = vsel %vm826_vm14, %v823_v12, %v827_v13  ;;  %v6421_v13 = vld [vmem:[%s9160_s19 + $0x8] sm:$0xff]  ;;  %vm1555_vm14 = vcmask 1040384  }
 0x324   :  { %v833_v15 = vpack.c.bf16 %v828_v14, %v828_v14 }
 0x326   :  { %v824_v16 = vpop.f32.mrf.mxu2  ;;  %5743 = vmatmul.msk.bf16.vlgmr.msra.gmra.mxu0 %vm581_vm6, %v833_v15 }
 0x327   :  { %v754_v19 = vpop.f32.mrf.mxu3  ;;  %v6420_v16 = vld [vmem:[%s9160_s19] sm:$0xff] }
 0x328   :  { %v7830_v24 = vadd.f32 %v6682_v20, %v754_v19 }
 0x32a   :  { %9157 = vst [vmem:[#allocation81_spill] sm:$0xff] %v7830_v24 }
 0x32f   :  { %v756_v25 = vpop.f32.mrf.mxu3 }
 0x330   :  { %v757_v26 = vadd.f32 %v6682_v20, %v756_v25 }
 0x332   :  { %v7834_v28 = vsel %vm540_vm2, %v757_v26, %v7826_v22 }
 0x333   :  { %9158 = vst [vmem:[#allocation82_spill] sm:$0xff] %v7834_v28  ;;  %v7840_v30 = vpack.c.bf16 %v7834_v28, %v7830_v24 }
 0x335   :  { %9159 = vst [vmem:[#allocation83_spill] sm:$0xff] %v7840_v30  ;;  %922 = vmatpush.bf16.msra.mxu3 %v7840_v30 }
 0x338   :  { %5753 = vmatmul.msk.bf16.vlgmr.msra.gmra.mxu3 %vm907_vm7, %v899_v59  ;;  %vm1979_vm7 = vcmask 67584  }
 0x3a3   :  { %v862_v40 = vpop.f32.mrf.mxu0 }
 0x3a4   :  { %v863_v41 = vadd.f32 %v6683_v37, %v862_v40 }
 0x3a6   :  { %v7857_v43 = vrot.slane %v863_v41, 1  ;;  %v960_v44 = vsel %vm650_vm0, %v863_v41, 0 }
 0x3a7   :  { %v977_v46 = vand.u32 4294901760, %v960_v44 }
 0x3a8   :  { %v7863_v47 = vsel %vm869_vm5, %v635_v42, %v7857_v43  ;;  %v1178_v48 = vmul.f32 %v7857_v43, %v7857_v43  ;;  %vm1923_vm5 = vcmask 10240  }
 0x3a9   :  { %v1012_v49 = vsub.f32 %v960_v44, %v977_v46  ;;  %978 = vmatpush.msra.mxu1 %v977_v46  ;;  %6510 = vmatpush.msra.mxu2 %v977_v46  ;;  %v1177_v50 = vmul.f32 %v7863_v47, %v7863_v47 }
 0x3aa   :  { %1071 = vmatpush.msrb.mxu3 %v977_v46  ;;  %992 = vmatmul.f32.vlgmr.msra.gmra.mxu2 %v7860_v45 }
 0x3ab   :  { %v864_v51 = vpop.f32.mrf.mxu0  ;;  %1043 = vmatpush.msrb.mxu0 %v1012_v49  ;;  %v1013_v52 = vand.u32 4294901760, %v1012_v49  ;;  %v6590_v53 = vpack.i.bf16 %v1178_v48, %v1177_v50  ;;  %984 = vmatmul.f32.vlgmr.msra.gmra.mxu1 %v7888_v3 }
 0x3ac   :  { %1046 = vmatmul.f32.vlgmr.msrb.gmra.mxu0 %v7880_v63  ;;  %1075 = vmatmul.f32.vlgmr.msrb.gmra.mxu3 %v7883_v1 }
 0x3ad   :  { %1103 = vmatpush.msrb.mxu1 %v1013_v52  ;;  %6591 = vrot.lane.b32.xlu1 %v6590_v53, %s7447_s23  ;;  %v1014_v54 = vsub.f32 %v1012_v49, %v1013_v52 }
 0x3ae   :  { %1169 = vmatpush.bf16.msra.mxu0 %v6421_v13 }
 0x3af   :  { %v1015_v55 = vand.u32 4294901760, %v1014_v54 }
 0x3b1   :  { %1016 = vmatpush.msrb.mxu2 %v1015_v55 }
 0x3b2   :  { %5754 = vmatmul.msk.f32.vlgmr.msrb.gmra.mxu2 %vm953_vm4, %v7874_v61  ;;  %1170 = vmatpush.bf16.msra.mxu0 %v6420_v16 }
 0x3b3   :  { %1129 = vmatpush.msra.mxu2 %v977_v46  ;;  %5756 = vmatmul.msk.f32.vlgmr.msrb.gmra.mxu1 %vm953_vm4, %v7874_v61 }
 0x3b4   :  { %1051 = vmatmul.f32.gmra.mxu0 %v7850_v35  ;;  %1081 = vmatmul.f32.gmra.mxu3 %v7853_v36 }
 0x3ba   :  { %5755 = vmatmul.msk.f32.gmra.mxu2 %vm953_vm4, %v7846_v33 }
 0x3bb   :  { %5757 = vmatmul.msk.f32.gmra.mxu1 %vm953_vm4, %v7846_v33  ;;  %v7910_v15 = vpop.f32.mrf.mxu3 }
 0x3c2   :  { %5758 = vmatmul.msk.f32.vlgmr.msra.gmra.mxu2 %vm953_vm4, %v7874_v61 }
 0x3c3   :  { %v7917_v19 = vpop.f32.mrf.mxu3 }
 0x3ca   :  { %5759 = vmatmul.msk.f32.gmra.mxu2 %vm953_vm4, %v7846_v33 }
 0x3e2   :  { %1196 = vxpose.xlu1.c.b16.start.end [1/1] (short) (narrow) %v5772_v58, 16 }
 0x41f   :  { %v6592_v4 = vpop.permute.xlu1 %6591 }
 0x420   :  { %v6594_v5 = vunpack.i.h.bf16 %v6592_v4  ;;  %v6593_v7 = vunpack.i.l.bf16 %v6592_v4 }
 0x422   :  { %v1188_v9 = vsel %vm581_vm6, %v7857_v43, %v6594_v5  ;;  %v1187_v10 = vsel %vm581_vm6, %v7863_v47, %v6593_v7 }
 0x423   :  { %v1189_v11 = vpack.c.bf16 %v1188_v9, %v1187_v10 }
 0x425   :  { %v1219_v12 = vand.u32 %v7843_v31, %v1189_v11 }
 0x427   :  { %1228 = vmatpush.bf16.msra.mxu3 %v1219_v12 }
 0x428   :  { %v985_v21 = vpop.f32.mrf.mxu1 }
 0x429   :  { %v1047_v20 = vpop.f32.mrf.mxu0 }
 0x42d   :  { %v993_v14 = vpop.f32.mrf.mxu2 }
 0x42f   :  { %v1076_v26 = vpop.f32.mrf.mxu3 }
 0x430   :  { %v1106_v32 = vpop.f32.mrf.mxu1 }
 0x431   :  { %v1052_v34 = vpop.f32.mrf.mxu0 }
 0x435   :  { %v1019_v17 = vpop.f32.mrf.mxu2 }
 0x436   :  { %v1020_v23 = vadd.f32 %v1019_v17, %v985_v21 }
 0x437   :  { %v1082_v40 = vpop.f32.mrf.mxu3 }
 0x438   :  { %v1048_v29 = vadd.f32 %v1047_v20, %v1020_v23  ;;  %v1110_v44 = vpop.f32.mrf.mxu1 }
 0x43a   :  { %v1077_v37 = vadd.f32 %v1076_v26, %v1048_v29 }
 0x43c   :  { %v1107_v41 = vadd.f32 %v1106_v32, %v1077_v37  ;;  %v9086_v37 = vmov 0  }
 0x43d   :  { %v1023_v25 = vpop.f32.mrf.mxu2  ;;  %6595 = vset.pattern.permute.xlu1 %v9086_v37  ;;  %6605 = vset.pattern.permute.xlu0 %v9086_v37 }
 0x43e   :  { %v1024_v27 = vadd.f32 %v1023_v25, %v993_v14 }
 0x440   :  { %v1053_v38 = vadd.f32 %v1052_v34, %v1024_v27  ;;  %v9088_v34 = vmov 1  }
 0x441   :  { %6596 = vset.pattern.permute.xlu2 %v9088_v34 }
 0x442   :  { %v1083_v42 = vadd.f32 %v1082_v40, %v1053_v38 }
 0x444   :  { %v1111_v46 = vadd.f32 %v1110_v44, %v1083_v42 }
 0x445   :  { %v1132_v39 = vpop.f32.mrf.mxu2 }
 0x446   :  { %v1133_v48 = vadd.f32 %v1132_v39, %v1107_v41 }
 0x44d   :  { %v1136_v49 = vpop.f32.mrf.mxu2 }
 0x44e   :  { %v1137_v50 = vadd.f32 %v1136_v49, %v1111_v46 }
 0x450   :  { %v7919_v51 = vpack.c.bf16 %v1137_v50, %v1133_v48 }
 0x452   :  { %5768 = vmatmul.msk.bf16.vlgmr.msra.gmra.mxu0 %vm581_vm6, %v7919_v51 }
 0x48e   :  { %v7913_v18 = vpop.trf.xlu1 }
 0x48f   :  { %5773 = vmatmul.msk.bf16.vlgmr.msra.gmra.mxu3 %vm1212_vm8, %v7913_v18 }
 0x4cf   :  { %v7948_v32 = vpop.f32.mrf.mxu0 }
 0x4d7   :  { %v7953_v39 = vpop.f32.mrf.mxu0 }
 0x512   :  { %v1230_v52 = vpop.f32.mrf.mxu3 }
 0x513   :  { %1240 = vrot.lane.b32.xlu2 %v1230_v52, %s7448_s26  ;;  %v1235_v54 = vsel %vm1234_vm9, %v1230_v52, 0.0 }
 0x51a   :  { %v1232_v53 = vpop.f32.mrf.mxu3 }
 0x53c   :  { %1236 = vadd.xlane.f32.xlu2 %v1235_v54 }
 0x56d   :  { %v1241_v55 = vpop.permute.xlu2 %1240 }
 0x56e   :  { %v1243_v56 = vsel %vm1234_vm9, %v1241_v55, 0.0 }
 0x56f   :  { %1244 = vadd.xlane.f32.xlu0 %v1243_v56 }
 0x5af   :  { %v1237_v58 = vpop.xlane.xlu2 %1236 }
 0x5b0   :  { %v1238_v59 = vmul.f32 %v1237_v58, %v518_v57 }
 0x5b2   :  { %v1247_v62 = vmul.f32 %v1238_v59, %v1238_v59 }
 0x5e2   :  { %v1245_v60 = vpop.xlane.xlu0 %1244 }
 0x5e3   :  { %v1246_v2 = vmul.f32 %v1245_v60, %v518_v57 }
 0x5e5   :  { %v1248_v4 = vsub.f32 %v1246_v2, %v1247_v62 }
 0x5e7   :  { %v1249_v5 = vmax.f32 %v1248_v4, 0.0 }
 0x5e9   :  { %v1250_v7 = vadd.f32 1e-05, %v1249_v5 }
 0x5eb   :  { %6701 = vrsqrt.f32 %v1250_v7  ;;  %vm1257_vm11 = vweird.f32 %v1250_v7 }
 0x5f1   :  { %v6702_v9 = vpop.eup %6701 }
 0x5f2   :  { %v1252_v10 = vmul.f32 %v6702_v9, %v1250_v7  ;;  %vm1258_vm10 = vweird.f32 %v6702_v9  ;;  %v516_v7 = vld [vmem:[%s9162_s28] sm:$0xff] }
 0x5f3   :  { %vm1259_vm12 = vmor %vm1257_vm11, %vm1258_vm10 }
 0x5f4   :  { %v1253_v11 = vmul.f32 %v6702_v9, %v1252_v10 }
 0x5f6   :  { %v1254_v12 = vmul.f32 0.5, %v1253_v11 }
 0x5f8   :  { %v1255_v13 = vsub.f32 1.5, %v1254_v12 }
 0x5fa   :  { %v1256_v14 = vmul.f32 %v6702_v9, %v1255_v13 }
 0x5fc   :  { %v1260_v16 = vsel %vm1259_vm12, %v6702_v9, %v1256_v14  ;;  %v517_v9 = vld [vmem:[%s9162_s28 + $0x8] sm:$0x1] }
 0x5fd   :  { %1262 = vrot.lane.b32.xlu2 %v1260_v16, %s7431_s17 }
 0x657   :  { %v1263_v17 = vpop.permute.xlu2 %1262 }
 0x658   :  { %v1266_v20 = vsel %vm1265_vm13, %v1238_v59, %v1263_v17 }
 0x659   :  { %v1268_v21 = vsel %vm650_vm0, %v1266_v20, 0 }
 0x65a   :  { %v1285_v23 = vand.u32 4294901760, %v1268_v21 }
 0x65c   :  { %v1320_v25 = vsub.f32 %v1268_v21, %v1285_v23  ;;  %1286 = vmatpush.msra.mxu1 %v1285_v23  ;;  %1379 = vmatpush.msrb.mxu3 %v1285_v23 }
 0x65d   :  { %1292 = vmatmul.f32.vlgmr.msra.gmra.mxu1 %v7888_v3  ;;  %1383 = vmatmul.f32.vlgmr.msrb.gmra.mxu3 %v7883_v1 }
 0x65e   :  { %1351 = vmatpush.msrb.mxu0 %v1320_v25  ;;  %v1321_v26 = vand.u32 4294901760, %v1320_v25 }
 0x65f   :  { %1354 = vmatmul.f32.vlgmr.msrb.gmra.mxu0 %v7880_v63 }
 0x660   :  { %1411 = vmatpush.msrb.mxu1 %v1321_v26  ;;  %v1322_v27 = vsub.f32 %v1320_v25, %v1321_v26  ;;  %v7972_v25 = vld [vmem:[%s9163_s14] sm:$0xff]  ;;  %v7977_v26 = vld [vmem:[%s9154_s22 + $0x10] sm:$0x3] }
 0x662   :  { %v1323_v29 = vand.u32 4294901760, %v1322_v27  ;;  %v1532_v27 = vunpack.c.l.b16 %v7977_v26 }
 0x664   :  { %1324 = vmatpush.msrb.mxu2 %v1323_v29  ;;  %v7980_v29 = vpack.c.b16 %v1532_v27, %v1532_v27 }
 0x665   :  { %5774 = vmatmul.msk.f32.vlgmr.msrb.gmra.mxu2 %vm953_vm4, %v7874_v61  ;;  %1300 = vmatmul.f32.gmra.mxu1 %v7860_v45 }
 0x666   :  { %1437 = vmatpush.msra.mxu2 %v1285_v23  ;;  %1389 = vmatmul.f32.gmra.mxu3 %v7853_v36 }
 0x667   :  { %1359 = vmatmul.f32.gmra.mxu0 %v7850_v35 }
 0x66d   :  { %5775 = vmatmul.msk.f32.gmra.mxu2 %vm953_vm4, %v7846_v33  ;;  %5776 = vmatmul.msk.f32.vlgmr.msrb.gmra.mxu1 %vm953_vm4, %v7874_v61 }
 0x675   :  { %5778 = vmatmul.msk.f32.vlgmr.msra.gmra.mxu2 %vm953_vm4, %v7874_v61  ;;  %5777 = vmatmul.msk.f32.gmra.mxu1 %vm953_vm4, %v7846_v33 }
 0x67d   :  { %5779 = vmatmul.msk.f32.gmra.mxu2 %vm953_vm4, %v7846_v33 }
 0x6da   :  { %v1293_v38 = vpop.f32.mrf.mxu1 }
 0x6dc   :  { %v1355_v42 = vpop.f32.mrf.mxu0 }
 0x6e0   :  { %v1384_v46 = vpop.f32.mrf.mxu3 }
 0x6e2   :  { %v1301_v40 = vpop.f32.mrf.mxu1 }
 0x6e4   :  { %v1360_v54 = vpop.f32.mrf.mxu0 }
 0x6e8   :  { %v1327_v41 = vpop.f32.mrf.mxu2 }
 0x6e9   :  { %v1328_v44 = vadd.f32 %v1327_v41, %v1293_v38  ;;  %v1390_v57 = vpop.f32.mrf.mxu3  ;;  %v7984_v38 = vld [vmem:[%s9163_s14 + $0x8] sm:$0xff] }
 0x6ea   :  { %v1414_v50 = vpop.f32.mrf.mxu1 }
 0x6eb   :  { %v1356_v48 = vadd.f32 %v1355_v42, %v1328_v44 }
 0x6ed   :  { %v1385_v52 = vadd.f32 %v1384_v46, %v1356_v48 }
 0x6ef   :  { %v1415_v55 = vadd.f32 %v1414_v50, %v1385_v52 }
 0x6f0   :  { %v1331_v49 = vpop.f32.mrf.mxu2 }
 0x6f1   :  { %v1332_v53 = vadd.f32 %v1331_v49, %v1301_v40  ;;  %v508_v40 = vld [vmem:[%s9163_s14 + $0x10] sm:$0x3] }
 0x6f2   :  { %v1418_v62 = vpop.f32.mrf.mxu1  ;;  %v1479_v41 = vunpack.c.l.b16 %v508_v40 }
 0x6f3   :  { %v1361_v56 = vadd.f32 %v1360_v54, %v1332_v53 }
 0x6f4   :  { %v7989_v42 = vpack.c.b16 %v1479_v41, %v1479_v41 }
 0x6f5   :  { %v1391_v60 = vadd.f32 %v1390_v57, %v1361_v56 }
 0x6f7   :  { %v1419_v2 = vadd.f32 %v1418_v62, %v1391_v60 }
 0x6f8   :  { %v1440_v58 = vpop.f32.mrf.mxu2 }
 0x6f9   :  { %v1441_v59 = vadd.f32 %v1440_v58, %v1415_v55 }
 0x6fb   :  { %1460 = vperm.xlu2 %6596, %v1441_v59   ;;  %1449 = vperm.xlu1 %6595, %v1441_v59  }
 0x700   :  { %v1444_v4 = vpop.f32.mrf.mxu2 }
 0x701   :  { %v1445_v5 = vadd.f32 %v1444_v4, %v1419_v2 }
 0x703   :  { %6597 = vset.pattern.permute.xlu2 %v9086_v37 }
 0x704   :  { %1454 = vperm.xlu2 %6597, %v1445_v5  }
 0x70c   :  { %6598 = vset.pattern.permute.xlu2 %v9088_v34 }
 0x70d   :  { %1464 = vperm.xlu2 %6598, %v1445_v5  }
 0x715   :  { %6599 = vset.pattern.permute.xlu2 %v9086_v37 }
 0x716   :  { %931 = vperm.xlu2 %6599, %v516_v7  }
 0x71e   :  { %936 = vperm.xlu2 %6599, %v517_v9  }
 0x744   :  { %1535 = vxpose.xlu2.c.b16.start [1/3] (short) (narrow) %v7818_v6, 16 }
 0x754   :  { %1536 = vxpose.xlu2.c.b16.cont [2/3] (short) (narrow) %v7822_v8, 16 }
 0x755   :  { %v1461_v10 = vpop.permute.xlu2 %1460 }
 0x75e   :  { %v1455_v11 = vpop.permute.xlu2 %1454 }
 0x75f   :  { %v1458_v14 = vsub.f32 %v7857_v43, %v1455_v11 }
 0x764   :  { %1537 = vxpose.xlu2.c.b16.end [3/3] (short) (narrow) %v7980_v29, 16 }
 0x767   :  { %v1465_v12 = vpop.permute.xlu2 %1464 }
 0x768   :  { %v7964_v17 = vmul.f32 %v1465_v12, %v1458_v14 }
 0x76d   :  { %v1450_v13 = vpop.permute.xlu1 %1449 }
 0x76e   :  { %v1457_v16 = vsub.f32 %v7863_v47, %v1450_v13 }
 0x770   :  { %v7966_v20 = vmul.f32 %v1461_v10, %v1457_v16  ;;  %v932_v48 = vpop.permute.xlu2 %931 }
 0x771   :  { %v939_v52 = vmul.f32 %v932_v48, %v7910_v15  ;;  %v1556_v15 = vsel %vm1555_vm14, 4294967295, %v9085_v0 }
 0x772   :  { %v1469_v21 = vpack.c.bf16 %v7964_v17, %v7966_v20  ;;  %v8009_v9 = vsel %vm650_vm0, %v1556_v15, 0 }
 0x773   :  { %v943_v55 = vrot.slane %v939_v52, 6  ;;  %v6433_v52 = vld [vmem:[%s9167_s1 + $0x8] sm:$0xff] }
 0x774   :  { %v1493_v23 = vand.u32 %v1469_v21, %v7843_v31 }
 0x775   :  { %v7997_v57 = vsel %vm650_vm0, %v7826_v22, %v943_v55 }
 0x776   :  { %1502 = vmatpush.bf16.msra.mxu0 %v1493_v23  ;;  %9164 = vst [vmem:[#allocation84_spill] sm:$0xff] %v7997_v57 }
 0x778   :  { %v937_v50 = vpop.permute.xlu2 %936 }
 0x779   :  { %5788 = vmatmul.msk.bf16.vlgmr.msra.gmra.mxu0 %vm1212_vm8, %v7972_v25  ;;  %v940_v53 = vmul.f32 %v937_v50, %v7917_v19  ;;  %v6422_v50 = vld [vmem:[%s9166_s20] sm:$0xff] }
 0x77b   :  { %v944_v56 = vrot.slane %v940_v53, 6  ;;  %v6432_v53 = vld [vmem:[%s9167_s1] sm:$0xff] }
 0x77d   :  { %v8000_v58 = vsel %vm650_vm0, %v943_v55, %v944_v56 }
 0x77e   :  { %9165 = vst [vmem:[#allocation85_spill] sm:$0xff] %v8000_v58  ;;  %v8034_v15 = vpack.c.bf16 %v8000_v58, %v8000_v58 }
 0x780   :  { %9170 = vst [vmem:[#allocation87_spill] sm:$0xff] %v8034_v15 }
 0x789   :  { %5789 = vmatmul.msk.bf16.gmra.mxu0 %vm1212_vm8, %v7984_v38 }
 0x799   :  { %5790 = vmatmul.msk.bf16.gmra.mxu0 %vm1212_vm8, %v7989_v42 }
 0x7f6   :  { %v1504_v44 = vpop.f32.mrf.mxu0 }
 0x7f7   :  { %v1505_v10 = vadd.f32 %v1504_v44, %v7830_v24  ;;  %v8013_v44 = vpop.trf.xlu2 }
 0x7f9   :  { %v1518_v23 = vmax.f32 %v1505_v10, 0.0 }
 0x7fe   :  { %v1506_v46 = vpop.f32.mrf.mxu0 }
 0x7ff   :  { %v1507_v4 = vadd.f32 %v1506_v46, %v7834_v28  ;;  %v1523_v46 = vadd.f32 1e-07, %v1518_v23  ;;  %v5829_v23 = vld [vmem:[%s9168_s7 + $0x38] sm:$0xf0] }
 0x801   :  { %v1519_v14 = vmax.f32 %v1507_v4, 0.0 }
 0x803   :  { %v1524_v40 = vadd.f32 1e-07, %v1519_v14  ;;  %v6431_v14 = vld [vmem:[%s9168_s7 + $0x34] sm:$0xf0] }
 0x805   :  { %v1528_v48 = vpack.c.bf16 %v1524_v40, %v1523_v46  ;;  %v6429_v40 = vld [vmem:[%s9168_s7 + $0x24] sm:$0xf0]  ;;  %v6428_v46 = vld [vmem:[%s9168_s7 + $0x24] sm:$0xf] }
 0x806   :  { %v1509_v49 = vpop.f32.mrf.mxu0 }
 0x807   :  { %v1510_v19 = vadd.f32 %v7826_v22, %v1509_v49  ;;  %v6423_v49 = vld [vmem:[%s9166_s20 + $0x8] sm:$0xff] }
 0x808   :  { %1605 = vmatpush.bf16.msra.mxu1 %v6423_v49 }
 0x809   :  { %v1520_v11 = vmax.f32 %v1510_v19, 0.0 }
 0x80b   :  { %v1525_v27 = vadd.f32 1e-07, %v1520_v11 }
 0x80c   :  { %1606 = vmatpush.bf16.msra.mxu1 %v6422_v50 }
 0x80e   :  { %v1511_v54 = vpop.f32.mrf.mxu0 }
 0x80f   :  { %v1512_v60 = vadd.f32 %v1511_v54, %v7997_v57 }
 0x810   :  { %1741 = vmatpush.bf16.msrb.mxu1 %v6433_v52  ;;  %v5811_v52 = vld [vmem:[%s9168_s7 + $0x10] sm:$0xf] }
 0x811   :  { %v1521_v5 = vmax.f32 %v1512_v60, 0.0 }
 0x813   :  { %v1526_v16 = vadd.f32 1e-07, %v1521_v5 }
 0x814   :  { %1742 = vmatpush.bf16.msrb.mxu1 %v6432_v53  ;;  %v6427_v53 = vld [vmem:[%s9168_s7 + $0x14] sm:$0xf0] }
 0x815   :  { %v1529_v41 = vpack.c.bf16 %v1526_v16, %v1525_v27  ;;  %v6430_v16 = vld [vmem:[%s9168_s7 + $0x34] sm:$0xf]  ;;  %v5819_v27 = vld [vmem:[%s9168_s7 + $0x20] sm:$0xf] }
 0x816   :  { %v1514_v59 = vpop.f32.mrf.mxu0  ;;  %v5820_v49 = vor.u32 %v6429_v40, %v5819_v27 }
 0x817   :  { %v1515_v62 = vadd.f32 %v1514_v59, %v8000_v58 }
 0x819   :  { %v1522_v2 = vmax.f32 %v1515_v62, 0.0  ;;  %v8028_v62 = vpack.c.bf16 %v7997_v57, %v7826_v22 }
 0x81b   :  { %v1527_v7 = vadd.f32 1e-07, %v1522_v2  ;;  %9169 = vst [vmem:[#allocation86_spill] sm:$0xff] %v8028_v62  ;;  %v6685_v2 = vld [vmem:[#allocation29] ss:$0 sm:$0xff] }
 0x81d   :  { %v1530_v12 = vpack.c.bf16 %v1527_v7, %v1527_v7 }
 0x81e   :  { %v1516_v13 = vpop.f32.mrf.mxu0 }
 0x81f   :  { %v1559_v21 = vand.u32 %v8009_v9, %v1530_v12  ;;  %v5827_v13 = vld [vmem:[%s9168_s7 + $0x30] sm:$0xf] }
 0x821   :  { %1566 = vmatpush.bf16.msra.mxu3 %v1559_v21  ;;  %v5828_v21 = vor.u32 %v6431_v14, %v5827_v13  ;;  %v5805_v14 = vld [vmem:[%s9168_s7 + $0x8] sm:$0xf0] }
 0x823   :  { %1686 = vmatpush.bf16.msrb.mxu2 %v5828_v21 }
 0x825   :  { %1567 = vmatpush.bf16.msra.mxu3 %v1529_v41  ;;  %v5832_v41 = vor.u32 %v6430_v16, %v5829_v23 }
 0x827   :  { %1687 = vmatpush.bf16.msrb.mxu2 %v5820_v49 }
 0x829   :  { %1568 = vmatpush.bf16.msra.mxu3 %v1528_v48  ;;  %v5821_v48 = vld [vmem:[%s9168_s7 + $0x28] sm:$0xf0] }
 0x82a   :  { %v5824_v50 = vor.u32 %v6428_v46, %v5821_v48 }
 0x82c   :  { %5791 = vmatmul.msk.bf16.vlgmr.msra.gmra.mxu3 %vm1551_vm15, %v8013_v44 }
 0x82d   :  { %1700 = vmatpush.bf16.msrb.mxu3 %v5832_v41 }
 0x831   :  { %1701 = vmatpush.bf16.msrb.mxu3 %v5824_v50  ;;  %v1632_v50 = vld [vmem:[%s9171_s12] sm:$0x3] }
 0x8af   :  { %v1570_v54 = vpop.f32.mrf.mxu3 }
 0x8b0   :  { %v1571_v56 = vadd.f32 %v1570_v54, %v7966_v20  ;;  %v6426_v54 = vld [vmem:[%s9168_s7 + $0x14] sm:$0xf] }
 0x8b7   :  { %v1572_v55 = vpop.f32.mrf.mxu3 }
 0x8b8   :  { %v1573_v59 = vadd.f32 %v1572_v55, %v7964_v17  ;;  %v5813_v55 = vld [vmem:[%s9168_s7 + $0x18] sm:$0xf0] }
 0x8ba   :  { %v1579_v60 = vpack.c.bf16 %v1573_v59, %v1571_v56  ;;  %v5812_v56 = vor.u32 %v6427_v53, %v5811_v52  ;;  %v1634_v52 = vperm.slane %v1632_v50, 0  ;;  %v1635_v53 = vperm.slane %v1632_v50, 1 }
 0x8bc   :  { %5800 = vmatmul.msk.bf16.vlgmr.msra.gmra.mxu1 %vm581_vm6, %v1579_v60  ;;  %v5816_v60 = vor.u32 %v6426_v54, %v5813_v55  ;;  %1688 = vmatpush.bf16.msrb.mxu2 %v5812_v56 }
 0x8be   :  { %1702 = vmatpush.bf16.msrb.mxu3 %v5816_v60 }
 0x8cc   :  { %5843 = vmatmul.msk.bf16.vlgmr.msrb.gmra.mxu1 %vm581_vm6, %v7840_v30 }
 0x8dc   :  { %5844 = vmatmul.msk.bf16.gmra.mxu1 %vm581_vm6, %v8028_v62 }
 0x8ec   :  { %5845 = vmatmul.msk.bf16.gmra.mxu1 %vm581_vm6, %v8034_v15 }
 0x939   :  { %v1608_v19 = vpop.f32.mrf.mxu1 }
 0x93a   :  { %v1609_v5 = vadd.f32 %v6685_v2, %v1608_v19 }
 0x941   :  { %v1610_v4 = vpop.f32.mrf.mxu1 }
 0x942   :  { %v1611_v7 = vadd.f32 %v6685_v2, %v1610_v4 }
 0x944   :  { %v6600_v10 = vpack.i.bf16 %v1611_v7, %v1609_v5  ;;  %v5803_v5 = vld [vmem:[%s9168_s7] sm:$0xf]  ;;  %v6425_v7 = vld [vmem:[%s9168_s7 + $0x4] sm:$0xf0] }
 0x945   :  { %v5804_v13 = vor.u32 %v6425_v7, %v5803_v5 }
 0x946   :  { %6601 = vrot.lane.b32.xlu0 %v6600_v10, %s7447_s23  ;;  %v6424_v10 = vld [vmem:[%s9168_s7 + $0x4] sm:$0xf] }
 0x947   :  { %v5808_v16 = vor.u32 %v6424_v10, %v5805_v14  ;;  %1689 = vmatpush.bf16.msrb.mxu2 %v5804_v13 }
 0x949   :  { %v8039_v11 = vpop.f32.mrf.mxu1  ;;  %1703 = vmatpush.bf16.msrb.mxu3 %v5808_v16 }
 0x951   :  { %v8041_v12 = vpop.f32.mrf.mxu1 }
 0x959   :  { %v8055_v59 = vpop.f32.mrf.mxu1 }
 0x961   :  { %v8057_v19 = vpop.f32.mrf.mxu1 }
 0x969   :  { %v8059_v2 = vpop.f32.mrf.mxu1 }
 0x971   :  { %v1756_v4 = vpop.f32.mrf.mxu1 }
 0x9b8   :  { %v6602_v21 = vpop.permute.xlu0 %6601 }
 0x9b9   :  { %v6604_v23 = vunpack.i.h.bf16 %v6602_v21  ;;  %v6603_v27 = vunpack.i.l.bf16 %v6602_v21 }
 0x9bb   :  { %v1622_v40 = vsel %vm581_vm6, %v7964_v17, %v6604_v23  ;;  %v1621_v41 = vsel %vm581_vm6, %v7966_v20, %v6603_v27 }
 0x9bc   :  { %v1631_v46 = vpack.c.bf16 %v1622_v40, %v1621_v41  ;;  %v6406_v41 = vld [vmem:[%s9172_s2 + $0x10] sm:$0xff] }
 0x9be   :  { %5833 = vmatmul.msk.bf16.vlgmr.msrb.gmra.mxu2 %vm1678_vm3, %v1631_v46  ;;  %5834 = vmatmul.msk.bf16.vlgmr.msrb.gmra.mxu3 %vm1678_vm3, %v1631_v46  ;;  %v6405_v46 = vld [vmem:[%s9172_s2 + $0x8] sm:$0xff] }
 0xa41   :  { %v1691_v48 = vpop.f32.mrf.mxu2  ;;  %v1705_v49 = vpop.f32.mrf.mxu3 }
 0xa42   :  { %v1692_v56 = vadd.f32 %v1691_v48, %v1634_v52  ;;  %v8072_v60 = vadd.f32 %v1705_v49, %v1635_v53  ;;  %v6404_v48 = vld [vmem:[%s9172_s2] sm:$0xff] }
 0xa49   :  { %v1693_v54 = vpop.f32.mrf.mxu2  ;;  %v1707_v55 = vpop.f32.mrf.mxu3 }
 0xa4a   :  { %v1694_v17 = vadd.f32 %v1693_v54, %v1634_v52  ;;  %v8074_v4 = vadd.f32 %v1707_v55, %v1635_v53 }
 0xa4c   :  { %v1788_v20 = vpack.c.bf16 %v8074_v4, %v8072_v60  ;;  %v1758_v5 = vpack.c.bf16 %v1694_v17, %v1692_v56 }
 0xa4e   :  { %v1790_v7 = vand.u32 %v1788_v20, %v7843_v31  ;;  %1760 = vrot.lane.b32.xlu1 %v1758_v5, %s7426_s25  ;;  %v1825_v10 = vand.u32 %v1758_v5, %v7843_v31 }
 0xa50   :  { %1799 = vmatpush.bf16.msra.mxu3 %v1790_v7  ;;  %1834 = vmatpush.bf16.msrb.mxu0 %v1825_v10 }
 0xa53   :  { %5849 = vmatmul.msk.bf16.vlgmr.msra.gmra.mxu3 %vm1212_vm8, %v7972_v25  ;;  %5852 = vmatmul.msk.bf16.vlgmr.msrb.gmra.mxu0 %vm1212_vm8, %v7818_v6 }
 0xa63   :  { %5850 = vmatmul.msk.bf16.gmra.mxu3 %vm1212_vm8, %v7984_v38  ;;  %5853 = vmatmul.msk.bf16.gmra.mxu0 %vm1212_vm8, %v7822_v8 }
 0xa73   :  { %5851 = vmatmul.msk.bf16.gmra.mxu3 %vm1212_vm8, %v7989_v42  ;;  %5854 = vmatmul.msk.bf16.gmra.mxu0 %vm1212_vm8, %v7980_v29 }
 0xac0   :  { %v1761_v13 = vpop.permute.xlu1 %1760 }
 0xac1   :  { %v1763_v14 = vand.u32 %v1761_v13, %v7843_v31 }
 0xac3   :  { %1772 = vmatpush.bf16.msra.mxu2 %v1763_v14 }
 0xac6   :  { %5846 = vmatmul.msk.bf16.vlgmr.msra.gmra.mxu2 %vm1212_vm8, %v7972_v25  ;;  %v6407_v25 = vld [vmem:[%s9172_s2 + $0x18] sm:$0xff] }
 0xac7   :  { %1895 = vmatpush.bf16.msra.mxu1 %v6407_v25 }
 0xacb   :  { %1896 = vmatpush.bf16.msra.mxu1 %v6406_v41 }
 0xacf   :  { %1897 = vmatpush.bf16.msra.mxu1 %v6405_v46 }
 0xad0   :  { %v1836_v40 = vpop.f32.mrf.mxu0 }
 0xad3   :  { %1898 = vmatpush.bf16.msra.mxu1 %v6404_v48 }
 0xad6   :  { %5847 = vmatmul.msk.bf16.gmra.mxu2 %vm1212_vm8, %v7984_v38  ;;  %v8098_v6 = vpop.f32.mrf.mxu3 }
 0xad8   :  { %v1838_v38 = vpop.f32.mrf.mxu0 }
 0xade   :  { %v8100_v8 = vpop.f32.mrf.mxu3 }
 0xae0   :  { %v1841_v49 = vpop.f32.mrf.mxu0 }
 0xae6   :  { %5848 = vmatmul.msk.bf16.gmra.mxu2 %vm1212_vm8, %v7989_v42  ;;  %v8104_v16 = vpop.f32.mrf.mxu3 }
 0xae8   :  { %v1843_v50 = vpop.f32.mrf.mxu0 }
 0xaee   :  { %v8106_v21 = vpop.f32.mrf.mxu3 }
 0xaf0   :  { %v1846_v53 = vpop.f32.mrf.mxu0 }
 0xaf6   :  { %v8108_v23 = vpop.f32.mrf.mxu3 }
 0xaf8   :  { %v1848_v17 = vpop.f32.mrf.mxu0 }
 0xafe   :  { %v1813_v27 = vpop.f32.mrf.mxu3 }
 0xb49   :  { %v1774_v52 = vpop.f32.mrf.mxu2 }
 0xb4a   :  { %v1775_v54 = vadd.f32 %v1774_v52, %v8039_v11 }
 0xb4c   :  { %v1850_v20 = vmul.f32 %v1836_v40, %v1775_v54 }
 0xb51   :  { %v1776_v55 = vpop.f32.mrf.mxu2 }
 0xb52   :  { %v1777_v56 = vadd.f32 %v1776_v55, %v8041_v12 }
 0xb54   :  { %v1851_v5 = vmul.f32 %v1838_v38, %v1777_v56 }
 0xb56   :  { %v1855_v7 = vpack.c.bf16 %v1851_v5, %v1850_v20 }
 0xb58   :  { %5871 = vmatmul.msk.bf16.vlgmr.msra.gmra.mxu1 %vm1678_vm3, %v1855_v7 }
 0xb59   :  { %v1779_v10 = vpop.f32.mrf.mxu2 }
 0xb5a   :  { %v1780_v13 = vadd.f32 %v1779_v10, %v8055_v59 }
 0xb5c   :  { %v1852_v25 = vmul.f32 %v1841_v49, %v1780_v13 }
 0xb61   :  { %v1781_v14 = vpop.f32.mrf.mxu2 }
 0xb62   :  { %v1782_v27 = vadd.f32 %v1781_v14, %v8057_v19 }
 0xb64   :  { %v1853_v41 = vmul.f32 %v1843_v50, %v1782_v27 }
 0xb66   :  { %v1856_v46 = vpack.c.bf16 %v1853_v41, %v1852_v25 }
 0xb68   :  { %5872 = vmatmul.msk.bf16.gmra.mxu1 %vm1678_vm3, %v1856_v46 }
 0xb69   :  { %v1784_v48 = vpop.f32.mrf.mxu2 }
 0xb6a   :  { %v1785_v52 = vadd.f32 %v1784_v48, %v8059_v2 }
 0xb6c   :  { %v1854_v40 = vmul.f32 %v1846_v53, %v1785_v52 }
 0xb6e   :  { %v1857_v38 = vpack.c.bf16 %v1854_v40, %v1854_v40 }
 0xb71   :  { %v1786_v55 = vpop.f32.mrf.mxu2 }
 0xb78   :  { %5873 = vmatmul.msk.bf16.gmra.mxu1 %vm1678_vm3, %v1857_v38 }
 0xbd5   :  { %v1900_v54 = vpop.f32.mrf.mxu1 }
 0xbd6   :  { %v1914_v5 = vmul.f32 0.17677669, %v1900_v54 }
 0xbd8   :  { %v1919_v14 = vsel %vm953_vm4, %v1914_v5, inf }
 0xbdd   :  { %v1902_v56 = vpop.f32.mrf.mxu1 }
 0xbde   :  { %v1915_v49 = vmul.f32 0.17677669, %v1902_v56 }
 0xbe0   :  { %v1920_v41 = vsel %vm953_vm4, %v1915_v49, inf }
 0xbe5   :  { %v1905_v17 = vpop.f32.mrf.mxu1 }
 0xbe6   :  { %v1916_v50 = vmul.f32 0.17677669, %v1905_v17 }
 0xbe8   :  { %v1921_v46 = vsel %vm953_vm4, %v1916_v50, inf }
 0xbed   :  { %v1907_v20 = vpop.f32.mrf.mxu1 }
 0xbee   :  { %v1917_v7 = vmul.f32 0.17677669, %v1907_v20 }
 0xbf0   :  { %v1922_v27 = vsel %vm953_vm4, %v1917_v7, inf }
 0xbf1   :  { %v1927_v48 = vmin.f32 %v1921_v46, %v1922_v27  ;;  %v509_v46 = vld [vmem:[%s9154_s22] sm:$0xff]  }
 0xbf5   :  { %v1910_v10 = vpop.f32.mrf.mxu1 }
 0xbf6   :  { %v1918_v13 = vmul.f32 0.17677669, %v1910_v10 }
 0xbf8   :  { %v1924_v53 = vsel %vm1923_vm5, %v1918_v13, inf }
 0xbf9   :  { %v1925_v25 = vmin.f32 %v1919_v14, %v1924_v53  ;;  %v9173_v14 = vmov 1  }
 0xbfb   :  { %v1926_v52 = vmin.f32 %v1925_v25, %v1920_v41 }
 0xbfd   :  { %v1928_v55 = vmin.f32 %v1926_v52, %v1927_v48  ;;  %v1912_v40 = vpop.f32.mrf.mxu1  ;;  %v8170_v48 = vunpack.c.l.bf16 %v509_v46  ;;  %v512_v52 = vld [vmem:[%s9154_s22 + $0x8] sm:$0xff]  }
 0xbfe   :  { %v8173_v40 = vunpack.c.h.bf16 %v509_v46 }
 0xbff   :  { %v1929_v38 = vrot.slane %v1928_v55, 4  ;;  %9175 = vst [vmem:[#allocation88_spill] sm:$0xff] %v8170_v48 }
 0xc00   :  { %9176 = vst [vmem:[#allocation89_spill] sm:$0xff] %v8173_v40 }
 0xc01   :  { %v1930_v54 = vmin.f32 %v1928_v55, %v1929_v38 }
 0xc03   :  { %v1931_v56 = vrot.slane %v1930_v54, 2 }
 0xc05   :  { %v1932_v17 = vmin.f32 %v1930_v54, %v1931_v56 }
 0xc07   :  { %v1933_v20 = vrot.slane %v1932_v17, 1 }
 0xc09   :  { %v1934_v10 = vmin.f32 %v1932_v17, %v1933_v20  ;;  %v8180_v20 = vunpack.c.l.bf16 %v512_v52 }
 0xc0b   :  { %v8127_v0 = vsub.f32 %v1918_v13, %v1934_v10  ;;  %v8129_v37 = vsub.f32 %v1917_v7, %v1934_v10  ;;  %v8131_v34 = vsub.f32 %v1914_v5, %v1934_v10  ;;  %v8140_v13 = vsub.f32 %v1915_v49, %v1934_v10  ;;  %v6684_v49 = vld [vmem:[#allocation35] ss:$0 sm:$0xff] }
 0xc0c   :  { %v9174_v7 = vmov 0   ;;  %v8145_v5 = vsub.f32 %v1916_v50, %v1934_v10  ;;  %v8155_v27 = vadd.f32 %v6684_v49, %v7953_v39  ;;  %v8162_v50 = vadd.f32 %v6684_v49, %v7948_v32 }
 0xc0d   :  { %1967 = vperm.xlu1 %6595, %v8127_v0   ;;  %1962 = vperm.xlu2 %6599, %v8129_v37   ;;  %v8168_v39 = vunpack.c.l.bf16 %v7977_v26 }
 0xc0e   :  { %1947 = vperm.xlu0 %6605, %v8131_v34  }
 0xc15   :  { %6606 = vset.pattern.permute.xlu1 %v9173_v14 }
 0xc16   :  { %6607 = vset.pattern.permute.xlu0 %v9173_v14  ;;  %1992 = vperm.xlu1 %6606, %v8131_v34  }
 0xc17   :  { %2008 = vperm.xlu0 %6607, %v8127_v0  }
 0xc1e   :  { %6608 = vset.pattern.permute.xlu1 %v9174_v7 }
 0xc1f   :  { %1996 = vperm.xlu0 %6607, %v8140_v13   ;;  %1952 = vperm.xlu1 %6608, %v8140_v13  }
 0xc27   :  { %2004 = vperm.xlu0 %6607, %v8129_v37   ;;  %1957 = vperm.xlu1 %6608, %v8145_v5  }
 0xc2f   :  { %2181 = vrot.lane.b32.xlu0 %v8074_v4, %s7426_s25  ;;  %6609 = vset.pattern.permute.xlu1 %v9173_v14 }
 0xc30   :  { %2000 = vperm.xlu1 %6609, %v8145_v5   ;;  %6615 = vset.pattern.permute.xlu0 %v9174_v7 }
 0xc37   :  { %2264 = vrot.lane.b32.xlu0 %v8155_v27, %s7448_s26 }
 0xc38   :  { %2179 = vrot.lane.b32.xlu1 %v8072_v60, %s7426_s25  ;;  %v8175_v60 = vunpack.c.h.bf16 %v512_v52 }
 0xc3a   :  { %9177 = vst [vmem:[#allocation90_spill] sm:$0xff] %v8175_v60 }
 0xc40   :  { %2262 = vrot.lane.b32.xlu1 %v8162_v50, %s7448_s26 }
 0xc67   :  { %v1963_v56 = vpop.permute.xlu2 %1962 }
 0xc68   :  { %v1973_v26 = vmul.f32 %v1963_v56, %v8175_v60 }
 0xc7f   :  { %v1968_v4 = vpop.permute.xlu1 %1967 }
 0xc80   :  { %v1948_v53 = vpop.permute.xlu0 %1947  ;;  %v1974_v32 = vmul.f32 %v1968_v4, %v8168_v39 }
 0xc81   :  { %v1970_v38 = vmul.f32 %v1948_v53, %v8170_v48  ;;  %v1978_v53 = vsel %vm1212_vm8, %v1973_v26, -inf }
 0xc82   :  { %v1980_v10 = vsel %vm1979_vm7, %v1974_v32, -inf }
 0xc83   :  { %v1975_v49 = vsel %vm1212_vm8, %v1970_v38, -inf }
 0xc84   :  { %v1981_v62 = vmax.f32 %v1975_v49, %v1980_v10 }
 0xc88   :  { %v1993_v25 = vpop.permute.xlu1 %1992 }
 0xc89   :  { %v2009_v41 = vpop.permute.xlu0 %2008 }
 0xc8a   :  { %v2015_v52 = vmul.f32 %v2009_v41, %v8168_v39 }
 0xc91   :  { %v1953_v55 = vpop.permute.xlu1 %1952  ;;  %v1997_v54 = vpop.permute.xlu0 %1996 }
 0xc92   :  { %v1971_v17 = vmul.f32 %v1953_v55, %v8173_v40  ;;  %v2011_v55 = vmul.f32 %v1993_v25, %v8170_v48  ;;  %v2012_v32 = vmul.f32 %v1997_v54, %v8173_v40 }
 0xc94   :  { %v1976_v15 = vsel %vm1212_vm8, %v1971_v17, -inf  ;;  %v2016_v22 = vsel %vm1212_vm8, %v2011_v55, -inf  ;;  %v2020_v17 = vsel %vm1979_vm7, %v2015_v52, -inf }
 0xc95   :  { %v1982_v24 = vmax.f32 %v1981_v62, %v1976_v15 }
 0xc99   :  { %v1958_v46 = vpop.permute.xlu1 %1957  ;;  %v2005_v28 = vpop.permute.xlu0 %2004 }
 0xc9a   :  { %v1972_v4 = vmul.f32 %v1958_v46, %v8180_v20  ;;  %v2014_v10 = vmul.f32 %v2005_v28, %v8175_v60  ;;  %v2017_v46 = vsel %vm1212_vm8, %v2012_v32, -inf }
 0xc9c   :  { %v1977_v30 = vsel %vm1212_vm8, %v1972_v4, -inf  ;;  %v2021_v4 = vmax.f32 %v2016_v22, %v2020_v17 }
 0xc9d   :  { %v1983_v56 = vmax.f32 %v1977_v30, %v1978_v53  ;;  %v2019_v30 = vsel %vm1212_vm8, %v2014_v10, -inf }
 0xc9e   :  { %v2022_v15 = vmax.f32 %v2021_v4, %v2017_v46  ;;  %v6774_v46 = vld [vmem:[%s9154_s22 + $0x8] sm:$0xff] }
 0xc9f   :  { %v1984_v38 = vmax.f32 %v1982_v24, %v1983_v56 }
 0xca1   :  { %v1985_v49 = vrot.slane %v1984_v38, 4 }
 0xca2   :  { %v2001_v26 = vpop.permute.xlu1 %2000 }
 0xca3   :  { %v2013_v25 = vmul.f32 %v2001_v26, %v8180_v20  ;;  %v1986_v41 = vmax.f32 %v1984_v38, %v1985_v49  ;;  %v6773_v49 = vld [vmem:[%s9154_s22] sm:$0xff] }
 0xca5   :  { %v2018_v62 = vsel %vm1212_vm8, %v2013_v25, -inf  ;;  %v1987_v54 = vrot.slane %v1986_v41, 2 }
 0xca6   :  { %v2023_v24 = vmax.f32 %v2018_v62, %v2019_v30 }
 0xca7   :  { %v1988_v28 = vmax.f32 %v1986_v41, %v1987_v54 }
 0xca8   :  { %v2024_v53 = vmax.f32 %v2022_v15, %v2023_v24 }
 0xca9   :  { %v1989_v60 = vrot.slane %v1988_v28, 1 }
 0xcaa   :  { %v2025_v55 = vrot.slane %v2024_v53, 4 }
 0xcab   :  { %v1990_v26 = vmax.f32 %v1988_v28, %v1989_v60 }
 0xcac   :  { %v2026_v52 = vmax.f32 %v2024_v53, %v2025_v55 }
 0xcae   :  { %v2027_v56 = vrot.slane %v2026_v52, 2 }
 0xcb0   :  { %v2028_v32 = vmax.f32 %v2026_v52, %v2027_v56 }
 0xcb2   :  { %v2029_v40 = vrot.slane %v2028_v32, 1 }
 0xcb4   :  { %v2030_v22 = vmax.f32 %v2028_v32, %v2029_v40 }
 0xcb6   :  { %v2031_v38 = vsel %vm1555_vm14, %v1990_v26, %v2030_v22 }
 0xcb7   :  { %v2032_v17 = vpack.c.bf16 %v2031_v38, %v2031_v38 }
 0xcb9   :  { %v2034_v10 = vsel %vm1212_vm8, %v2032_v17, 0 }
 0xcba   :  { %2043 = vmatpush.bf16.xpose.msrb.mxu2 %v2034_v10 }
 0xcc1   :  { %5874 = vmatmul.msk.bf16.vlgmr.msrb.gmra.mxu2 %vm1212_vm8, %v6773_v49 }
 0xcd1   :  { %5875 = vmatmul.msk.bf16.gmra.mxu2 %vm1212_vm8, %v6774_v46 }
 0xce1   :  { %5876 = vmatmul.msk.bf16.gmra.mxu2 %vm1212_vm8, %v7980_v29 }
 0xd44   :  { %v2045_v25 = vpop.f32.mrf.mxu2 }
 0xd45   :  { %v2059_v55 = vsub.f32 %v8131_v34, %v2045_v25 }
 0xd47   :  { %v2064_v26 = vmul.f32 1.442695, %v2059_v55 }
 0xd4c   :  { %v2047_v4 = vpop.f32.mrf.mxu2 }
 0xd4d   :  { %v2060_v54 = vsub.f32 %v8140_v13, %v2047_v4 }
 0xd4f   :  { %v2066_v56 = vmul.f32 1.442695, %v2060_v54 }
 0xd54   :  { %v2050_v41 = vpop.f32.mrf.mxu2 }
 0xd55   :  { %v2061_v15 = vsub.f32 %v8145_v5, %v2050_v41 }
 0xd57   :  { %v2068_v28 = vmul.f32 1.442695, %v2061_v15 }
 0xd5c   :  { %v2052_v60 = vpop.f32.mrf.mxu2 }
 0xd5d   :  { %v2062_v30 = vsub.f32 %v8129_v37, %v2052_v60  ;;  %v520_v60 = vld [vmem:[#allocation7] sm:$0x1] }
 0xd5f   :  { %v2070_v53 = vmul.f32 1.442695, %v2062_v30 }
 0xd64   :  { %v2055_v40 = vpop.f32.mrf.mxu2 }
 0xd65   :  { %v2063_v62 = vsub.f32 %v8127_v0, %v2055_v40  ;;  %v8221_v40 = vsel %vm1555_vm14, %v520_v60, 0 }
 0xd67   :  { %v2072_v24 = vmul.f32 1.442695, %v2063_v62 }
 0xd69   :  { %6703 = vpow2.f32 %v2072_v24 }
 0xd6a   :  { %6705 = vpow2.f32 %v2070_v53 }
 0xd6b   :  { %6707 = vpow2.f32 %v2068_v28 }
 0xd6c   :  { %v2057_v52 = vpop.f32.mrf.mxu2  ;;  %6709 = vpow2.f32 %v2066_v56 }
 0xd6d   :  { %6711 = vpow2.f32 %v2064_v26 }
 0xd6f   :  { %v6704_v32 = vpop.eup %6703 }
 0xd70   :  { %v2076_v22 = vpack.c.bf16 %v6704_v32, %v6704_v32  ;;  %v6706_v37 = vpop.eup %6705 }
 0xd71   :  { %v6708_v5 = vpop.eup %6707 }
 0xd72   :  { %v2078_v0 = vand.u32 %v2076_v22, %v8009_v9  ;;  %v2075_v13 = vpack.c.bf16 %v6706_v37, %v6708_v5  ;;  %v6710_v38 = vpop.eup %6709 }
 0xd73   :  { %v6712_v17 = vpop.eup %6711 }
 0xd74   :  { %2085 = vmatpush.bf16.msrb.mxu3 %v2078_v0  ;;  %v2074_v34 = vpack.c.bf16 %v6710_v38, %v6712_v17 }
 0xd78   :  { %2086 = vmatpush.bf16.msrb.mxu3 %v2075_v13 }
 0xd7c   :  { %2087 = vmatpush.bf16.msrb.mxu3 %v2074_v34 }
 0xd7f   :  { %5877 = vmatmul.msk.bf16.vlgmr.msrb.gmra.mxu3 %vm1551_vm15, %v8013_v44 }
 0xd80   :  { %2153 = vmatpush.bf16.msra.mxu3 %v8221_v40 }
 0xe02   :  { %v2089_v10 = vpop.f32.mrf.mxu3 }
 0xe0a   :  { %v2091_v25 = vpop.f32.mrf.mxu3 }
 0xe0b   :  { %v2094_v4 = vpack.c.bf16 %v2091_v25, %v2089_v10 }
 0xe0d   :  { %v2096_v41 = vand.u32 %v2094_v4, %v7843_v31 }
 0xe0f   :  { %2105 = vmatpush.bf16.msra.mxu0 %v2096_v41 }
 0xe12   :  { %5878 = vmatmul.msk.bf16.vlgmr.msra.gmra.mxu0 %vm1212_vm8, %v6773_v49 }
 0xe22   :  { %5879 = vmatmul.msk.bf16.gmra.mxu0 %vm1212_vm8, %v6774_v46 }
 0xe32   :  { %5880 = vmatmul.msk.bf16.gmra.mxu0 %vm1212_vm8, %v7980_v29 }
 0xe8f   :  { %v2107_v30 = vpop.f32.mrf.mxu0 }
 0xe90   :  { %v2108_v62 = vadd.f32 1e-16, %v2107_v30 }
 0xe92   :  { %6713 = vrcp.f32 %v2108_v62 }
 0xe97   :  { %v2109_v15 = vpop.f32.mrf.mxu0 }
 0xe98   :  { %v2110_v24 = vadd.f32 1e-16, %v2109_v15  ;;  %v6714_v54 = vpop.eup %6713 }
 0xe99   :  { %v2126_v55 = vmul.f32 %v6714_v54, %v6712_v17 }
 0xe9a   :  { %6715 = vrcp.f32 %v2110_v24  ;;  %v6437_v24 = vld [vmem:[%s9178_s10 + $0x18] sm:$0xff] }
 0xe9b   :  { %2246 = vmatpush.bf16.msra.mxu2 %v6437_v24 }
 0xe9f   :  { %v2112_v53 = vpop.f32.mrf.mxu0 }
 0xea0   :  { %v6716_v49 = vpop.eup %6715  ;;  %v2113_v52 = vadd.f32 1e-16, %v2112_v53 }
 0xea1   :  { %v2127_v46 = vmul.f32 %v6716_v49, %v6710_v38  ;;  %v1809_v49 = vadd.f32 %v8106_v21, %v8057_v19 }
 0xea2   :  { %6717 = vrcp.f32 %v2113_v52  ;;  %v1804_v52 = vadd.f32 %v8100_v8, %v8041_v12  ;;  %v6434_v12 = vld [vmem:[%s9178_s10] sm:$0xff] }
 0xea3   :  { %v2131_v28 = vpack.c.bf16 %v2127_v46, %v2126_v55 }
 0xea5   :  { %5881 = vmatmul.msk.bf16.vlgmr.msra.gmra.mxu3 %vm953_vm4, %v2131_v28 }
 0xea7   :  { %v2114_v56 = vpop.f32.mrf.mxu0 }
 0xea8   :  { %v2115_v26 = vadd.f32 1e-16, %v2114_v56  ;;  %v6718_v22 = vpop.eup %6717 }
 0xea9   :  { %v2128_v34 = vmul.f32 %v6718_v22, %v6708_v5 }
 0xeaa   :  { %6719 = vrcp.f32 %v2115_v26 }
 0xeaf   :  { %v2117_v0 = vpop.f32.mrf.mxu0 }
 0xeb0   :  { %v6720_v13 = vpop.eup %6719  ;;  %v2118_v25 = vadd.f32 1e-16, %v2117_v0  ;;  %v2182_v0 = vpop.permute.xlu0 %2181 }
 0xeb1   :  { %v2129_v10 = vmul.f32 %v6720_v13, %v6706_v37  ;;  %v1812_v37 = vadd.f32 %v8108_v23, %v8059_v2  ;;  %v1802_v23 = vadd.f32 %v8098_v6, %v8039_v11  ;;  %v2180_v13 = vpop.permute.xlu1 %2179 }
 0xeb2   :  { %6721 = vrcp.f32 %v2118_v25  ;;  %v6686_v25 = vld [vmem:[#allocation31] ss:$0 sm:$0xff] }
 0xeb3   :  { %v2132_v4 = vpack.c.bf16 %v2129_v10, %v2128_v34 }
 0xeb5   :  { %5882 = vmatmul.msk.bf16.gmra.mxu3 %vm953_vm4, %v2132_v4 }
 0xeb7   :  { %v2119_v38 = vpop.f32.mrf.mxu0 }
 0xeb8   :  { %v6722_v17 = vpop.eup %6721 }
 0xeb9   :  { %v2130_v41 = vmul.f32 %v6722_v17, %v6704_v32  ;;  %v1807_v32 = vadd.f32 %v8104_v16, %v8055_v59  ;;  %v6436_v59 = vld [vmem:[%s9178_s10 + $0x10] sm:$0xff]  ;;  %v6435_v16 = vld [vmem:[%s9178_s10 + $0x8] sm:$0xff] }
 0xeba   :  { %2247 = vmatpush.bf16.msra.mxu2 %v6436_v59 }
 0xebb   :  { %v2133_v60 = vpack.c.bf16 %v2130_v41, %v2130_v41 }
 0xebe   :  { %2248 = vmatpush.bf16.msra.mxu2 %v6435_v16 }
 0xec2   :  { %2249 = vmatpush.bf16.msra.mxu2 %v6434_v12 }
 0xec5   :  { %5883 = vmatmul.msk.bf16.gmra.mxu3 %vm953_vm4, %v2133_v60 }
 0xf28   :  { %v2155_v30 = vpop.f32.mrf.mxu3 }
 0xf29   :  { %v2169_v26 = vmul.f32 %v2155_v30, %v1802_v23 }
 0xf30   :  { %v2157_v62 = vpop.f32.mrf.mxu3 }
 0xf31   :  { %v2170_v19 = vmul.f32 %v2157_v62, %v1804_v52 }
 0xf33   :  { %v2174_v22 = vpack.c.bf16 %v2170_v19, %v2169_v26  ;;  %v8269_v26 = vld [vmem:[%s9161_s18] sm:$0x3] }
 0xf38   :  { %v2160_v15 = vpop.f32.mrf.mxu3 }
 0xf39   :  { %v2171_v56 = vmul.f32 %v2160_v15, %v1807_v32  ;;  %v2263_v15 = vpop.permute.xlu1 %2262 }
 0xf40   :  { %v2162_v54 = vpop.f32.mrf.mxu3 }
 0xf41   :  { %v2172_v46 = vmul.f32 %v2162_v54, %v1809_v49 }
 0xf43   :  { %v2175_v21 = vpack.c.bf16 %v2172_v46, %v2171_v56 }
 0xf48   :  { %v2165_v5 = vpop.f32.mrf.mxu3 }
 0xf49   :  { %v2173_v53 = vmul.f32 %v2165_v5, %v1812_v37  ;;  %v2265_v37 = vpop.permute.xlu0 %2264 }
 0xf4b   :  { %v2176_v55 = vpack.c.bf16 %v2173_v53, %v2173_v53 }
 0xf4d   :  { %v2186_v28 = vand.u32 %v2176_v55, %v8009_v9 }
 0xf4f   :  { %2193 = vmatpush.bf16.msrb.mxu1 %v2186_v28 }
 0xf50   :  { %v2167_v2 = vpop.f32.mrf.mxu3 }
 0xf53   :  { %2194 = vmatpush.bf16.msrb.mxu1 %v2175_v21 }
 0xf57   :  { %2195 = vmatpush.bf16.msrb.mxu1 %v2174_v22 }
 0xf5a   :  { %5884 = vmatmul.msk.bf16.vlgmr.msrb.gmra.mxu1 %vm1551_vm15, %v8013_v44 }
 0xfd7   :  { %v2197_v8 = vpop.f32.mrf.mxu1 }
 0xfd8   :  { %v2198_v11 = vadd.f32 %v2197_v8, %v2180_v13 }
 0xfdf   :  { %v2199_v34 = vpop.f32.mrf.mxu1 }
 0xfe0   :  { %v2200_v6 = vadd.f32 %v2199_v34, %v2182_v0 }
 0xfe2   :  { %v2210_v10 = vpack.c.bf16 %v2200_v6, %v2198_v11 }
 0xfe4   :  { %5901 = vmatmul.msk.bf16.vlgmr.msra.gmra.mxu2 %vm1678_vm3, %v2210_v10 }
0x1067   :  { %v2251_v4 = vpop.f32.mrf.mxu2 }
0x1068   :  { %v2252_v38 = vadd.f32 %v6686_v25, %v2251_v4 }
0x106a   :  { %v2256_v17 = vmul.f32 %v2252_v38, %v8162_v50 }
0x106c   :  { %v2258_v60 = vadd.f32 %v2256_v17, %v7863_v47 }
0x106e   :  { %v8248_v24 = vadd.f32 %v2263_v15, %v2258_v60  ;;  %v6449_v15 = vld [vmem:[%s9160_s19 + $0x18] sm:$0xff] }
0x106f   :  { %v2253_v41 = vpop.f32.mrf.mxu2 }
0x1070   :  { %v2254_v30 = vadd.f32 %v6686_v25, %v2253_v41  ;;  %v2270_v53 = vmul.f32 %v8248_v24, %v8248_v24 }
0x1072   :  { %v2257_v62 = vmul.f32 %v2254_v30, %v8155_v27 }
0x1074   :  { %v2259_v54 = vadd.f32 %v2257_v62, %v7857_v43 }
0x1076   :  { %v8251_v5 = vadd.f32 %v2265_v37, %v2259_v54 }
0x1078   :  { %v2271_v50 = vmul.f32 %v8251_v5, %v8251_v5 }
0x107a   :  { %v6610_v49 = vpack.i.bf16 %v2271_v50, %v2270_v53  ;;  %v6448_v50 = vld [vmem:[%s9160_s19 + $0x10] sm:$0xff] }
0x107c   :  { %6611 = vrot.lane.b32.xlu1 %v6610_v49, %s7447_s23 }
0x10ee   :  { %v6612_v47 = vpop.permute.xlu1 %6611 }
0x10ef   :  { %v6614_v55 = vunpack.i.h.bf16 %v6612_v47  ;;  %v6613_v27 = vunpack.i.l.bf16 %v6612_v47 }
0x10f1   :  { %v2281_v32 = vsel %vm581_vm6, %v8251_v5, %v6614_v55  ;;  %v2280_v43 = vsel %vm581_vm6, %v8248_v24, %v6613_v27 }
0x10f2   :  { %v2282_v46 = vpack.c.bf16 %v2281_v32, %v2280_v43 }
0x10f4   :  { %v2284_v28 = vand.u32 %v2282_v46, %v7843_v31 }
0x10f6   :  { %2293 = vmatpush.bf16.msra.mxu1 %v2284_v28 }
0x10f9   :  { %5902 = vmatmul.msk.bf16.vlgmr.msra.gmra.mxu1 %vm1212_vm8, %v7913_v18 }
0x1176   :  { %v2295_v52 = vpop.f32.mrf.mxu1 }
0x1177   :  { %2304 = vrot.lane.b32.xlu0 %v2295_v52, %s7448_s26  ;;  %v2299_v56 = vsel %vm1234_vm9, %v2295_v52, 0.0 }
0x1178   :  { %2300 = vadd.xlane.f32.xlu1 %v2299_v56 }
0x117e   :  { %v2297_v2 = vpop.f32.mrf.mxu1 }
0x11e9   :  { %v2305_v23 = vpop.permute.xlu0 %2304 }
0x11ea   :  { %v2307_v19 = vsel %vm1234_vm9, %v2305_v23, 0.0 }
0x11eb   :  { %2308 = vadd.xlane.f32.xlu0 %v2307_v19  ;;  %v2301_v21 = vpop.xlane.xlu1 %2300 }
0x11ec   :  { %v2302_v22 = vmul.f32 %v8269_v26, %v2301_v21 }
0x11ee   :  { %v2311_v16 = vmul.f32 %v2302_v22, %v2302_v22 }
0x125e   :  { %v2309_v59 = vpop.xlane.xlu0 %2308 }
0x125f   :  { %v2310_v12 = vmul.f32 %v8269_v26, %v2309_v59 }
0x1261   :  { %v2312_v8 = vsub.f32 %v2310_v12, %v2311_v16 }
0x1263   :  { %v2313_v0 = vmax.f32 %v2312_v8, 0.0 }
0x1265   :  { %v2314_v13 = vadd.f32 1e-05, %v2313_v0 }
0x1267   :  { %6723 = vrsqrt.f32 %v2314_v13  ;;  %vm2321_vm11 = vweird.f32 %v2314_v13 }
0x126d   :  { %v6724_v34 = vpop.eup %6723 }
0x126e   :  { %v2316_v11 = vmul.f32 %v6724_v34, %v2314_v13  ;;  %vm2322_vm10 = vweird.f32 %v6724_v34 }
0x126f   :  { %vm2323_vm12 = vmor %vm2321_vm11, %vm2322_vm10 }
0x1270   :  { %v2317_v6 = vmul.f32 %v6724_v34, %v2316_v11  ;;  %v6439_v11 = vld [vmem:[%s9179_s30 + $0x8] sm:$0xff] }
0x1272   :  { %v2318_v10 = vmul.f32 0.5, %v2317_v6  ;;  %v6438_v6 = vld [vmem:[%s9179_s30] sm:$0xff] }
0x1274   :  { %v2319_v25 = vsub.f32 1.5, %v2318_v10  ;;  %v6447_v10 = vld [vmem:[%s9180_s11 + $0x38] sm:$0xff] }
0x1276   :  { %v2320_v4 = vmul.f32 %v6724_v34, %v2319_v25  ;;  %v6446_v25 = vld [vmem:[%s9180_s11 + $0x30] sm:$0xff] }
0x1278   :  { %v2324_v38 = vsel %vm2323_vm12, %v6724_v34, %v2320_v4  ;;  %v6445_v4 = vld [vmem:[%s9180_s11 + $0x28] sm:$0xff] }
0x1279   :  { %2326 = vrot.lane.b32.xlu1 %v2324_v38, %s7431_s17  ;;  %v6444_v38 = vld [vmem:[%s9180_s11 + $0x20] sm:$0xff] }
0x12eb   :  { %v2327_v17 = vpop.permute.xlu1 %2326 }
0x12ec   :  { %v2329_v41 = vsel %vm1265_vm13, %v2302_v22, %v2327_v17 }
0x12ed   :  { %v2331_v60 = vsel %vm650_vm0, %v2329_v41, 0 }
0x12ee   :  { %v2348_v30 = vand.u32 4294901760, %v2331_v60 }
0x12f0   :  { %v2383_v62 = vsub.f32 %v2331_v60, %v2348_v30  ;;  %2349 = vmatpush.msrb.mxu2 %v2348_v30  ;;  %2442 = vmatpush.msrb.mxu1 %v2348_v30 }
0x12f1   :  { %2355 = vmatmul.f32.vlgmr.msrb.gmra.mxu2 %v7888_v3  ;;  %2446 = vmatmul.f32.vlgmr.msrb.gmra.mxu1 %v7883_v1 }
0x12f2   :  { %2414 = vmatpush.msrb.mxu3 %v2383_v62  ;;  %v2384_v54 = vand.u32 4294901760, %v2383_v62  ;;  %2641 = vmatpush.bf16.msra.mxu1 %v6447_v10 }
0x12f3   :  { %2417 = vmatmul.f32.vlgmr.msrb.gmra.mxu3 %v7880_v63 }
0x12f4   :  { %2474 = vmatpush.msra.mxu2 %v2384_v54  ;;  %v2385_v37 = vsub.f32 %v2383_v62, %v2384_v54  ;;  %2562 = vmatpush.bf16.msra.mxu3 %v6439_v11 }
0x12f6   :  { %2691 = vmatpush.bf16.msrb.mxu2 %v6449_v15  ;;  %v2386_v53 = vand.u32 4294901760, %v2385_v37  ;;  %2642 = vmatpush.bf16.msra.mxu1 %v6446_v25 }
0x12f8   :  { %2387 = vmatpush.msrb.mxu0 %v2386_v53  ;;  %2563 = vmatpush.bf16.msra.mxu3 %v6438_v6 }
0x12f9   :  { %2363 = vmatmul.f32.gmra.mxu2 %v7860_v45  ;;  %5903 = vmatmul.msk.f32.vlgmr.msrb.gmra.mxu0 %vm953_vm4, %v7874_v61 }
0x12fa   :  { %2500 = vmatpush.msra.mxu0 %v2348_v30  ;;  %2452 = vmatmul.f32.gmra.mxu1 %v7853_v36 }
0x12fb   :  { %2422 = vmatmul.f32.gmra.mxu3 %v7850_v35  ;;  %2692 = vmatpush.bf16.msrb.mxu2 %v6448_v50  ;;  %v6443_v50 = vld [vmem:[%s9180_s11 + $0x18] sm:$0xff] }
0x12fc   :  { %2643 = vmatpush.bf16.msra.mxu1 %v6445_v4 }
0x1300   :  { %2644 = vmatpush.bf16.msra.mxu1 %v6444_v38 }
0x1301   :  { %5904 = vmatmul.msk.f32.gmra.mxu0 %vm953_vm4, %v7846_v33  ;;  %5905 = vmatmul.msk.f32.vlgmr.msra.gmra.mxu2 %vm953_vm4, %v7874_v61 }
0x1304   :  { %2645 = vmatpush.bf16.msra.mxu1 %v6443_v50 }
0x1309   :  { %5906 = vmatmul.msk.f32.gmra.mxu2 %vm953_vm4, %v7846_v33  ;;  %5907 = vmatmul.msk.f32.vlgmr.msra.gmra.mxu0 %vm953_vm4, %v7874_v61 }
0x1311   :  { %5908 = vmatmul.msk.f32.gmra.mxu0 %vm953_vm4, %v7846_v33  ;;  %5962 = vmatmul.msk.bf16.vlgmr.msrb.gmra.mxu2 %vm581_vm6, %v7919_v51 }
0x136e   :  { %v2447_v43 = vpop.f32.mrf.mxu1 }
0x1374   :  { %v2356_v49 = vpop.f32.mrf.mxu2 }
0x1376   :  { %v2390_v47 = vpop.f32.mrf.mxu0  ;;  %v2418_v55 = vpop.f32.mrf.mxu3 }
0x1377   :  { %v2391_v27 = vadd.f32 %v2390_v47, %v2356_v49  ;;  %v2453_v16 = vpop.f32.mrf.mxu1  ;;  %v6442_v49 = vld [vmem:[%s9180_s11 + $0x10] sm:$0xff]  ;;  %v6441_v47 = vld [vmem:[%s9180_s11 + $0x8] sm:$0xff] }
0x1378   :  { %2646 = vmatpush.bf16.msra.mxu1 %v6442_v49 }
0x1379   :  { %v2419_v28 = vadd.f32 %v2418_v55, %v2391_v27  ;;  %v6440_v55 = vld [vmem:[%s9180_s11] sm:$0xff] }
0x137b   :  { %v2448_v52 = vadd.f32 %v2447_v43, %v2419_v28 }
0x137c   :  { %v2364_v32 = vpop.f32.mrf.mxu2  ;;  %2647 = vmatpush.bf16.msra.mxu1 %v6441_v47 }
0x137e   :  { %v2394_v46 = vpop.f32.mrf.mxu0  ;;  %v2423_v2 = vpop.f32.mrf.mxu3 }
0x137f   :  { %v2395_v56 = vadd.f32 %v2394_v46, %v2364_v32  ;;  %v6688_v32 = vld [vmem:[#allocation32] ss:$0 sm:$0xff] }
0x1380   :  { %2648 = vmatpush.bf16.msra.mxu1 %v6440_v55 }
0x1381   :  { %v2424_v22 = vadd.f32 %v2423_v2, %v2395_v56 }
0x1383   :  { %v2454_v12 = vadd.f32 %v2453_v16, %v2424_v22 }
0x1384   :  { %v2477_v23 = vpop.f32.mrf.mxu2 }
0x1385   :  { %v2478_v19 = vadd.f32 %v2477_v23, %v2448_v52 }
0x1386   :  { %v2503_v21 = vpop.f32.mrf.mxu0 }
0x1387   :  { %v2504_v59 = vadd.f32 %v2503_v21, %v2478_v19 }
0x1389   :  { %2523 = vperm.xlu1 %6609, %v2504_v59   ;;  %2512 = vperm.xlu0 %6615, %v2504_v59   ;;  %v6689_v59 = vld [vmem:[#allocation34] ss:$0 sm:$0xff] }
0x138c   :  { %v2481_v8 = vpop.f32.mrf.mxu2 }
0x138d   :  { %v2482_v0 = vadd.f32 %v2481_v8, %v2454_v12 }
0x138e   :  { %v2507_v13 = vpop.f32.mrf.mxu0 }
0x138f   :  { %v2508_v34 = vadd.f32 %v2507_v13, %v2482_v0 }
0x1391   :  { %2517 = vperm.xlu2 %6599, %v2508_v34   ;;  %6634 = vset.pattern.permute.xlu1 %v9174_v7 }
0x1399   :  { %6616 = vset.pattern.permute.xlu2 %v9173_v14 }
0x139a   :  { %2527 = vperm.xlu2 %6616, %v2508_v34  }
0x13a2   :  { %6622 = vset.pattern.permute.xlu2 %v9174_v7 }
0x13eb   :  { %v2518_v17 = vpop.permute.xlu2 %2517 }
0x13ec   :  { %v2521_v30 = vsub.f32 %v8251_v5, %v2518_v17 }
0x13f4   :  { %v2528_v41 = vpop.permute.xlu2 %2527 }
0x13f5   :  { %v2531_v54 = vmul.f32 %v2528_v41, %v2521_v30 }
0x13fb   :  { %v2513_v60 = vpop.permute.xlu0 %2512  ;;  %v2524_v15 = vpop.permute.xlu1 %2523 }
0x13fc   :  { %v2520_v62 = vsub.f32 %v8248_v24, %v2513_v60 }
0x13fe   :  { %v2530_v37 = vmul.f32 %v2524_v15, %v2520_v62 }
0x1400   :  { %v2536_v53 = vpack.c.bf16 %v2531_v54, %v2530_v37 }
0x1402   :  { %5917 = vmatmul.msk.bf16.vlgmr.msra.gmra.mxu3 %vm581_vm6, %v2536_v53 }
0x1485   :  { %v2565_v27 = vpop.f32.mrf.mxu3 }
0x1486   :  { %v2566_v43 = vadd.f32 %v6688_v32, %v2565_v27 }
0x1488   :  { %v2572_v28 = vmul.f32 0.01, %v2566_v43  ;;  %vm2570_vm10 = vcmp.gt.f32.partialorder %v2566_v43, 0.0 }
0x148a   :  { %v2574_v2 = vsel %vm2570_vm10, %v2566_v43, %v2572_v28 }
0x148d   :  { %v2567_v46 = vpop.f32.mrf.mxu3 }
0x148e   :  { %v2568_v52 = vadd.f32 %v6688_v32, %v2567_v46 }
0x1490   :  { %vm2571_vm11 = vcmp.gt.f32.partialorder %v2568_v52, 0.0  ;;  %v2573_v56 = vmul.f32 0.01, %v2568_v52 }
0x1492   :  { %v2575_v23 = vsel %vm2571_vm11, %v2568_v52, %v2573_v56 }
0x1493   :  { %v2592_v19 = vpack.c.bf16 %v2575_v23, %v2574_v2 }
0x1495   :  { %2649 = vmatmul.bf16.vlgmr.msra.gmra.mxu1 %v2592_v19 }
0x1512   :  { %v2650_v21 = vpop.f32.mrf.mxu1 }
0x1513   :  { %v2655_v22 = vadd.f32 %v2650_v21, %v8248_v24 }
0x1515   :  { %v8315_v12 = vadd.f32 %v6689_v59, %v2655_v22 }
0x1517   :  { %v2699_v13 = vmul.f32 %v8315_v12, %v8315_v12 }
0x151a   :  { %v2652_v16 = vpop.f32.mrf.mxu1 }
0x151b   :  { %v2656_v8 = vadd.f32 %v2652_v16, %v8251_v5 }
0x151d   :  { %v8318_v0 = vadd.f32 %v6689_v59, %v2656_v8  ;;  %v8358_v8 = vpop.f32.mrf.mxu2 }
0x151f   :  { %v2700_v34 = vmul.f32 %v8318_v0, %v8318_v0 }
0x1521   :  { %v6617_v11 = vpack.i.bf16 %v2700_v34, %v2699_v13 }
0x1523   :  { %6618 = vrot.lane.b32.xlu1 %v6617_v11, %s7447_s23 }
0x1525   :  { %v8360_v13 = vpop.f32.mrf.mxu2 }
0x1595   :  { %v6619_v6 = vpop.permute.xlu1 %6618 }
0x1596   :  { %v6621_v10 = vunpack.i.h.bf16 %v6619_v6  ;;  %v6620_v24 = vunpack.i.l.bf16 %v6619_v6 }
0x1598   :  { %v2710_v25 = vsel %vm581_vm6, %v8318_v0, %v6621_v10  ;;  %v2709_v5 = vsel %vm581_vm6, %v8315_v12, %v6620_v24 }
0x1599   :  { %v2711_v4 = vpack.c.bf16 %v2710_v25, %v2709_v5 }
0x159b   :  { %v2713_v38 = vand.u32 %v2711_v4, %v7843_v31 }
0x159d   :  { %2722 = vmatpush.bf16.msrb.mxu0 %v2713_v38 }
0x15a0   :  { %5963 = vmatmul.msk.bf16.vlgmr.msrb.gmra.mxu0 %vm1212_vm8, %v7913_v18 }
0x161d   :  { %v2724_v17 = vpop.f32.mrf.mxu0 }
0x161e   :  { %2733 = vrot.lane.b32.xlu2 %v2724_v17, %s7448_s26  ;;  %v2728_v41 = vsel %vm1234_vm9, %v2724_v17, 0.0 }
0x161f   :  { %2729 = vadd.xlane.f32.xlu1 %v2728_v41 }
0x1625   :  { %v2726_v60 = vpop.f32.mrf.mxu0 }
0x1678   :  { %v2734_v30 = vpop.permute.xlu2 %2733 }
0x1679   :  { %v2736_v62 = vsel %vm1234_vm9, %v2734_v30, 0.0 }
0x167a   :  { %2737 = vadd.xlane.f32.xlu0 %v2736_v62 }
0x1692   :  { %v2730_v15 = vpop.xlane.xlu1 %2729 }
0x1693   :  { %v2731_v54 = vmul.f32 %v8269_v26, %v2730_v15 }
0x1695   :  { %v2740_v53 = vmul.f32 %v2731_v54, %v2731_v54 }
0x16ed   :  { %v2738_v37 = vpop.xlane.xlu0 %2737 }
0x16ee   :  { %v2739_v50 = vmul.f32 %v8269_v26, %v2738_v37 }
0x16f0   :  { %v2741_v49 = vsub.f32 %v2739_v50, %v2740_v53 }
0x16f2   :  { %v2742_v47 = vmax.f32 %v2741_v49, 0.0 }
0x16f4   :  { %v2743_v55 = vadd.f32 1e-05, %v2742_v47 }
0x16f6   :  { %6725 = vrsqrt.f32 %v2743_v55  ;;  %vm2750_vm10 = vweird.f32 %v2743_v55 }
0x16fc   :  { %v6726_v27 = vpop.eup %6725 }
0x16fd   :  { %v2745_v32 = vmul.f32 %v6726_v27, %v2743_v55  ;;  %vm2751_vm12 = vweird.f32 %v6726_v27 }
0x16fe   :  { %vm2752_vm11 = vmor %vm2750_vm10, %vm2751_vm12 }
0x16ff   :  { %v2746_v43 = vmul.f32 %v6726_v27, %v2745_v32 }
0x1701   :  { %v2747_v46 = vmul.f32 0.5, %v2746_v43 }
0x1703   :  { %v2748_v28 = vsub.f32 1.5, %v2747_v46 }
0x1705   :  { %v2749_v52 = vmul.f32 %v6726_v27, %v2748_v28 }
0x1707   :  { %v2753_v56 = vsel %vm2752_vm11, %v6726_v27, %v2749_v52 }
0x1708   :  { %2755 = vrot.lane.b32.xlu2 %v2753_v56, %s7431_s17 }
0x1762   :  { %v2756_v2 = vpop.permute.xlu2 %2755 }
0x1763   :  { %v2758_v23 = vsel %vm1265_vm13, %v2731_v54, %v2756_v2 }
0x1764   :  { %v2760_v26 = vsel %vm650_vm0, %v2758_v23, 0 }
0x1765   :  { %v2777_v19 = vand.u32 4294901760, %v2760_v26 }
0x1767   :  { %v2812_v21 = vsub.f32 %v2760_v26, %v2777_v19  ;;  %2778 = vmatpush.msrb.mxu3 %v2777_v19 }
0x1768   :  { %2784 = vmatmul.f32.vlgmr.msrb.gmra.mxu3 %v7888_v3 }
0x1769   :  { %2871 = vmatpush.msra.mxu3 %v2777_v19  ;;  %2843 = vmatpush.msra.mxu0 %v2812_v21  ;;  %v2813_v22 = vand.u32 4294901760, %v2812_v21 }
0x176a   :  { %2846 = vmatmul.f32.vlgmr.msra.gmra.mxu0 %v7880_v63 }
0x176b   :  { %2903 = vmatpush.msrb.mxu1 %v2813_v22  ;;  %v2814_v59 = vsub.f32 %v2812_v21, %v2813_v22  ;;  %v8381_v21 = vld [vmem:[%s9163_s14 + $0x8] sm:$0xff] }
0x176c   :  { %5966 = vmatmul.msk.f32.vlgmr.msrb.gmra.mxu1 %vm953_vm4, %v7874_v61 }
0x176d   :  { %v2815_v16 = vand.u32 4294901760, %v2814_v59 }
0x176f   :  { %2816 = vmatpush.msra.mxu2 %v2815_v16 }
0x1770   :  { %2792 = vmatmul.f32.gmra.mxu3 %v7860_v45  ;;  %5964 = vmatmul.msk.f32.vlgmr.msra.gmra.mxu2 %vm953_vm4, %v7874_v61 }
0x1771   :  { %2929 = vmatpush.msrb.mxu2 %v2777_v19  ;;  %v8376_v19 = vld [vmem:[%s9163_s14] sm:$0xff] }
0x1772   :  { %2851 = vmatmul.f32.gmra.mxu0 %v7850_v35 }
0x1774   :  { %5967 = vmatmul.msk.f32.gmra.mxu1 %vm953_vm4, %v7846_v33 }
0x1778   :  { %5965 = vmatmul.msk.f32.gmra.mxu2 %vm953_vm4, %v7846_v33  ;;  %2875 = vmatmul.f32.vlgmr.msra.gmra.mxu3 %v7883_v1 }
0x1780   :  { %2881 = vmatmul.f32.gmra.mxu3 %v7853_v36  ;;  %5968 = vmatmul.msk.f32.vlgmr.msrb.gmra.mxu2 %vm953_vm4, %v7874_v61 }
0x1788   :  { %5969 = vmatmul.msk.f32.gmra.mxu2 %vm953_vm4, %v7846_v33 }
0x17e7   :  { %v2847_v24 = vpop.f32.mrf.mxu0 }
0x17e9   :  { %v2906_v17 = vpop.f32.mrf.mxu1 }
0x17eb   :  { %v2785_v34 = vpop.f32.mrf.mxu3 }
0x17ef   :  { %v2852_v15 = vpop.f32.mrf.mxu0 }
0x17f1   :  { %v2910_v50 = vpop.f32.mrf.mxu1 }
0x17f3   :  { %v2793_v11 = vpop.f32.mrf.mxu3  ;;  %v2819_v6 = vpop.f32.mrf.mxu2 }
0x17f4   :  { %v2820_v10 = vadd.f32 %v2819_v6, %v2785_v34 }
0x17f6   :  { %v2848_v4 = vadd.f32 %v2847_v24, %v2820_v10  ;;  %v9181_v24 = vld [vmem:[#allocation80_spill] sm:$0xff] }
0x17fb   :  { %v2823_v25 = vpop.f32.mrf.mxu2  ;;  %v2876_v5 = vpop.f32.mrf.mxu3 }
0x17fc   :  { %v2877_v38 = vadd.f32 %v2876_v5, %v2848_v4  ;;  %v2824_v62 = vadd.f32 %v2823_v25, %v2793_v11  ;;  %v9182_v4 = vld [vmem:[#allocation82_spill] sm:$0xff] }
0x17fe   :  { %v2907_v41 = vadd.f32 %v2906_v17, %v2877_v38  ;;  %v2853_v37 = vadd.f32 %v2852_v15, %v2824_v62 }
0x1803   :  { %v2932_v60 = vpop.f32.mrf.mxu2  ;;  %v2882_v54 = vpop.f32.mrf.mxu3 }
0x1804   :  { %v2933_v30 = vadd.f32 %v2932_v60, %v2907_v41  ;;  %v2883_v53 = vadd.f32 %v2882_v54, %v2853_v37  ;;  %v9183_v60 = vld [vmem:[#allocation81_spill] sm:$0xff] }
0x1806   :  { %2941 = vperm.xlu2 %6622, %v2933_v30   ;;  %v2911_v47 = vadd.f32 %v2910_v50, %v2883_v53 }
0x180b   :  { %v2936_v49 = vpop.f32.mrf.mxu2 }
0x180c   :  { %v2937_v55 = vadd.f32 %v2936_v49, %v2911_v47 }
0x180e   :  { %6623 = vset.pattern.permute.xlu2 %v9173_v14 }
0x180f   :  { %2952 = vperm.xlu2 %6623, %v2933_v30  }
0x1817   :  { %6624 = vset.pattern.permute.xlu2 %v9174_v7 }
0x1818   :  { %2946 = vperm.xlu2 %6624, %v2937_v55  }
0x1820   :  { %6625 = vset.pattern.permute.xlu2 %v9173_v14 }
0x1821   :  { %2956 = vperm.xlu2 %6625, %v2937_v55  }
0x1829   :  { %6631 = vset.pattern.permute.xlu2 %v9174_v7 }
0x1860   :  { %v2942_v27 = vpop.permute.xlu2 %2941 }
0x1861   :  { %v2949_v46 = vsub.f32 %v8315_v12, %v2942_v27 }
0x1869   :  { %v2953_v32 = vpop.permute.xlu2 %2952 }
0x186a   :  { %v8368_v56 = vmul.f32 %v2953_v32, %v2949_v46  ;;  %v6451_v46 = vld [vmem:[%s9166_s20 + $0x18] sm:$0xff] }
0x186b   :  { %3050 = vmatpush.bf16.msra.mxu1 %v6451_v46  ;;  %v6457_v46 = vld [vmem:[%s9168_s7 + $0x64] sm:$0xf0] }
0x1872   :  { %v2947_v43 = vpop.permute.xlu2 %2946 }
0x1873   :  { %v2950_v28 = vsub.f32 %v8318_v0, %v2947_v43 }
0x187b   :  { %v2957_v52 = vpop.permute.xlu2 %2956 }
0x187c   :  { %v8370_v2 = vmul.f32 %v2957_v52, %v2950_v28  ;;  %v6450_v28 = vld [vmem:[%s9166_s20 + $0x10] sm:$0xff]  ;;  %v6461_v52 = vld [vmem:[%s9167_s1 + $0x18] sm:$0xff] }
0x187d   :  { %3051 = vmatpush.bf16.msra.mxu1 %v6450_v28 }
0x187e   :  { %v2961_v23 = vpack.c.bf16 %v8370_v2, %v8368_v56 }
0x1880   :  { %v2963_v26 = vand.u32 %v2961_v23, %v7843_v31  ;;  %v6460_v23 = vld [vmem:[%s9167_s1 + $0x10] sm:$0xff] }
0x1881   :  { %3179 = vmatpush.bf16.msrb.mxu1 %v6461_v52  ;;  %v6456_v52 = vld [vmem:[%s9168_s7 + $0x64] sm:$0xf] }
0x1882   :  { %2972 = vmatpush.bf16.msrb.mxu0 %v2963_v26 }
0x1885   :  { %5970 = vmatmul.msk.bf16.vlgmr.msrb.gmra.mxu0 %vm1212_vm8, %v8376_v19  ;;  %3180 = vmatpush.bf16.msrb.mxu1 %v6460_v23  ;;  %v6016_v23 = vld [vmem:[%s9168_s7 + $0x68] sm:$0xf0] }
0x1895   :  { %5971 = vmatmul.msk.bf16.gmra.mxu0 %vm1212_vm8, %v8381_v21 }
0x18a5   :  { %5972 = vmatmul.msk.bf16.gmra.mxu0 %vm1212_vm8, %v7989_v42 }
0x1902   :  { %v2974_v22 = vpop.f32.mrf.mxu0 }
0x1903   :  { %v2975_v30 = vadd.f32 %v2974_v22, %v9183_v60 }
0x1905   :  { %v2988_v49 = vmax.f32 %v2975_v30, 0.0  ;;  %v6690_v30 = vld [vmem:[#allocation29 + $0x1] ss:$0 sm:$0xff] }
0x1907   :  { %v2993_v32 = vadd.f32 1e-07, %v2988_v49  ;;  %v6022_v49 = vld [vmem:[%s9168_s7 + $0x70] sm:$0xf] }
0x190a   :  { %v2976_v59 = vpop.f32.mrf.mxu0 }
0x190b   :  { %v2977_v38 = vadd.f32 %v2976_v59, %v9182_v4 }
0x190d   :  { %v2989_v37 = vmax.f32 %v2977_v38, 0.0  ;;  %v9185_v38 = vld [vmem:[#allocation86_spill] sm:$0xff] }
0x190f   :  { %v2994_v55 = vadd.f32 1e-07, %v2989_v37 }
0x1911   :  { %v2998_v43 = vpack.c.bf16 %v2994_v55, %v2993_v32  ;;  %v6458_v55 = vld [vmem:[%s9168_s7 + $0x74] sm:$0xf]  ;;  %v6024_v32 = vld [vmem:[%s9168_s7 + $0x78] sm:$0xf0] }
0x1912   :  { %v2979_v16 = vpop.f32.mrf.mxu0  ;;  %v6027_v28 = vor.u32 %v6458_v55, %v6024_v32 }
0x1913   :  { %v2980_v25 = vadd.f32 %v9181_v24, %v2979_v16 }
0x1915   :  { %v2990_v62 = vmax.f32 %v2980_v25, 0.0  ;;  %v6781_v25 = vld [vmem:[%s9172_s2] sm:$0xff] }
0x1917   :  { %v2995_v47 = vadd.f32 1e-07, %v2990_v62 }
0x191a   :  { %v2981_v34 = vpop.f32.mrf.mxu0 }
0x191b   :  { %v2982_v6 = vadd.f32 %v2981_v34, %v7997_v57 }
0x191d   :  { %v2991_v17 = vmax.f32 %v2982_v6, 0.0  ;;  %v6779_v6 = vld [vmem:[%s9172_s2 + $0x10] sm:$0xff] }
0x191f   :  { %v2996_v53 = vadd.f32 1e-07, %v2991_v17  ;;  %v9186_v17 = vld [vmem:[#allocation87_spill] sm:$0xff] }
0x1921   :  { %v2999_v27 = vpack.c.bf16 %v2996_v53, %v2995_v47  ;;  %v6459_v47 = vld [vmem:[%s9168_s7 + $0x74] sm:$0xf0] }
0x1922   :  { %v2984_v11 = vpop.f32.mrf.mxu0 }
0x1923   :  { %v2985_v10 = vadd.f32 %v2984_v11, %v8000_v58  ;;  %v6778_v11 = vld [vmem:[%s9172_s2 + $0x18] sm:$0xff] }
0x1925   :  { %v2992_v5 = vmax.f32 %v2985_v10, 0.0  ;;  %v6780_v10 = vld [vmem:[%s9172_s2 + $0x8] sm:$0xff] }
0x1927   :  { %v2997_v41 = vadd.f32 1e-07, %v2992_v5  ;;  %v9184_v5 = vld [vmem:[#allocation83_spill] sm:$0xff] }
0x1929   :  { %v3000_v15 = vpack.c.bf16 %v2997_v41, %v2997_v41 }
0x192a   :  { %v2986_v54 = vpop.f32.mrf.mxu0 }
0x192b   :  { %v3002_v50 = vand.u32 %v3000_v15, %v8009_v9 }
0x192d   :  { %3009 = vmatpush.bf16.msrb.mxu3 %v3002_v50 }
0x1931   :  { %3010 = vmatpush.bf16.msrb.mxu3 %v2999_v27  ;;  %v6023_v27 = vor.u32 %v6459_v47, %v6022_v49  ;;  %v6000_v47 = vld [vmem:[%s9168_s7 + $0x48] sm:$0xf0] }
0x1933   :  { %3132 = vmatpush.bf16.msra.mxu2 %v6023_v27 }
0x1935   :  { %3011 = vmatpush.bf16.msrb.mxu3 %v2998_v43  ;;  %v6014_v43 = vld [vmem:[%s9168_s7 + $0x60] sm:$0xf] }
0x1938   :  { %5973 = vmatmul.msk.bf16.vlgmr.msrb.gmra.mxu3 %vm1551_vm15, %v8013_v44 }
0x1939   :  { %3146 = vmatpush.bf16.msra.mxu3 %v6027_v28 }
0x19bb   :  { %v3013_v26 = vpop.f32.mrf.mxu3 }
0x19bc   :  { %v3014_v59 = vadd.f32 %v3013_v26, %v8368_v56  ;;  %v6015_v26 = vor.u32 %v6457_v46, %v6014_v43 }
0x19be   :  { %3133 = vmatpush.bf16.msra.mxu2 %v6015_v26 }
0x19c3   :  { %v3015_v22 = vpop.f32.mrf.mxu3 }
0x19c4   :  { %v3016_v16 = vadd.f32 %v3015_v22, %v8370_v2  ;;  %v6019_v22 = vor.u32 %v6456_v52, %v6016_v23 }
0x19c6   :  { %v3023_v34 = vpack.c.bf16 %v3016_v16, %v3014_v59  ;;  %v6006_v59 = vld [vmem:[%s9168_s7 + $0x50] sm:$0xf]  ;;  %v6455_v16 = vld [vmem:[%s9168_s7 + $0x54] sm:$0xf0]  ;;  %3147 = vmatpush.bf16.msra.mxu3 %v6019_v22  ;;  %v5995_v22 = vld [vmem:[%s9171_s12 + $0x2] sm:$0x3] }
0x19c8   :  { %5986 = vmatmul.msk.bf16.vlgmr.msra.gmra.mxu1 %vm581_vm6, %v3023_v34  ;;  %v6454_v34 = vld [vmem:[%s9168_s7 + $0x54] sm:$0xf] }
0x19c9   :  { %3300 = vmatpush.bf16.msra.mxu1 %v6778_v11  ;;  %v6008_v11 = vld [vmem:[%s9168_s7 + $0x58] sm:$0xf0] }
0x19cd   :  { %3301 = vmatpush.bf16.msra.mxu1 %v6779_v6  ;;  %v6007_v6 = vor.u32 %v6455_v16, %v6006_v59  ;;  %v3081_v59 = vperm.slane %v5995_v22, 0  ;;  %v3082_v16 = vperm.slane %v5995_v22, 1 }
0x19cf   :  { %3134 = vmatpush.bf16.msra.mxu2 %v6007_v6 }
0x19d1   :  { %3302 = vmatpush.bf16.msra.mxu1 %v6780_v10 }
0x19d5   :  { %3303 = vmatpush.bf16.msra.mxu1 %v6781_v25  ;;  %v6011_v25 = vor.u32 %v6454_v34, %v6008_v11 }
0x19d7   :  { %3148 = vmatpush.bf16.msra.mxu3 %v6011_v25 }
0x19d8   :  { %6042 = vmatmul.msk.bf16.vlgmr.msrb.gmra.mxu1 %vm581_vm6, %v9184_v5 }
0x19e8   :  { %6043 = vmatmul.msk.bf16.gmra.mxu1 %vm581_vm6, %v9185_v38 }
0x19f8   :  { %6044 = vmatmul.msk.bf16.gmra.mxu1 %vm581_vm6, %v9186_v17 }
0x1a45   :  { %v3053_v41 = vpop.f32.mrf.mxu1 }
0x1a46   :  { %v3054_v15 = vadd.f32 %v6690_v30, %v3053_v41 }
0x1a4d   :  { %v3055_v62 = vpop.f32.mrf.mxu1 }
0x1a4e   :  { %v3056_v54 = vadd.f32 %v6690_v30, %v3055_v62 }
0x1a50   :  { %v6626_v37 = vpack.i.bf16 %v3056_v54, %v3054_v15  ;;  %v5998_v15 = vld [vmem:[%s9168_s7 + $0x40] sm:$0xf]  ;;  %v6453_v54 = vld [vmem:[%s9168_s7 + $0x44] sm:$0xf0] }
0x1a51   :  { %v5999_v49 = vor.u32 %v6453_v54, %v5998_v15 }
0x1a52   :  { %6627 = vrot.lane.b32.xlu1 %v6626_v37, %s7447_s23  ;;  %v6452_v37 = vld [vmem:[%s9168_s7 + $0x44] sm:$0xf] }
0x1a53   :  { %v6003_v55 = vor.u32 %v6452_v37, %v6000_v47  ;;  %3135 = vmatpush.bf16.msra.mxu2 %v5999_v49  ;;  %v8458_v49 = vld [vmem:[%s9154_s22] sm:$0xff]  ;;  %v8465_v47 = vld [vmem:[%s9154_s22 + $0x8] sm:$0xff] }
0x1a55   :  { %v8413_v53 = vpop.f32.mrf.mxu1  ;;  %3149 = vmatpush.bf16.msra.mxu3 %v6003_v55 }
0x1a5d   :  { %v8415_v50 = vpop.f32.mrf.mxu1 }
0x1a65   :  { %v8429_v10 = vpop.f32.mrf.mxu1 }
0x1a6d   :  { %v8431_v41 = vpop.f32.mrf.mxu1 }
0x1a75   :  { %v8433_v30 = vpop.f32.mrf.mxu1 }
0x1a7d   :  { %v3194_v62 = vpop.f32.mrf.mxu1 }
0x1ac4   :  { %v6628_v27 = vpop.permute.xlu1 %6627 }
0x1ac5   :  { %v6630_v32 = vunpack.i.h.bf16 %v6628_v27  ;;  %v6629_v43 = vunpack.i.l.bf16 %v6628_v27 }
0x1ac7   :  { %v3067_v46 = vsel %vm581_vm6, %v8370_v2, %v6630_v32  ;;  %v3066_v28 = vsel %vm581_vm6, %v8368_v56, %v6629_v43 }
0x1ac8   :  { %v3077_v52 = vpack.c.bf16 %v3067_v46, %v3066_v28 }
0x1aca   :  { %6028 = vmatmul.msk.bf16.vlgmr.msra.gmra.mxu2 %vm1678_vm3, %v3077_v52  ;;  %6029 = vmatmul.msk.bf16.vlgmr.msra.gmra.mxu3 %vm1678_vm3, %v3077_v52 }
0x1b4d   :  { %v3137_v23 = vpop.f32.mrf.mxu2  ;;  %v3151_v26 = vpop.f32.mrf.mxu3 }
0x1b4e   :  { %v3138_v6 = vadd.f32 %v3137_v23, %v3081_v59  ;;  %v8446_v25 = vadd.f32 %v3151_v26, %v3082_v16 }
0x1b55   :  { %v3139_v34 = vpop.f32.mrf.mxu2  ;;  %v3153_v11 = vpop.f32.mrf.mxu3 }
0x1b56   :  { %v3140_v2 = vadd.f32 %v3139_v34, %v3081_v59  ;;  %v8448_v62 = vadd.f32 %v3153_v11, %v3082_v16 }
0x1b58   :  { %v3226_v56 = vpack.c.bf16 %v8448_v62, %v8446_v25  ;;  %v3196_v15 = vpack.c.bf16 %v3140_v2, %v3138_v6 }
0x1b5a   :  { %v3228_v54 = vand.u32 %v3226_v56, %v7843_v31  ;;  %3198 = vrot.lane.b32.xlu2 %v3196_v15, %s7426_s25  ;;  %v3254_v37 = vand.u32 %v3196_v15, %v7843_v31 }
0x1b5c   :  { %3237 = vmatpush.bf16.msrb.mxu3 %v3228_v54  ;;  %3263 = vmatpush.bf16.msra.mxu0 %v3254_v37 }
0x1b5f   :  { %6048 = vmatmul.msk.bf16.vlgmr.msrb.gmra.mxu3 %vm1212_vm8, %v8376_v19  ;;  %6051 = vmatmul.msk.bf16.vlgmr.msra.gmra.mxu0 %vm1212_vm8, %v8458_v49 }
0x1b6f   :  { %6049 = vmatmul.msk.bf16.gmra.mxu3 %vm1212_vm8, %v8381_v21  ;;  %6052 = vmatmul.msk.bf16.gmra.mxu0 %vm1212_vm8, %v8465_v47 }
0x1b7f   :  { %6050 = vmatmul.msk.bf16.gmra.mxu3 %vm1212_vm8, %v7989_v42  ;;  %6053 = vmatmul.msk.bf16.gmra.mxu0 %vm1212_vm8, %v7980_v29 }
0x1bb4   :  { %v3199_v55 = vpop.permute.xlu2 %3198 }
0x1bb5   :  { %v3201_v27 = vand.u32 %v3199_v55, %v7843_v31 }
0x1bb7   :  { %3210 = vmatpush.bf16.msrb.mxu2 %v3201_v27 }
0x1bba   :  { %6045 = vmatmul.msk.bf16.vlgmr.msrb.gmra.mxu2 %vm1212_vm8, %v8376_v19 }
0x1bca   :  { %6046 = vmatmul.msk.bf16.gmra.mxu2 %vm1212_vm8, %v8381_v21 }
0x1bda   :  { %6047 = vmatmul.msk.bf16.gmra.mxu2 %vm1212_vm8, %v7989_v42 }
0x1bdc   :  { %v3265_v26 = vpop.f32.mrf.mxu0 }
0x1be2   :  { %v8480_v32 = vpop.f32.mrf.mxu3 }
0x1be4   :  { %v3267_v22 = vpop.f32.mrf.mxu0 }
0x1bea   :  { %v8482_v43 = vpop.f32.mrf.mxu3 }
0x1bec   :  { %v3270_v19 = vpop.f32.mrf.mxu0 }
0x1bf2   :  { %v8484_v46 = vpop.f32.mrf.mxu3 }
0x1bf4   :  { %v3272_v59 = vpop.f32.mrf.mxu0 }
0x1bfa   :  { %v8486_v28 = vpop.f32.mrf.mxu3 }
0x1bfc   :  { %v3275_v21 = vpop.f32.mrf.mxu0 }
0x1c02   :  { %v8488_v52 = vpop.f32.mrf.mxu3 }
0x1c04   :  { %v3277_v2 = vpop.f32.mrf.mxu0 }
0x1c0a   :  { %v3251_v23 = vpop.f32.mrf.mxu3 }
0x1c3d   :  { %v3212_v16 = vpop.f32.mrf.mxu2 }
0x1c3e   :  { %v3213_v34 = vadd.f32 %v3212_v16, %v8413_v53 }
0x1c40   :  { %v3279_v56 = vmul.f32 %v3265_v26, %v3213_v34 }
0x1c45   :  { %v3214_v11 = vpop.f32.mrf.mxu2 }
0x1c46   :  { %v3215_v6 = vadd.f32 %v3214_v11, %v8415_v50 }
0x1c48   :  { %v3280_v15 = vmul.f32 %v3267_v22, %v3215_v6 }
0x1c4a   :  { %v3284_v54 = vpack.c.bf16 %v3280_v15, %v3279_v56 }
0x1c4c   :  { %6054 = vmatmul.msk.bf16.vlgmr.msra.gmra.mxu1 %vm1678_vm3, %v3284_v54 }
0x1c4d   :  { %v3217_v37 = vpop.f32.mrf.mxu2 }
0x1c4e   :  { %v3218_v55 = vadd.f32 %v3217_v37, %v8429_v10 }
0x1c50   :  { %v3281_v17 = vmul.f32 %v3270_v19, %v3218_v55 }
0x1c55   :  { %v3219_v27 = vpop.f32.mrf.mxu2 }
0x1c56   :  { %v3220_v23 = vadd.f32 %v3219_v27, %v8431_v41 }
0x1c58   :  { %v3282_v38 = vmul.f32 %v3272_v59, %v3220_v23 }
0x1c5a   :  { %v3285_v5 = vpack.c.bf16 %v3282_v38, %v3281_v17 }
0x1c5c   :  { %6055 = vmatmul.msk.bf16.gmra.mxu1 %vm1678_vm3, %v3285_v5 }
0x1c5d   :  { %v3222_v16 = vpop.f32.mrf.mxu2 }
0x1c5e   :  { %v3223_v11 = vadd.f32 %v3222_v16, %v8433_v30 }
0x1c60   :  { %v3283_v26 = vmul.f32 %v3275_v21, %v3223_v11 }
0x1c62   :  { %v3286_v22 = vpack.c.bf16 %v3283_v26, %v3283_v26 }
0x1c65   :  { %v3224_v2 = vpop.f32.mrf.mxu2 }
0x1c6c   :  { %6056 = vmatmul.msk.bf16.gmra.mxu1 %vm1678_vm3, %v3286_v22 }
0x1cc9   :  { %v3305_v34 = vpop.f32.mrf.mxu1 }
0x1cca   :  { %v3319_v54 = vmul.f32 0.17677669, %v3305_v34 }
0x1ccc   :  { %v3324_v5 = vsel %vm953_vm4, %v3319_v54, inf }
0x1cd1   :  { %v3307_v6 = vpop.f32.mrf.mxu1 }
0x1cd2   :  { %v3320_v19 = vmul.f32 0.17677669, %v3307_v6 }
0x1cd4   :  { %v3325_v23 = vsel %vm953_vm4, %v3320_v19, inf }
0x1cd9   :  { %v3310_v56 = vpop.f32.mrf.mxu1 }
0x1cda   :  { %v3321_v59 = vmul.f32 0.17677669, %v3310_v56 }
0x1cdc   :  { %v3326_v16 = vsel %vm953_vm4, %v3321_v59, inf }
0x1ce1   :  { %v3312_v15 = vpop.f32.mrf.mxu1 }
0x1ce2   :  { %v3322_v37 = vmul.f32 0.17677669, %v3312_v15 }
0x1ce4   :  { %v3327_v17 = vsel %vm953_vm4, %v3322_v37, inf }
0x1ce5   :  { %v3331_v11 = vmin.f32 %v3326_v16, %v3327_v17 }
0x1ce9   :  { %v3315_v27 = vpop.f32.mrf.mxu1 }
0x1cea   :  { %v3323_v38 = vmul.f32 0.17677669, %v3315_v27 }
0x1cec   :  { %v3328_v55 = vsel %vm1923_vm5, %v3323_v38, inf }
0x1ced   :  { %v3329_v21 = vmin.f32 %v3324_v5, %v3328_v55 }
0x1cef   :  { %v3330_v2 = vmin.f32 %v3329_v21, %v3325_v23 }
0x1cf1   :  { %v3332_v26 = vmin.f32 %v3330_v2, %v3331_v11  ;;  %v3317_v22 = vpop.f32.mrf.mxu1 }
0x1cf2   :  { %v9188_v22 = vld [vmem:[#allocation90_spill] sm:$0xff] }
0x1cf3   :  { %v3333_v34 = vrot.slane %v3332_v26, 4 }
0x1cf5   :  { %v3334_v15 = vmin.f32 %v3332_v26, %v3333_v34 }
0x1cf7   :  { %v3335_v6 = vrot.slane %v3334_v15, 2 }
0x1cf9   :  { %v3336_v56 = vmin.f32 %v3334_v15, %v3335_v6 }
0x1cfb   :  { %v3337_v27 = vrot.slane %v3336_v56, 1 }
0x1cfd   :  { %v3338_v60 = vmin.f32 %v3336_v56, %v3337_v27 }
0x1cff   :  { %v8503_v4 = vsub.f32 %v3323_v38, %v3338_v60  ;;  %v8505_v24 = vsub.f32 %v3320_v19, %v3338_v60  ;;  %v8507_v58 = vsub.f32 %v3319_v54, %v3338_v60  ;;  %v8512_v5 = vsub.f32 %v3322_v37, %v3338_v60  ;;  %v6687_v37 = vld [vmem:[#allocation35 + $0x1] ss:$0 sm:$0xff] }
0x1d00   :  { %v8520_v54 = vsub.f32 %v3321_v59, %v3338_v60  ;;  %v8527_v19 = vadd.f32 %v6687_v37, %v8358_v8  ;;  %v8540_v8 = vadd.f32 %v6687_v37, %v8360_v13  ;;  %v9187_v13 = vld [vmem:[#allocation89_spill] sm:$0xff] }
0x1d01   :  { %3366 = vperm.xlu2 %6631, %v8503_v4   ;;  %3351 = vperm.xlu1 %6634, %v8505_v24  }
0x1d02   :  { %3346 = vperm.xlu0 %6615, %v8507_v58  }
0x1d09   :  { %6632 = vset.pattern.permute.xlu2 %v9173_v14  ;;  %3361 = vperm.xlu1 %6634, %v8512_v5  }
0x1d0a   :  { %6633 = vset.pattern.permute.xlu0 %v9173_v14  ;;  %3390 = vperm.xlu2 %6632, %v8507_v58  }
0x1d0b   :  { %3406 = vperm.xlu0 %6633, %v8503_v4  }
0x1d11   :  { %6637 = vset.pattern.permute.xlu1 %v9173_v14 }
0x1d12   :  { %3402 = vperm.xlu1 %6637, %v8512_v5   ;;  %6635 = vset.pattern.permute.xlu2 %v9174_v7 }
0x1d13   :  { %3398 = vperm.xlu0 %6633, %v8520_v54   ;;  %3356 = vperm.xlu2 %6635, %v8520_v54  }
0x1d1a   :  { %3659 = vrot.lane.b32.xlu1 %v8527_v19, %s7448_s26 }
0x1d1b   :  { %3576 = vrot.lane.b32.xlu0 %v8448_v62, %s7426_s25  ;;  %6636 = vset.pattern.permute.xlu2 %v9173_v14 }
0x1d1c   :  { %3394 = vperm.xlu2 %6636, %v8505_v24   ;;  %6643 = vset.pattern.permute.xlu1 %v9174_v7 }
0x1d24   :  { %3574 = vrot.lane.b32.xlu2 %v8446_v25, %s7426_s25 }
0x1d25   :  { %6652 = vset.pattern.permute.xlu2 %v9174_v7 }
0x1d2c   :  { %3661 = vrot.lane.b32.xlu2 %v8540_v8, %s7448_s26 }
0x1d5b   :  { %v3367_v60 = vpop.permute.xlu2 %3366 }
0x1d5c   :  { %v3373_v55 = vmul.f32 %v3367_v60, %v8168_v39 }
0x1d5e   :  { %v3378_v25 = vsel %vm1979_vm7, %v3373_v55, -inf }
0x1d64   :  { %v3391_v59 = vpop.permute.xlu2 %3390 }
0x1d6d   :  { %v3357_v21 = vpop.permute.xlu2 %3356 }
0x1d6e   :  { %v3371_v16 = vmul.f32 %v3357_v21, %v8180_v20 }
0x1d70   :  { %v3376_v6 = vsel %vm1212_vm8, %v3371_v16, -inf }
0x1d73   :  { %v3352_v62 = vpop.permute.xlu1 %3351 }
0x1d74   :  { %v3347_v38 = vpop.permute.xlu0 %3346  ;;  %v3370_v11 = vmul.f32 %v3352_v62, %v9187_v13 }
0x1d75   :  { %v3369_v17 = vmul.f32 %v3347_v38, %v8170_v48 }
0x1d76   :  { %v3375_v56 = vsel %vm1212_vm8, %v3370_v11, -inf  ;;  %v3395_v55 = vpop.permute.xlu2 %3394 }
0x1d77   :  { %v3374_v23 = vsel %vm1212_vm8, %v3369_v17, -inf  ;;  %v3409_v17 = vmul.f32 %v3391_v59, %v8170_v48 }
0x1d78   :  { %v3379_v2 = vmax.f32 %v3374_v23, %v3378_v25 }
0x1d79   :  { %v3414_v25 = vsel %vm1212_vm8, %v3409_v17, -inf }
0x1d7a   :  { %v3380_v60 = vmax.f32 %v3379_v2, %v3375_v56 }
0x1d7b   :  { %v3362_v26 = vpop.permute.xlu1 %3361 }
0x1d7c   :  { %v3372_v34 = vmul.f32 %v3362_v26, %v9188_v22  ;;  %v3410_v26 = vmul.f32 %v3395_v55, %v9187_v13 }
0x1d7d   :  { %v3407_v15 = vpop.permute.xlu0 %3406 }
0x1d7e   :  { %v3377_v27 = vsel %vm1212_vm8, %v3372_v34, -inf  ;;  %v3413_v37 = vmul.f32 %v3407_v15, %v8168_v39  ;;  %v3415_v59 = vsel %vm1212_vm8, %v3410_v26, -inf }
0x1d7f   :  { %v3381_v38 = vmax.f32 %v3376_v6, %v3377_v27 }
0x1d80   :  { %v3418_v62 = vsel %vm1979_vm7, %v3413_v37, -inf }
0x1d81   :  { %v3382_v21 = vmax.f32 %v3380_v60, %v3381_v38  ;;  %v3419_v57 = vmax.f32 %v3414_v25, %v3418_v62 }
0x1d83   :  { %v3383_v23 = vrot.slane %v3382_v21, 4  ;;  %v3420_v27 = vmax.f32 %v3419_v57, %v3415_v59 }
0x1d84   :  { %v3403_v16 = vpop.permute.xlu1 %3402 }
0x1d85   :  { %v3412_v11 = vmul.f32 %v3403_v16, %v9188_v22  ;;  %v3399_v34 = vpop.permute.xlu0 %3398  ;;  %v3384_v2 = vmax.f32 %v3382_v21, %v3383_v23 }
0x1d86   :  { %v3411_v15 = vmul.f32 %v3399_v34, %v8180_v20 }
0x1d87   :  { %v3417_v6 = vsel %vm1212_vm8, %v3412_v11, -inf  ;;  %v3385_v60 = vrot.slane %v3384_v2, 2 }
0x1d88   :  { %v3416_v56 = vsel %vm1212_vm8, %v3411_v15, -inf }
0x1d89   :  { %v3421_v37 = vmax.f32 %v3416_v56, %v3417_v6  ;;  %v3386_v55 = vmax.f32 %v3384_v2, %v3385_v60 }
0x1d8b   :  { %v3422_v38 = vmax.f32 %v3420_v27, %v3421_v37  ;;  %v3387_v25 = vrot.slane %v3386_v55, 1 }
0x1d8d   :  { %v3423_v17 = vrot.slane %v3422_v38, 4  ;;  %v3388_v48 = vmax.f32 %v3386_v55, %v3387_v25 }
0x1d8f   :  { %v3424_v13 = vmax.f32 %v3422_v38, %v3423_v17 }
0x1d91   :  { %v3425_v62 = vrot.slane %v3424_v13, 2 }
0x1d93   :  { %v3426_v16 = vmax.f32 %v3424_v13, %v3425_v62 }
0x1d95   :  { %v3427_v22 = vrot.slane %v3426_v16, 1 }
0x1d97   :  { %v3428_v34 = vmax.f32 %v3426_v16, %v3427_v22 }
0x1d99   :  { %v3429_v21 = vsel %vm1555_vm14, %v3388_v48, %v3428_v34 }
0x1d9a   :  { %v3430_v23 = vpack.c.bf16 %v3429_v21, %v3429_v21 }
0x1d9c   :  { %v3432_v26 = vsel %vm1212_vm8, %v3430_v23, 0 }
0x1d9d   :  { %3441 = vmatpush.bf16.xpose.msra.mxu2 %v3432_v26 }
0x1da4   :  { %6057 = vmatmul.msk.bf16.vlgmr.msra.gmra.mxu2 %vm1212_vm8, %v8458_v49 }
0x1db4   :  { %6058 = vmatmul.msk.bf16.gmra.mxu2 %vm1212_vm8, %v8465_v47 }
0x1dc4   :  { %6059 = vmatmul.msk.bf16.gmra.mxu2 %vm1212_vm8, %v7980_v29 }
0x1e27   :  { %v3443_v57 = vpop.f32.mrf.mxu2 }
0x1e28   :  { %v3457_v37 = vsub.f32 %v8507_v58, %v3443_v57 }
0x1e2a   :  { %v3462_v62 = vmul.f32 1.442695, %v3457_v37 }
0x1e2f   :  { %v3445_v13 = vpop.f32.mrf.mxu2 }
0x1e30   :  { %v3458_v56 = vsub.f32 %v8505_v24, %v3445_v13 }
0x1e32   :  { %v3464_v17 = vmul.f32 1.442695, %v3458_v56 }
0x1e37   :  { %v3448_v11 = vpop.f32.mrf.mxu2 }
0x1e38   :  { %v3459_v6 = vsub.f32 %v8520_v54, %v3448_v11 }
0x1e3a   :  { %v3466_v60 = vmul.f32 1.442695, %v3459_v6 }
0x1e3f   :  { %v3450_v15 = vpop.f32.mrf.mxu2 }
0x1e40   :  { %v3460_v48 = vsub.f32 %v8512_v5, %v3450_v15 }
0x1e42   :  { %v3468_v27 = vmul.f32 1.442695, %v3460_v48 }
0x1e47   :  { %v3453_v22 = vpop.f32.mrf.mxu2 }
0x1e48   :  { %v3461_v2 = vsub.f32 %v8503_v4, %v3453_v22 }
0x1e4a   :  { %v3470_v59 = vmul.f32 1.442695, %v3461_v2 }
0x1e4c   :  { %6727 = vpow2.f32 %v3470_v59 }
0x1e4d   :  { %6729 = vpow2.f32 %v3468_v27 }
0x1e4e   :  { %6731 = vpow2.f32 %v3466_v60 }
0x1e4f   :  { %v3455_v38 = vpop.f32.mrf.mxu2  ;;  %6733 = vpow2.f32 %v3464_v17 }
0x1e50   :  { %6735 = vpow2.f32 %v3462_v62 }
0x1e52   :  { %v6728_v55 = vpop.eup %6727 }
0x1e53   :  { %v3474_v25 = vpack.c.bf16 %v6728_v55, %v6728_v55  ;;  %v6730_v5 = vpop.eup %6729 }
0x1e54   :  { %v6732_v54 = vpop.eup %6731 }
0x1e55   :  { %v3476_v4 = vand.u32 %v3474_v25, %v8009_v9  ;;  %v3473_v24 = vpack.c.bf16 %v6730_v5, %v6732_v54  ;;  %v6734_v16 = vpop.eup %6733 }
0x1e56   :  { %v6736_v34 = vpop.eup %6735 }
0x1e57   :  { %3483 = vmatpush.bf16.msra.mxu3 %v3476_v4  ;;  %v3472_v58 = vpack.c.bf16 %v6734_v16, %v6736_v34 }
0x1e5b   :  { %3484 = vmatpush.bf16.msra.mxu3 %v3473_v24 }
0x1e5f   :  { %3485 = vmatpush.bf16.msra.mxu3 %v3472_v58 }
0x1e62   :  { %6060 = vmatmul.msk.bf16.vlgmr.msra.gmra.mxu3 %vm1551_vm15, %v8013_v44 }
0x1e63   :  { %3548 = vmatpush.bf16.msrb.mxu3 %v8221_v40 }
0x1ee5   :  { %v3487_v21 = vpop.f32.mrf.mxu3 }
0x1eed   :  { %v3489_v23 = vpop.f32.mrf.mxu3 }
0x1eee   :  { %v3492_v26 = vpack.c.bf16 %v3489_v23, %v3487_v21 }
0x1ef0   :  { %v3494_v57 = vand.u32 %v3492_v26, %v7843_v31 }
0x1ef2   :  { %3503 = vmatpush.bf16.msrb.mxu0 %v3494_v57 }
0x1ef5   :  { %6061 = vmatmul.msk.bf16.vlgmr.msrb.gmra.mxu0 %vm1212_vm8, %v8458_v49 }
0x1f05   :  { %6062 = vmatmul.msk.bf16.gmra.mxu0 %vm1212_vm8, %v8465_v47 }
0x1f15   :  { %6063 = vmatmul.msk.bf16.gmra.mxu0 %vm1212_vm8, %v7980_v29 }
0x1f72   :  { %v3505_v13 = vpop.f32.mrf.mxu0 }
0x1f73   :  { %v3506_v11 = vadd.f32 1e-16, %v3505_v13  ;;  %v6465_v13 = vld [vmem:[%s9178_s10 + $0x38] sm:$0xff] }
0x1f74   :  { %3643 = vmatpush.bf16.msrb.mxu2 %v6465_v13 }
0x1f75   :  { %6737 = vrcp.f32 %v3506_v11 }
0x1f7a   :  { %v3507_v15 = vpop.f32.mrf.mxu0 }
0x1f7b   :  { %v3508_v22 = vadd.f32 1e-16, %v3507_v15  ;;  %v6738_v48 = vpop.eup %6737 }
0x1f7c   :  { %v3524_v59 = vmul.f32 %v6738_v48, %v6736_v34 }
0x1f7d   :  { %6739 = vrcp.f32 %v3508_v22  ;;  %v3247_v22 = vadd.f32 %v8486_v28, %v8431_v41 }
0x1f82   :  { %v3510_v2 = vpop.f32.mrf.mxu0 }
0x1f83   :  { %v6740_v6 = vpop.eup %6739  ;;  %v3511_v37 = vadd.f32 1e-16, %v3510_v2 }
0x1f84   :  { %v3525_v56 = vmul.f32 %v6740_v6, %v6734_v16 }
0x1f85   :  { %6741 = vrcp.f32 %v3511_v37 }
0x1f86   :  { %v3529_v27 = vpack.c.bf16 %v3525_v56, %v3524_v59  ;;  %v3242_v59 = vadd.f32 %v8482_v43, %v8415_v50  ;;  %v6462_v50 = vld [vmem:[%s9178_s10 + $0x20] sm:$0xff] }
0x1f88   :  { %6064 = vmatmul.msk.bf16.vlgmr.msrb.gmra.mxu3 %vm953_vm4, %v3529_v27 }
0x1f8a   :  { %v3512_v49 = vpop.f32.mrf.mxu0 }
0x1f8b   :  { %v3513_v47 = vadd.f32 1e-16, %v3512_v49  ;;  %v6742_v60 = vpop.eup %6741  ;;  %v3575_v49 = vpop.permute.xlu2 %3574 }
0x1f8c   :  { %v3526_v62 = vmul.f32 %v6742_v60, %v6732_v54 }
0x1f8d   :  { %6743 = vrcp.f32 %v3513_v47  ;;  %v3577_v47 = vpop.permute.xlu0 %3576 }
0x1f92   :  { %v3515_v38 = vpop.f32.mrf.mxu0 }
0x1f93   :  { %v6744_v17 = vpop.eup %6743  ;;  %v3516_v4 = vadd.f32 1e-16, %v3515_v38 }
0x1f94   :  { %v3527_v25 = vmul.f32 %v6744_v17, %v6730_v5  ;;  %v3250_v5 = vadd.f32 %v8488_v52, %v8433_v30  ;;  %v3240_v52 = vadd.f32 %v8480_v32, %v8413_v53  ;;  %v6691_v17 = vld [vmem:[#allocation31 + $0x1] ss:$0 sm:$0xff] }
0x1f95   :  { %6745 = vrcp.f32 %v3516_v4 }
0x1f96   :  { %v3530_v24 = vpack.c.bf16 %v3527_v25, %v3526_v62 }
0x1f98   :  { %6065 = vmatmul.msk.bf16.gmra.mxu3 %vm953_vm4, %v3530_v24 }
0x1f9a   :  { %v3517_v16 = vpop.f32.mrf.mxu0 }
0x1f9b   :  { %v6746_v34 = vpop.eup %6745 }
0x1f9c   :  { %v3528_v58 = vmul.f32 %v6746_v34, %v6728_v55  ;;  %v3245_v55 = vadd.f32 %v8484_v46, %v8429_v10  ;;  %v6464_v10 = vld [vmem:[%s9178_s10 + $0x30] sm:$0xff]  ;;  %v6463_v46 = vld [vmem:[%s9178_s10 + $0x28] sm:$0xff] }
0x1f9d   :  { %3644 = vmatpush.bf16.msrb.mxu2 %v6464_v10 }
0x1f9e   :  { %v3531_v21 = vpack.c.bf16 %v3528_v58, %v3528_v58 }
0x1fa1   :  { %3645 = vmatpush.bf16.msrb.mxu2 %v6463_v46 }
0x1fa5   :  { %3646 = vmatpush.bf16.msrb.mxu2 %v6462_v50 }
0x1fa8   :  { %6066 = vmatmul.msk.bf16.gmra.mxu3 %vm953_vm4, %v3531_v21  ;;  %v3660_v21 = vpop.permute.xlu1 %3659 }
0x200b   :  { %v3550_v23 = vpop.f32.mrf.mxu3 }
0x200c   :  { %v3564_v27 = vmul.f32 %v3550_v23, %v3240_v52  ;;  %v8633_v52 = vld [vmem:[%s9161_s18] sm:$0x3] }
0x2013   :  { %v3552_v26 = vpop.f32.mrf.mxu3 }
0x2014   :  { %v3565_v41 = vmul.f32 %v3552_v26, %v3242_v59 }
0x2016   :  { %v3569_v37 = vpack.c.bf16 %v3565_v41, %v3564_v27 }
0x201b   :  { %v3555_v57 = vpop.f32.mrf.mxu3 }
0x201c   :  { %v3566_v56 = vmul.f32 %v3555_v57, %v3245_v55  ;;  %v3662_v57 = vpop.permute.xlu2 %3661 }
0x2023   :  { %v3557_v11 = vpop.f32.mrf.mxu3 }
0x2024   :  { %v3567_v2 = vmul.f32 %v3557_v11, %v3247_v22 }
0x2026   :  { %v3570_v28 = vpack.c.bf16 %v3567_v2, %v3566_v56 }
0x202b   :  { %v3560_v54 = vpop.f32.mrf.mxu3 }
0x202c   :  { %v3568_v15 = vmul.f32 %v3560_v54, %v3250_v5 }
0x202e   :  { %v3571_v48 = vpack.c.bf16 %v3568_v15, %v3568_v15 }
0x2030   :  { %v3581_v6 = vand.u32 %v3571_v48, %v8009_v9 }
0x2032   :  { %3588 = vmatpush.bf16.msrb.mxu1 %v3581_v6 }
0x2033   :  { %v3562_v30 = vpop.f32.mrf.mxu3 }
0x2036   :  { %3589 = vmatpush.bf16.msrb.mxu1 %v3570_v28 }
0x203a   :  { %3590 = vmatpush.bf16.msrb.mxu1 %v3569_v37 }
0x203d   :  { %6067 = vmatmul.msk.bf16.vlgmr.msrb.gmra.mxu1 %vm1551_vm15, %v8013_v44 }
0x20ba   :  { %v3592_v43 = vpop.f32.mrf.mxu1 }
0x20bb   :  { %v3593_v53 = vadd.f32 %v3592_v43, %v3575_v49 }
0x20c2   :  { %v3594_v60 = vpop.f32.mrf.mxu1 }
0x20c3   :  { %v3595_v32 = vadd.f32 %v3594_v60, %v3577_v47 }
0x20c5   :  { %v3606_v38 = vpack.c.bf16 %v3595_v32, %v3593_v53 }
0x20c7   :  { %6092 = vmatmul.msk.bf16.vlgmr.msrb.gmra.mxu2 %vm1678_vm3, %v3606_v38 }
0x214a   :  { %v3648_v62 = vpop.f32.mrf.mxu2 }
0x214b   :  { %v3649_v25 = vadd.f32 %v6691_v17, %v3648_v62 }
0x214d   :  { %v3653_v4 = vmul.f32 %v3649_v25, %v8527_v19 }
0x214f   :  { %v3655_v16 = vadd.f32 %v3653_v4, %v8315_v12 }
0x2151   :  { %v8612_v23 = vadd.f32 %v3660_v21, %v3655_v16  ;;  %v6477_v16 = vld [vmem:[%s9160_s19 + $0x28] sm:$0xff] }
0x2152   :  { %v3650_v24 = vpop.f32.mrf.mxu2 }
0x2153   :  { %v3651_v34 = vadd.f32 %v6691_v17, %v3650_v24  ;;  %v3667_v11 = vmul.f32 %v8612_v23, %v8612_v23 }
0x2155   :  { %v3654_v58 = vmul.f32 %v3651_v34, %v8540_v8 }
0x2157   :  { %v3656_v26 = vadd.f32 %v3654_v58, %v8318_v0 }
0x2159   :  { %v8615_v13 = vadd.f32 %v3662_v57, %v3656_v26  ;;  %v6476_v26 = vld [vmem:[%s9160_s19 + $0x20] sm:$0xff] }
0x215b   :  { %v3668_v19 = vmul.f32 %v8615_v13, %v8615_v13 }
0x215d   :  { %v6638_v5 = vpack.i.bf16 %v3668_v19, %v3667_v11 }
0x215f   :  { %6639 = vrot.lane.b32.xlu0 %v6638_v5, %s7447_s23 }
0x21d1   :  { %v6640_v12 = vpop.permute.xlu0 %6639 }
0x21d2   :  { %v6642_v54 = vunpack.i.h.bf16 %v6640_v12  ;;  %v6641_v8 = vunpack.i.l.bf16 %v6640_v12 }
0x21d4   :  { %v3678_v15 = vsel %vm581_vm6, %v8615_v13, %v6642_v54  ;;  %v3677_v0 = vsel %vm581_vm6, %v8612_v23, %v6641_v8 }
0x21d5   :  { %v3679_v22 = vpack.c.bf16 %v3678_v15, %v3677_v0 }
0x21d7   :  { %v3681_v48 = vand.u32 %v3679_v22, %v7843_v31 }
0x21d9   :  { %3690 = vmatpush.bf16.msra.mxu1 %v3681_v48 }
0x21dc   :  { %6093 = vmatmul.msk.bf16.vlgmr.msra.gmra.mxu1 %vm1212_vm8, %v7913_v18 }
0x2259   :  { %v3692_v55 = vpop.f32.mrf.mxu1 }
0x225a   :  { %3701 = vrot.lane.b32.xlu1 %v3692_v55, %s7448_s26  ;;  %v3696_v2 = vsel %vm1234_vm9, %v3692_v55, 0.0 }
0x225b   :  { %3697 = vadd.xlane.f32.xlu2 %v3696_v2 }
0x2261   :  { %v3694_v6 = vpop.f32.mrf.mxu1 }
0x22cc   :  { %v3702_v59 = vpop.permute.xlu1 %3701 }
0x22cd   :  { %v3704_v56 = vsel %vm1234_vm9, %v3702_v59, 0.0 }
0x22ce   :  { %3705 = vadd.xlane.f32.xlu0 %v3704_v56  ;;  %v3698_v30 = vpop.xlane.xlu2 %3697 }
0x22cf   :  { %v3699_v41 = vmul.f32 %v8633_v52, %v3698_v30 }
0x22d1   :  { %v3708_v27 = vmul.f32 %v3699_v41, %v3699_v41 }
0x2341   :  { %v3706_v28 = vpop.xlane.xlu0 %3705 }
0x2342   :  { %v3707_v37 = vmul.f32 %v8633_v52, %v3706_v28 }
0x2344   :  { %v3709_v10 = vsub.f32 %v3707_v37, %v3708_v27 }
0x2346   :  { %v3710_v46 = vmax.f32 %v3709_v10, 0.0  ;;  %v6467_v10 = vld [vmem:[%s9179_s30 + $0x18] sm:$0xff] }
0x2348   :  { %v3711_v50 = vadd.f32 1e-05, %v3710_v46  ;;  %v6466_v46 = vld [vmem:[%s9179_s30 + $0x10] sm:$0xff] }
0x234a   :  { %6747 = vrsqrt.f32 %v3711_v50  ;;  %vm3718_vm10 = vweird.f32 %v3711_v50 }
0x2350   :  { %v6748_v43 = vpop.eup %6747 }
0x2351   :  { %v3713_v49 = vmul.f32 %v6748_v43, %v3711_v50  ;;  %vm3719_vm12 = vweird.f32 %v6748_v43 }
0x2352   :  { %vm3720_vm11 = vmor %vm3718_vm10, %vm3719_vm12 }
0x2353   :  { %v3714_v47 = vmul.f32 %v6748_v43, %v3713_v49  ;;  %v6474_v49 = vld [vmem:[%s9180_s11 + $0x70] sm:$0xff] }
0x2355   :  { %v3715_v60 = vmul.f32 0.5, %v3714_v47  ;;  %v6473_v47 = vld [vmem:[%s9180_s11 + $0x68] sm:$0xff] }
0x2357   :  { %v3716_v53 = vsub.f32 1.5, %v3715_v60 }
0x2359   :  { %v3717_v32 = vmul.f32 %v6748_v43, %v3716_v53  ;;  %v6472_v53 = vld [vmem:[%s9180_s11 + $0x60] sm:$0xff] }
0x235b   :  { %v3721_v38 = vsel %vm3720_vm11, %v6748_v43, %v3717_v32  ;;  %v6475_v43 = vld [vmem:[%s9180_s11 + $0x78] sm:$0xff] }
0x235c   :  { %3723 = vrot.lane.b32.xlu1 %v3721_v38, %s7431_s17 }
0x23ce   :  { %v3724_v17 = vpop.permute.xlu1 %3723 }
0x23cf   :  { %v3726_v62 = vsel %vm1265_vm13, %v3699_v41, %v3724_v17 }
0x23d0   :  { %v3728_v25 = vsel %vm650_vm0, %v3726_v62, 0 }
0x23d1   :  { %v3745_v4 = vand.u32 4294901760, %v3728_v25 }
0x23d3   :  { %v3780_v24 = vsub.f32 %v3728_v25, %v3745_v4  ;;  %3746 = vmatpush.msra.mxu2 %v3745_v4  ;;  %3839 = vmatpush.msrb.mxu1 %v3745_v4 }
0x23d4   :  { %3752 = vmatmul.f32.vlgmr.msra.gmra.mxu2 %v7888_v3  ;;  %3843 = vmatmul.f32.vlgmr.msrb.gmra.mxu1 %v7883_v1 }
0x23d5   :  { %3811 = vmatpush.msra.mxu3 %v3780_v24  ;;  %v3781_v34 = vand.u32 4294901760, %v3780_v24  ;;  %4041 = vmatpush.bf16.msra.mxu1 %v6475_v43 }
0x23d6   :  { %3814 = vmatmul.f32.vlgmr.msra.gmra.mxu3 %v7880_v63 }
0x23d7   :  { %3871 = vmatpush.msrb.mxu2 %v3781_v34  ;;  %v3782_v58 = vsub.f32 %v3780_v24, %v3781_v34  ;;  %3961 = vmatpush.bf16.msrb.mxu3 %v6467_v10  ;;  %v6470_v34 = vld [vmem:[%s9180_s11 + $0x50] sm:$0xff] }
0x23d9   :  { %4092 = vmatpush.bf16.msra.mxu2 %v6477_v16  ;;  %v3783_v21 = vand.u32 4294901760, %v3782_v58  ;;  %4042 = vmatpush.bf16.msra.mxu1 %v6474_v49  ;;  %v6471_v16 = vld [vmem:[%s9180_s11 + $0x58] sm:$0xff]  ;;  %v6469_v58 = vld [vmem:[%s9180_s11 + $0x48] sm:$0xff] }
0x23db   :  { %3784 = vmatpush.msra.mxu0 %v3783_v21  ;;  %3962 = vmatpush.bf16.msrb.mxu3 %v6466_v46  ;;  %v6468_v21 = vld [vmem:[%s9180_s11 + $0x40] sm:$0xff] }
0x23dc   :  { %3760 = vmatmul.f32.gmra.mxu2 %v7860_v45  ;;  %6094 = vmatmul.msk.f32.vlgmr.msra.gmra.mxu0 %vm953_vm4, %v7874_v61 }
0x23dd   :  { %3897 = vmatpush.msrb.mxu0 %v3745_v4  ;;  %3849 = vmatmul.f32.gmra.mxu1 %v7853_v36 }
0x23de   :  { %3819 = vmatmul.f32.gmra.mxu3 %v7850_v35  ;;  %4093 = vmatpush.bf16.msra.mxu2 %v6476_v26 }
0x23df   :  { %4043 = vmatpush.bf16.msra.mxu1 %v6473_v47 }
0x23e3   :  { %4044 = vmatpush.bf16.msra.mxu1 %v6472_v53 }
0x23e4   :  { %6095 = vmatmul.msk.f32.gmra.mxu0 %vm953_vm4, %v7846_v33  ;;  %6096 = vmatmul.msk.f32.vlgmr.msrb.gmra.mxu2 %vm953_vm4, %v7874_v61 }
0x23e7   :  { %4045 = vmatpush.bf16.msra.mxu1 %v6471_v16 }
0x23eb   :  { %4046 = vmatpush.bf16.msra.mxu1 %v6470_v34 }
0x23ec   :  { %6097 = vmatmul.msk.f32.gmra.mxu2 %vm953_vm4, %v7846_v33  ;;  %6098 = vmatmul.msk.f32.vlgmr.msrb.gmra.mxu0 %vm953_vm4, %v7874_v61 }
0x23ef   :  { %4047 = vmatpush.bf16.msra.mxu1 %v6469_v58 }
0x23f3   :  { %4048 = vmatpush.bf16.msra.mxu1 %v6468_v21 }
0x23f4   :  { %6099 = vmatmul.msk.f32.gmra.mxu0 %vm953_vm4, %v7846_v33  ;;  %6173 = vmatmul.msk.bf16.vlgmr.msra.gmra.mxu2 %vm581_vm6, %v7919_v51 }
0x2451   :  { %v3844_v15 = vpop.f32.mrf.mxu1 }
0x2457   :  { %v3753_v57 = vpop.f32.mrf.mxu2 }
0x2459   :  { %v3787_v11 = vpop.f32.mrf.mxu0  ;;  %v3815_v5 = vpop.f32.mrf.mxu3 }
0x245a   :  { %v3788_v19 = vadd.f32 %v3787_v11, %v3753_v57  ;;  %v3850_v51 = vpop.f32.mrf.mxu1  ;;  %v6693_v57 = vld [vmem:[#allocation32 + $0x1] ss:$0 sm:$0xff] }
0x245c   :  { %v3816_v8 = vadd.f32 %v3815_v5, %v3788_v19 }
0x245e   :  { %v3845_v0 = vadd.f32 %v3844_v15, %v3816_v8 }
0x245f   :  { %v3761_v12 = vpop.f32.mrf.mxu2 }
0x2461   :  { %v3791_v54 = vpop.f32.mrf.mxu0  ;;  %v3820_v59 = vpop.f32.mrf.mxu3 }
0x2462   :  { %v3792_v6 = vadd.f32 %v3791_v54, %v3761_v12 }
0x2464   :  { %v3821_v56 = vadd.f32 %v3820_v59, %v3792_v6 }
0x2466   :  { %v3851_v41 = vadd.f32 %v3850_v51, %v3821_v56 }
0x2467   :  { %v3874_v22 = vpop.f32.mrf.mxu2 }
0x2468   :  { %v3875_v48 = vadd.f32 %v3874_v22, %v3845_v0 }
0x2469   :  { %v3900_v55 = vpop.f32.mrf.mxu0 }
0x246a   :  { %v3901_v2 = vadd.f32 %v3900_v55, %v3875_v48  ;;  %v6694_v55 = vld [vmem:[#allocation34 + $0x1] ss:$0 sm:$0xff] }
0x246c   :  { %3909 = vperm.xlu1 %6643, %v3901_v2  }
0x246f   :  { %v3878_v30 = vpop.f32.mrf.mxu2 }
0x2470   :  { %v3879_v28 = vadd.f32 %v3878_v30, %v3851_v41 }
0x2471   :  { %v3904_v27 = vpop.f32.mrf.mxu0 }
0x2472   :  { %v3905_v37 = vadd.f32 %v3904_v27, %v3879_v28 }
0x2474   :  { %6644 = vset.pattern.permute.xlu1 %v9173_v14 }
0x2475   :  { %3920 = vperm.xlu1 %6644, %v3901_v2  }
0x247d   :  { %6645 = vset.pattern.permute.xlu1 %v9174_v7 }
0x247e   :  { %3914 = vperm.xlu1 %6645, %v3905_v37  }
0x2486   :  { %6646 = vset.pattern.permute.xlu1 %v9173_v14 }
0x2487   :  { %3924 = vperm.xlu1 %6646, %v3905_v37  }
0x248f   :  { %6660 = vset.pattern.permute.xlu1 %v9174_v7 }
0x24de   :  { %v3910_v50 = vpop.permute.xlu1 %3909 }
0x24df   :  { %v3917_v38 = vsub.f32 %v8612_v23, %v3910_v50 }
0x24e7   :  { %v3921_v60 = vpop.permute.xlu1 %3920 }
0x24e8   :  { %v3927_v25 = vmul.f32 %v3921_v60, %v3917_v38 }
0x24f0   :  { %v3915_v32 = vpop.permute.xlu1 %3914 }
0x24f1   :  { %v3918_v17 = vsub.f32 %v8615_v13, %v3915_v32 }
0x24f9   :  { %v3925_v62 = vpop.permute.xlu1 %3924 }
0x24fa   :  { %v3928_v4 = vmul.f32 %v3925_v62, %v3918_v17 }
0x24fc   :  { %v3934_v24 = vpack.c.bf16 %v3928_v4, %v3927_v25 }
0x24fe   :  { %6112 = vmatmul.msk.bf16.vlgmr.msrb.gmra.mxu3 %vm581_vm6, %v3934_v24 }
0x2581   :  { %v3964_v26 = vpop.f32.mrf.mxu3 }
0x2582   :  { %v3965_v11 = vadd.f32 %v6693_v57, %v3964_v26 }
0x2584   :  { %v3971_v5 = vmul.f32 0.01, %v3965_v11  ;;  %vm3969_vm12 = vcmp.gt.f32.partialorder %v3965_v11, 0.0 }
0x2586   :  { %v3973_v8 = vsel %vm3969_vm12, %v3965_v11, %v3971_v5 }
0x2589   :  { %v3966_v19 = vpop.f32.mrf.mxu3 }
0x258a   :  { %v3967_v12 = vadd.f32 %v6693_v57, %v3966_v19 }
0x258c   :  { %vm3970_vm10 = vcmp.gt.f32.partialorder %v3967_v12, 0.0  ;;  %v3972_v54 = vmul.f32 0.01, %v3967_v12 }
0x258e   :  { %v3974_v15 = vsel %vm3970_vm10, %v3967_v12, %v3972_v54 }
0x258f   :  { %v3992_v0 = vpack.c.bf16 %v3974_v15, %v3973_v8 }
0x2591   :  { %4049 = vmatmul.bf16.vlgmr.msra.gmra.mxu1 %v3992_v0 }
0x260e   :  { %v4050_v22 = vpop.f32.mrf.mxu1 }
0x260f   :  { %v4055_v48 = vadd.f32 %v4050_v22, %v8612_v23  ;;  %v8723_v22 = vpop.f32.mrf.mxu2 }
0x2611   :  { %v8680_v6 = vadd.f32 %v6694_v55, %v4055_v48 }
0x2613   :  { %v4100_v51 = vmul.f32 %v8680_v6, %v8680_v6 }
0x2616   :  { %v4052_v2 = vpop.f32.mrf.mxu1 }
0x2617   :  { %v4056_v59 = vadd.f32 %v4052_v2, %v8615_v13  ;;  %v8725_v48 = vpop.f32.mrf.mxu2 }
0x2619   :  { %v8683_v56 = vadd.f32 %v6694_v55, %v4056_v59 }
0x261b   :  { %v4101_v30 = vmul.f32 %v8683_v56, %v8683_v56 }
0x261d   :  { %v6647_v41 = vpack.i.bf16 %v4101_v30, %v4100_v51 }
0x261f   :  { %6648 = vrot.lane.b32.xlu2 %v6647_v41, %s7447_s23 }
0x2679   :  { %v6649_v28 = vpop.permute.xlu2 %6648 }
0x267a   :  { %v6651_v27 = vunpack.i.h.bf16 %v6649_v28  ;;  %v6650_v23 = vunpack.i.l.bf16 %v6649_v28 }
0x267c   :  { %v4111_v37 = vsel %vm581_vm6, %v8683_v56, %v6651_v27  ;;  %v4110_v13 = vsel %vm581_vm6, %v8680_v6, %v6650_v23 }
0x267d   :  { %v4112_v10 = vpack.c.bf16 %v4111_v37, %v4110_v13 }
0x267f   :  { %v4114_v46 = vand.u32 %v4112_v10, %v7843_v31 }
0x2681   :  { %4123 = vmatpush.bf16.msra.mxu0 %v4114_v46 }
0x2684   :  { %6174 = vmatmul.msk.bf16.vlgmr.msra.gmra.mxu0 %vm1212_vm8, %v7913_v18 }
0x2701   :  { %v4125_v50 = vpop.f32.mrf.mxu0 }
0x2702   :  { %4134 = vrot.lane.b32.xlu1 %v4125_v50, %s7448_s26  ;;  %v4129_v43 = vsel %vm1234_vm9, %v4125_v50, 0.0 }
0x2703   :  { %4130 = vadd.xlane.f32.xlu0 %v4129_v43 }
0x2709   :  { %v4127_v49 = vpop.f32.mrf.mxu0 }
0x2774   :  { %v4135_v47 = vpop.permute.xlu1 %4134 }
0x2775   :  { %v4137_v60 = vsel %vm1234_vm9, %v4135_v47, 0.0 }
0x2776   :  { %4138 = vadd.xlane.f32.xlu1 %v4137_v60  ;;  %v4131_v53 = vpop.xlane.xlu0 %4130 }
0x2777   :  { %v4132_v32 = vmul.f32 %v8633_v52, %v4131_v53 }
0x2779   :  { %v4141_v17 = vmul.f32 %v4132_v32, %v4132_v32 }
0x27e9   :  { %v4139_v38 = vpop.xlane.xlu1 %4138 }
0x27ea   :  { %v4140_v62 = vmul.f32 %v8633_v52, %v4139_v38 }
0x27ec   :  { %v4142_v25 = vsub.f32 %v4140_v62, %v4141_v17 }
0x27ee   :  { %v4143_v4 = vmax.f32 %v4142_v25, 0.0 }
0x27f0   :  { %v4144_v24 = vadd.f32 1e-05, %v4143_v4 }
0x27f2   :  { %6749 = vrsqrt.f32 %v4144_v24  ;;  %vm4151_vm12 = vweird.f32 %v4144_v24 }
0x27f8   :  { %v6750_v16 = vpop.eup %6749 }
0x27f9   :  { %v4146_v34 = vmul.f32 %v6750_v16, %v4144_v24  ;;  %vm4152_vm11 = vweird.f32 %v6750_v16 }
0x27fa   :  { %vm4153_vm10 = vmor %vm4151_vm12, %vm4152_vm11 }
0x27fb   :  { %v4147_v58 = vmul.f32 %v6750_v16, %v4146_v34 }
0x27fd   :  { %v4148_v21 = vmul.f32 0.5, %v4147_v58 }
0x27ff   :  { %v4149_v26 = vsub.f32 1.5, %v4148_v21 }
0x2801   :  { %v4150_v57 = vmul.f32 %v6750_v16, %v4149_v26 }
0x2803   :  { %v4154_v11 = vsel %vm4153_vm10, %v6750_v16, %v4150_v57 }
0x2804   :  { %4156 = vrot.lane.b32.xlu0 %v4154_v11, %s7431_s17  ;;  %v8739_v11 = vld [vmem:[%s9163_s14] sm:$0xff] }
0x2876   :  { %v4157_v19 = vpop.permute.xlu0 %4156 }
0x2877   :  { %v4159_v5 = vsel %vm1265_vm13, %v4132_v32, %v4157_v19  ;;  %v8744_v19 = vld [vmem:[%s9163_s14 + $0x8] sm:$0xff] }
0x2878   :  { %v4161_v52 = vsel %vm650_vm0, %v4159_v5, 0 }
0x2879   :  { %v4178_v12 = vand.u32 4294901760, %v4161_v52 }
0x287b   :  { %v4213_v54 = vsub.f32 %v4161_v52, %v4178_v12  ;;  %4179 = vmatpush.msra.mxu3 %v4178_v12 }
0x287c   :  { %4185 = vmatmul.f32.vlgmr.msra.gmra.mxu3 %v7888_v3 }
0x287d   :  { %4272 = vmatpush.msrb.mxu3 %v4178_v12  ;;  %4244 = vmatpush.msrb.mxu0 %v4213_v54  ;;  %v4214_v8 = vand.u32 4294901760, %v4213_v54 }
0x287e   :  { %4247 = vmatmul.f32.vlgmr.msrb.gmra.mxu0 %v7880_v63 }
0x287f   :  { %4304 = vmatpush.msrb.mxu1 %v4214_v8  ;;  %v4215_v15 = vsub.f32 %v4213_v54, %v4214_v8 }
0x2880   :  { %6177 = vmatmul.msk.f32.vlgmr.msrb.gmra.mxu1 %vm953_vm4, %v7874_v61 }
0x2881   :  { %v4216_v0 = vand.u32 4294901760, %v4215_v15  ;;  %v9189_v15 = vld [vmem:[#allocation84_spill] sm:$0xff] }
0x2883   :  { %4217 = vmatpush.msrb.mxu2 %v4216_v0 }
0x2884   :  { %4193 = vmatmul.f32.gmra.mxu3 %v7860_v45  ;;  %6175 = vmatmul.msk.f32.vlgmr.msrb.gmra.mxu2 %vm953_vm4, %v7874_v61 }
0x2885   :  { %4330 = vmatpush.msra.mxu2 %v4178_v12 }
0x2886   :  { %4252 = vmatmul.f32.gmra.mxu0 %v7850_v35 }
0x2888   :  { %6178 = vmatmul.msk.f32.gmra.mxu1 %vm953_vm4, %v7846_v33 }
0x288c   :  { %6176 = vmatmul.msk.f32.gmra.mxu2 %vm953_vm4, %v7846_v33  ;;  %4276 = vmatmul.f32.vlgmr.msrb.gmra.mxu3 %v7883_v1 }
0x2894   :  { %4282 = vmatmul.f32.gmra.mxu3 %v7853_v36  ;;  %6179 = vmatmul.msk.f32.vlgmr.msra.gmra.mxu2 %vm953_vm4, %v7874_v61 }
0x289c   :  { %6180 = vmatmul.msk.f32.gmra.mxu2 %vm953_vm4, %v7846_v33 }
0x28fb   :  { %v4248_v51 = vpop.f32.mrf.mxu0 }
0x28fd   :  { %v4307_v23 = vpop.f32.mrf.mxu1 }
0x28ff   :  { %v4186_v55 = vpop.f32.mrf.mxu3 }
0x2903   :  { %v4253_v10 = vpop.f32.mrf.mxu0 }
0x2905   :  { %v4311_v53 = vpop.f32.mrf.mxu1 }
0x2907   :  { %v4194_v2 = vpop.f32.mrf.mxu3  ;;  %v4220_v59 = vpop.f32.mrf.mxu2 }
0x2908   :  { %v4221_v30 = vadd.f32 %v4220_v59, %v4186_v55  ;;  %v9190_v55 = vld [vmem:[#allocation85_spill] sm:$0xff]  ;;  %v9191_v59 = vld [vmem:[#allocation80_spill] sm:$0xff] }
0x290a   :  { %v4249_v27 = vadd.f32 %v4248_v51, %v4221_v30 }
0x290f   :  { %v4224_v41 = vpop.f32.mrf.mxu2  ;;  %v4277_v28 = vpop.f32.mrf.mxu3 }
0x2910   :  { %v4278_v37 = vadd.f32 %v4277_v28, %v4249_v27  ;;  %v4225_v13 = vadd.f32 %v4224_v41, %v4194_v2  ;;  %v9192_v41 = vld [vmem:[#allocation82_spill] sm:$0xff] }
0x2912   :  { %v4308_v46 = vadd.f32 %v4307_v23, %v4278_v37  ;;  %v4254_v49 = vadd.f32 %v4253_v10, %v4225_v13  ;;  %v9193_v37 = vld [vmem:[#allocation81_spill] sm:$0xff] }
0x2917   :  { %v4283_v50 = vpop.f32.mrf.mxu3  ;;  %v4333_v43 = vpop.f32.mrf.mxu2 }
0x2918   :  { %v4334_v47 = vadd.f32 %v4333_v43, %v4308_v46  ;;  %v4284_v60 = vadd.f32 %v4283_v50, %v4254_v49 }
0x291a   :  { %4353 = vperm.xlu0 %6633, %v4334_v47   ;;  %4342 = vperm.xlu2 %6652, %v4334_v47   ;;  %v4312_v32 = vadd.f32 %v4311_v53, %v4284_v60 }
0x291f   :  { %v4337_v38 = vpop.f32.mrf.mxu2 }
0x2920   :  { %v4338_v17 = vadd.f32 %v4337_v38, %v4312_v32 }
0x2922   :  { %4347 = vperm.xlu2 %6652, %v4338_v17   ;;  %6659 = vset.pattern.permute.xlu0 %v9174_v7 }
0x292a   :  { %6653 = vset.pattern.permute.xlu2 %v9173_v14 }
0x292b   :  { %4357 = vperm.xlu2 %6653, %v4338_v17  }
0x2974   :  { %v4343_v62 = vpop.permute.xlu2 %4342 }
0x2975   :  { %v4350_v24 = vsub.f32 %v8680_v6, %v4343_v62 }
0x297c   :  { %v4348_v25 = vpop.permute.xlu2 %4347 }
0x297d   :  { %v4351_v16 = vsub.f32 %v8683_v56, %v4348_v25  ;;  %v6479_v25 = vld [vmem:[%s9166_s20 + $0x28] sm:$0xff] }
0x297e   :  { %4451 = vmatpush.bf16.msra.mxu1 %v6479_v25  ;;  %v6483_v25 = vld [vmem:[%s9168_s7 + $0x94] sm:$0xf0] }
0x2985   :  { %v4358_v4 = vpop.permute.xlu2 %4357 }
0x2986   :  { %v8731_v58 = vmul.f32 %v4358_v4, %v4351_v16  ;;  %v6478_v4 = vld [vmem:[%s9166_s20 + $0x20] sm:$0xff] }
0x2987   :  { %4452 = vmatpush.bf16.msra.mxu1 %v6478_v4  ;;  %v6488_v16 = vld [vmem:[%s9167_s1 + $0x20] sm:$0xff]  ;;  %v6482_v4 = vld [vmem:[%s9168_s7 + $0x94] sm:$0xf] }
0x298c   :  { %v4354_v34 = vpop.permute.xlu0 %4353 }
0x298d   :  { %v8733_v21 = vmul.f32 %v4354_v34, %v4350_v24  ;;  %v6489_v24 = vld [vmem:[%s9167_s1 + $0x28] sm:$0xff] }
0x298e   :  { %4580 = vmatpush.bf16.msrb.mxu1 %v6489_v24  ;;  %v6219_v24 = vld [vmem:[%s9168_s7 + $0x98] sm:$0xf0] }
0x298f   :  { %v4362_v26 = vpack.c.bf16 %v8731_v58, %v8733_v21 }
0x2991   :  { %v4364_v57 = vand.u32 %v4362_v26, %v7843_v31 }
0x2992   :  { %4581 = vmatpush.bf16.msrb.mxu1 %v6488_v16 }
0x2993   :  { %4373 = vmatpush.bf16.msra.mxu0 %v4364_v57 }
0x2996   :  { %6181 = vmatmul.msk.bf16.vlgmr.msra.gmra.mxu0 %vm1212_vm8, %v8739_v11 }
0x29a6   :  { %6182 = vmatmul.msk.bf16.gmra.mxu0 %vm1212_vm8, %v8744_v19 }
0x29b6   :  { %6183 = vmatmul.msk.bf16.gmra.mxu0 %vm1212_vm8, %v7989_v42 }
0x2a13   :  { %v4375_v5 = vpop.f32.mrf.mxu0 }
0x2a14   :  { %v4376_v13 = vadd.f32 %v4375_v5, %v9193_v37 }
0x2a16   :  { %v4389_v60 = vmax.f32 %v4376_v13, 0.0  ;;  %v6233_v13 = vld [vmem:[%s9168_s7 + $0xb0] sm:$0xf] }
0x2a18   :  { %v4394_v17 = vadd.f32 1e-07, %v4389_v60 }
0x2a1b   :  { %v4377_v52 = vpop.f32.mrf.mxu0 }
0x2a1c   :  { %v4378_v28 = vadd.f32 %v4377_v52, %v9192_v41 }
0x2a1e   :  { %v4390_v43 = vmax.f32 %v4378_v28, 0.0 }
0x2a20   :  { %v4395_v32 = vadd.f32 1e-07, %v4390_v43  ;;  %v6235_v43 = vld [vmem:[%s9168_s7 + $0xb8] sm:$0xf0] }
0x2a22   :  { %v4399_v62 = vpack.c.bf16 %v4395_v32, %v4394_v17  ;;  %v6227_v32 = vld [vmem:[%s9168_s7 + $0xa8] sm:$0xf0] }
0x2a23   :  { %v4380_v12 = vpop.f32.mrf.mxu0 }
0x2a24   :  { %v4381_v51 = vadd.f32 %v9191_v59, %v4380_v12  ;;  %v6787_v12 = vld [vmem:[%s9172_s2 + $0x18] sm:$0xff] }
0x2a26   :  { %v4391_v10 = vmax.f32 %v4381_v51, 0.0  ;;  %v6695_v51 = vld [vmem:[#allocation29 + $0x2] ss:$0 sm:$0xff] }
0x2a28   :  { %v4396_v53 = vadd.f32 1e-07, %v4391_v10  ;;  %v6487_v10 = vld [vmem:[%s9168_s7 + $0xb4] sm:$0xf0] }
0x2a2b   :  { %v4382_v54 = vpop.f32.mrf.mxu0 }
0x2a2c   :  { %v4383_v0 = vadd.f32 %v4382_v54, %v9189_v15  ;;  %v6788_v54 = vld [vmem:[%s9172_s2 + $0x10] sm:$0xff]  ;;  %v6790_v15 = vld [vmem:[%s9172_s2] sm:$0xff] }
0x2a2e   :  { %v4392_v27 = vmax.f32 %v4383_v0, 0.0  ;;  %v9194_v0 = vld [vmem:[#allocation83_spill] sm:$0xff] }
0x2a30   :  { %v4397_v49 = vadd.f32 1e-07, %v4392_v27 }
0x2a32   :  { %v4400_v38 = vpack.c.bf16 %v4397_v49, %v4396_v53  ;;  %v6225_v49 = vld [vmem:[%s9168_s7 + $0xa0] sm:$0xf]  ;;  %v6484_v53 = vld [vmem:[%s9168_s7 + $0xa4] sm:$0xf] }
0x2a33   :  { %v4385_v8 = vpop.f32.mrf.mxu0  ;;  %v6230_v17 = vor.u32 %v6484_v53, %v6227_v32 }
0x2a34   :  { %v4386_v2 = vadd.f32 %v4385_v8, %v9190_v55  ;;  %v6789_v8 = vld [vmem:[%s9172_s2 + $0x8] sm:$0xff]  ;;  %v9195_v55 = vld [vmem:[#allocation86_spill] sm:$0xff] }
0x2a36   :  { %v4393_v30 = vmax.f32 %v4386_v2, 0.0  ;;  %v9196_v2 = vld [vmem:[#allocation87_spill] sm:$0xff] }
0x2a38   :  { %v4398_v23 = vadd.f32 1e-07, %v4393_v30 }
0x2a3a   :  { %v4401_v46 = vpack.c.bf16 %v4398_v23, %v4398_v23 }
0x2a3b   :  { %v4387_v50 = vpop.f32.mrf.mxu0 }
0x2a3c   :  { %v4403_v47 = vand.u32 %v4401_v46, %v8009_v9  ;;  %v6486_v46 = vld [vmem:[%s9168_s7 + $0xb4] sm:$0xf]  ;;  %v6234_v50 = vor.u32 %v6487_v10, %v6233_v13  ;;  %v6206_v10 = vld [vmem:[%s9171_s12 + $0x4] sm:$0x3] }
0x2a3d   :  { %v6238_v60 = vor.u32 %v6486_v46, %v6235_v43  ;;  %v4482_v46 = vperm.slane %v6206_v10, 0 }
0x2a3e   :  { %4410 = vmatpush.bf16.msra.mxu3 %v4403_v47  ;;  %v6485_v47 = vld [vmem:[%s9168_s7 + $0xa4] sm:$0xf0]  ;;  %4533 = vmatpush.bf16.msrb.mxu2 %v6234_v50  ;;  %v4483_v50 = vperm.slane %v6206_v10, 1 }
0x2a42   :  { %4411 = vmatpush.bf16.msra.mxu3 %v4400_v38  ;;  %v6226_v38 = vor.u32 %v6485_v47, %v6225_v49 }
0x2a44   :  { %4534 = vmatpush.bf16.msrb.mxu2 %v6226_v38 }
0x2a46   :  { %4412 = vmatpush.bf16.msra.mxu3 %v4399_v62  ;;  %v6217_v62 = vld [vmem:[%s9168_s7 + $0x90] sm:$0xf] }
0x2a47   :  { %v6218_v16 = vor.u32 %v6483_v25, %v6217_v62  ;;  %v8821_v62 = vld [vmem:[%s9154_s22] sm:$0xff]  ;;  %v8828_v25 = vld [vmem:[%s9154_s22 + $0x8] sm:$0xff] }
0x2a49   :  { %6184 = vmatmul.msk.bf16.vlgmr.msra.gmra.mxu3 %vm1551_vm15, %v8013_v44  ;;  %4535 = vmatpush.bf16.msrb.mxu2 %v6218_v16 }
0x2a4a   :  { %4547 = vmatpush.bf16.msrb.mxu3 %v6238_v60 }
0x2a4e   :  { %4548 = vmatpush.bf16.msrb.mxu3 %v6230_v17 }
0x2acc   :  { %v4414_v34 = vpop.f32.mrf.mxu3 }
0x2acd   :  { %v4415_v57 = vadd.f32 %v4414_v34, %v8733_v21 }
0x2ad4   :  { %v4416_v26 = vpop.f32.mrf.mxu3 }
0x2ad5   :  { %v4417_v5 = vadd.f32 %v4416_v26, %v8731_v58  ;;  %v6222_v26 = vor.u32 %v6482_v4, %v6219_v24 }
0x2ad7   :  { %v4424_v52 = vpack.c.bf16 %v4417_v5, %v4415_v57  ;;  %4549 = vmatpush.bf16.msrb.mxu3 %v6222_v26 }
0x2ad9   :  { %6197 = vmatmul.msk.bf16.vlgmr.msra.gmra.mxu1 %vm581_vm6, %v4424_v52 }
0x2ada   :  { %4701 = vmatpush.bf16.msra.mxu1 %v6787_v12  ;;  %v6209_v12 = vld [vmem:[%s9168_s7 + $0x80] sm:$0xf] }
0x2ade   :  { %4702 = vmatpush.bf16.msra.mxu1 %v6788_v54  ;;  %v6481_v54 = vld [vmem:[%s9168_s7 + $0x84] sm:$0xf0] }
0x2ae2   :  { %4703 = vmatpush.bf16.msra.mxu1 %v6789_v8  ;;  %v6480_v8 = vld [vmem:[%s9168_s7 + $0x84] sm:$0xf] }
0x2ae6   :  { %4704 = vmatpush.bf16.msra.mxu1 %v6790_v15  ;;  %v6210_v15 = vor.u32 %v6481_v54, %v6209_v12 }
0x2ae8   :  { %4536 = vmatpush.bf16.msrb.mxu2 %v6210_v15 }
0x2ae9   :  { %6253 = vmatmul.msk.bf16.vlgmr.msrb.gmra.mxu1 %vm581_vm6, %v9194_v0  ;;  %v6211_v0 = vld [vmem:[%s9168_s7 + $0x88] sm:$0xf0] }
0x2af9   :  { %6254 = vmatmul.msk.bf16.gmra.mxu1 %vm581_vm6, %v9195_v55  ;;  %v6214_v55 = vor.u32 %v6480_v8, %v6211_v0 }
0x2afb   :  { %4550 = vmatpush.bf16.msrb.mxu3 %v6214_v55 }
0x2b09   :  { %6255 = vmatmul.msk.bf16.gmra.mxu1 %vm581_vm6, %v9196_v2 }
0x2b56   :  { %v4454_v59 = vpop.f32.mrf.mxu1 }
0x2b57   :  { %v4455_v41 = vadd.f32 %v6695_v51, %v4454_v59 }
0x2b5e   :  { %v4456_v30 = vpop.f32.mrf.mxu1 }
0x2b5f   :  { %v4457_v28 = vadd.f32 %v6695_v51, %v4456_v30 }
0x2b61   :  { %v6654_v27 = vpack.i.bf16 %v4457_v28, %v4455_v41 }
0x2b63   :  { %6655 = vrot.lane.b32.xlu0 %v6654_v27, %s7447_s23 }
0x2b66   :  { %v8776_v23 = vpop.f32.mrf.mxu1 }
0x2b6e   :  { %v8778_v37 = vpop.f32.mrf.mxu1 }
0x2b76   :  { %v8792_v34 = vpop.f32.mrf.mxu1 }
0x2b7e   :  { %v8794_v57 = vpop.f32.mrf.mxu1 }
0x2b86   :  { %v8796_v5 = vpop.f32.mrf.mxu1 }
0x2b8e   :  { %v4595_v52 = vpop.f32.mrf.mxu1 }
0x2bd5   :  { %v6656_v2 = vpop.permute.xlu0 %6655 }
0x2bd6   :  { %v6658_v59 = vunpack.i.h.bf16 %v6656_v2  ;;  %v6657_v51 = vunpack.i.l.bf16 %v6656_v2 }
0x2bd8   :  { %v4468_v30 = vsel %vm581_vm6, %v8731_v58, %v6658_v59  ;;  %v4467_v41 = vsel %vm581_vm6, %v8733_v21, %v6657_v51 }
0x2bd9   :  { %v4478_v28 = vpack.c.bf16 %v4468_v30, %v4467_v41 }
0x2bdb   :  { %6239 = vmatmul.msk.bf16.vlgmr.msrb.gmra.mxu2 %vm1678_vm3, %v4478_v28  ;;  %6240 = vmatmul.msk.bf16.vlgmr.msrb.gmra.mxu3 %vm1678_vm3, %v4478_v28 }
0x2c5e   :  { %v4538_v27 = vpop.f32.mrf.mxu2  ;;  %v4552_v13 = vpop.f32.mrf.mxu3 }
0x2c5f   :  { %v4539_v47 = vadd.f32 %v4538_v27, %v4482_v46  ;;  %v8809_v60 = vadd.f32 %v4552_v13, %v4483_v50 }
0x2c66   :  { %v4540_v43 = vpop.f32.mrf.mxu2  ;;  %v4554_v49 = vpop.f32.mrf.mxu3 }
0x2c67   :  { %v4541_v58 = vadd.f32 %v4540_v43, %v4482_v46  ;;  %v8811_v53 = vadd.f32 %v4554_v49, %v4483_v50 }
0x2c69   :  { %v4627_v21 = vpack.c.bf16 %v8811_v53, %v8809_v60  ;;  %v4597_v32 = vpack.c.bf16 %v4541_v58, %v4539_v47 }
0x2c6b   :  { %v4629_v38 = vand.u32 %v4627_v21, %v7843_v31  ;;  %4599 = vrot.lane.b32.xlu2 %v4597_v32, %s7426_s25  ;;  %v4655_v17 = vand.u32 %v4597_v32, %v7843_v31 }
0x2c6d   :  { %4638 = vmatpush.bf16.msra.mxu3 %v4629_v38  ;;  %4664 = vmatpush.bf16.msrb.mxu0 %v4655_v17 }
0x2c70   :  { %6259 = vmatmul.msk.bf16.vlgmr.msra.gmra.mxu3 %vm1212_vm8, %v8739_v11  ;;  %6262 = vmatmul.msk.bf16.vlgmr.msrb.gmra.mxu0 %vm1212_vm8, %v8821_v62 }
0x2c80   :  { %6260 = vmatmul.msk.bf16.gmra.mxu3 %vm1212_vm8, %v8744_v19  ;;  %6263 = vmatmul.msk.bf16.gmra.mxu0 %vm1212_vm8, %v8828_v25 }
0x2c90   :  { %6261 = vmatmul.msk.bf16.gmra.mxu3 %vm1212_vm8, %v7989_v42  ;;  %6264 = vmatmul.msk.bf16.gmra.mxu0 %vm1212_vm8, %v7980_v29 }
0x2cc5   :  { %v4600_v4 = vpop.permute.xlu2 %4599 }
0x2cc6   :  { %v4602_v24 = vand.u32 %v4600_v4, %v7843_v31 }
0x2cc8   :  { %4611 = vmatpush.bf16.msra.mxu2 %v4602_v24 }
0x2ccb   :  { %6256 = vmatmul.msk.bf16.vlgmr.msra.gmra.mxu2 %vm1212_vm8, %v8739_v11 }
0x2cdb   :  { %6257 = vmatmul.msk.bf16.gmra.mxu2 %vm1212_vm8, %v8744_v19 }
0x2ceb   :  { %6258 = vmatmul.msk.bf16.gmra.mxu2 %vm1212_vm8, %v7989_v42 }
0x2ced   :  { %v4666_v15 = vpop.f32.mrf.mxu0 }
0x2cf3   :  { %v8843_v16 = vpop.f32.mrf.mxu3 }
0x2cf5   :  { %v4668_v0 = vpop.f32.mrf.mxu0 }
0x2cfb   :  { %v8845_v26 = vpop.f32.mrf.mxu3 }
0x2cfd   :  { %v4671_v11 = vpop.f32.mrf.mxu0 }
0x2d03   :  { %v8847_v52 = vpop.f32.mrf.mxu3 }
0x2d05   :  { %v4673_v55 = vpop.f32.mrf.mxu0 }
0x2d0b   :  { %v8849_v12 = vpop.f32.mrf.mxu3 }
0x2d0d   :  { %v4676_v19 = vpop.f32.mrf.mxu0 }
0x2d13   :  { %v8851_v54 = vpop.f32.mrf.mxu3 }
0x2d15   :  { %v4678_v30 = vpop.f32.mrf.mxu0 }
0x2d1b   :  { %v4652_v8 = vpop.f32.mrf.mxu3 }
0x2d4e   :  { %v4613_v2 = vpop.f32.mrf.mxu2 }
0x2d4f   :  { %v4614_v59 = vadd.f32 %v4613_v2, %v8776_v23 }
0x2d51   :  { %v4680_v41 = vmul.f32 %v4666_v15, %v4614_v59 }
0x2d56   :  { %v4615_v42 = vpop.f32.mrf.mxu2 }
0x2d57   :  { %v4616_v51 = vadd.f32 %v4615_v42, %v8778_v37 }
0x2d59   :  { %v4681_v28 = vmul.f32 %v4668_v0, %v4616_v51 }
0x2d5b   :  { %v4685_v27 = vpack.c.bf16 %v4681_v28, %v4680_v41 }
0x2d5d   :  { %6265 = vmatmul.msk.bf16.vlgmr.msra.gmra.mxu1 %vm1678_vm3, %v4685_v27 }
0x2d5e   :  { %v4618_v13 = vpop.f32.mrf.mxu2 }
0x2d5f   :  { %v4619_v10 = vadd.f32 %v4618_v13, %v8792_v34 }
0x2d61   :  { %v4682_v43 = vmul.f32 %v4671_v11, %v4619_v10 }
0x2d66   :  { %v4620_v46 = vpop.f32.mrf.mxu2 }
0x2d67   :  { %v4621_v50 = vadd.f32 %v4620_v46, %v8794_v57 }
0x2d69   :  { %v4683_v49 = vmul.f32 %v4673_v55, %v4621_v50 }
0x2d6b   :  { %v4686_v47 = vpack.c.bf16 %v4683_v49, %v4682_v43 }
0x2d6d   :  { %6266 = vmatmul.msk.bf16.gmra.mxu1 %vm1678_vm3, %v4686_v47 }
0x2d6e   :  { %v4623_v58 = vpop.f32.mrf.mxu2 }
0x2d6f   :  { %v4624_v21 = vadd.f32 %v4623_v58, %v8796_v5 }
0x2d71   :  { %v4684_v38 = vmul.f32 %v4676_v19, %v4624_v21 }
0x2d73   :  { %v4687_v17 = vpack.c.bf16 %v4684_v38, %v4684_v38 }
0x2d76   :  { %v4625_v32 = vpop.f32.mrf.mxu2 }
0x2d7d   :  { %6267 = vmatmul.msk.bf16.gmra.mxu1 %vm1678_vm3, %v4687_v17 }
0x2dda   :  { %v4706_v4 = vpop.f32.mrf.mxu1 }
0x2ddb   :  { %v4720_v0 = vmul.f32 0.17677669, %v4706_v4 }
0x2ddd   :  { %v4725_v51 = vsel %vm953_vm4, %v4720_v0, inf }
0x2de2   :  { %v4708_v24 = vpop.f32.mrf.mxu1 }
0x2de3   :  { %v4721_v11 = vmul.f32 0.17677669, %v4708_v24 }
0x2de5   :  { %v4726_v28 = vsel %vm953_vm4, %v4721_v11, inf }
0x2dea   :  { %v4711_v8 = vpop.f32.mrf.mxu1 }
0x2deb   :  { %v4722_v55 = vmul.f32 0.17677669, %v4711_v8 }
0x2ded   :  { %v4727_v27 = vsel %vm953_vm4, %v4722_v55, inf }
0x2df2   :  { %v4713_v15 = vpop.f32.mrf.mxu1 }
0x2df3   :  { %v4723_v2 = vmul.f32 0.17677669, %v4713_v15  ;;  %v6692_v15 = vld [vmem:[#allocation35 + $0x2] ss:$0 sm:$0xff] }
0x2df5   :  { %v4728_v30 = vsel %vm953_vm4, %v4723_v2, inf }
0x2df6   :  { %v4732_v13 = vmin.f32 %v4727_v27, %v4728_v30  ;;  %v9197_v30 = vld [vmem:[#allocation88_spill] sm:$0xff] }
0x2dfa   :  { %v4716_v59 = vpop.f32.mrf.mxu1 }
0x2dfb   :  { %v4724_v42 = vmul.f32 0.17677669, %v4716_v59 }
0x2dfd   :  { %v4729_v41 = vsel %vm1923_vm5, %v4724_v42, inf }
0x2dfe   :  { %v4730_v19 = vmin.f32 %v4725_v51, %v4729_v41 }
0x2e00   :  { %v4731_v10 = vmin.f32 %v4730_v19, %v4726_v28  ;;  %v9198_v19 = vld [vmem:[#allocation89_spill] sm:$0xff] }
0x2e02   :  { %v4733_v46 = vmin.f32 %v4731_v10, %v4732_v13  ;;  %v4718_v50 = vpop.f32.mrf.mxu1 }
0x2e04   :  { %v4734_v43 = vrot.slane %v4733_v46, 4 }
0x2e06   :  { %v4735_v49 = vmin.f32 %v4733_v46, %v4734_v43  ;;  %v9199_v46 = vld [vmem:[#allocation90_spill] sm:$0xff] }
0x2e08   :  { %v4736_v47 = vrot.slane %v4735_v49, 2 }
0x2e0a   :  { %v4737_v58 = vmin.f32 %v4735_v49, %v4736_v47 }
0x2e0c   :  { %v4738_v21 = vrot.slane %v4737_v58, 1 }
0x2e0e   :  { %v4739_v32 = vmin.f32 %v4737_v58, %v4738_v21 }
0x2e10   :  { %v8866_v38 = vsub.f32 %v4724_v42, %v4739_v32  ;;  %v8868_v17 = vsub.f32 %v4720_v0, %v4739_v32  ;;  %v8873_v4 = vsub.f32 %v4721_v11, %v4739_v32  ;;  %v8879_v24 = vsub.f32 %v4723_v2, %v4739_v32 }
0x2e11   :  { %v8882_v8 = vsub.f32 %v4722_v55, %v4739_v32  ;;  %v8890_v0 = vadd.f32 %v6692_v15, %v8723_v22 }
0x2e12   :  { %4767 = vperm.xlu1 %6660, %v8866_v38   ;;  %4791 = vperm.xlu2 %6653, %v8868_v17  }
0x2e13   :  { %4747 = vperm.xlu0 %6659, %v8868_v17  }
0x2e1a   :  { %6662 = vset.pattern.permute.xlu1 %v9173_v14  ;;  %4807 = vperm.xlu2 %6653, %v8866_v38  }
0x2e1b   :  { %4752 = vperm.xlu0 %6659, %v8873_v4   ;;  %4795 = vperm.xlu1 %6662, %v8873_v4  }
0x2e22   :  { %6661 = vset.pattern.permute.xlu2 %v9174_v7 }
0x2e23   :  { %4762 = vperm.xlu0 %6659, %v8879_v24   ;;  %4975 = vrot.lane.b32.xlu1 %v8809_v60, %s7426_s25  ;;  %v8902_v60 = vadd.f32 %v6692_v15, %v8725_v48 }
0x2e24   :  { %4757 = vperm.xlu2 %6661, %v8882_v8   ;;  %6670 = vset.pattern.permute.xlu1 %v9174_v7 }
0x2e2b   :  { %6664 = vset.pattern.permute.xlu0 %v9173_v14  ;;  %5060 = vrot.lane.b32.xlu1 %v8890_v0, %s7448_s26 }
0x2e2c   :  { %6663 = vset.pattern.permute.xlu2 %v9173_v14  ;;  %4803 = vperm.xlu0 %6664, %v8879_v24  }
0x2e2d   :  { %4799 = vperm.xlu2 %6663, %v8882_v8  }
0x2e34   :  { %6674 = vset.pattern.permute.xlu0 %v9174_v7 }
0x2e35   :  { %4977 = vrot.lane.b32.xlu2 %v8811_v53, %s7426_s25  ;;  %s9200_s25 = sld [smem:[#allocation57_spill]] }
0x2e3d   :  { %5062 = vrot.lane.b32.xlu2 %v8902_v60, %s7448_s26 }
0x2e6c   :  { %v4792_v22 = vpop.permute.xlu2 %4791 }
0x2e74   :  { %v4808_v59 = vpop.permute.xlu2 %4807 }
0x2e75   :  { %v4814_v21 = vmul.f32 %v4808_v59, %v8168_v39 }
0x2e7e   :  { %v4758_v42 = vpop.permute.xlu2 %4757 }
0x2e7f   :  { %v4772_v53 = vmul.f32 %v4758_v42, %v8180_v20 }
0x2e81   :  { %v4777_v49 = vsel %vm1212_vm8, %v4772_v53, -inf }
0x2e84   :  { %v4768_v11 = vpop.permute.xlu1 %4767 }
0x2e85   :  { %v4748_v2 = vpop.permute.xlu0 %4747  ;;  %v4774_v51 = vmul.f32 %v4768_v11, %v8168_v39  ;;  %v4810_v11 = vmul.f32 %v4792_v22, %v9197_v30 }
0x2e86   :  { %v4770_v41 = vmul.f32 %v4748_v2, %v9197_v30 }
0x2e87   :  { %v4779_v48 = vsel %vm1979_vm7, %v4774_v51, -inf  ;;  %v4800_v2 = vpop.permute.xlu2 %4799  ;;  %v4819_v51 = vsel %vm1979_vm7, %v4814_v21, -inf  ;;  %v4815_v53 = vsel %vm1212_vm8, %v4810_v11, -inf }
0x2e88   :  { %v4775_v27 = vsel %vm1212_vm8, %v4770_v41, -inf  ;;  %v4812_v41 = vmul.f32 %v4800_v2, %v8180_v20  ;;  %v4820_v59 = vmax.f32 %v4815_v53, %v4819_v51 }
0x2e89   :  { %v4780_v43 = vmax.f32 %v4775_v27, %v4779_v48 }
0x2e8d   :  { %v4753_v55 = vpop.permute.xlu0 %4752  ;;  %v4796_v47 = vpop.permute.xlu1 %4795 }
0x2e8e   :  { %v4771_v28 = vmul.f32 %v4753_v55, %v9198_v19  ;;  %v4811_v55 = vmul.f32 %v4796_v47, %v9198_v19 }
0x2e90   :  { %v4776_v10 = vsel %vm1212_vm8, %v4771_v28, -inf  ;;  %v4816_v27 = vsel %vm1212_vm8, %v4811_v55, -inf }
0x2e91   :  { %v4781_v32 = vmax.f32 %v4780_v43, %v4776_v10  ;;  %v4817_v10 = vsel %vm1212_vm8, %v4812_v41, -inf  ;;  %v4821_v30 = vmax.f32 %v4820_v59, %v4816_v27 }
0x2e95   :  { %v4763_v13 = vpop.permute.xlu0 %4762 }
0x2e96   :  { %v4773_v50 = vmul.f32 %v4763_v13, %v9199_v46 }
0x2e98   :  { %v4778_v58 = vsel %vm1212_vm8, %v4773_v50, -inf }
0x2e99   :  { %v4782_v15 = vmax.f32 %v4777_v49, %v4778_v58 }
0x2e9b   :  { %v4783_v42 = vmax.f32 %v4781_v32, %v4782_v15 }
0x2e9d   :  { %v4784_v28 = vrot.slane %v4783_v42, 4 }
0x2e9e   :  { %v4804_v48 = vpop.permute.xlu0 %4803 }
0x2e9f   :  { %v4813_v39 = vmul.f32 %v4804_v48, %v9199_v46  ;;  %v4785_v13 = vmax.f32 %v4783_v42, %v4784_v28 }
0x2ea1   :  { %v4818_v22 = vsel %vm1212_vm8, %v4813_v39, -inf  ;;  %v4786_v50 = vrot.slane %v4785_v13, 2 }
0x2ea2   :  { %v4822_v19 = vmax.f32 %v4817_v10, %v4818_v22 }
0x2ea3   :  { %v4787_v20 = vmax.f32 %v4785_v13, %v4786_v50 }
0x2ea4   :  { %v4823_v43 = vmax.f32 %v4821_v30, %v4822_v19 }
0x2ea5   :  { %v4788_v21 = vrot.slane %v4787_v20, 1 }
0x2ea6   :  { %v4824_v49 = vrot.slane %v4823_v43, 4 }
0x2ea7   :  { %v4789_v2 = vmax.f32 %v4787_v20, %v4788_v21 }
0x2ea8   :  { %v4825_v47 = vmax.f32 %v4823_v43, %v4824_v49 }
0x2eaa   :  { %v4826_v58 = vrot.slane %v4825_v47, 2 }
0x2eac   :  { %v4827_v32 = vmax.f32 %v4825_v47, %v4826_v58 }
0x2eae   :  { %v4828_v15 = vrot.slane %v4827_v32, 1 }
0x2eb0   :  { %v4829_v11 = vmax.f32 %v4827_v32, %v4828_v15 }
0x2eb2   :  { %v4830_v46 = vsel %vm1555_vm14, %v4789_v2, %v4829_v11 }
0x2eb3   :  { %v4831_v55 = vpack.c.bf16 %v4830_v46, %v4830_v46 }
0x2eb5   :  { %v4833_v42 = vsel %vm1212_vm8, %v4831_v55, 0 }
0x2eb6   :  { %4842 = vmatpush.bf16.xpose.msrb.mxu2 %v4833_v42 }
0x2ebd   :  { %6268 = vmatmul.msk.bf16.vlgmr.msrb.gmra.mxu2 %vm1212_vm8, %v8821_v62 }
0x2ecd   :  { %6269 = vmatmul.msk.bf16.gmra.mxu2 %vm1212_vm8, %v8828_v25 }
0x2edd   :  { %6270 = vmatmul.msk.bf16.gmra.mxu2 %vm1212_vm8, %v7980_v29 }
0x2f40   :  { %v4844_v51 = vpop.f32.mrf.mxu2 }
0x2f41   :  { %v4858_v30 = vsub.f32 %v8868_v17, %v4844_v51 }
0x2f43   :  { %v4863_v20 = vmul.f32 1.442695, %v4858_v30 }
0x2f48   :  { %v4846_v41 = vpop.f32.mrf.mxu2 }
0x2f49   :  { %v4859_v10 = vsub.f32 %v8873_v4, %v4846_v41 }
0x2f4b   :  { %v4865_v43 = vmul.f32 1.442695, %v4859_v10 }
0x2f50   :  { %v4849_v28 = vpop.f32.mrf.mxu2 }
0x2f51   :  { %v4860_v59 = vsub.f32 %v8882_v8, %v4849_v28 }
0x2f53   :  { %v4867_v19 = vmul.f32 1.442695, %v4860_v59 }
0x2f58   :  { %v4851_v48 = vpop.f32.mrf.mxu2 }
0x2f59   :  { %v4861_v27 = vsub.f32 %v8879_v24, %v4851_v48 }
0x2f5b   :  { %v4869_v22 = vmul.f32 1.442695, %v4861_v27 }
0x2f60   :  { %v4854_v53 = vpop.f32.mrf.mxu2 }
0x2f61   :  { %v4862_v39 = vsub.f32 %v8866_v38, %v4854_v53 }
0x2f63   :  { %v4871_v13 = vmul.f32 1.442695, %v4862_v39 }
0x2f65   :  { %6751 = vpow2.f32 %v4871_v13 }
0x2f66   :  { %6753 = vpow2.f32 %v4869_v22 }
0x2f67   :  { %6755 = vpow2.f32 %v4867_v19 }
0x2f68   :  { %v4856_v50 = vpop.f32.mrf.mxu2  ;;  %6757 = vpow2.f32 %v4865_v43 }
0x2f69   :  { %6759 = vpow2.f32 %v4863_v20 }
0x2f6b   :  { %v6752_v49 = vpop.eup %6751 }
0x2f6c   :  { %v4875_v47 = vpack.c.bf16 %v6752_v49, %v6752_v49  ;;  %v6754_v24 = vpop.eup %6753 }
0x2f6d   :  { %v6756_v8 = vpop.eup %6755 }
0x2f6e   :  { %v4877_v38 = vand.u32 %v4875_v47, %v8009_v9  ;;  %v4874_v4 = vpack.c.bf16 %v6754_v24, %v6756_v8  ;;  %v6758_v58 = vpop.eup %6757 }
0x2f6f   :  { %v6760_v21 = vpop.eup %6759 }
0x2f70   :  { %4884 = vmatpush.bf16.msrb.mxu3 %v4877_v38  ;;  %v4873_v17 = vpack.c.bf16 %v6758_v58, %v6760_v21 }
0x2f74   :  { %4885 = vmatpush.bf16.msrb.mxu3 %v4874_v4  ;;  %v4641_v4 = vadd.f32 %v8843_v16, %v8776_v23 }
0x2f78   :  { %4886 = vmatpush.bf16.msrb.mxu3 %v4873_v17 }
0x2f7b   :  { %6271 = vmatmul.msk.bf16.vlgmr.msrb.gmra.mxu3 %vm1551_vm15, %v8013_v44 }
0x2f7c   :  { %4949 = vmatpush.bf16.msra.mxu3 %v8221_v40 }
0x2ffe   :  { %v4888_v32 = vpop.f32.mrf.mxu3 }
0x3006   :  { %v4890_v15 = vpop.f32.mrf.mxu3 }
0x3007   :  { %v4893_v2 = vpack.c.bf16 %v4890_v15, %v4888_v32  ;;  %v6493_v15 = vld [vmem:[%s9178_s10 + $0x58] sm:$0xff] }
0x3008   :  { %5044 = vmatpush.bf16.msra.mxu2 %v6493_v15 }
0x3009   :  { %v4895_v11 = vand.u32 %v4893_v2, %v7843_v31  ;;  %v4648_v2 = vadd.f32 %v8849_v12, %v8794_v57  ;;  %v6492_v57 = vld [vmem:[%s9178_s10 + $0x50] sm:$0xff]  ;;  %v6490_v12 = vld [vmem:[%s9178_s10 + $0x40] sm:$0xff] }
0x300b   :  { %4904 = vmatpush.bf16.msra.mxu0 %v4895_v11 }
0x300c   :  { %5045 = vmatpush.bf16.msra.mxu2 %v6492_v57 }
0x300e   :  { %6272 = vmatmul.msk.bf16.vlgmr.msra.gmra.mxu0 %vm1212_vm8, %v8821_v62 }
0x301e   :  { %6273 = vmatmul.msk.bf16.gmra.mxu0 %vm1212_vm8, %v8828_v25 }
0x302e   :  { %6274 = vmatmul.msk.bf16.gmra.mxu0 %vm1212_vm8, %v7980_v29 }
0x308b   :  { %v4906_v46 = vpop.f32.mrf.mxu0 }
0x308c   :  { %v4907_v40 = vadd.f32 1e-16, %v4906_v46 }
0x308e   :  { %6761 = vrcp.f32 %v4907_v40 }
0x3093   :  { %v4908_v55 = vpop.f32.mrf.mxu0 }
0x3094   :  { %v4909_v42 = vadd.f32 1e-16, %v4908_v55  ;;  %v6762_v51 = vpop.eup %6761 }
0x3095   :  { %v4925_v48 = vmul.f32 %v6762_v51, %v6760_v21 }
0x3096   :  { %6763 = vrcp.f32 %v4909_v42 }
0x309b   :  { %v4911_v41 = vpop.f32.mrf.mxu0 }
0x309c   :  { %v6764_v28 = vpop.eup %6763  ;;  %v4912_v39 = vadd.f32 1e-16, %v4911_v41 }
0x309d   :  { %v4926_v53 = vmul.f32 %v6764_v28, %v6758_v58 }
0x309e   :  { %6765 = vrcp.f32 %v4912_v39 }
0x309f   :  { %v4930_v27 = vpack.c.bf16 %v4926_v53, %v4925_v48  ;;  %v6696_v53 = vld [vmem:[#allocation31 + $0x2] ss:$0 sm:$0xff] }
0x30a1   :  { %6275 = vmatmul.msk.bf16.vlgmr.msra.gmra.mxu3 %vm953_vm4, %v4930_v27 }
0x30a3   :  { %v4913_v62 = vpop.f32.mrf.mxu0 }
0x30a4   :  { %v4914_v25 = vadd.f32 1e-16, %v4913_v62  ;;  %v6766_v29 = vpop.eup %6765 }
0x30a5   :  { %v4927_v10 = vmul.f32 %v6766_v29, %v6756_v8  ;;  %v4643_v8 = vadd.f32 %v8845_v26, %v8778_v37  ;;  %v4651_v26 = vadd.f32 %v8851_v54, %v8796_v5  ;;  %v4978_v5 = vpop.permute.xlu2 %4977  ;;  %v4976_v54 = vpop.permute.xlu1 %4975 }
0x30a6   :  { %6767 = vrcp.f32 %v4914_v25 }
0x30ab   :  { %v4916_v59 = vpop.f32.mrf.mxu0 }
0x30ac   :  { %v6768_v13 = vpop.eup %6767  ;;  %v4917_v30 = vadd.f32 1e-16, %v4916_v59 }
0x30ad   :  { %v4928_v22 = vmul.f32 %v6768_v13, %v6754_v24  ;;  %v5061_v13 = vpop.permute.xlu1 %5060 }
0x30ae   :  { %6769 = vrcp.f32 %v4917_v30  ;;  %v5063_v30 = vpop.permute.xlu2 %5062 }
0x30af   :  { %v4931_v19 = vpack.c.bf16 %v4928_v22, %v4927_v10 }
0x30b1   :  { %6276 = vmatmul.msk.bf16.gmra.mxu3 %vm953_vm4, %v4931_v19 }
0x30b3   :  { %v4918_v50 = vpop.f32.mrf.mxu0 }
0x30b4   :  { %v6770_v43 = vpop.eup %6769 }
0x30b5   :  { %v4929_v20 = vmul.f32 %v6770_v43, %v6752_v49  ;;  %v4646_v49 = vadd.f32 %v8847_v52, %v8792_v34  ;;  %v6491_v52 = vld [vmem:[%s9178_s10 + $0x48] sm:$0xff] }
0x30b6   :  { %5046 = vmatpush.bf16.msra.mxu2 %v6491_v52 }
0x30b7   :  { %v4932_v47 = vpack.c.bf16 %v4929_v20, %v4929_v20 }
0x30ba   :  { %5047 = vmatpush.bf16.msra.mxu2 %v6490_v12 }
0x30c1   :  { %6277 = vmatmul.msk.bf16.gmra.mxu3 %vm953_vm4, %v4932_v47 }
0x3124   :  { %v4951_v38 = vpop.f32.mrf.mxu3 }
0x3125   :  { %v4965_v58 = vmul.f32 %v4951_v38, %v4641_v4 }
0x312c   :  { %v4953_v24 = vpop.f32.mrf.mxu3 }
0x312d   :  { %v4966_v21 = vmul.f32 %v4953_v24, %v4643_v8 }
0x312f   :  { %v4970_v17 = vpack.c.bf16 %v4966_v21, %v4965_v58  ;;  %v6793_v21 = vld [vmem:[%s9155_s5] sm:$0xf] }
0x3134   :  { %v4956_v32 = vpop.f32.mrf.mxu3 }
0x3135   :  { %v4967_v23 = vmul.f32 %v4956_v32, %v4646_v49  ;;  %v6794_v49 = vld [vmem:[%s9161_s18] sm:$0x3] }
0x313c   :  { %v4958_v11 = vpop.f32.mrf.mxu3 }
0x313d   :  { %v4968_v16 = vmul.f32 %v4958_v11, %v4648_v2 }
0x313f   :  { %v4971_v37 = vpack.c.bf16 %v4968_v16, %v4967_v23 }
0x3144   :  { %v4961_v46 = vpop.f32.mrf.mxu3 }
0x3145   :  { %v4969_v40 = vmul.f32 %v4961_v46, %v4651_v26 }
0x3147   :  { %v4972_v55 = vpack.c.bf16 %v4969_v40, %v4969_v40 }
0x3149   :  { %v4982_v42 = vand.u32 %v4972_v55, %v8009_v9 }
0x314b   :  { %4989 = vmatpush.bf16.msrb.mxu1 %v4982_v42 }
0x314c   :  { %v4963_v34 = vpop.f32.mrf.mxu3 }
0x314f   :  { %4990 = vmatpush.bf16.msrb.mxu1 %v4971_v37 }
0x3153   :  { %4991 = vmatpush.bf16.msrb.mxu1 %v4970_v17 }
0x3156   :  { %6278 = vmatmul.msk.bf16.vlgmr.msrb.gmra.mxu1 %vm1551_vm15, %v8013_v44 }
0x31d3   :  { %v4993_v51 = vpop.f32.mrf.mxu1 }
0x31d4   :  { %v4994_v28 = vadd.f32 %v4993_v51, %v4976_v54 }
0x31db   :  { %v4995_v41 = vpop.f32.mrf.mxu1 }
0x31dc   :  { %v4996_v48 = vadd.f32 %v4995_v41, %v4978_v5 }
0x31de   :  { %v5007_v9 = vpack.c.bf16 %v4996_v48, %v4994_v28 }
0x31e0   :  { %6303 = vmatmul.msk.bf16.vlgmr.msra.gmra.mxu2 %vm1678_vm3, %v5007_v9 }
0x3263   :  { %v5049_v27 = vpop.f32.mrf.mxu2 }
0x3264   :  { %v5050_v39 = vadd.f32 %v6696_v53, %v5049_v27 }
0x3266   :  { %v5054_v44 = vmul.f32 %v5050_v39, %v8890_v0 }
0x3268   :  { %v5056_v25 = vadd.f32 %v5054_v44, %v8680_v6 }
0x326a   :  { %v8974_v10 = vadd.f32 %v5061_v13, %v5056_v25 }
0x326b   :  { %v5051_v62 = vpop.f32.mrf.mxu2 }
0x326c   :  { %v5052_v29 = vadd.f32 %v6696_v53, %v5051_v62  ;;  %v5068_v50 = vmul.f32 %v8974_v10, %v8974_v10 }
0x326e   :  { %v5055_v59 = vmul.f32 %v5052_v29, %v8902_v60 }
0x3270   :  { %v5057_v22 = vadd.f32 %v5055_v59, %v8683_v56 }
0x3272   :  { %v8977_v19 = vadd.f32 %v5063_v30, %v5057_v22 }
0x3274   :  { %v5069_v0 = vmul.f32 %v8977_v19, %v8977_v19 }
0x3276   :  { %v6665_v43 = vpack.i.bf16 %v5069_v0, %v5068_v50 }
0x3278   :  { %6666 = vrot.lane.b32.xlu0 %v6665_v43, %s7447_s23  ;;  %v6495_v43 = vld [vmem:[%s9179_s30 + $0x28] sm:$0xff] }
0x32ea   :  { %v6667_v6 = vpop.permute.xlu0 %6666 }
0x32eb   :  { %v6669_v60 = vunpack.i.h.bf16 %v6667_v6  ;;  %v6668_v20 = vunpack.i.l.bf16 %v6667_v6  ;;  %v6494_v6 = vld [vmem:[%s9179_s30 + $0x20] sm:$0xff] }
0x32ed   :  { %v5079_v47 = vsel %vm581_vm6, %v8977_v19, %v6669_v60  ;;  %v5078_v56 = vsel %vm581_vm6, %v8974_v10, %v6668_v20  ;;  %v6503_v20 = vld [vmem:[%s9180_s11 + $0xb8] sm:$0xff] }
0x32ee   :  { %v5080_v38 = vpack.c.bf16 %v5079_v47, %v5078_v56  ;;  %v6502_v47 = vld [vmem:[%s9180_s11 + $0xb0] sm:$0xff]  ;;  %v6501_v56 = vld [vmem:[%s9180_s11 + $0xa8] sm:$0xff] }
0x32f0   :  { %v5082_v4 = vand.u32 %v5080_v38, %v7843_v31 }
0x32f2   :  { %5091 = vmatpush.bf16.msra.mxu1 %v5082_v4 }
0x32f5   :  { %6304 = vmatmul.msk.bf16.vlgmr.msra.gmra.mxu1 %vm1212_vm8, %v7913_v18 }
0x3372   :  { %v5093_v8 = vpop.f32.mrf.mxu1 }
0x3373   :  { %5102 = vrot.lane.b32.xlu1 %v5093_v8, %s7448_s26  ;;  %v5097_v24 = vsel %vm1234_vm9, %v5093_v8, 0.0 }
0x3374   :  { %5098 = vadd.xlane.f32.xlu2 %v5097_v24 }
0x337a   :  { %v5095_v58 = vpop.f32.mrf.mxu1 }
0x339d   :  { %5466 = vxpose.xlu2.c.b16.start.end [1/1] (short) (narrow) %v6793_v21, 16 }
0x33e5   :  { %v5103_v17 = vpop.permute.xlu1 %5102 }
0x33e6   :  { %v5105_v32 = vsel %vm1234_vm9, %v5103_v17, 0.0 }
0x33e7   :  { %5106 = vadd.xlane.f32.xlu0 %v5105_v32  ;;  %v5099_v15 = vpop.xlane.xlu2 %5098  ;;  %v6499_v32 = vld [vmem:[%s9180_s11 + $0x98] sm:$0xff] }
0x33e8   :  { %v5100_v31 = vmul.f32 %v6794_v49, %v5099_v15  ;;  %v6498_v15 = vld [vmem:[%s9180_s11 + $0x90] sm:$0xff] }
0x33ea   :  { %v5109_v11 = vmul.f32 %v5100_v31, %v5100_v31 }
0x345a   :  { %v5107_v2 = vpop.xlane.xlu0 %5106 }
0x345b   :  { %v5108_v23 = vmul.f32 %v6794_v49, %v5107_v2  ;;  %v6497_v49 = vld [vmem:[%s9180_s11 + $0x88] sm:$0xff] }
0x345d   :  { %v5110_v18 = vsub.f32 %v5108_v23, %v5109_v11  ;;  %v6697_v11 = vld [vmem:[#allocation32 + $0x2] ss:$0 sm:$0xff] }
0x345f   :  { %v5111_v16 = vmax.f32 %v5110_v18, 0.0 }
0x3461   :  { %v5112_v37 = vadd.f32 1e-05, %v5111_v16 }
0x3463   :  { %6771 = vrsqrt.f32 %v5112_v37  ;;  %vm5119_vm15 = vweird.f32 %v5112_v37 }
0x3469   :  { %v6772_v26 = vpop.eup %6771 }
0x346a   :  { %v5114_v46 = vmul.f32 %v6772_v26, %v5112_v37  ;;  %vm5120_vm8 = vweird.f32 %v6772_v26 }
0x346b   :  { %vm5121_vm5 = vmor %vm5119_vm15, %vm5120_vm8 }
0x346c   :  { %v5115_v40 = vmul.f32 %v6772_v26, %v5114_v46 }
0x346e   :  { %v5116_v55 = vmul.f32 0.5, %v5115_v40 }
0x3470   :  { %v5117_v42 = vsub.f32 1.5, %v5116_v55 }
0x3472   :  { %v5118_v34 = vmul.f32 %v6772_v26, %v5117_v42  ;;  %v519_v42 = vld [vmem:[%s9200_s25] sm:$0x3] }
0x3473   :  { %5506 = vperm.xlu0 %6674, %v519_v42  }
0x3474   :  { %v5122_v57 = vsel %vm5121_vm5, %v6772_v26, %v5118_v34  ;;  %v6698_v34 = vld [vmem:[#allocation34 + $0x2] ss:$0 sm:$0xff] }
0x3475   :  { %5124 = vrot.lane.b32.xlu1 %v5122_v57, %s7431_s17  ;;  %s9202_s17 = sld [smem:[#allocation79_spill]] }
0x34e7   :  { %v5125_v52 = vpop.permute.xlu1 %5124 }
0x34e8   :  { %v5127_v12 = vsel %vm1265_vm13, %v5100_v31, %v5125_v52  ;;  %v6496_v31 = vld [vmem:[%s9180_s11 + $0x80] sm:$0xff]  ;;  %v9201_v52 = vmov 65535   ;;  %vm5482_vm13 = vcmask 56320  }
0x34e9   :  { %v5129_v51 = vsel %vm650_vm0, %v5127_v12, 0  ;;  %v5486_v12 = vsel %vm651_vm1, 4294967295, %v9201_v52 }
0x34ea   :  { %v5146_v5 = vand.u32 4294901760, %v5129_v51 }
0x34ec   :  { %v5181_v54 = vsub.f32 %v5129_v51, %v5146_v5  ;;  %5147 = vmatpush.msrb.mxu2 %v5146_v5  ;;  %5240 = vmatpush.msrb.mxu1 %v5146_v5 }
0x34ed   :  { %5153 = vmatmul.f32.vlgmr.msrb.gmra.mxu2 %v7888_v3  ;;  %5244 = vmatmul.f32.vlgmr.msrb.gmra.mxu1 %v7883_v1 }
0x34ee   :  { %5212 = vmatpush.msrb.mxu3 %v5181_v54  ;;  %v5182_v41 = vand.u32 4294901760, %v5181_v54  ;;  %5442 = vmatpush.bf16.msra.mxu1 %v6503_v20 }
0x34ef   :  { %5215 = vmatmul.f32.vlgmr.msrb.gmra.mxu3 %v7880_v63 }
0x34f0   :  { %5272 = vmatpush.msra.mxu2 %v5182_v41  ;;  %v5183_v28 = vsub.f32 %v5181_v54, %v5182_v41  ;;  %5362 = vmatpush.bf16.msra.mxu3 %v6495_v43  ;;  %v5487_v54 = vsel %vm540_vm2, %v5486_v12, 0 }
0x34f2   :  { %v5184_v48 = vand.u32 4294901760, %v5183_v28  ;;  %5443 = vmatpush.bf16.msra.mxu1 %v6502_v47 }
0x34f4   :  { %5185 = vmatpush.msrb.mxu0 %v5184_v48  ;;  %5363 = vmatpush.bf16.msra.mxu3 %v6494_v6 }
0x34f5   :  { %5161 = vmatmul.f32.gmra.mxu2 %v7860_v45  ;;  %6305 = vmatmul.msk.f32.vlgmr.msrb.gmra.mxu0 %vm953_vm4, %v7874_v61 }
0x34f6   :  { %5298 = vmatpush.msra.mxu0 %v5146_v5  ;;  %5250 = vmatmul.f32.gmra.mxu1 %v7853_v36 }
0x34f7   :  { %5220 = vmatmul.f32.gmra.mxu3 %v7850_v35  ;;  %5444 = vmatpush.bf16.msra.mxu1 %v6501_v56 }
0x34fd   :  { %6306 = vmatmul.msk.f32.gmra.mxu0 %vm953_vm4, %v7846_v33  ;;  %6307 = vmatmul.msk.f32.vlgmr.msra.gmra.mxu2 %vm953_vm4, %v7874_v61 }
0x3505   :  { %6309 = vmatmul.msk.f32.vlgmr.msra.gmra.mxu0 %vm953_vm4, %v7874_v61  ;;  %6308 = vmatmul.msk.f32.gmra.mxu2 %vm953_vm4, %v7846_v33 }
0x350d   :  { %6310 = vmatmul.msk.f32.gmra.mxu0 %vm953_vm4, %v7846_v33 }
0x356a   :  { %v5245_v53 = vpop.f32.mrf.mxu1 }
0x3570   :  { %v5154_v45 = vpop.f32.mrf.mxu2 }
0x3572   :  { %v5188_v63 = vpop.f32.mrf.mxu0  ;;  %v5216_v35 = vpop.f32.mrf.mxu3 }
0x3573   :  { %v5189_v36 = vadd.f32 %v5188_v63, %v5154_v45  ;;  %v5251_v33 = vpop.f32.mrf.mxu1  ;;  %v5474_v63 = vpop.trf.xlu2 }
0x3575   :  { %v5217_v9 = vadd.f32 %v5216_v35, %v5189_v36 }
0x3577   :  { %v5246_v27 = vadd.f32 %v5245_v53, %v5217_v9  ;;  %v6506_v9 = vld [vmem:[%s9202_s17 + $0x10] sm:$0xff]  ;;  %v6505_v53 = vld [vmem:[%s9202_s17 + $0x8] sm:$0xff] }
0x3578   :  { %v5162_v1 = vpop.f32.mrf.mxu2 }
0x357a   :  { %v5192_v3 = vpop.f32.mrf.mxu0  ;;  %v5221_v29 = vpop.f32.mrf.mxu3 }
0x357b   :  { %v5193_v61 = vadd.f32 %v5192_v3, %v5162_v1  ;;  %v6507_v3 = vld [vmem:[%s9202_s17 + $0x18] sm:$0xff] }
0x357c   :  { %5563 = vmatpush.bf16.msrb.mxu0 %v6507_v3 }
0x357d   :  { %v5222_v59 = vadd.f32 %v5221_v29, %v5193_v61 }
0x357f   :  { %v5252_v22 = vadd.f32 %v5251_v33, %v5222_v59  ;;  %v6509_v59 = vld [vmem:[%s7680_s6 + $0x8] sm:$0xff]  ;;  %v6508_v33 = vld [vmem:[%s7680_s6] sm:$0xff] }
0x3580   :  { %v5275_v39 = vpop.f32.mrf.mxu2  ;;  %5564 = vmatpush.bf16.msrb.mxu0 %v6506_v9  ;;  %5605 = vmatpush.bf16.msrb.mxu3 %v6509_v59 }
0x3581   :  { %v5276_v44 = vadd.f32 %v5275_v39, %v5246_v27  ;;  %v5507_v27 = vpop.permute.xlu0 %5506 }
0x3582   :  { %v5301_v62 = vpop.f32.mrf.mxu0 }
0x3583   :  { %v5302_v25 = vadd.f32 %v5301_v62, %v5276_v44 }
0x3584   :  { %5565 = vmatpush.bf16.msrb.mxu0 %v6505_v53  ;;  %5606 = vmatpush.bf16.msrb.mxu3 %v6508_v33 }
0x3585   :  { %5310 = vperm.xlu1 %6670, %v5302_v25  }
0x3588   :  { %v5279_v13 = vpop.f32.mrf.mxu2 }
0x3589   :  { %v5280_v30 = vadd.f32 %v5279_v13, %v5252_v22  ;;  %v6699_v13 = vld [vmem:[%s7675_s21] ss:$0 sm:$0xff]  ;;  %s7335_s21 = sshra.s32 %s5621_s15, 4  ;;  %s7336_s21 = int_to_ptr.hbm [resolvable:$true] %s7335_s21 }
0x358a   :  { %v5305_v50 = vpop.f32.mrf.mxu0  ;;  %s7337_s6 = scalar_lea.hbm %s7336_s21, 2  ;;  %p7340_p13 = scmp.lt.s32.totalorder %s7336_s21, %s7690_s3 }
0x358b   :  { %v5306_v0 = vadd.f32 %v5305_v50, %v5280_v30  ;;  %p7338_p12 = scmp.ne.s32.totalorder %s7336_s21, %s7337_s6  ;;  %p7341_p0 = scmp.lt.s32.totalorder %s7339_s0, %s7337_s6 }
0x358d   :  { %6671 = vset.pattern.permute.xlu1 %v9173_v14  ;;  %p7342_p1 = por %p7341_p0, %p7340_p13 }
0x358e   :  { %5321 = vperm.xlu1 %6671, %v5302_v25  }
0x358f   :  { %p7343_p2 = pnand %p7342_p1, %p7338_p12 }
0x3596   :  { %6672 = vset.pattern.permute.xlu1 %v9174_v7  ;;  %v6500_v7 = vld [vmem:[%s9180_s11 + $0xa0] sm:$0xff] }
0x3597   :  { %5315 = vperm.xlu1 %6672, %v5306_v0   ;;  %5445 = vmatpush.bf16.msra.mxu1 %v6500_v7 }
0x359b   :  { %5446 = vmatpush.bf16.msra.mxu1 %v6499_v32 }
0x359f   :  { %6673 = vset.pattern.permute.xlu1 %v9173_v14  ;;  %5447 = vmatpush.bf16.msra.mxu1 %v6498_v15 }
0x35a0   :  { %5325 = vperm.xlu1 %6673, %v5306_v0  }
0x35a3   :  { %5448 = vmatpush.bf16.msra.mxu1 %v6497_v49 }
0x35a7   :  { %5449 = vmatpush.bf16.msra.mxu1 %v6496_v31 }
0x35f7   :  { %v5311_v60 = vpop.permute.xlu1 %5310 }
0x35f8   :  { %v5318_v4 = vsub.f32 %v8974_v10, %v5311_v60  ;;  %v6700_v60 = vld [vmem:[%s7685_s8] ss:$0 sm:$0xff] }
0x3600   :  { %v5322_v38 = vpop.permute.xlu1 %5321 }
0x3601   :  { %v5328_v58 = vmul.f32 %v5322_v38, %v5318_v4 }
0x3609   :  { %v5316_v14 = vpop.permute.xlu1 %5315 }
0x360a   :  { %v5319_v8 = vsub.f32 %v8977_v19, %v5316_v14 }
0x3612   :  { %v5326_v24 = vpop.permute.xlu1 %5325 }
0x3613   :  { %v5329_v21 = vmul.f32 %v5326_v24, %v5319_v8 }
0x3615   :  { %v5335_v17 = vpack.c.bf16 %v5329_v21, %v5328_v58 }
0x3617   :  { %6323 = vmatmul.msk.bf16.vlgmr.msra.gmra.mxu3 %vm581_vm6, %v5335_v17 }
0x369a   :  { %v5365_v2 = vpop.f32.mrf.mxu3 }
0x369b   :  { %v5366_v23 = vadd.f32 %v6697_v11, %v5365_v2 }
0x369d   :  { %v5372_v16 = vmul.f32 0.01, %v5366_v23  ;;  %vm5370_vm0 = vcmp.gt.f32.partialorder %v5366_v23, 0.0 }
0x369f   :  { %v5374_v46 = vsel %vm5370_vm0, %v5366_v23, %v5372_v16 }
0x36a2   :  { %v5367_v18 = vpop.f32.mrf.mxu3 }
0x36a3   :  { %v5368_v37 = vadd.f32 %v6697_v11, %v5367_v18 }
0x36a5   :  { %vm5371_vm4 = vcmp.gt.f32.partialorder %v5368_v37, 0.0  ;;  %v5373_v26 = vmul.f32 0.01, %v5368_v37 }
0x36a7   :  { %v5375_v40 = vsel %vm5371_vm4, %v5368_v37, %v5373_v26 }
0x36a8   :  { %v5393_v55 = vpack.c.bf16 %v5375_v40, %v5374_v46 }
0x36aa   :  { %5450 = vmatmul.bf16.vlgmr.msra.gmra.mxu1 %v5393_v55 }
0x3727   :  { %v5451_v57 = vpop.f32.mrf.mxu1 }
0x3728   :  { %v5456_v51 = vadd.f32 %v5451_v57, %v8974_v10 }
0x372a   :  { %v5463_v5 = vadd.f32 %v6698_v34, %v5456_v51 }
0x372c   :  { %v5465_v41 = vpack.c.bf16 %v5463_v5, %v5463_v5  ;;  %v5512_v1 = vrot.slane %v5463_v5, 7 }
0x372e   :  { %v5489_v28 = vand.u32 %v5487_v54, %v5465_v41 }
0x372f   :  { %v5453_v48 = vpop.f32.mrf.mxu1 }
0x3730   :  { %v5457_v45 = vadd.f32 %v5453_v48, %v8977_v19  ;;  %5498 = vmatpush.bf16.msrb.mxu2 %v5489_v28  ;;  %v6504_v19 = vld [vmem:[%s9202_s17] sm:$0xff] }
0x3731   :  { %5566 = vmatpush.bf16.msrb.mxu0 %v6504_v19 }
0x3732   :  { %v5464_v36 = vadd.f32 %v6698_v34, %v5457_v45 }
0x3733   :  { %6372 = vmatmul.msk.bf16.vlgmr.msrb.gmra.mxu2 %vm5482_vm13, %v5474_v63 }
0x3734   :  { %v5513_v35 = vrot.slane %v5464_v36, 7 }
0x3736   :  { %v5514_v10 = vsel %vm1555_vm14, %v5512_v1, %v5513_v35 }
0x3737   :  { %5515 = vrot.lane.b32.xlu1 %v5514_v10, %s7447_s23 }
0x37a9   :  { %v5516_v62 = vpop.permute.xlu1 %5515 }
0x37b6   :  { %v5500_v39 = vpop.f32.mrf.mxu2 }
0x37b7   :  { %v5509_v44 = vmul.f32 %v5507_v27, %v5500_v39 }
0x37b9   :  { %v5518_v25 = vsel %vm581_vm6, %v5509_v44, %v5516_v62 }
0x37ba   :  { %v5527_v61 = vpack.c.bf16 %v5518_v25, %v5518_v25 }
0x37bc   :  { %6389 = vmatmul.msk.bf16.vlgmr.msrb.gmra.mxu0 %vm1678_vm3, %v5527_v61 }
0x37be   :  { %v5502_v29 = vpop.f32.mrf.mxu2 }
0x3839   :  { %v5568_v22 = vpop.f32.mrf.mxu0 }
0x383a   :  { %v5569_v30 = vadd.f32 %v6699_v13, %v5568_v22 }
0x383c   :  { %vm5572_vm1 = vcmp.gt.f32.partialorder %v5569_v30, 0.0  ;;  %v5573_v50 = vmul.f32 0.01, %v5569_v30 }
0x383e   :  { %v5574_v0 = vsel %vm5572_vm1, %v5569_v30, %v5573_v50 }
0x383f   :  { %v5579_v43 = vpack.c.bf16 %v5574_v0, %v5574_v0 }
0x3841   :  { %v5570_v6 = vpop.f32.mrf.mxu0  ;;  %6398 = vmatmul.msk.bf16.vlgmr.msrb.gmra.mxu3 %vm581_vm6, %v5579_v43 }
0x38c4   :  { %v5608_v20 = vpop.f32.mrf.mxu3 }
0x38c5   :  { %v5609_v47 = vadd.f32 %v6700_v60, %v5608_v20 }
0x38c7   :  { %5612 = vst.msk [vmem:[#allocation37] sm:$0x3] %vm1234_vm9, %v5609_v47 }
0x38c8   :  { %7346 = shalt.err (!%p7343_p2)
}
0x38c9   :  { %5623 = dma.vmem_to_hbm [thread:$0]  %s5619_s9, 32, %s5621_s15, [#allocation4]  }
0x38cc   :  { %v5610_v56 = vpop.f32.mrf.mxu3 }
0x38cd   :  { %7371 = dma.done.wait [#allocation4], 32  }
0x38ce   :  { %7372 = vsyncadd [#allocation4], 4294967264 }
0x38cf   :  { %5628 = vsyncpa [#allocation3], 1 }
0x38d0   :  { %5629 = vsyncpa [#allocation6], 1 }
0x38d1   :  { %5630 = vsyncpa [#allocation9], 1 }
0x38d2   :  { %5631 = vsyncpa [#allocation12], 1 }
0x38d3   :  { %5632 = vsyncpa [#allocation15], 1 }
0x38d4   :  { %5633 = vsyncpa [#allocation18], 1 }
0x38d5   :  { %5634 = vsyncpa [#allocation21], 1 }
0x38d6   :  { %5635 = vsyncpa [#allocation24], 1 }
0x38d7   :  { %5636 = vsyncpa [#allocation27], 1 }
0x38d8   :  { %5637 = vsyncpa [#allocation30], 1 }
0x38d9   :  { %5638 = vsyncpa [#allocation33], 1 }
0x38da   :  { %5639 = vsyncpa [#allocation36], 1 }
0x38db   :  { %5640 = vsyncpa [#allocation4], 1 }

</bundles_post_ra>
